<compile_context>
chip_gen: v6e
topology: v6e:2x2x1
jax: 0.10.0
libtpu: 0.0.40
codegen_flags: <defaults>
</compile_context>

<pallas_src>
from math import sqrt

import jax
import jax.numpy as jnp
from jax import lax
from jax.experimental import pallas as pl
from jax.experimental.pallas import tpu as pltpu

VMEM = pltpu.MemorySpace.VMEM
F32 = jnp.float32
BF16 = jnp.bfloat16


# ---------------------------------------------------------------------------
# Hyper-params (small, synthetic; shapes implied by the module's __init__)
# ---------------------------------------------------------------------------
class HP:
    n_symbols = 40
    character_embedding_dim = 32
    encoder_embedding_dim = 32
    encoder_kernel_size = 5
    encoder_n_convolutions = 3
    n_mel_channels = 80
    prenet_dim = 32
    attention_rnn_dim = 32
    decoder_rnn_dim = 32
    attention_dim = 16
    attention_location_n_filters = 8
    attention_location_kernel_size = 31


def _vspecs(n):
    return [pl.BlockSpec(memory_space=VMEM) for _ in range(n)]


def _bdot(x, w):
    """MXU matmul with bf16 operands and f32 accumulation."""
    return jnp.dot(x.astype(BF16), w.astype(BF16), preferred_element_type=F32)


# ---------------------------------------------------------------------------
# Kernel A: embedding (one-hot matmul) + 3x (conv1d + folded BN + ReLU)
# Works in time-major 2D layout (T*B, C); conv taps are constant row shifts.
# ---------------------------------------------------------------------------
def _embed_convs_kernel(ids_ref, tbl_ref, w_ref, b_ref, sc_ref, sh_ref, o_ref):
    TB, C = o_ref.shape
    V = tbl_ref.shape[0]
    nc = w_ref.shape[0]
    K = w_ref.shape[1]
    pad = (K - 1) // 2
    B = ids_ref.shape[0] // (TB // ids_ref.shape[0]) if False else None  # unused
    B = w_ref.shape[2] // w_ref.shape[2]  # placeholder removed below
    del B

    ids = ids_ref[...]                                        # (T*B, 1) int32
    onehot = (ids == lax.broadcasted_iota(jnp.int32, (TB, V), 1)).astype(F32)
    y = jnp.dot(onehot, tbl_ref[...], preferred_element_type=F32)   # (T*B, C)

    # batch size is encoded in the row-shift stride passed via sc_ref's layout?
    # -> no: it is a compile-time Python constant closed over through w_ref; we
    #    recover it from b_ref which is (nc, 1, C) and the shift constant below.
    # (B is supplied statically by the wrapper through the captured constant.)
    for i in range(nc):                                       # static, unrolled
        acc = jnp.zeros((TB, C), F32) + b_ref[i]              # bias broadcast
        for k in range(K):                                    # per-tap accumulate
            s = (k - pad) * _embed_convs_kernel._batch        # row shift (mult of B)
            if s > 0:
                xk = jnp.concatenate([y[s:], jnp.zeros((s, C), F32)], axis=0)
            elif s < 0:
                xk = jnp.concatenate([jnp.zeros((-s, C), F32), y[:TB + s]], axis=0)
            else:
                xk = y
            acc = acc + _bdot(xk, w_ref[i, k])
        acc = acc * sc_ref[i] + sh_ref[i]                     # folded BatchNorm1d
        y = jnp.maximum(acc, 0.0)
        # TODO(synk): dropout(0.5) after each encoder conv skipped (eval semantics).
    o_ref[...] = y


def embed_and_convs(ids_tm, params, B, T):
    C = params["embedding"].shape[1]
    _embed_convs_kernel._batch = B        # static Python constant for row shifts
    return pl.pallas_call(
        _embed_convs_kernel,
        out_shape=jax.ShapeDtypeStruct((T * B, C), F32),
        in_specs=_vspecs(6),
        out_specs=pl.BlockSpec(memory_space=VMEM),
    )(ids_tm, params["embedding"],
      params["enc_conv_w"].astype(BF16), params["enc_conv_b"],
      params["enc_bn_scale"], params["enc_bn_shift"])


# ---------------------------------------------------------------------------
# LSTM cell helper: [x ; h] already concatenated, stacked weight [W_ih ; W_hh].
# is_g (which lanes get tanh) is hoisted out of the recurrent loop by callers.
# ---------------------------------------------------------------------------
def _lstm_step(xin, c, w, b, is_g):
    H = c.shape[1]
    gates = _bdot(xin, w) + b                                 # (B, 4H)
    act = jnp.where(is_g, jnp.tanh(gates), jax.nn.sigmoid(gates))
    i = act[:, 0:H]
    f = act[:, H:2 * H]
    g = act[:, 2 * H:3 * H]
    o = act[:, 3 * H:4 * H]
    c_new = f * c + i * g
    h_new = o * jnp.tanh(c_new)
    return h_new, c_new


# ---------------------------------------------------------------------------
# Kernel B: BiLSTM -- both directions in ONE fori_loop, single (T, B, 2H) output
# ---------------------------------------------------------------------------
def _bilstm_kernel(xs_ref, wf_ref, bf_ref, wb_ref, bb_ref, o_ref, sf, sb):
    T, B, C = xs_ref.shape
    H = sf.shape[2]

    lane = lax.broadcasted_iota(jnp.int32, (B, 4 * H), 1)     # hoisted gate mask
    is_g = (lane >= 2 * H) & (lane < 3 * H)

    def step(t, carry):
        hf, cf, hb, cb = carry
        xin_f = jnp.concatenate([xs_ref[t], hf], axis=-1)
        hfn, cfn = _lstm_step(xin_f, cf, wf_ref[...], bf_ref[...], is_g)
        xin_b = jnp.concatenate([xs_ref[T - 1 - t], hb], axis=-1)
        hbn, cbn = _lstm_step(xin_b, cb, wb_ref[...], bb_ref[...], is_g)
        sf[t] = hfn
        sb[T - 1 - t] = hbn
        return hfn, cfn, hbn, cbn

    z = jnp.zeros((B, H), F32)
    lax.fori_loop(0, T, step, (z, z, z, z), unroll=True)
    # single lane-dense store: forward hiddens in lanes [0,H), backward in [H,2H)
    o_ref[...] = jnp.concatenate([sf[...], sb[...]], axis=-1)


def bilstm(xs, wf, bf_, wb, bb_):
    T, B, C = xs.shape
    H = wf.shape[1] // 4
    return pl.pallas_call(
        _bilstm_kernel,
        out_shape=jax.ShapeDtypeStruct((T, B, 2 * H), F32),
        in_specs=_vspecs(5),
        out_specs=pl.BlockSpec(memory_space=VMEM),
        scratch_shapes=[pltpu.VMEM((T, B, H), F32), pltpu.VMEM((T, B, H), F32)],
    )(xs, wf.astype(BF16), bf_, wb.astype(BF16), bb_)


# ---------------------------------------------------------------------------
# Kernel C: whole teacher-forced decoder loop, state carried by lax.fori_loop,
# all weights resident, mel+gate+alignment packed into one 128-lane output slab.
# ---------------------------------------------------------------------------
def _decoder_kernel(prev_ref, mem_ref, pmem_ref, ebias_ref,
                    locm_ref, wqt_ref, vmat_ref,
                    pre1_ref, pre2_ref,
                    warn_ref, barn_ref, wdec_ref, bdec_ref,
                    wout_ref, bout_ref,
                    y_ref):
    T_out, B, n_mel = prev_ref.shape
    _, T, E = mem_ref.shape
    AR = warn_ref.shape[1] // 4
    DR = wdec_ref.shape[1] // 4
    PACK = y_ref.shape[2]

    # loop-invariant values hoisted out of the recurrent body
    mem = mem_ref[...]                                        # (B, T, E) f32
    pmem = pmem_ref[...]                                      # (B, T*A) f32
    ebias = ebias_ref[...]                                    # (B, T) additive mask
    lane_ar = lax.broadcasted_iota(jnp.int32, (B, 4 * AR), 1)
    is_g_ar = (lane_ar >= 2 * AR) & (lane_ar < 3 * AR)
    lane_dr = lax.broadcasted_iota(jnp.int32, (B, 4 * DR), 1)
    is_g_dr = (lane_dr >= 2 * DR) & (lane_dr < 3 * DR)
    zpre = jnp.zeros((B, n_mel + 1), F32)
    npad = PACK - (n_mel + 1) - T
    zpost = jnp.zeros((B, npad), F32) if npad > 0 else None

    def step(t, carry):
        ah, ac, dh, dc, ctx, aw, awc = carry
        x_prev = prev_ref[t]                                  # (B, n_mel)

        # prenet: bias-free linear + relu, twice.
        # TODO(synk): prenet dropout (p=0.5, applied even at eval in reference) skipped.
        p = jnp.maximum(_bdot(x_prev, pre1_ref[...]), 0.0)
        p = jnp.maximum(_bdot(p, pre2_ref[...]), 0.0)

        # attention RNN: one stacked matmul over [prenet_out, context, hidden]
        xin = jnp.concatenate([p, ctx, ah], axis=-1)
        ah_n, ac_n = _lstm_step(xin, ac, warn_ref[...], barn_ref[...], is_g_ar)
        # TODO(synk): dropout on attention_hidden skipped (inference semantics).

        # location-sensitive attention (loc conv + dense pre-folded on host).
        # TODO(synk): loc_m / vmat are O(T^2*A) operators -- fine at T=8 but at
        # production lengths (esp. v7x 64MiB VMEM) use a banded/tap form instead.
        awcat = jnp.concatenate([aw, awc], axis=-1)           # (B, 2T)
        z = jnp.tanh(_bdot(ah_n, wqt_ref[...]) + pmem
                     + _bdot(awcat, locm_ref[...]))           # (B, T*A)
        energies = _bdot(z, vmat_ref[...]) + ebias            # (B, T)
        mx = jnp.max(energies, axis=-1, keepdims=True)
        ex = jnp.exp(energies - mx)
        w = ex * pl.reciprocal(jnp.sum(ex, axis=-1, keepdims=True), approx=True)

        # context: batched (1,T)x(T,E) contraction, f32 (no block-diag trick)
        ctx_n = jnp.einsum('bqt,bte->bqe', w[:, None, :], mem,
                           preferred_element_type=F32)[:, 0, :]
        awc_n = awc + w

        # decoder RNN: one stacked matmul over [attn_hidden, context, hidden]
        din = jnp.concatenate([ah_n, ctx_n, dh], axis=-1)
        dh_n, dc_n = _lstm_step(din, dc, wdec_ref[...], bdec_ref[...], is_g_dr)
        # TODO(synk): dropout on decoder_hidden skipped (inference semantics).

        # mel + gate via one 128-wide matmul; alignment packed into spare lanes
        dhc = jnp.concatenate([dh_n, ctx_n], axis=-1)
        out = _bdot(dhc, wout_ref[...]) + bout_ref[...]       # (B, 128)
        pieces = [zpre, w] + ([zpost] if zpost is not None else [])
        y_ref[t] = out + jnp.concatenate(pieces, axis=-1)     # lane-dense store
        return ah_n, ac_n, dh_n, dc_n, ctx_n, w, awc_n

    def zB(n):
        return jnp.zeros((B, n), F32)

    lax.fori_loop(0, T_out, step,
                  (zB(AR), zB(AR), zB(DR), zB(DR), zB(E), zB(T), zB(T)),
                  unroll=True)


def build_attention_operators(params, T, hp):
    """Fold location conv+dense, tile query projection, build energies matrix."""
    A = hp.attention_dim
    K = hp.attention_location_kernel_size
    pad = (K - 1) // 2
    # (K,2,F) x (F,A) -> effective per-tap weight (K,2,A)
    w_eff = jnp.einsum('kcf,fa->kca', params["loc_conv_w"], params["loc_dense_w"])
    tt = jnp.arange(T)[:, None]
    jj = jnp.arange(T)[None, :]
    kk = jj - tt + pad
    valid = (kk >= 0) & (kk < K)
    m = w_eff[jnp.clip(kk, 0, K - 1)]                         # (T, T, 2, A): [t, j, c, a]
    m = jnp.where(valid[:, :, None, None], m, 0.0)
    loc_m = jnp.transpose(m, (2, 1, 0, 3)).reshape(2 * T, T * A)
    # query projection tiled across T positions: (ar, T*A)
    tile = jnp.tile(jnp.eye(A, dtype=F32), (1, T))            # (A, T*A)
    wq_tiled = params["query_w"] @ tile
    # energies = z @ vmat,  vmat[t*A+a, s] = v[a] * delta(t, s)
    v_vec = params["attn_v"].reshape(A)
    vmat = jnp.einsum('a,ts->tas', v_vec, jnp.eye(T, dtype=F32)).reshape(T * A, T)
    return loc_m, wq_tiled, vmat


def decoder_forward(memory, mel_targets, input_lengths, params, hp):
    B, T, E = memory.shape
    n_mel = hp.n_mel_channels
    A = hp.attention_dim
    AR = hp.attention_rnn_dim
    DR = hp.decoder_rnn_dim
    T_out = mel_targets.shape[2]
    PACK = 128
    assert n_mel + 1 + T <= PACK, "alignment does not fit packed output lanes"

    # teacher forcing: prev frames = [go, y_0, ..., y_{T_out-2}]
    go = jnp.zeros((1, B, n_mel), F32)
    tgt = jnp.transpose(mel_targets, (2, 0, 1))               # (T_out, B, n_mel)
    prev = jnp.concatenate([go, tgt[:-1]], axis=0)

    ebias = jnp.where(jnp.arange(T)[None, :] < input_lengths[:, None],
                      0.0, -1e9).astype(F32)                  # (B, T) additive mask

    # processed memory (memory_layer): tiny wrapper-side XLA dot (no extra
    # pallas dispatch); layout (B, T*A) position-major to match loc_m/wq_tiled.
    pmem = jnp.einsum('bte,ea->bta', memory, params["mem_w"]).reshape(B, T * A)

    loc_m, wq_tiled, vmat = build_attention_operators(params, T, hp)

    # pack mel projection + gate into one lane-dense (DR+E, 128) weight
    out_w = jnp.concatenate([params["proj_w"], params["gate_w"],
                             jnp.zeros((DR + E, PACK - n_mel - 1), F32)], axis=1)
    out_b = jnp.concatenate([params["proj_b"], params["gate_b"],
                             jnp.zeros((1, PACK - n_mel - 1), F32)], axis=1)

    in_arrays = [
        prev, memory, pmem, ebias,
        loc_m.astype(BF16), wq_tiled.astype(BF16), vmat.astype(BF16),
        params["pre1_w"].astype(BF16), params["pre2_w"].astype(BF16),
        params["attn_rnn_w"].astype(BF16), params["attn_rnn_b"],
        params["dec_rnn_w"].astype(BF16), params["dec_rnn_b"],
        out_w.astype(BF16), out_b,
    ]

    # TODO(synk): at production hparams the resident weights need an explicit
    # vmem_limit_bytes (v5e/v6e) or per-step streaming of dec_rnn_w (v7x).
    ys = pl.pallas_call(
        _decoder_kernel,
        out_shape=jax.ShapeDtypeStruct((T_out, B, PACK), F32),
        in_specs=_vspecs(len(in_arrays)),
        out_specs=pl.BlockSpec(memory_space=VMEM),
    )(*in_arrays)

    mel_outputs = jnp.transpose(ys[:, :, :n_mel], (1, 2, 0))          # (B, n_mel, T_out)
    gate_outputs = jnp.transpose(ys[:, :, n_mel], (1, 0))             # (B, T_out)
    alignments = jnp.transpose(ys[:, :, n_mel + 1:n_mel + 1 + T], (1, 0, 2))
    return mel_outputs, gate_outputs, alignments


# ---------------------------------------------------------------------------
# Parameter init (deterministic, synthetic); LSTM weights pre-stacked [W_ih;W_hh]
# ---------------------------------------------------------------------------
def init_params(key, hp):
    keys = iter(jax.random.split(key, 64))

    def u(shape, scale=0.1):
        return jax.random.uniform(next(keys), shape, F32, -scale, scale)

    p = {}
    std = sqrt(2.0 / (hp.n_symbols + hp.character_embedding_dim))
    val = sqrt(3.0) * std
    p["embedding"] = jax.random.uniform(
        next(keys), (hp.n_symbols, hp.character_embedding_dim), F32, -val, val)

    C = hp.encoder_embedding_dim
    K = hp.encoder_kernel_size
    nc = hp.encoder_n_convolutions
    p["enc_conv_w"] = u((nc, K, C, C))                        # per-tap (Cin, Cout)
    p["enc_conv_b"] = u((nc, 1, C))
    # BatchNorm1d folded (gamma=1, beta=0, running_mean=0, running_var=1)
    p["enc_bn_scale"] = jnp.ones((nc, 1, C), F32)
    p["enc_bn_shift"] = jnp.zeros((nc, 1, C), F32)

    H = C // 2
    for d in ("f", "b"):
        # stacked [W_ih ; W_hh]; single bias (= b_ih + b_hh of PyTorch LSTM)
        p[f"lstm_{d}_w"] = u((C + H, 4 * H))
        p[f"lstm_{d}_b"] = u((1, 4 * H))

    E = C
    nm = hp.n_mel_channels
    pd = hp.prenet_dim
    ar = hp.attention_rnn_dim
    dr = hp.decoder_rnn_dim
    A = hp.attention_dim
    F = hp.attention_location_n_filters
    LK = hp.attention_location_kernel_size

    p["pre1_w"] = u((nm, pd))                                 # prenet is bias-free
    p["pre2_w"] = u((pd, pd))
    p["attn_rnn_w"] = u((pd + E + ar, 4 * ar))                # stacked [W_ih ; W_hh]
    p["attn_rnn_b"] = u((1, 4 * ar))
    p["query_w"] = u((ar, A))
    p["mem_w"] = u((E, A))
    p["loc_conv_w"] = u((LK, 2, F))
    p["loc_dense_w"] = u((F, A))
    p["attn_v"] = u((1, A))
    p["dec_rnn_w"] = u((ar + E + dr, 4 * dr))                 # stacked [W_ih ; W_hh]
    p["dec_rnn_b"] = u((1, 4 * dr))
    p["proj_w"] = u((dr + E, nm))
    p["proj_b"] = u((1, nm))
    p["gate_w"] = u((dr + E, 1))
    p["gate_b"] = u((1, 1))
    return p


# ---------------------------------------------------------------------------
# Top-level forward (mirrors Tacotron2.forward; PyTorch forward returns None,
# we return the decoder products so there is something to block on / inspect).
# ---------------------------------------------------------------------------
@jax.jit
def tacotron2_forward(params, text_inputs, input_lengths, mel_targets, output_lengths):
    B, Tin = text_inputs.shape
    C = HP.encoder_embedding_dim
    # time-major ids so the whole encoder works on a (T*B, C) lane-dense slab
    ids_tm = jnp.transpose(text_inputs).reshape(Tin * B, 1).astype(jnp.int32)
    enc_tm = embed_and_convs(ids_tm, params, B, Tin)          # (Tin*B, C)
    xs = enc_tm.reshape(Tin, B, C)                            # (T, B, C)
    # TODO(synk): pack_padded_sequence handling skipped; BiLSTM runs full length.
    mem_tm = bilstm(xs, params["lstm_f_w"], params["lstm_f_b"],
                    params["lstm_b_w"], params["lstm_b_b"])   # (T, B, 2H)
    memory = jnp.transpose(mem_tm, (1, 0, 2))                 # (B, T, E)
    return decoder_forward(memory, mel_targets, input_lengths, params, HP)


if __name__ == "__main__":
    hp = HP
    key = jax.random.PRNGKey(0)
    kp, kt, km = jax.random.split(key, 3)
    params = init_params(kp, hp)

    B, T_in, T_out = 2, 8, 10
    text_inputs = jax.random.randint(kt, (B, T_in), 0, hp.n_symbols, dtype=jnp.int32)
    input_lengths = jnp.array([T_in, T_in], dtype=jnp.int32)
    mel_targets = jax.random.normal(km, (B, hp.n_mel_channels, T_out), F32)
    output_lengths = jnp.array([T_out, T_out], dtype=jnp.int32)

    mel_out, gate_out, align = tacotron2_forward(
        params, text_inputs, input_lengths, mel_targets, output_lengths)
    jax.block_until_ready((mel_out, gate_out, align))

    assert mel_out.shape == (B, hp.n_mel_channels, T_out)
    assert gate_out.shape == (B, T_out)
    assert align.shape == (B, T_out, T_in)
    print("KERNEL_OK")
</pallas_src>

<mosaic_0001>
module attributes {stable_mosaic.version = 11 : i64} {
  func.func @_embed_convs_kernel(%arg0: memref<16x1xi32, #tpu.memory_space<vmem>>, %arg1: memref<40x32xf32, #tpu.memory_space<vmem>>, %arg2: memref<3x5x32x32xbf16, #tpu.memory_space<vmem>>, %arg3: memref<3x1x32xf32, #tpu.memory_space<vmem>>, %arg4: memref<3x1x32xf32, #tpu.memory_space<vmem>>, %arg5: memref<3x1x32xf32, #tpu.memory_space<vmem>>, %arg6: memref<16x32xf32, #tpu.memory_space<vmem>>) attributes {dimension_semantics = [], scalar_prefetch = 0 : i64, scratch_operands = 0 : i64, tpu.core_type = #tpu.core_type<tc>} {
    %c0 = arith.constant 0 : index
    %c0_0 = arith.constant 0 : index
    %0 = vector.load %arg0[%c0, %c0_0] : memref<16x1xi32, #tpu.memory_space<vmem>>, vector<16x1xi32>
    %1 = tpu.iota {dimensions = array<i32: 1>} : vector<16x40xi32>
    %2 = vector.broadcast %0 : vector<16x1xi32> to vector<16x40xi32>
    %3 = arith.cmpi eq, %2, %1 : vector<16x40xi32>
    %4 = arith.extui %3 : vector<16x40xi1> to vector<16x40xi32>
    %5 = arith.sitofp %4 : vector<16x40xi32> to vector<16x40xf32>
    %c0_1 = arith.constant 0 : index
    %c0_2 = arith.constant 0 : index
    %6 = vector.load %arg1[%c0_1, %c0_2] : memref<40x32xf32, #tpu.memory_space<vmem>>, vector<40x32xf32>
    %cst = arith.constant dense<0.000000e+00> : vector<16x32xf32>
    %7 = tpu.matmul %5, %6, %cst {dimension_numbers = #tpu.dot_dimension_numbers<[1], [0], [0], [1], [0, 0, 1, 1], [], []>} : vector<16x40xf32>, vector<40x32xf32>, vector<16x32xf32> -> vector<16x32xf32>
    %cst_3 = arith.constant 0.000000e+00 : f32
    %8 = vector.broadcast %cst_3 : f32 to vector<16x32xf32>
    %c0_4 = arith.constant 0 : index
    %c0_5 = arith.constant 0 : index
    %c0_6 = arith.constant 0 : index
    %9 = vector.load %arg3[%c0_4, %c0_5, %c0_6] : memref<3x1x32xf32, #tpu.memory_space<vmem>>, vector<1x1x32xf32>
    %10 = vector.shape_cast %9 : vector<1x1x32xf32> to vector<1x32xf32>
    %11 = vector.broadcast %10 : vector<1x32xf32> to vector<16x32xf32>
    %12 = arith.addf %8, %11 : vector<16x32xf32>
    %cst_7 = arith.constant 0.000000e+00 : f32
    %13 = vector.broadcast %cst_7 : f32 to vector<4x32xf32>
    %14 = vector.extract_strided_slice %7 {offsets = [0, 0], sizes = [12, 32], strides = [1, 1]} : vector<16x32xf32> to vector<12x32xf32>
    %15 = tpu.concatenate %13, %14 in 0 : vector<4x32xf32>, vector<12x32xf32> -> vector<16x32xf32>
    %c0_8 = arith.constant 0 : index
    %c0_9 = arith.constant 0 : index
    %c0_10 = arith.constant 0 : index
    %c0_11 = arith.constant 0 : index
    %16 = vector.load %arg2[%c0_8, %c0_9, %c0_10, %c0_11] : memref<3x5x32x32xbf16, #tpu.memory_space<vmem>>, vector<1x1x32x32xbf16>
    %17 = vector.shape_cast %16 : vector<1x1x32x32xbf16> to vector<32x32xbf16>
    %18 = arith.truncf %15 : vector<16x32xf32> to vector<16x32xbf16>
    %cst_12 = arith.constant dense<0.000000e+00> : vector<16x32xf32>
    %19 = tpu.matmul %18, %17, %cst_12 {dimension_numbers = #tpu.dot_dimension_numbers<[1], [0], [0], [1], [0, 0, 1, 1], [], []>} : vector<16x32xbf16>, vector<32x32xbf16>, vector<16x32xf32> -> vector<16x32xf32>
    %20 = arith.addf %12, %19 : vector<16x32xf32>
    %cst_13 = arith.constant 0.000000e+00 : f32
    %21 = vector.broadcast %cst_13 : f32 to vector<2x32xf32>
    %22 = vector.extract_strided_slice %7 {offsets = [0, 0], sizes = [14, 32], strides = [1, 1]} : vector<16x32xf32> to vector<14x32xf32>
    %23 = tpu.concatenate %21, %22 in 0 : vector<2x32xf32>, vector<14x32xf32> -> vector<16x32xf32>
    %c0_14 = arith.constant 0 : index
    %c1 = arith.constant 1 : index
    %c0_15 = arith.constant 0 : index
    %c0_16 = arith.constant 0 : index
    %24 = vector.load %arg2[%c0_14, %c1, %c0_15, %c0_16] : memref<3x5x32x32xbf16, #tpu.memory_space<vmem>>, vector<1x1x32x32xbf16>
    %25 = vector.shape_cast %24 : vector<1x1x32x32xbf16> to vector<32x32xbf16>
    %26 = arith.truncf %23 : vector<16x32xf32> to vector<16x32xbf16>
    %cst_17 = arith.constant dense<0.000000e+00> : vector<16x32xf32>
    %27 = tpu.matmul %26, %25, %cst_17 {dimension_numbers = #tpu.dot_dimension_numbers<[1], [0], [0], [1], [0, 0, 1, 1], [], []>} : vector<16x32xbf16>, vector<32x32xbf16>, vector<16x32xf32> -> vector<16x32xf32>
    %28 = arith.addf %20, %27 : vector<16x32xf32>
    %c0_18 = arith.constant 0 : index
    %c2 = arith.constant 2 : index
    %c0_19 = arith.constant 0 : index
    %c0_20 = arith.constant 0 : index
    %29 = vector.load %arg2[%c0_18, %c2, %c0_19, %c0_20] : memref<3x5x32x32xbf16, #tpu.memory_space<vmem>>, vector<1x1x32x32xbf16>
    %30 = vector.shape_cast %29 : vector<1x1x32x32xbf16> to vector<32x32xbf16>
    %31 = arith.truncf %7 : vector<16x32xf32> to vector<16x32xbf16>
    %cst_21 = arith.constant dense<0.000000e+00> : vector<16x32xf32>
    %32 = tpu.matmul %31, %30, %cst_21 {dimension_numbers = #tpu.dot_dimension_numbers<[1], [0], [0], [1], [0, 0, 1, 1], [], []>} : vector<16x32xbf16>, vector<32x32xbf16>, vector<16x32xf32> -> vector<16x32xf32>
    %33 = arith.addf %28, %32 : vector<16x32xf32>
    %34 = vector.extract_strided_slice %7 {offsets = [2, 0], sizes = [14, 32], strides = [1, 1]} : vector<16x32xf32> to vector<14x32xf32>
    %cst_22 = arith.constant 0.000000e+00 : f32
    %35 = vector.broadcast %cst_22 : f32 to vector<2x32xf32>
    %36 = tpu.concatenate %34, %35 in 0 : vector<14x32xf32>, vector<2x32xf32> -> vector<16x32xf32>
    %c0_23 = arith.constant 0 : index
    %c3 = arith.constant 3 : index
    %c0_24 = arith.constant 0 : index
    %c0_25 = arith.constant 0 : index
    %37 = vector.load %arg2[%c0_23, %c3, %c0_24, %c0_25] : memref<3x5x32x32xbf16, #tpu.memory_space<vmem>>, vector<1x1x32x32xbf16>
    %38 = vector.shape_cast %37 : vector<1x1x32x32xbf16> to vector<32x32xbf16>
    %39 = arith.truncf %36 : vector<16x32xf32> to vector<16x32xbf16>
    %cst_26 = arith.constant dense<0.000000e+00> : vector<16x32xf32>
    %40 = tpu.matmul %39, %38, %cst_26 {dimension_numbers = #tpu.dot_dimension_numbers<[1], [0], [0], [1], [0, 0, 1, 1], [], []>} : vector<16x32xbf16>, vector<32x32xbf16>, vector<16x32xf32> -> vector<16x32xf32>
    %41 = arith.addf %33, %40 : vector<16x32xf32>
    %42 = vector.extract_strided_slice %7 {offsets = [4, 0], sizes = [12, 32], strides = [1, 1]} : vector<16x32xf32> to vector<12x32xf32>
    %cst_27 = arith.constant 0.000000e+00 : f32
    %43 = vector.broadcast %cst_27 : f32 to vector<4x32xf32>
    %44 = tpu.concatenate %42, %43 in 0 : vector<12x32xf32>, vector<4x32xf32> -> vector<16x32xf32>
    %c0_28 = arith.constant 0 : index
    %c4 = arith.constant 4 : index
    %c0_29 = arith.constant 0 : index
    %c0_30 = arith.constant 0 : index
    %45 = vector.load %arg2[%c0_28, %c4, %c0_29, %c0_30] : memref<3x5x32x32xbf16, #tpu.memory_space<vmem>>, vector<1x1x32x32xbf16>
    %46 = vector.shape_cast %45 : vector<1x1x32x32xbf16> to vector<32x32xbf16>
    %47 = arith.truncf %44 : vector<16x32xf32> to vector<16x32xbf16>
    %cst_31 = arith.constant dense<0.000000e+00> : vector<16x32xf32>
    %48 = tpu.matmul %47, %46, %cst_31 {dimension_numbers = #tpu.dot_dimension_numbers<[1], [0], [0], [1], [0, 0, 1, 1], [], []>} : vector<16x32xbf16>, vector<32x32xbf16>, vector<16x32xf32> -> vector<16x32xf32>
    %49 = arith.addf %41, %48 : vector<16x32xf32>
    %c0_32 = arith.constant 0 : index
    %c0_33 = arith.constant 0 : index
    %c0_34 = arith.constant 0 : index
    %50 = vector.load %arg4[%c0_32, %c0_33, %c0_34] : memref<3x1x32xf32, #tpu.memory_space<vmem>>, vector<1x1x32xf32>
    %51 = vector.shape_cast %50 : vector<1x1x32xf32> to vector<1x32xf32>
    %52 = vector.broadcast %51 : vector<1x32xf32> to vector<16x32xf32>
    %53 = arith.mulf %49, %52 : vector<16x32xf32>
    %c0_35 = arith.constant 0 : index
    %c0_36 = arith.constant 0 : index
    %c0_37 = arith.constant 0 : index
    %54 = vector.load %arg5[%c0_35, %c0_36, %c0_37] : memref<3x1x32xf32, #tpu.memory_space<vmem>>, vector<1x1x32xf32>
    %55 = vector.shape_cast %54 : vector<1x1x32xf32> to vector<1x32xf32>
    %56 = vector.broadcast %55 : vector<1x32xf32> to vector<16x32xf32>
    %57 = arith.addf %53, %56 : vector<16x32xf32>
    %cst_38 = arith.constant 0.000000e+00 : f32
    %58 = vector.broadcast %cst_38 : f32 to vector<16x32xf32>
    %59 = arith.maximumf %57, %58 : vector<16x32xf32>
    %cst_39 = arith.constant 0.000000e+00 : f32
    %60 = vector.broadcast %cst_39 : f32 to vector<16x32xf32>
    %c1_40 = arith.constant 1 : index
    %c0_41 = arith.constant 0 : index
    %c0_42 = arith.constant 0 : index
    %61 = vector.load %arg3[%c1_40, %c0_41, %c0_42] : memref<3x1x32xf32, #tpu.memory_space<vmem>>, vector<1x1x32xf32>
    %62 = vector.shape_cast %61 : vector<1x1x32xf32> to vector<1x32xf32>
    %63 = vector.broadcast %62 : vector<1x32xf32> to vector<16x32xf32>
    %64 = arith.addf %60, %63 : vector<16x32xf32>
    %cst_43 = arith.constant 0.000000e+00 : f32
    %65 = vector.broadcast %cst_43 : f32 to vector<4x32xf32>
    %66 = vector.extract_strided_slice %59 {offsets = [0, 0], sizes = [12, 32], strides = [1, 1]} : vector<16x32xf32> to vector<12x32xf32>
    %67 = tpu.concatenate %65, %66 in 0 : vector<4x32xf32>, vector<12x32xf32> -> vector<16x32xf32>
    %c1_44 = arith.constant 1 : index
    %c0_45 = arith.constant 0 : index
    %c0_46 = arith.constant 0 : index
    %c0_47 = arith.constant 0 : index
    %68 = vector.load %arg2[%c1_44, %c0_45, %c0_46, %c0_47] : memref<3x5x32x32xbf16, #tpu.memory_space<vmem>>, vector<1x1x32x32xbf16>
    %69 = vector.shape_cast %68 : vector<1x1x32x32xbf16> to vector<32x32xbf16>
    %70 = arith.truncf %67 : vector<16x32xf32> to vector<16x32xbf16>
    %cst_48 = arith.constant dense<0.000000e+00> : vector<16x32xf32>
    %71 = tpu.matmul %70, %69, %cst_48 {dimension_numbers = #tpu.dot_dimension_numbers<[1], [0], [0], [1], [0, 0, 1, 1], [], []>} : vector<16x32xbf16>, vector<32x32xbf16>, vector<16x32xf32> -> vector<16x32xf32>
    %72 = arith.addf %64, %71 : vector<16x32xf32>
    %cst_49 = arith.constant 0.000000e+00 : f32
    %73 = vector.broadcast %cst_49 : f32 to vector<2x32xf32>
    %74 = vector.extract_strided_slice %59 {offsets = [0, 0], sizes = [14, 32], strides = [1, 1]} : vector<16x32xf32> to vector<14x32xf32>
    %75 = tpu.concatenate %73, %74 in 0 : vector<2x32xf32>, vector<14x32xf32> -> vector<16x32xf32>
    %c1_50 = arith.constant 1 : index
    %c1_51 = arith.constant 1 : index
    %c0_52 = arith.constant 0 : index
    %c0_53 = arith.constant 0 : index
    %76 = vector.load %arg2[%c1_50, %c1_51, %c0_52, %c0_53] : memref<3x5x32x32xbf16, #tpu.memory_space<vmem>>, vector<1x1x32x32xbf16>
    %77 = vector.shape_cast %76 : vector<1x1x32x32xbf16> to vector<32x32xbf16>
    %78 = arith.truncf %75 : vector<16x32xf32> to vector<16x32xbf16>
    %cst_54 = arith.constant dense<0.000000e+00> : vector<16x32xf32>
    %79 = tpu.matmul %78, %77, %cst_54 {dimension_numbers = #tpu.dot_dimension_numbers<[1], [0], [0], [1], [0, 0, 1, 1], [], []>} : vector<16x32xbf16>, vector<32x32xbf16>, vector<16x32xf32> -> vector<16x32xf32>
    %80 = arith.addf %72, %79 : vector<16x32xf32>
    %c1_55 = arith.constant 1 : index
    %c2_56 = arith.constant 2 : index
    %c0_57 = arith.constant 0 : index
    %c0_58 = arith.constant 0 : index
    %81 = vector.load %arg2[%c1_55, %c2_56, %c0_57, %c0_58] : memref<3x5x32x32xbf16, #tpu.memory_space<vmem>>, vector<1x1x32x32xbf16>
    %82 = vector.shape_cast %81 : vector<1x1x32x32xbf16> to vector<32x32xbf16>
    %83 = arith.truncf %59 : vector<16x32xf32> to vector<16x32xbf16>
    %cst_59 = arith.constant dense<0.000000e+00> : vector<16x32xf32>
    %84 = tpu.matmul %83, %82, %cst_59 {dimension_numbers = #tpu.dot_dimension_numbers<[1], [0], [0], [1], [0, 0, 1, 1], [], []>} : vector<16x32xbf16>, vector<32x32xbf16>, vector<16x32xf32> -> vector<16x32xf32>
    %85 = arith.addf %80, %84 : vector<16x32xf32>
    %86 = vector.extract_strided_slice %59 {offsets = [2, 0], sizes = [14, 32], strides = [1, 1]} : vector<16x32xf32> to vector<14x32xf32>
    %cst_60 = arith.constant 0.000000e+00 : f32
    %87 = vector.broadcast %cst_60 : f32 to vector<2x32xf32>
    %88 = tpu.concatenate %86, %87 in 0 : vector<14x32xf32>, vector<2x32xf32> -> vector<16x32xf32>
    %c1_61 = arith.constant 1 : index
    %c3_62 = arith.constant 3 : index
    %c0_63 = arith.constant 0 : index
    %c0_64 = arith.constant 0 : index
    %89 = vector.load %arg2[%c1_61, %c3_62, %c0_63, %c0_64] : memref<3x5x32x32xbf16, #tpu.memory_space<vmem>>, vector<1x1x32x32xbf16>
    %90 = vector.shape_cast %89 : vector<1x1x32x32xbf16> to vector<32x32xbf16>
    %91 = arith.truncf %88 : vector<16x32xf32> to vector<16x32xbf16>
    %cst_65 = arith.constant dense<0.000000e+00> : vector<16x32xf32>
    %92 = tpu.matmul %91, %90, %cst_65 {dimension_numbers = #tpu.dot_dimension_numbers<[1], [0], [0], [1], [0, 0, 1, 1], [], []>} : vector<16x32xbf16>, vector<32x32xbf16>, vector<16x32xf32> -> vector<16x32xf32>
    %93 = arith.addf %85, %92 : vector<16x32xf32>
    %94 = vector.extract_strided_slice %59 {offsets = [4, 0], sizes = [12, 32], strides = [1, 1]} : vector<16x32xf32> to vector<12x32xf32>
    %cst_66 = arith.constant 0.000000e+00 : f32
    %95 = vector.broadcast %cst_66 : f32 to vector<4x32xf32>
    %96 = tpu.concatenate %94, %95 in 0 : vector<12x32xf32>, vector<4x32xf32> -> vector<16x32xf32>
    %c1_67 = arith.constant 1 : index
    %c4_68 = arith.constant 4 : index
    %c0_69 = arith.constant 0 : index
    %c0_70 = arith.constant 0 : index
    %97 = vector.load %arg2[%c1_67, %c4_68, %c0_69, %c0_70] : memref<3x5x32x32xbf16, #tpu.memory_space<vmem>>, vector<1x1x32x32xbf16>
    %98 = vector.shape_cast %97 : vector<1x1x32x32xbf16> to vector<32x32xbf16>
    %99 = arith.truncf %96 : vector<16x32xf32> to vector<16x32xbf16>
    %cst_71 = arith.constant dense<0.000000e+00> : vector<16x32xf32>
    %100 = tpu.matmul %99, %98, %cst_71 {dimension_numbers = #tpu.dot_dimension_numbers<[1], [0], [0], [1], [0, 0, 1, 1], [], []>} : vector<16x32xbf16>, vector<32x32xbf16>, vector<16x32xf32> -> vector<16x32xf32>
    %101 = arith.addf %93, %100 : vector<16x32xf32>
    %c1_72 = arith.constant 1 : index
    %c0_73 = arith.constant 0 : index
    %c0_74 = arith.constant 0 : index
    %102 = vector.load %arg4[%c1_72, %c0_73, %c0_74] : memref<3x1x32xf32, #tpu.memory_space<vmem>>, vector<1x1x32xf32>
    %103 = vector.shape_cast %102 : vector<1x1x32xf32> to vector<1x32xf32>
    %104 = vector.broadcast %103 : vector<1x32xf32> to vector<16x32xf32>
    %105 = arith.mulf %101, %104 : vector<16x32xf32>
    %c1_75 = arith.constant 1 : index
    %c0_76 = arith.constant 0 : index
    %c0_77 = arith.constant 0 : index
    %106 = vector.load %arg5[%c1_75, %c0_76, %c0_77] : memref<3x1x32xf32, #tpu.memory_space<vmem>>, vector<1x1x32xf32>
    %107 = vector.shape_cast %106 : vector<1x1x32xf32> to vector<1x32xf32>
    %108 = vector.broadcast %107 : vector<1x32xf32> to vector<16x32xf32>
    %109 = arith.addf %105, %108 : vector<16x32xf32>
    %cst_78 = arith.constant 0.000000e+00 : f32
    %110 = vector.broadcast %cst_78 : f32 to vector<16x32xf32>
    %111 = arith.maximumf %109, %110 : vector<16x32xf32>
    %cst_79 = arith.constant 0.000000e+00 : f32
    %112 = vector.broadcast %cst_79 : f32 to vector<16x32xf32>
    %c2_80 = arith.constant 2 : index
    %c0_81 = arith.constant 0 : index
    %c0_82 = arith.constant 0 : index
    %113 = vector.load %arg3[%c2_80, %c0_81, %c0_82] : memref<3x1x32xf32, #tpu.memory_space<vmem>>, vector<1x1x32xf32>
    %114 = vector.shape_cast %113 : vector<1x1x32xf32> to vector<1x32xf32>
    %115 = vector.broadcast %114 : vector<1x32xf32> to vector<16x32xf32>
    %116 = arith.addf %112, %115 : vector<16x32xf32>
    %cst_83 = arith.constant 0.000000e+00 : f32
    %117 = vector.broadcast %cst_83 : f32 to vector<4x32xf32>
    %118 = vector.extract_strided_slice %111 {offsets = [0, 0], sizes = [12, 32], strides = [1, 1]} : vector<16x32xf32> to vector<12x32xf32>
    %119 = tpu.concatenate %117, %118 in 0 : vector<4x32xf32>, vector<12x32xf32> -> vector<16x32xf32>
    %c2_84 = arith.constant 2 : index
    %c0_85 = arith.constant 0 : index
    %c0_86 = arith.constant 0 : index
    %c0_87 = arith.constant 0 : index
    %120 = vector.load %arg2[%c2_84, %c0_85, %c0_86, %c0_87] : memref<3x5x32x32xbf16, #tpu.memory_space<vmem>>, vector<1x1x32x32xbf16>
    %121 = vector.shape_cast %120 : vector<1x1x32x32xbf16> to vector<32x32xbf16>
    %122 = arith.truncf %119 : vector<16x32xf32> to vector<16x32xbf16>
    %cst_88 = arith.constant dense<0.000000e+00> : vector<16x32xf32>
    %123 = tpu.matmul %122, %121, %cst_88 {dimension_numbers = #tpu.dot_dimension_numbers<[1], [0], [0], [1], [0, 0, 1, 1], [], []>} : vector<16x32xbf16>, vector<32x32xbf16>, vector<16x32xf32> -> vector<16x32xf32>
    %124 = arith.addf %116, %123 : vector<16x32xf32>
    %cst_89 = arith.constant 0.000000e+00 : f32
    %125 = vector.broadcast %cst_89 : f32 to vector<2x32xf32>
    %126 = vector.extract_strided_slice %111 {offsets = [0, 0], sizes = [14, 32], strides = [1, 1]} : vector<16x32xf32> to vector<14x32xf32>
    %127 = tpu.concatenate %125, %126 in 0 : vector<2x32xf32>, vector<14x32xf32> -> vector<16x32xf32>
    %c2_90 = arith.constant 2 : index
    %c1_91 = arith.constant 1 : index
    %c0_92 = arith.constant 0 : index
    %c0_93 = arith.constant 0 : index
    %128 = vector.load %arg2[%c2_90, %c1_91, %c0_92, %c0_93] : memref<3x5x32x32xbf16, #tpu.memory_space<vmem>>, vector<1x1x32x32xbf16>
    %129 = vector.shape_cast %128 : vector<1x1x32x32xbf16> to vector<32x32xbf16>
    %130 = arith.truncf %127 : vector<16x32xf32> to vector<16x32xbf16>
    %cst_94 = arith.constant dense<0.000000e+00> : vector<16x32xf32>
    %131 = tpu.matmul %130, %129, %cst_94 {dimension_numbers = #tpu.dot_dimension_numbers<[1], [0], [0], [1], [0, 0, 1, 1], [], []>} : vector<16x32xbf16>, vector<32x32xbf16>, vector<16x32xf32> -> vector<16x32xf32>
    %132 = arith.addf %124, %131 : vector<16x32xf32>
    %c2_95 = arith.constant 2 : index
    %c2_96 = arith.constant 2 : index
    %c0_97 = arith.constant 0 : index
    %c0_98 = arith.constant 0 : index
    %133 = vector.load %arg2[%c2_95, %c2_96, %c0_97, %c0_98] : memref<3x5x32x32xbf16, #tpu.memory_space<vmem>>, vector<1x1x32x32xbf16>
    %134 = vector.shape_cast %133 : vector<1x1x32x32xbf16> to vector<32x32xbf16>
    %135 = arith.truncf %111 : vector<16x32xf32> to vector<16x32xbf16>
    %cst_99 = arith.constant dense<0.000000e+00> : vector<16x32xf32>
    %136 = tpu.matmul %135, %134, %cst_99 {dimension_numbers = #tpu.dot_dimension_numbers<[1], [0], [0], [1], [0, 0, 1, 1], [], []>} : vector<16x32xbf16>, vector<32x32xbf16>, vector<16x32xf32> -> vector<16x32xf32>
    %137 = arith.addf %132, %136 : vector<16x32xf32>
    %138 = vector.extract_strided_slice %111 {offsets = [2, 0], sizes = [14, 32], strides = [1, 1]} : vector<16x32xf32> to vector<14x32xf32>
    %cst_100 = arith.constant 0.000000e+00 : f32
    %139 = vector.broadcast %cst_100 : f32 to vector<2x32xf32>
    %140 = tpu.concatenate %138, %139 in 0 : vector<14x32xf32>, vector<2x32xf32> -> vector<16x32xf32>
    %c2_101 = arith.constant 2 : index
    %c3_102 = arith.constant 3 : index
    %c0_103 = arith.constant 0 : index
    %c0_104 = arith.constant 0 : index
    %141 = vector.load %arg2[%c2_101, %c3_102, %c0_103, %c0_104] : memref<3x5x32x32xbf16, #tpu.memory_space<vmem>>, vector<1x1x32x32xbf16>
    %142 = vector.shape_cast %141 : vector<1x1x32x32xbf16> to vector<32x32xbf16>
    %143 = arith.truncf %140 : vector<16x32xf32> to vector<16x32xbf16>
    %cst_105 = arith.constant dense<0.000000e+00> : vector<16x32xf32>
    %144 = tpu.matmul %143, %142, %cst_105 {dimension_numbers = #tpu.dot_dimension_numbers<[1], [0], [0], [1], [0, 0, 1, 1], [], []>} : vector<16x32xbf16>, vector<32x32xbf16>, vector<16x32xf32> -> vector<16x32xf32>
    %145 = arith.addf %137, %144 : vector<16x32xf32>
    %146 = vector.extract_strided_slice %111 {offsets = [4, 0], sizes = [12, 32], strides = [1, 1]} : vector<16x32xf32> to vector<12x32xf32>
    %cst_106 = arith.constant 0.000000e+00 : f32
    %147 = vector.broadcast %cst_106 : f32 to vector<4x32xf32>
    %148 = tpu.concatenate %146, %147 in 0 : vector<12x32xf32>, vector<4x32xf32> -> vector<16x32xf32>
    %c2_107 = arith.constant 2 : index
    %c4_108 = arith.constant 4 : index
    %c0_109 = arith.constant 0 : index
    %c0_110 = arith.constant 0 : index
    %149 = vector.load %arg2[%c2_107, %c4_108, %c0_109, %c0_110] : memref<3x5x32x32xbf16, #tpu.memory_space<vmem>>, vector<1x1x32x32xbf16>
    %150 = vector.shape_cast %149 : vector<1x1x32x32xbf16> to vector<32x32xbf16>
    %151 = arith.truncf %148 : vector<16x32xf32> to vector<16x32xbf16>
    %cst_111 = arith.constant dense<0.000000e+00> : vector<16x32xf32>
    %152 = tpu.matmul %151, %150, %cst_111 {dimension_numbers = #tpu.dot_dimension_numbers<[1], [0], [0], [1], [0, 0, 1, 1], [], []>} : vector<16x32xbf16>, vector<32x32xbf16>, vector<16x32xf32> -> vector<16x32xf32>
    %153 = arith.addf %145, %152 : vector<16x32xf32>
    %c2_112 = arith.constant 2 : index
    %c0_113 = arith.constant 0 : index
    %c0_114 = arith.constant 0 : index
    %154 = vector.load %arg4[%c2_112, %c0_113, %c0_114] : memref<3x1x32xf32, #tpu.memory_space<vmem>>, vector<1x1x32xf32>
    %155 = vector.shape_cast %154 : vector<1x1x32xf32> to vector<1x32xf32>
    %156 = vector.broadcast %155 : vector<1x32xf32> to vector<16x32xf32>
    %157 = arith.mulf %153, %156 : vector<16x32xf32>
    %c2_115 = arith.constant 2 : index
    %c0_116 = arith.constant 0 : index
    %c0_117 = arith.constant 0 : index
    %158 = vector.load %arg5[%c2_115, %c0_116, %c0_117] : memref<3x1x32xf32, #tpu.memory_space<vmem>>, vector<1x1x32xf32>
    %159 = vector.shape_cast %158 : vector<1x1x32xf32> to vector<1x32xf32>
    %160 = vector.broadcast %159 : vector<1x32xf32> to vector<16x32xf32>
    %161 = arith.addf %157, %160 : vector<16x32xf32>
    %cst_118 = arith.constant 0.000000e+00 : f32
    %162 = vector.broadcast %cst_118 : f32 to vector<16x32xf32>
    %163 = arith.maximumf %161, %162 : vector<16x32xf32>
    %c0_119 = arith.constant 0 : index
    %c0_120 = arith.constant 0 : index
    %164 = vector.load %arg6[%c0_119, %c0_120] : memref<16x32xf32, #tpu.memory_space<vmem>>, vector<16x32xf32>
    tpu.vector_store %arg6[%c0_119, %c0_120], %163 {strides = array<i32>} : memref<16x32xf32, #tpu.memory_space<vmem>>, vector<16x32xf32>,
    return
  }
}

module attributes {stable_mosaic.version = 11 : i64} {
  func.func @_bilstm_kernel(%arg0: memref<8x2x32xf32, #tpu.memory_space<vmem>>, %arg1: memref<48x64xbf16, #tpu.memory_space<vmem>>, %arg2: memref<1x64xf32, #tpu.memory_space<vmem>>, %arg3: memref<48x64xbf16, #tpu.memory_space<vmem>>, %arg4: memref<1x64xf32, #tpu.memory_space<vmem>>, %arg5: memref<8x2x32xf32, #tpu.memory_space<vmem>>, %arg6: memref<8x2x16xf32, #tpu.memory_space<vmem>>, %arg7: memref<8x2x16xf32, #tpu.memory_space<vmem>>) attributes {dimension_semantics = [], scalar_prefetch = 0 : i64, scratch_operands = 2 : i64, tpu.core_type = #tpu.core_type<tc>} {
    %0 = tpu.iota {dimensions = array<i32: 1>} : vector<2x64xi32>
    %c32_i32 = arith.constant 32 : i32
    %1 = vector.broadcast %c32_i32 : i32 to vector<2x64xi32>
    %2 = arith.cmpi sge, %0, %1 : vector<2x64xi32>
    %c48_i32 = arith.constant 48 : i32
    %3 = vector.broadcast %c48_i32 : i32 to vector<2x64xi32>
    %4 = arith.cmpi slt, %0, %3 : vector<2x64xi32>
    %5 = arith.andi %2, %4 : vector<2x64xi1>
    %cst = arith.constant 0.000000e+00 : f32
    %6 = vector.broadcast %cst : f32 to vector<2x16xf32>
    %c0_i32 = arith.constant 0 : i32
    %7 = arith.index_cast %c0_i32 : i32 to index
    %c0 = arith.constant 0 : index
    %c0_0 = arith.constant 0 : index
    %8 = vector.load %arg0[%7, %c0, %c0_0] : memref<8x2x32xf32, #tpu.memory_space<vmem>>, vector<1x2x32xf32>
    %9 = vector.shape_cast %8 : vector<1x2x32xf32> to vector<2x32xf32>
    %10 = tpu.concatenate %9, %6 in 1 : vector<2x32xf32>, vector<2x16xf32> -> vector<2x48xf32>
    %c0_1 = arith.constant 0 : index
    %c0_2 = arith.constant 0 : index
    %11 = vector.load %arg1[%c0_1, %c0_2] : memref<48x64xbf16, #tpu.memory_space<vmem>>, vector<48x64xbf16>
    %c0_3 = arith.constant 0 : index
    %c0_4 = arith.constant 0 : index
    %12 = vector.load %arg2[%c0_3, %c0_4] : memref<1x64xf32, #tpu.memory_space<vmem>>, vector<1x64xf32>
    %13 = arith.truncf %10 : vector<2x48xf32> to vector<2x48xbf16>
    %cst_5 = arith.constant dense<0.000000e+00> : vector<2x64xf32>
    %14 = tpu.matmul %13, %11, %cst_5 {dimension_numbers = #tpu.dot_dimension_numbers<[1], [0], [0], [1], [0, 0, 1, 1], [], []>} : vector<2x48xbf16>, vector<48x64xbf16>, vector<2x64xf32> -> vector<2x64xf32>
    %15 = vector.broadcast %12 : vector<1x64xf32> to vector<2x64xf32>
    %16 = arith.addf %14, %15 : vector<2x64xf32>
    %17 = math.tanh %16 : vector<2x64xf32>
    %18 = arith.negf %16 : vector<2x64xf32>
    %19 = math.exp %18 : vector<2x64xf32>
    %cst_6 = arith.constant 1.000000e+00 : f32
    %20 = vector.broadcast %cst_6 : f32 to vector<2x64xf32>
    %21 = arith.addf %20, %19 : vector<2x64xf32>
    %22 = arith.divf %20, %21 : vector<2x64xf32>
    %23 = arith.select %5, %17, %22 : vector<2x64xi1>, vector<2x64xf32>
    %24 = vector.extract_strided_slice %23 {offsets = [0, 0], sizes = [2, 16], strides = [1, 1]} : vector<2x64xf32> to vector<2x16xf32>
    %25 = vector.extract_strided_slice %23 {offsets = [0, 16], sizes = [2, 16], strides = [1, 1]} : vector<2x64xf32> to vector<2x16xf32>
    %26 = vector.extract_strided_slice %23 {offsets = [0, 32], sizes = [2, 16], strides = [1, 1]} : vector<2x64xf32> to vector<2x16xf32>
    %27 = vector.extract_strided_slice %23 {offsets = [0, 48], sizes = [2, 16], strides = [1, 1]} : vector<2x64xf32> to vector<2x16xf32>
    %28 = arith.mulf %25, %6 : vector<2x16xf32>
    %29 = arith.mulf %24, %26 : vector<2x16xf32>
    %30 = arith.addf %28, %29 : vector<2x16xf32>
    %31 = math.tanh %30 : vector<2x16xf32>
    %32 = arith.mulf %27, %31 : vector<2x16xf32>
    %c7_i32 = arith.constant 7 : i32
    %33 = arith.subi %c7_i32, %c0_i32 : i32
    %34 = arith.index_cast %33 : i32 to index
    %c0_7 = arith.constant 0 : index
    %c0_8 = arith.constant 0 : index
    %35 = vector.load %arg0[%34, %c0_7, %c0_8] : memref<8x2x32xf32, #tpu.memory_space<vmem>>, vector<1x2x32xf32>
    %36 = vector.shape_cast %35 : vector<1x2x32xf32> to vector<2x32xf32>
    %37 = tpu.concatenate %36, %6 in 1 : vector<2x32xf32>, vector<2x16xf32> -> vector<2x48xf32>
    %c0_9 = arith.constant 0 : index
    %c0_10 = arith.constant 0 : index
    %38 = vector.load %arg3[%c0_9, %c0_10] : memref<48x64xbf16, #tpu.memory_space<vmem>>, vector<48x64xbf16>
    %c0_11 = arith.constant 0 : index
    %c0_12 = arith.constant 0 : index
    %39 = vector.load %arg4[%c0_11, %c0_12] : memref<1x64xf32, #tpu.memory_space<vmem>>, vector<1x64xf32>
    %40 = arith.truncf %37 : vector<2x48xf32> to vector<2x48xbf16>
    %cst_13 = arith.constant dense<0.000000e+00> : vector<2x64xf32>
    %41 = tpu.matmul %40, %38, %cst_13 {dimension_numbers = #tpu.dot_dimension_numbers<[1], [0], [0], [1], [0, 0, 1, 1], [], []>} : vector<2x48xbf16>, vector<48x64xbf16>, vector<2x64xf32> -> vector<2x64xf32>
    %42 = vector.broadcast %39 : vector<1x64xf32> to vector<2x64xf32>
    %43 = arith.addf %41, %42 : vector<2x64xf32>
    %44 = math.tanh %43 : vector<2x64xf32>
    %45 = arith.negf %43 : vector<2x64xf32>
    %46 = math.exp %45 : vector<2x64xf32>
    %cst_14 = arith.constant 1.000000e+00 : f32
    %47 = vector.broadcast %cst_14 : f32 to vector<2x64xf32>
    %48 = arith.addf %47, %46 : vector<2x64xf32>
    %49 = arith.divf %47, %48 : vector<2x64xf32>
    %50 = arith.select %5, %44, %49 : vector<2x64xi1>, vector<2x64xf32>
    %51 = vector.extract_strided_slice %50 {offsets = [0, 0], sizes = [2, 16], strides = [1, 1]} : vector<2x64xf32> to vector<2x16xf32>
    %52 = vector.extract_strided_slice %50 {offsets = [0, 16], sizes = [2, 16], strides = [1, 1]} : vector<2x64xf32> to vector<2x16xf32>
    %53 = vector.extract_strided_slice %50 {offsets = [0, 32], sizes = [2, 16], strides = [1, 1]} : vector<2x64xf32> to vector<2x16xf32>
    %54 = vector.extract_strided_slice %50 {offsets = [0, 48], sizes = [2, 16], strides = [1, 1]} : vector<2x64xf32> to vector<2x16xf32>
    %55 = arith.mulf %52, %6 : vector<2x16xf32>
    %56 = arith.mulf %51, %53 : vector<2x16xf32>
    %57 = arith.addf %55, %56 : vector<2x16xf32>
    %58 = math.tanh %57 : vector<2x16xf32>
    %59 = arith.mulf %54, %58 : vector<2x16xf32>
    %60 = arith.index_cast %c0_i32 : i32 to index
    %c0_15 = arith.constant 0 : index
    %c0_16 = arith.constant 0 : index
    %61 = vector.load %arg6[%60, %c0_15, %c0_16] : memref<8x2x16xf32, #tpu.memory_space<vmem>>, vector<1x2x16xf32>
    %62 = vector.shape_cast %61 : vector<1x2x16xf32> to vector<2x16xf32>
    %63 = vector.shape_cast %32 : vector<2x16xf32> to vector<1x2x16xf32>
    tpu.vector_store %arg6[%60, %c0_15, %c0_16], %63 {strides = array<i32>} : memref<8x2x16xf32, #tpu.memory_space<vmem>>, vector<1x2x16xf32>,
    %c7_i32_17 = arith.constant 7 : i32
    %64 = arith.subi %c7_i32_17, %c0_i32 : i32
    %65 = arith.index_cast %64 : i32 to index
    %c0_18 = arith.constant 0 : index
    %c0_19 = arith.constant 0 : index
    %66 = vector.load %arg7[%65, %c0_18, %c0_19] : memref<8x2x16xf32, #tpu.memory_space<vmem>>, vector<1x2x16xf32>
    %67 = vector.shape_cast %66 : vector<1x2x16xf32> to vector<2x16xf32>
    %68 = vector.shape_cast %59 : vector<2x16xf32> to vector<1x2x16xf32>
    tpu.vector_store %arg7[%65, %c0_18, %c0_19], %68 {strides = array<i32>} : memref<8x2x16xf32, #tpu.memory_space<vmem>>, vector<1x2x16xf32>,
    %c1_i32 = arith.constant 1 : i32
    %69 = arith.index_cast %c1_i32 : i32 to index
    %c0_20 = arith.constant 0 : index
    %c0_21 = arith.constant 0 : index
    %70 = vector.load %arg0[%69, %c0_20, %c0_21] : memref<8x2x32xf32, #tpu.memory_space<vmem>>, vector<1x2x32xf32>
    %71 = vector.shape_cast %70 : vector<1x2x32xf32> to vector<2x32xf32>
    %72 = tpu.concatenate %71, %32 in 1 : vector<2x32xf32>, vector<2x16xf32> -> vector<2x48xf32>
    %c0_22 = arith.constant 0 : index
    %c0_23 = arith.constant 0 : index
    %73 = vector.load %arg1[%c0_22, %c0_23] : memref<48x64xbf16, #tpu.memory_space<vmem>>, vector<48x64xbf16>
    %c0_24 = arith.constant 0 : index
    %c0_25 = arith.constant 0 : index
    %74 = vector.load %arg2[%c0_24, %c0_25] : memref<1x64xf32, #tpu.memory_space<vmem>>, vector<1x64xf32>
    %75 = arith.truncf %72 : vector<2x48xf32> to vector<2x48xbf16>
    %cst_26 = arith.constant dense<0.000000e+00> : vector<2x64xf32>
    %76 = tpu.matmul %75, %73, %cst_26 {dimension_numbers = #tpu.dot_dimension_numbers<[1], [0], [0], [1], [0, 0, 1, 1], [], []>} : vector<2x48xbf16>, vector<48x64xbf16>, vector<2x64xf32> -> vector<2x64xf32>
    %77 = vector.broadcast %74 : vector<1x64xf32> to vector<2x64xf32>
    %78 = arith.addf %76, %77 : vector<2x64xf32>
    %79 = math.tanh %78 : vector<2x64xf32>
    %80 = arith.negf %78 : vector<2x64xf32>
    %81 = math.exp %80 : vector<2x64xf32>
    %cst_27 = arith.constant 1.000000e+00 : f32
    %82 = vector.broadcast %cst_27 : f32 to vector<2x64xf32>
    %83 = arith.addf %82, %81 : vector<2x64xf32>
    %84 = arith.divf %82, %83 : vector<2x64xf32>
    %85 = arith.select %5, %79, %84 : vector<2x64xi1>, vector<2x64xf32>
    %86 = vector.extract_strided_slice %85 {offsets = [0, 0], sizes = [2, 16], strides = [1, 1]} : vector<2x64xf32> to vector<2x16xf32>
    %87 = vector.extract_strided_slice %85 {offsets = [0, 16], sizes = [2, 16], strides = [1, 1]} : vector<2x64xf32> to vector<2x16xf32>
    %88 = vector.extract_strided_slice %85 {offsets = [0, 32], sizes = [2, 16], strides = [1, 1]} : vector<2x64xf32> to vector<2x16xf32>
    %89 = vector.extract_strided_slice %85 {offsets = [0, 48], sizes = [2, 16], strides = [1, 1]} : vector<2x64xf32> to vector<2x16xf32>
    %90 = arith.mulf %87, %30 : vector<2x16xf32>
    %91 = arith.mulf %86, %88 : vector<2x16xf32>
    %92 = arith.addf %90, %91 : vector<2x16xf32>
    %93 = math.tanh %92 : vector<2x16xf32>
    %94 = arith.mulf %89, %93 : vector<2x16xf32>
    %c7_i32_28 = arith.constant 7 : i32
    %95 = arith.subi %c7_i32_28, %c1_i32 : i32
    %96 = arith.index_cast %95 : i32 to index
    %c0_29 = arith.constant 0 : index
    %c0_30 = arith.constant 0 : index
    %97 = vector.load %arg0[%96, %c0_29, %c0_30] : memref<8x2x32xf32, #tpu.memory_space<vmem>>, vector<1x2x32xf32>
    %98 = vector.shape_cast %97 : vector<1x2x32xf32> to vector<2x32xf32>
    %99 = tpu.concatenate %98, %59 in 1 : vector<2x32xf32>, vector<2x16xf32> -> vector<2x48xf32>
    %c0_31 = arith.constant 0 : index
    %c0_32 = arith.constant 0 : index
    %100 = vector.load %arg3[%c0_31, %c0_32] : memref<48x64xbf16, #tpu.memory_space<vmem>>, vector<48x64xbf16>
    %c0_33 = arith.constant 0 : index
    %c0_34 = arith.constant 0 : index
    %101 = vector.load %arg4[%c0_33, %c0_34] : memref<1x64xf32, #tpu.memory_space<vmem>>, vector<1x64xf32>
    %102 = arith.truncf %99 : vector<2x48xf32> to vector<2x48xbf16>
    %cst_35 = arith.constant dense<0.000000e+00> : vector<2x64xf32>
    %103 = tpu.matmul %102, %100, %cst_35 {dimension_numbers = #tpu.dot_dimension_numbers<[1], [0], [0], [1], [0, 0, 1, 1], [], []>} : vector<2x48xbf16>, vector<48x64xbf16>, vector<2x64xf32> -> vector<2x64xf32>
    %104 = vector.broadcast %101 : vector<1x64xf32> to vector<2x64xf32>
    %105 = arith.addf %103, %104 : vector<2x64xf32>
    %106 = math.tanh %105 : vector<2x64xf32>
    %107 = arith.negf %105 : vector<2x64xf32>
    %108 = math.exp %107 : vector<2x64xf32>
    %cst_36 = arith.constant 1.000000e+00 : f32
    %109 = vector.broadcast %cst_36 : f32 to vector<2x64xf32>
    %110 = arith.addf %109, %108 : vector<2x64xf32>
    %111 = arith.divf %109, %110 : vector<2x64xf32>
    %112 = arith.select %5, %106, %111 : vector<2x64xi1>, vector<2x64xf32>
    %113 = vector.extract_strided_slice %112 {offsets = [0, 0], sizes = [2, 16], strides = [1, 1]} : vector<2x64xf32> to vector<2x16xf32>
    %114 = vector.extract_strided_slice %112 {offsets = [0, 16], sizes = [2, 16], strides = [1, 1]} : vector<2x64xf32> to vector<2x16xf32>
    %115 = vector.extract_strided_slice %112 {offsets = [0, 32], sizes = [2, 16], strides = [1, 1]} : vector<2x64xf32> to vector<2x16xf32>
    %116 = vector.extract_strided_slice %112 {offsets = [0, 48], sizes = [2, 16], strides = [1, 1]} : vector<2x64xf32> to vector<2x16xf32>
    %117 = arith.mulf %114, %57 : vector<2x16xf32>
    %118 = arith.mulf %113, %115 : vector<2x16xf32>
    %119 = arith.addf %117, %118 : vector<2x16xf32>
    %120 = math.tanh %119 : vector<2x16xf32>
    %121 = arith.mulf %116, %120 : vector<2x16xf32>
    %122 = arith.index_cast %c1_i32 : i32 to index
    %c0_37 = arith.constant 0 : index
    %c0_38 = arith.constant 0 : index
    %123 = vector.load %arg6[%122, %c0_37, %c0_38] : memref<8x2x16xf32, #tpu.memory_space<vmem>>, vector<1x2x16xf32>
    %124 = vector.shape_cast %123 : vector<1x2x16xf32> to vector<2x16xf32>
    %125 = vector.shape_cast %94 : vector<2x16xf32> to vector<1x2x16xf32>
    tpu.vector_store %arg6[%122, %c0_37, %c0_38], %125 {strides = array<i32>} : memref<8x2x16xf32, #tpu.memory_space<vmem>>, vector<1x2x16xf32>,
    %c7_i32_39 = arith.constant 7 : i32
    %126 = arith.subi %c7_i32_39, %c1_i32 : i32
    %127 = arith.index_cast %126 : i32 to index
    %c0_40 = arith.constant 0 : index
    %c0_41 = arith.constant 0 : index
    %128 = vector.load %arg7[%127, %c0_40, %c0_41] : memref<8x2x16xf32, #tpu.memory_space<vmem>>, vector<1x2x16xf32>
    %129 = vector.shape_cast %128 : vector<1x2x16xf32> to vector<2x16xf32>
    %130 = vector.shape_cast %121 : vector<2x16xf32> to vector<1x2x16xf32>
    tpu.vector_store %arg7[%127, %c0_40, %c0_41], %130 {strides = array<i32>} : memref<8x2x16xf32, #tpu.memory_space<vmem>>, vector<1x2x16xf32>,
    %c2_i32 = arith.constant 2 : i32
    %131 = arith.index_cast %c2_i32 : i32 to index
    %c0_42 = arith.constant 0 : index
    %c0_43 = arith.constant 0 : index
    %132 = vector.load %arg0[%131, %c0_42, %c0_43] : memref<8x2x32xf32, #tpu.memory_space<vmem>>, vector<1x2x32xf32>
    %133 = vector.shape_cast %132 : vector<1x2x32xf32> to vector<2x32xf32>
    %134 = tpu.concatenate %133, %94 in 1 : vector<2x32xf32>, vector<2x16xf32> -> vector<2x48xf32>
    %c0_44 = arith.constant 0 : index
    %c0_45 = arith.constant 0 : index
    %135 = vector.load %arg1[%c0_44, %c0_45] : memref<48x64xbf16, #tpu.memory_space<vmem>>, vector<48x64xbf16>
    %c0_46 = arith.constant 0 : index
    %c0_47 = arith.constant 0 : index
    %136 = vector.load %arg2[%c0_46, %c0_47] : memref<1x64xf32, #tpu.memory_space<vmem>>, vector<1x64xf32>
    %137 = arith.truncf %134 : vector<2x48xf32> to vector<2x48xbf16>
    %cst_48 = arith.constant dense<0.000000e+00> : vector<2x64xf32>
    %138 = tpu.matmul %137, %135, %cst_48 {dimension_numbers = #tpu.dot_dimension_numbers<[1], [0], [0], [1], [0, 0, 1, 1], [], []>} : vector<2x48xbf16>, vector<48x64xbf16>, vector<2x64xf32> -> vector<2x64xf32>
    %139 = vector.broadcast %136 : vector<1x64xf32> to vector<2x64xf32>
    %140 = arith.addf %138, %139 : vector<2x64xf32>
    %141 = math.tanh %140 : vector<2x64xf32>
    %142 = arith.negf %140 : vector<2x64xf32>
    %143 = math.exp %142 : vector<2x64xf32>
    %cst_49 = arith.constant 1.000000e+00 : f32
    %144 = vector.broadcast %cst_49 : f32 to vector<2x64xf32>
    %145 = arith.addf %144, %143 : vector<2x64xf32>
    %146 = arith.divf %144, %145 : vector<2x64xf32>
    %147 = arith.select %5, %141, %146 : vector<2x64xi1>, vector<2x64xf32>
    %148 = vector.extract_strided_slice %147 {offsets = [0, 0], sizes = [2, 16], strides = [1, 1]} : vector<2x64xf32> to vector<2x16xf32>
    %149 = vector.extract_strided_slice %147 {offsets = [0, 16], sizes = [2, 16], strides = [1, 1]} : vector<2x64xf32> to vector<2x16xf32>
    %150 = vector.extract_strided_slice %147 {offsets = [0, 32], sizes = [2, 16], strides = [1, 1]} : vector<2x64xf32> to vector<2x16xf32>
    %151 = vector.extract_strided_slice %147 {offsets = [0, 48], sizes = [2, 16], strides = [1, 1]} : vector<2x64xf32> to vector<2x16xf32>
    %152 = arith.mulf %149, %92 : vector<2x16xf32>
    %153 = arith.mulf %148, %150 : vector<2x16xf32>
    %154 = arith.addf %152, %153 : vector<2x16xf32>
    %155 = math.tanh %154 : vector<2x16xf32>
    %156 = arith.mulf %151, %155 : vector<2x16xf32>
    %c7_i32_50 = arith.constant 7 : i32
    %157 = arith.subi %c7_i32_50, %c2_i32 : i32
    %158 = arith.index_cast %157 : i32 to index
    %c0_51 = arith.constant 0 : index
    %c0_52 = arith.constant 0 : index
    %159 = vector.load %arg0[%158, %c0_51, %c0_52] : memref<8x2x32xf32, #tpu.memory_space<vmem>>, vector<1x2x32xf32>
    %160 = vector.shape_cast %159 : vector<1x2x32xf32> to vector<2x32xf32>
    %161 = tpu.concatenate %160, %121 in 1 : vector<2x32xf32>, vector<2x16xf32> -> vector<2x48xf32>
    %c0_53 = arith.constant 0 : index
    %c0_54 = arith.constant 0 : index
    %162 = vector.load %arg3[%c0_53, %c0_54] : memref<48x64xbf16, #tpu.memory_space<vmem>>, vector<48x64xbf16>
    %c0_55 = arith.constant 0 : index
    %c0_56 = arith.constant 0 : index
    %163 = vector.load %arg4[%c0_55, %c0_56] : memref<1x64xf32, #tpu.memory_space<vmem>>, vector<1x64xf32>
    %164 = arith.truncf %161 : vector<2x48xf32> to vector<2x48xbf16>
    %cst_57 = arith.constant dense<0.000000e+00> : vector<2x64xf32>
    %165 = tpu.matmul %164, %162, %cst_57 {dimension_numbers = #tpu.dot_dimension_numbers<[1], [0], [0], [1], [0, 0, 1, 1], [], []>} : vector<2x48xbf16>, vector<48x64xbf16>, vector<2x64xf32> -> vector<2x64xf32>
    %166 = vector.broadcast %163 : vector<1x64xf32> to vector<2x64xf32>
    %167 = arith.addf %165, %166 : vector<2x64xf32>
    %168 = math.tanh %167 : vector<2x64xf32>
    %169 = arith.negf %167 : vector<2x64xf32>
    %170 = math.exp %169 : vector<2x64xf32>
    %cst_58 = arith.constant 1.000000e+00 : f32
    %171 = vector.broadcast %cst_58 : f32 to vector<2x64xf32>
    %172 = arith.addf %171, %170 : vector<2x64xf32>
    %173 = arith.divf %171, %172 : vector<2x64xf32>
    %174 = arith.select %5, %168, %173 : vector<2x64xi1>, vector<2x64xf32>
    %175 = vector.extract_strided_slice %174 {offsets = [0, 0], sizes = [2, 16], strides = [1, 1]} : vector<2x64xf32> to vector<2x16xf32>
    %176 = vector.extract_strided_slice %174 {offsets = [0, 16], sizes = [2, 16], strides = [1, 1]} : vector<2x64xf32> to vector<2x16xf32>
    %177 = vector.extract_strided_slice %174 {offsets = [0, 32], sizes = [2, 16], strides = [1, 1]} : vector<2x64xf32> to vector<2x16xf32>
    %178 = vector.extract_strided_slice %174 {offsets = [0, 48], sizes = [2, 16], strides = [1, 1]} : vector<2x64xf32> to vector<2x16xf32>
    %179 = arith.mulf %176, %119 : vector<2x16xf32>
    %180 = arith.mulf %175, %177 : vector<2x16xf32>
    %181 = arith.addf %179, %180 : vector<2x16xf32>
    %182 = math.tanh %181 : vector<2x16xf32>
    %183 = arith.mulf %178, %182 : vector<2x16xf32>
    %184 = arith.index_cast %c2_i32 : i32 to index
    %c0_59 = arith.constant 0 : index
    %c0_60 = arith.constant 0 : index
    %185 = vector.load %arg6[%184, %c0_59, %c0_60] : memref<8x2x16xf32, #tpu.memory_space<vmem>>, vector<1x2x16xf32>
    %186 = vector.shape_cast %185 : vector<1x2x16xf32> to vector<2x16xf32>
    %187 = vector.shape_cast %156 : vector<2x16xf32> to vector<1x2x16xf32>
    tpu.vector_store %arg6[%184, %c0_59, %c0_60], %187 {strides = array<i32>} : memref<8x2x16xf32, #tpu.memory_space<vmem>>, vector<1x2x16xf32>,
    %c7_i32_61 = arith.constant 7 : i32
    %188 = arith.subi %c7_i32_61, %c2_i32 : i32
    %189 = arith.index_cast %188 : i32 to index
    %c0_62 = arith.constant 0 : index
    %c0_63 = arith.constant 0 : index
    %190 = vector.load %arg7[%189, %c0_62, %c0_63] : memref<8x2x16xf32, #tpu.memory_space<vmem>>, vector<1x2x16xf32>
    %191 = vector.shape_cast %190 : vector<1x2x16xf32> to vector<2x16xf32>
    %192 = vector.shape_cast %183 : vector<2x16xf32> to vector<1x2x16xf32>
    tpu.vector_store %arg7[%189, %c0_62, %c0_63], %192 {strides = array<i32>} : memref<8x2x16xf32, #tpu.memory_space<vmem>>, vector<1x2x16xf32>,
    %c3_i32 = arith.constant 3 : i32
    %193 = arith.index_cast %c3_i32 : i32 to index
    %c0_64 = arith.constant 0 : index
    %c0_65 = arith.constant 0 : index
    %194 = vector.load %arg0[%193, %c0_64, %c0_65] : memref<8x2x32xf32, #tpu.memory_space<vmem>>, vector<1x2x32xf32>
    %195 = vector.shape_cast %194 : vector<1x2x32xf32> to vector<2x32xf32>
    %196 = tpu.concatenate %195, %156 in 1 : vector<2x32xf32>, vector<2x16xf32> -> vector<2x48xf32>
    %c0_66 = arith.constant 0 : index
    %c0_67 = arith.constant 0 : index
    %197 = vector.load %arg1[%c0_66, %c0_67] : memref<48x64xbf16, #tpu.memory_space<vmem>>, vector<48x64xbf16>
    %c0_68 = arith.constant 0 : index
    %c0_69 = arith.constant 0 : index
    %198 = vector.load %arg2[%c0_68, %c0_69] : memref<1x64xf32, #tpu.memory_space<vmem>>, vector<1x64xf32>
    %199 = arith.truncf %196 : vector<2x48xf32> to vector<2x48xbf16>
    %cst_70 = arith.constant dense<0.000000e+00> : vector<2x64xf32>
    %200 = tpu.matmul %199, %197, %cst_70 {dimension_numbers = #tpu.dot_dimension_numbers<[1], [0], [0], [1], [0, 0, 1, 1], [], []>} : vector<2x48xbf16>, vector<48x64xbf16>, vector<2x64xf32> -> vector<2x64xf32>
    %201 = vector.broadcast %198 : vector<1x64xf32> to vector<2x64xf32>
    %202 = arith.addf %200, %201 : vector<2x64xf32>
    %203 = math.tanh %202 : vector<2x64xf32>
    %204 = arith.negf %202 : vector<2x64xf32>
    %205 = math.exp %204 : vector<2x64xf32>
    %cst_71 = arith.constant 1.000000e+00 : f32
    %206 = vector.broadcast %cst_71 : f32 to vector<2x64xf32>
    %207 = arith.addf %206, %205 : vector<2x64xf32>
    %208 = arith.divf %206, %207 : vector<2x64xf32>
    %209 = arith.select %5, %203, %208 : vector<2x64xi1>, vector<2x64xf32>
    %210 = vector.extract_strided_slice %209 {offsets = [0, 0], sizes = [2, 16], strides = [1, 1]} : vector<2x64xf32> to vector<2x16xf32>
    %211 = vector.extract_strided_slice %209 {offsets = [0, 16], sizes = [2, 16], strides = [1, 1]} : vector<2x64xf32> to vector<2x16xf32>
    %212 = vector.extract_strided_slice %209 {offsets = [0, 32], sizes = [2, 16], strides = [1, 1]} : vector<2x64xf32> to vector<2x16xf32>
    %213 = vector.extract_strided_slice %209 {offsets = [0, 48], sizes = [2, 16], strides = [1, 1]} : vector<2x64xf32> to vector<2x16xf32>
    %214 = arith.mulf %211, %154 : vector<2x16xf32>
    %215 = arith.mulf %210, %212 : vector<2x16xf32>
    %216 = arith.addf %214, %215 : vector<2x16xf32>
    %217 = math.tanh %216 : vector<2x16xf32>
    %218 = arith.mulf %213, %217 : vector<2x16xf32>
    %c7_i32_72 = arith.constant 7 : i32
    %219 = arith.subi %c7_i32_72, %c3_i32 : i32
    %220 = arith.index_cast %219 : i32 to index
    %c0_73 = arith.constant 0 : index
    %c0_74 = arith.constant 0 : index
    %221 = vector.load %arg0[%220, %c0_73, %c0_74] : memref<8x2x32xf32, #tpu.memory_space<vmem>>, vector<1x2x32xf32>
    %222 = vector.shape_cast %221 : vector<1x2x32xf32> to vector<2x32xf32>
    %223 = tpu.concatenate %222, %183 in 1 : vector<2x32xf32>, vector<2x16xf32> -> vector<2x48xf32>
    %c0_75 = arith.constant 0 : index
    %c0_76 = arith.constant 0 : index
    %224 = vector.load %arg3[%c0_75, %c0_76] : memref<48x64xbf16, #tpu.memory_space<vmem>>, vector<48x64xbf16>
    %c0_77 = arith.constant 0 : index
    %c0_78 = arith.constant 0 : index
    %225 = vector.load %arg4[%c0_77, %c0_78] : memref<1x64xf32, #tpu.memory_space<vmem>>, vector<1x64xf32>
    %226 = arith.truncf %223 : vector<2x48xf32> to vector<2x48xbf16>
    %cst_79 = arith.constant dense<0.000000e+00> : vector<2x64xf32>
    %227 = tpu.matmul %226, %224, %cst_79 {dimension_numbers = #tpu.dot_dimension_numbers<[1], [0], [0], [1], [0, 0, 1, 1], [], []>} : vector<2x48xbf16>, vector<48x64xbf16>, vector<2x64xf32> -> vector<2x64xf32>
    %228 = vector.broadcast %225 : vector<1x64xf32> to vector<2x64xf32>
    %229 = arith.addf %227, %228 : vector<2x64xf32>
    %230 = math.tanh %229 : vector<2x64xf32>
    %231 = arith.negf %229 : vector<2x64xf32>
    %232 = math.exp %231 : vector<2x64xf32>
    %cst_80 = arith.constant 1.000000e+00 : f32
    %233 = vector.broadcast %cst_80 : f32 to vector<2x64xf32>
    %234 = arith.addf %233, %232 : vector<2x64xf32>
    %235 = arith.divf %233, %234 : vector<2x64xf32>
    %236 = arith.select %5, %230, %235 : vector<2x64xi1>, vector<2x64xf32>
    %237 = vector.extract_strided_slice %236 {offsets = [0, 0], sizes = [2, 16], strides = [1, 1]} : vector<2x64xf32> to vector<2x16xf32>
    %238 = vector.extract_strided_slice %236 {offsets = [0, 16], sizes = [2, 16], strides = [1, 1]} : vector<2x64xf32> to vector<2x16xf32>
    %239 = vector.extract_strided_slice %236 {offsets = [0, 32], sizes = [2, 16], strides = [1, 1]} : vector<2x64xf32> to vector<2x16xf32>
    %240 = vector.extract_strided_slice %236 {offsets = [0, 48], sizes = [2, 16], strides = [1, 1]} : vector<2x64xf32> to vector<2x16xf32>
    %241 = arith.mulf %238, %181 : vector<2x16xf32>
    %242 = arith.mulf %237, %239 : vector<2x16xf32>
    %243 = arith.addf %241, %242 : vector<2x16xf32>
    %244 = math.tanh %243 : vector<2x16xf32>
    %245 = arith.mulf %240, %244 : vector<2x16xf32>
    %246 = arith.index_cast %c3_i32 : i32 to index
    %c0_81 = arith.constant 0 : index
    %c0_82 = arith.constant 0 : index
    %247 = vector.load %arg6[%246, %c0_81, %c0_82] : memref<8x2x16xf32, #tpu.memory_space<vmem>>, vector<1x2x16xf32>
    %248 = vector.shape_cast %247 : vector<1x2x16xf32> to vector<2x16xf32>
    %249 = vector.shape_cast %218 : vector<2x16xf32> to vector<1x2x16xf32>
    tpu.vector_store %arg6[%246, %c0_81, %c0_82], %249 {strides = array<i32>} : memref<8x2x16xf32, #tpu.memory_space<vmem>>, vector<1x2x16xf32>,
    %c7_i32_83 = arith.constant 7 : i32
    %250 = arith.subi %c7_i32_83, %c3_i32 : i32
    %251 = arith.index_cast %250 : i32 to index
    %c0_84 = arith.constant 0 : index
    %c0_85 = arith.constant 0 : index
    %252 = vector.load %arg7[%251, %c0_84, %c0_85] : memref<8x2x16xf32, #tpu.memory_space<vmem>>, vector<1x2x16xf32>
    %253 = vector.shape_cast %252 : vector<1x2x16xf32> to vector<2x16xf32>
    %254 = vector.shape_cast %245 : vector<2x16xf32> to vector<1x2x16xf32>
    tpu.vector_store %arg7[%251, %c0_84, %c0_85], %254 {strides = array<i32>} : memref<8x2x16xf32, #tpu.memory_space<vmem>>, vector<1x2x16xf32>,
    %c4_i32 = arith.constant 4 : i32
    %255 = arith.index_cast %c4_i32 : i32 to index
    %c0_86 = arith.constant 0 : index
    %c0_87 = arith.constant 0 : index
    %256 = vector.load %arg0[%255, %c0_86, %c0_87] : memref<8x2x32xf32, #tpu.memory_space<vmem>>, vector<1x2x32xf32>
    %257 = vector.shape_cast %256 : vector<1x2x32xf32> to vector<2x32xf32>
    %258 = tpu.concatenate %257, %218 in 1 : vector<2x32xf32>, vector<2x16xf32> -> vector<2x48xf32>
    %c0_88 = arith.constant 0 : index
    %c0_89 = arith.constant 0 : index
    %259 = vector.load %arg1[%c0_88, %c0_89] : memref<48x64xbf16, #tpu.memory_space<vmem>>, vector<48x64xbf16>
    %c0_90 = arith.constant 0 : index
    %c0_91 = arith.constant 0 : index
    %260 = vector.load %arg2[%c0_90, %c0_91] : memref<1x64xf32, #tpu.memory_space<vmem>>, vector<1x64xf32>
    %261 = arith.truncf %258 : vector<2x48xf32> to vector<2x48xbf16>
    %cst_92 = arith.constant dense<0.000000e+00> : vector<2x64xf32>
    %262 = tpu.matmul %261, %259, %cst_92 {dimension_numbers = #tpu.dot_dimension_numbers<[1], [0], [0], [1], [0, 0, 1, 1], [], []>} : vector<2x48xbf16>, vector<48x64xbf16>, vector<2x64xf32> -> vector<2x64xf32>
    %263 = vector.broadcast %260 : vector<1x64xf32> to vector<2x64xf32>
    %264 = arith.addf %262, %263 : vector<2x64xf32>
    %265 = math.tanh %264 : vector<2x64xf32>
    %266 = arith.negf %264 : vector<2x64xf32>
    %267 = math.exp %266 : vector<2x64xf32>
    %cst_93 = arith.constant 1.000000e+00 : f32
    %268 = vector.broadcast %cst_93 : f32 to vector<2x64xf32>
    %269 = arith.addf %268, %267 : vector<2x64xf32>
    %270 = arith.divf %268, %269 : vector<2x64xf32>
    %271 = arith.select %5, %265, %270 : vector<2x64xi1>, vector<2x64xf32>
    %272 = vector.extract_strided_slice %271 {offsets = [0, 0], sizes = [2, 16], strides = [1, 1]} : vector<2x64xf32> to vector<2x16xf32>
    %273 = vector.extract_strided_slice %271 {offsets = [0, 16], sizes = [2, 16], strides = [1, 1]} : vector<2x64xf32> to vector<2x16xf32>
    %274 = vector.extract_strided_slice %271 {offsets = [0, 32], sizes = [2, 16], strides = [1, 1]} : vector<2x64xf32> to vector<2x16xf32>
    %275 = vector.extract_strided_slice %271 {offsets = [0, 48], sizes = [2, 16], strides = [1, 1]} : vector<2x64xf32> to vector<2x16xf32>
    %276 = arith.mulf %273, %216 : vector<2x16xf32>
    %277 = arith.mulf %272, %274 : vector<2x16xf32>
    %278 = arith.addf %276, %277 : vector<2x16xf32>
    %279 = math.tanh %278 : vector<2x16xf32>
    %280 = arith.mulf %275, %279 : vector<2x16xf32>
    %c7_i32_94 = arith.constant 7 : i32
    %281 = arith.subi %c7_i32_94, %c4_i32 : i32
    %282 = arith.index_cast %281 : i32 to index
    %c0_95 = arith.constant 0 : index
    %c0_96 = arith.constant 0 : index
    %283 = vector.load %arg0[%282, %c0_95, %c0_96] : memref<8x2x32xf32, #tpu.memory_space<vmem>>, vector<1x2x32xf32>
    %284 = vector.shape_cast %283 : vector<1x2x32xf32> to vector<2x32xf32>
    %285 = tpu.concatenate %284, %245 in 1 : vector<2x32xf32>, vector<2x16xf32> -> vector<2x48xf32>
    %c0_97 = arith.constant 0 : index
    %c0_98 = arith.constant 0 : index
    %286 = vector.load %arg3[%c0_97, %c0_98] : memref<48x64xbf16, #tpu.memory_space<vmem>>, vector<48x64xbf16>
    %c0_99 = arith.constant 0 : index
    %c0_100 = arith.constant 0 : index
    %287 = vector.load %arg4[%c0_99, %c0_100] : memref<1x64xf32, #tpu.memory_space<vmem>>, vector<1x64xf32>
    %288 = arith.truncf %285 : vector<2x48xf32> to vector<2x48xbf16>
    %cst_101 = arith.constant dense<0.000000e+00> : vector<2x64xf32>
    %289 = tpu.matmul %288, %286, %cst_101 {dimension_numbers = #tpu.dot_dimension_numbers<[1], [0], [0], [1], [0, 0, 1, 1], [], []>} : vector<2x48xbf16>, vector<48x64xbf16>, vector<2x64xf32> -> vector<2x64xf32>
    %290 = vector.broadcast %287 : vector<1x64xf32> to vector<2x64xf32>
    %291 = arith.addf %289, %290 : vector<2x64xf32>
    %292 = math.tanh %291 : vector<2x64xf32>
    %293 = arith.negf %291 : vector<2x64xf32>
    %294 = math.exp %293 : vector<2x64xf32>
    %cst_102 = arith.constant 1.000000e+00 : f32
    %295 = vector.broadcast %cst_102 : f32 to vector<2x64xf32>
    %296 = arith.addf %295, %294 : vector<2x64xf32>
    %297 = arith.divf %295, %296 : vector<2x64xf32>
    %298 = arith.select %5, %292, %297 : vector<2x64xi1>, vector<2x64xf32>
    %299 = vector.extract_strided_slice %298 {offsets = [0, 0], sizes = [2, 16], strides = [1, 1]} : vector<2x64xf32> to vector<2x16xf32>
    %300 = vector.extract_strided_slice %298 {offsets = [0, 16], sizes = [2, 16], strides = [1, 1]} : vector<2x64xf32> to vector<2x16xf32>
    %301 = vector.extract_strided_slice %298 {offsets = [0, 32], sizes = [2, 16], strides = [1, 1]} : vector<2x64xf32> to vector<2x16xf32>
    %302 = vector.extract_strided_slice %298 {offsets = [0, 48], sizes = [2, 16], strides = [1, 1]} : vector<2x64xf32> to vector<2x16xf32>
    %303 = arith.mulf %300, %243 : vector<2x16xf32>
    %304 = arith.mulf %299, %301 : vector<2x16xf32>
    %305 = arith.addf %303, %304 : vector<2x16xf32>
    %306 = math.tanh %305 : vector<2x16xf32>
    %307 = arith.mulf %302, %306 : vector<2x16xf32>
    %308 = arith.index_cast %c4_i32 : i32 to index
    %c0_103 = arith.constant 0 : index
    %c0_104 = arith.constant 0 : index
    %309 = vector.load %arg6[%308, %c0_103, %c0_104] : memref<8x2x16xf32, #tpu.memory_space<vmem>>, vector<1x2x16xf32>
    %310 = vector.shape_cast %309 : vector<1x2x16xf32> to vector<2x16xf32>
    %311 = vector.shape_cast %280 : vector<2x16xf32> to vector<1x2x16xf32>
    tpu.vector_store %arg6[%308, %c0_103, %c0_104], %311 {strides = array<i32>} : memref<8x2x16xf32, #tpu.memory_space<vmem>>, vector<1x2x16xf32>,
    %c7_i32_105 = arith.constant 7 : i32
    %312 = arith.subi %c7_i32_105, %c4_i32 : i32
    %313 = arith.index_cast %312 : i32 to index
    %c0_106 = arith.constant 0 : index
    %c0_107 = arith.constant 0 : index
    %314 = vector.load %arg7[%313, %c0_106, %c0_107] : memref<8x2x16xf32, #tpu.memory_space<vmem>>, vector<1x2x16xf32>
    %315 = vector.shape_cast %314 : vector<1x2x16xf32> to vector<2x16xf32>
    %316 = vector.shape_cast %307 : vector<2x16xf32> to vector<1x2x16xf32>
    tpu.vector_store %arg7[%313, %c0_106, %c0_107], %316 {strides = array<i32>} : memref<8x2x16xf32, #tpu.memory_space<vmem>>, vector<1x2x16xf32>,
    %c5_i32 = arith.constant 5 : i32
    %317 = arith.index_cast %c5_i32 : i32 to index
    %c0_108 = arith.constant 0 : index
    %c0_109 = arith.constant 0 : index
    %318 = vector.load %arg0[%317, %c0_108, %c0_109] : memref<8x2x32xf32, #tpu.memory_space<vmem>>, vector<1x2x32xf32>
    %319 = vector.shape_cast %318 : vector<1x2x32xf32> to vector<2x32xf32>
    %320 = tpu.concatenate %319, %280 in 1 : vector<2x32xf32>, vector<2x16xf32> -> vector<2x48xf32>
    %c0_110 = arith.constant 0 : index
    %c0_111 = arith.constant 0 : index
    %321 = vector.load %arg1[%c0_110, %c0_111] : memref<48x64xbf16, #tpu.memory_space<vmem>>, vector<48x64xbf16>
    %c0_112 = arith.constant 0 : index
    %c0_113 = arith.constant 0 : index
    %322 = vector.load %arg2[%c0_112, %c0_113] : memref<1x64xf32, #tpu.memory_space<vmem>>, vector<1x64xf32>
    %323 = arith.truncf %320 : vector<2x48xf32> to vector<2x48xbf16>
    %cst_114 = arith.constant dense<0.000000e+00> : vector<2x64xf32>
    %324 = tpu.matmul %323, %321, %cst_114 {dimension_numbers = #tpu.dot_dimension_numbers<[1], [0], [0], [1], [0, 0, 1, 1], [], []>} : vector<2x48xbf16>, vector<48x64xbf16>, vector<2x64xf32> -> vector<2x64xf32>
    %325 = vector.broadcast %322 : vector<1x64xf32> to vector<2x64xf32>
    %326 = arith.addf %324, %325 : vector<2x64xf32>
    %327 = math.tanh %326 : vector<2x64xf32>
    %328 = arith.negf %326 : vector<2x64xf32>
    %329 = math.exp %328 : vector<2x64xf32>
    %cst_115 = arith.constant 1.000000e+00 : f32
    %330 = vector.broadcast %cst_115 : f32 to vector<2x64xf32>
    %331 = arith.addf %330, %329 : vector<2x64xf32>
    %332 = arith.divf %330, %331 : vector<2x64xf32>
    %333 = arith.select %5, %327, %332 : vector<2x64xi1>, vector<2x64xf32>
    %334 = vector.extract_strided_slice %333 {offsets = [0, 0], sizes = [2, 16], strides = [1, 1]} : vector<2x64xf32> to vector<2x16xf32>
    %335 = vector.extract_strided_slice %333 {offsets = [0, 16], sizes = [2, 16], strides = [1, 1]} : vector<2x64xf32> to vector<2x16xf32>
    %336 = vector.extract_strided_slice %333 {offsets = [0, 32], sizes = [2, 16], strides = [1, 1]} : vector<2x64xf32> to vector<2x16xf32>
    %337 = vector.extract_strided_slice %333 {offsets = [0, 48], sizes = [2, 16], strides = [1, 1]} : vector<2x64xf32> to vector<2x16xf32>
    %338 = arith.mulf %335, %278 : vector<2x16xf32>
    %339 = arith.mulf %334, %336 : vector<2x16xf32>
    %340 = arith.addf %338, %339 : vector<2x16xf32>
    %341 = math.tanh %340 : vector<2x16xf32>
    %342 = arith.mulf %337, %341 : vector<2x16xf32>
    %c7_i32_116 = arith.constant 7 : i32
    %343 = arith.subi %c7_i32_116, %c5_i32 : i32
    %344 = arith.index_cast %343 : i32 to index
    %c0_117 = arith.constant 0 : index
    %c0_118 = arith.constant 0 : index
    %345 = vector.load %arg0[%344, %c0_117, %c0_118] : memref<8x2x32xf32, #tpu.memory_space<vmem>>, vector<1x2x32xf32>
    %346 = vector.shape_cast %345 : vector<1x2x32xf32> to vector<2x32xf32>
    %347 = tpu.concatenate %346, %307 in 1 : vector<2x32xf32>, vector<2x16xf32> -> vector<2x48xf32>
    %c0_119 = arith.constant 0 : index
    %c0_120 = arith.constant 0 : index
    %348 = vector.load %arg3[%c0_119, %c0_120] : memref<48x64xbf16, #tpu.memory_space<vmem>>, vector<48x64xbf16>
    %c0_121 = arith.constant 0 : index
    %c0_122 = arith.constant 0 : index
    %349 = vector.load %arg4[%c0_121, %c0_122] : memref<1x64xf32, #tpu.memory_space<vmem>>, vector<1x64xf32>
    %350 = arith.truncf %347 : vector<2x48xf32> to vector<2x48xbf16>
    %cst_123 = arith.constant dense<0.000000e+00> : vector<2x64xf32>
    %351 = tpu.matmul %350, %348, %cst_123 {dimension_numbers = #tpu.dot_dimension_numbers<[1], [0], [0], [1], [0, 0, 1, 1], [], []>} : vector<2x48xbf16>, vector<48x64xbf16>, vector<2x64xf32> -> vector<2x64xf32>
    %352 = vector.broadcast %349 : vector<1x64xf32> to vector<2x64xf32>
    %353 = arith.addf %351, %352 : vector<2x64xf32>
    %354 = math.tanh %353 : vector<2x64xf32>
    %355 = arith.negf %353 : vector<2x64xf32>
    %356 = math.exp %355 : vector<2x64xf32>
    %cst_124 = arith.constant 1.000000e+00 : f32
    %357 = vector.broadcast %cst_124 : f32 to vector<2x64xf32>
    %358 = arith.addf %357, %356 : vector<2x64xf32>
    %359 = arith.divf %357, %358 : vector<2x64xf32>
    %360 = arith.select %5, %354, %359 : vector<2x64xi1>, vector<2x64xf32>
    %361 = vector.extract_strided_slice %360 {offsets = [0, 0], sizes = [2, 16], strides = [1, 1]} : vector<2x64xf32> to vector<2x16xf32>
    %362 = vector.extract_strided_slice %360 {offsets = [0, 16], sizes = [2, 16], strides = [1, 1]} : vector<2x64xf32> to vector<2x16xf32>
    %363 = vector.extract_strided_slice %360 {offsets = [0, 32], sizes = [2, 16], strides = [1, 1]} : vector<2x64xf32> to vector<2x16xf32>
    %364 = vector.extract_strided_slice %360 {offsets = [0, 48], sizes = [2, 16], strides = [1, 1]} : vector<2x64xf32> to vector<2x16xf32>
    %365 = arith.mulf %362, %305 : vector<2x16xf32>
    %366 = arith.mulf %361, %363 : vector<2x16xf32>
    %367 = arith.addf %365, %366 : vector<2x16xf32>
    %368 = math.tanh %367 : vector<2x16xf32>
    %369 = arith.mulf %364, %368 : vector<2x16xf32>
    %370 = arith.index_cast %c5_i32 : i32 to index
    %c0_125 = arith.constant 0 : index
    %c0_126 = arith.constant 0 : index
    %371 = vector.load %arg6[%370, %c0_125, %c0_126] : memref<8x2x16xf32, #tpu.memory_space<vmem>>, vector<1x2x16xf32>
    %372 = vector.shape_cast %371 : vector<1x2x16xf32> to vector<2x16xf32>
    %373 = vector.shape_cast %342 : vector<2x16xf32> to vector<1x2x16xf32>
    tpu.vector_store %arg6[%370, %c0_125, %c0_126], %373 {strides = array<i32>} : memref<8x2x16xf32, #tpu.memory_space<vmem>>, vector<1x2x16xf32>,
    %c7_i32_127 = arith.constant 7 : i32
    %374 = arith.subi %c7_i32_127, %c5_i32 : i32
    %375 = arith.index_cast %374 : i32 to index
    %c0_128 = arith.constant 0 : index
    %c0_129 = arith.constant 0 : index
    %376 = vector.load %arg7[%375, %c0_128, %c0_129] : memref<8x2x16xf32, #tpu.memory_space<vmem>>, vector<1x2x16xf32>
    %377 = vector.shape_cast %376 : vector<1x2x16xf32> to vector<2x16xf32>
    %378 = vector.shape_cast %369 : vector<2x16xf32> to vector<1x2x16xf32>
    tpu.vector_store %arg7[%375, %c0_128, %c0_129], %378 {strides = array<i32>} : memref<8x2x16xf32, #tpu.memory_space<vmem>>, vector<1x2x16xf32>,
    %c6_i32 = arith.constant 6 : i32
    %379 = arith.index_cast %c6_i32 : i32 to index
    %c0_130 = arith.constant 0 : index
    %c0_131 = arith.constant 0 : index
    %380 = vector.load %arg0[%379, %c0_130, %c0_131] : memref<8x2x32xf32, #tpu.memory_space<vmem>>, vector<1x2x32xf32>
    %381 = vector.shape_cast %380 : vector<1x2x32xf32> to vector<2x32xf32>
    %382 = tpu.concatenate %381, %342 in 1 : vector<2x32xf32>, vector<2x16xf32> -> vector<2x48xf32>
    %c0_132 = arith.constant 0 : index
    %c0_133 = arith.constant 0 : index
    %383 = vector.load %arg1[%c0_132, %c0_133] : memref<48x64xbf16, #tpu.memory_space<vmem>>, vector<48x64xbf16>
    %c0_134 = arith.constant 0 : index
    %c0_135 = arith.constant 0 : index
    %384 = vector.load %arg2[%c0_134, %c0_135] : memref<1x64xf32, #tpu.memory_space<vmem>>, vector<1x64xf32>
    %385 = arith.truncf %382 : vector<2x48xf32> to vector<2x48xbf16>
    %cst_136 = arith.constant dense<0.000000e+00> : vector<2x64xf32>
    %386 = tpu.matmul %385, %383, %cst_136 {dimension_numbers = #tpu.dot_dimension_numbers<[1], [0], [0], [1], [0, 0, 1, 1], [], []>} : vector<2x48xbf16>, vector<48x64xbf16>, vector<2x64xf32> -> vector<2x64xf32>
    %387 = vector.broadcast %384 : vector<1x64xf32> to vector<2x64xf32>
    %388 = arith.addf %386, %387 : vector<2x64xf32>
    %389 = math.tanh %388 : vector<2x64xf32>
    %390 = arith.negf %388 : vector<2x64xf32>
    %391 = math.exp %390 : vector<2x64xf32>
    %cst_137 = arith.constant 1.000000e+00 : f32
    %392 = vector.broadcast %cst_137 : f32 to vector<2x64xf32>
    %393 = arith.addf %392, %391 : vector<2x64xf32>
    %394 = arith.divf %392, %393 : vector<2x64xf32>
    %395 = arith.select %5, %389, %394 : vector<2x64xi1>, vector<2x64xf32>
    %396 = vector.extract_strided_slice %395 {offsets = [0, 0], sizes = [2, 16], strides = [1, 1]} : vector<2x64xf32> to vector<2x16xf32>
    %397 = vector.extract_strided_slice %395 {offsets = [0, 16], sizes = [2, 16], strides = [1, 1]} : vector<2x64xf32> to vector<2x16xf32>
    %398 = vector.extract_strided_slice %395 {offsets = [0, 32], sizes = [2, 16], strides = [1, 1]} : vector<2x64xf32> to vector<2x16xf32>
    %399 = vector.extract_strided_slice %395 {offsets = [0, 48], sizes = [2, 16], strides = [1, 1]} : vector<2x64xf32> to vector<2x16xf32>
    %400 = arith.mulf %397, %340 : vector<2x16xf32>
    %401 = arith.mulf %396, %398 : vector<2x16xf32>
    %402 = arith.addf %400, %401 : vector<2x16xf32>
    %403 = math.tanh %402 : vector<2x16xf32>
    %404 = arith.mulf %399, %403 : vector<2x16xf32>
    %c7_i32_138 = arith.constant 7 : i32
    %405 = arith.subi %c7_i32_138, %c6_i32 : i32
    %406 = arith.index_cast %405 : i32 to index
    %c0_139 = arith.constant 0 : index
    %c0_140 = arith.constant 0 : index
    %407 = vector.load %arg0[%406, %c0_139, %c0_140] : memref<8x2x32xf32, #tpu.memory_space<vmem>>, vector<1x2x32xf32>
    %408 = vector.shape_cast %407 : vector<1x2x32xf32> to vector<2x32xf32>
    %409 = tpu.concatenate %408, %369 in 1 : vector<2x32xf32>, vector<2x16xf32> -> vector<2x48xf32>
    %c0_141 = arith.constant 0 : index
    %c0_142 = arith.constant 0 : index
    %410 = vector.load %arg3[%c0_141, %c0_142] : memref<48x64xbf16, #tpu.memory_space<vmem>>, vector<48x64xbf16>
    %c0_143 = arith.constant 0 : index
    %c0_144 = arith.constant 0 : index
    %411 = vector.load %arg4[%c0_143, %c0_144] : memref<1x64xf32, #tpu.memory_space<vmem>>, vector<1x64xf32>
    %412 = arith.truncf %409 : vector<2x48xf32> to vector<2x48xbf16>
    %cst_145 = arith.constant dense<0.000000e+00> : vector<2x64xf32>
    %413 = tpu.matmul %412, %410, %cst_145 {dimension_numbers = #tpu.dot_dimension_numbers<[1], [0], [0], [1], [0, 0, 1, 1], [], []>} : vector<2x48xbf16>, vector<48x64xbf16>, vector<2x64xf32> -> vector<2x64xf32>
    %414 = vector.broadcast %411 : vector<1x64xf32> to vector<2x64xf32>
    %415 = arith.addf %413, %414 : vector<2x64xf32>
    %416 = math.tanh %415 : vector<2x64xf32>
    %417 = arith.negf %415 : vector<2x64xf32>
    %418 = math.exp %417 : vector<2x64xf32>
    %cst_146 = arith.constant 1.000000e+00 : f32
    %419 = vector.broadcast %cst_146 : f32 to vector<2x64xf32>
    %420 = arith.addf %419, %418 : vector<2x64xf32>
    %421 = arith.divf %419, %420 : vector<2x64xf32>
    %422 = arith.select %5, %416, %421 : vector<2x64xi1>, vector<2x64xf32>
    %423 = vector.extract_strided_slice %422 {offsets = [0, 0], sizes = [2, 16], strides = [1, 1]} : vector<2x64xf32> to vector<2x16xf32>
    %424 = vector.extract_strided_slice %422 {offsets = [0, 16], sizes = [2, 16], strides = [1, 1]} : vector<2x64xf32> to vector<2x16xf32>
    %425 = vector.extract_strided_slice %422 {offsets = [0, 32], sizes = [2, 16], strides = [1, 1]} : vector<2x64xf32> to vector<2x16xf32>
    %426 = vector.extract_strided_slice %422 {offsets = [0, 48], sizes = [2, 16], strides = [1, 1]} : vector<2x64xf32> to vector<2x16xf32>
    %427 = arith.mulf %424, %367 : vector<2x16xf32>
    %428 = arith.mulf %423, %425 : vector<2x16xf32>
    %429 = arith.addf %427, %428 : vector<2x16xf32>
    %430 = math.tanh %429 : vector<2x16xf32>
    %431 = arith.mulf %426, %430 : vector<2x16xf32>
    %432 = arith.index_cast %c6_i32 : i32 to index
    %c0_147 = arith.constant 0 : index
    %c0_148 = arith.constant 0 : index
    %433 = vector.load %arg6[%432, %c0_147, %c0_148] : memref<8x2x16xf32, #tpu.memory_space<vmem>>, vector<1x2x16xf32>
    %434 = vector.shape_cast %433 : vector<1x2x16xf32> to vector<2x16xf32>
    %435 = vector.shape_cast %404 : vector<2x16xf32> to vector<1x2x16xf32>
    tpu.vector_store %arg6[%432, %c0_147, %c0_148], %435 {strides = array<i32>} : memref<8x2x16xf32, #tpu.memory_space<vmem>>, vector<1x2x16xf32>,
    %c7_i32_149 = arith.constant 7 : i32
    %436 = arith.subi %c7_i32_149, %c6_i32 : i32
    %437 = arith.index_cast %436 : i32 to index
    %c0_150 = arith.constant 0 : index
    %c0_151 = arith.constant 0 : index
    %438 = vector.load %arg7[%437, %c0_150, %c0_151] : memref<8x2x16xf32, #tpu.memory_space<vmem>>, vector<1x2x16xf32>
    %439 = vector.shape_cast %438 : vector<1x2x16xf32> to vector<2x16xf32>
    %440 = vector.shape_cast %431 : vector<2x16xf32> to vector<1x2x16xf32>
    tpu.vector_store %arg7[%437, %c0_150, %c0_151], %440 {strides = array<i32>} : memref<8x2x16xf32, #tpu.memory_space<vmem>>, vector<1x2x16xf32>,
    %c7_i32_152 = arith.constant 7 : i32
    %441 = arith.index_cast %c7_i32_152 : i32 to index
    %c0_153 = arith.constant 0 : index
    %c0_154 = arith.constant 0 : index
    %442 = vector.load %arg0[%441, %c0_153, %c0_154] : memref<8x2x32xf32, #tpu.memory_space<vmem>>, vector<1x2x32xf32>
    %443 = vector.shape_cast %442 : vector<1x2x32xf32> to vector<2x32xf32>
    %444 = tpu.concatenate %443, %404 in 1 : vector<2x32xf32>, vector<2x16xf32> -> vector<2x48xf32>
    %c0_155 = arith.constant 0 : index
    %c0_156 = arith.constant 0 : index
    %445 = vector.load %arg1[%c0_155, %c0_156] : memref<48x64xbf16, #tpu.memory_space<vmem>>, vector<48x64xbf16>
    %c0_157 = arith.constant 0 : index
    %c0_158 = arith.constant 0 : index
    %446 = vector.load %arg2[%c0_157, %c0_158] : memref<1x64xf32, #tpu.memory_space<vmem>>, vector<1x64xf32>
    %447 = arith.truncf %444 : vector<2x48xf32> to vector<2x48xbf16>
    %cst_159 = arith.constant dense<0.000000e+00> : vector<2x64xf32>
    %448 = tpu.matmul %447, %445, %cst_159 {dimension_numbers = #tpu.dot_dimension_numbers<[1], [0], [0], [1], [0, 0, 1, 1], [], []>} : vector<2x48xbf16>, vector<48x64xbf16>, vector<2x64xf32> -> vector<2x64xf32>
    %449 = vector.broadcast %446 : vector<1x64xf32> to vector<2x64xf32>
    %450 = arith.addf %448, %449 : vector<2x64xf32>
    %451 = math.tanh %450 : vector<2x64xf32>
    %452 = arith.negf %450 : vector<2x64xf32>
    %453 = math.exp %452 : vector<2x64xf32>
    %cst_160 = arith.constant 1.000000e+00 : f32
    %454 = vector.broadcast %cst_160 : f32 to vector<2x64xf32>
    %455 = arith.addf %454, %453 : vector<2x64xf32>
    %456 = arith.divf %454, %455 : vector<2x64xf32>
    %457 = arith.select %5, %451, %456 : vector<2x64xi1>, vector<2x64xf32>
    %458 = vector.extract_strided_slice %457 {offsets = [0, 0], sizes = [2, 16], strides = [1, 1]} : vector<2x64xf32> to vector<2x16xf32>
    %459 = vector.extract_strided_slice %457 {offsets = [0, 16], sizes = [2, 16], strides = [1, 1]} : vector<2x64xf32> to vector<2x16xf32>
    %460 = vector.extract_strided_slice %457 {offsets = [0, 32], sizes = [2, 16], strides = [1, 1]} : vector<2x64xf32> to vector<2x16xf32>
    %461 = vector.extract_strided_slice %457 {offsets = [0, 48], sizes = [2, 16], strides = [1, 1]} : vector<2x64xf32> to vector<2x16xf32>
    %462 = arith.mulf %459, %402 : vector<2x16xf32>
    %463 = arith.mulf %458, %460 : vector<2x16xf32>
    %464 = arith.addf %462, %463 : vector<2x16xf32>
    %465 = math.tanh %464 : vector<2x16xf32>
    %466 = arith.mulf %461, %465 : vector<2x16xf32>
    %c7_i32_161 = arith.constant 7 : i32
    %467 = arith.subi %c7_i32_161, %c7_i32_152 : i32
    %468 = arith.index_cast %467 : i32 to index
    %c0_162 = arith.constant 0 : index
    %c0_163 = arith.constant 0 : index
    %469 = vector.load %arg0[%468, %c0_162, %c0_163] : memref<8x2x32xf32, #tpu.memory_space<vmem>>, vector<1x2x32xf32>
    %470 = vector.shape_cast %469 : vector<1x2x32xf32> to vector<2x32xf32>
    %471 = tpu.concatenate %470, %431 in 1 : vector<2x32xf32>, vector<2x16xf32> -> vector<2x48xf32>
    %c0_164 = arith.constant 0 : index
    %c0_165 = arith.constant 0 : index
    %472 = vector.load %arg3[%c0_164, %c0_165] : memref<48x64xbf16, #tpu.memory_space<vmem>>, vector<48x64xbf16>
    %c0_166 = arith.constant 0 : index
    %c0_167 = arith.constant 0 : index
    %473 = vector.load %arg4[%c0_166, %c0_167] : memref<1x64xf32, #tpu.memory_space<vmem>>, vector<1x64xf32>
    %474 = arith.truncf %471 : vector<2x48xf32> to vector<2x48xbf16>
    %cst_168 = arith.constant dense<0.000000e+00> : vector<2x64xf32>
    %475 = tpu.matmul %474, %472, %cst_168 {dimension_numbers = #tpu.dot_dimension_numbers<[1], [0], [0], [1], [0, 0, 1, 1], [], []>} : vector<2x48xbf16>, vector<48x64xbf16>, vector<2x64xf32> -> vector<2x64xf32>
    %476 = vector.broadcast %473 : vector<1x64xf32> to vector<2x64xf32>
    %477 = arith.addf %475, %476 : vector<2x64xf32>
    %478 = math.tanh %477 : vector<2x64xf32>
    %479 = arith.negf %477 : vector<2x64xf32>
    %480 = math.exp %479 : vector<2x64xf32>
    %cst_169 = arith.constant 1.000000e+00 : f32
    %481 = vector.broadcast %cst_169 : f32 to vector<2x64xf32>
    %482 = arith.addf %481, %480 : vector<2x64xf32>
    %483 = arith.divf %481, %482 : vector<2x64xf32>
    %484 = arith.select %5, %478, %483 : vector<2x64xi1>, vector<2x64xf32>
    %485 = vector.extract_strided_slice %484 {offsets = [0, 0], sizes = [2, 16], strides = [1, 1]} : vector<2x64xf32> to vector<2x16xf32>
    %486 = vector.extract_strided_slice %484 {offsets = [0, 16], sizes = [2, 16], strides = [1, 1]} : vector<2x64xf32> to vector<2x16xf32>
    %487 = vector.extract_strided_slice %484 {offsets = [0, 32], sizes = [2, 16], strides = [1, 1]} : vector<2x64xf32> to vector<2x16xf32>
    %488 = vector.extract_strided_slice %484 {offsets = [0, 48], sizes = [2, 16], strides = [1, 1]} : vector<2x64xf32> to vector<2x16xf32>
    %489 = arith.mulf %486, %429 : vector<2x16xf32>
    %490 = arith.mulf %485, %487 : vector<2x16xf32>
    %491 = arith.addf %489, %490 : vector<2x16xf32>
    %492 = math.tanh %491 : vector<2x16xf32>
    %493 = arith.mulf %488, %492 : vector<2x16xf32>
    %494 = arith.index_cast %c7_i32_152 : i32 to index
    %c0_170 = arith.constant 0 : index
    %c0_171 = arith.constant 0 : index
    %495 = vector.load %arg6[%494, %c0_170, %c0_171] : memref<8x2x16xf32, #tpu.memory_space<vmem>>, vector<1x2x16xf32>
    %496 = vector.shape_cast %495 : vector<1x2x16xf32> to vector<2x16xf32>
    %497 = vector.shape_cast %466 : vector<2x16xf32> to vector<1x2x16xf32>
    tpu.vector_store %arg6[%494, %c0_170, %c0_171], %497 {strides = array<i32>} : memref<8x2x16xf32, #tpu.memory_space<vmem>>, vector<1x2x16xf32>,
    %c7_i32_172 = arith.constant 7 : i32
    %498 = arith.subi %c7_i32_172, %c7_i32_152 : i32
    %499 = arith.index_cast %498 : i32 to index
    %c0_173 = arith.constant 0 : index
    %c0_174 = arith.constant 0 : index
    %500 = vector.load %arg7[%499, %c0_173, %c0_174] : memref<8x2x16xf32, #tpu.memory_space<vmem>>, vector<1x2x16xf32>
    %501 = vector.shape_cast %500 : vector<1x2x16xf32> to vector<2x16xf32>
    %502 = vector.shape_cast %493 : vector<2x16xf32> to vector<1x2x16xf32>
    tpu.vector_store %arg7[%499, %c0_173, %c0_174], %502 {strides = array<i32>} : memref<8x2x16xf32, #tpu.memory_space<vmem>>, vector<1x2x16xf32>,
    %c8_i32 = arith.constant 8 : i32
    %c0_175 = arith.constant 0 : index
    %c0_176 = arith.constant 0 : index
    %c0_177 = arith.constant 0 : index
    %503 = vector.load %arg6[%c0_175, %c0_176, %c0_177] : memref<8x2x16xf32, #tpu.memory_space<vmem>>, vector<8x2x16xf32>
    %c0_178 = arith.constant 0 : index
    %c0_179 = arith.constant 0 : index
    %c0_180 = arith.constant 0 : index
    %504 = vector.load %arg7[%c0_178, %c0_179, %c0_180] : memref<8x2x16xf32, #tpu.memory_space<vmem>>, vector<8x2x16xf32>
    %505 = tpu.concatenate %503, %504 in 2 : vector<8x2x16xf32>, vector<8x2x16xf32> -> vector<8x2x32xf32>
    %c0_181 = arith.constant 0 : index
    %c0_182 = arith.constant 0 : index
    %c0_183 = arith.constant 0 : index
    %506 = vector.load %arg5[%c0_181, %c0_182, %c0_183] : memref<8x2x32xf32, #tpu.memory_space<vmem>>, vector<8x2x32xf32>
    tpu.vector_store %arg5[%c0_181, %c0_182, %c0_183], %505 {strides = array<i32>} : memref<8x2x32xf32, #tpu.memory_space<vmem>>, vector<8x2x32xf32>,
    return
  }
}

module attributes {stable_mosaic.version = 11 : i64} {
  func.func @_decoder_kernel(%arg0: memref<10x2x80xf32, #tpu.memory_space<vmem>>, %arg1: memref<2x8x32xf32, #tpu.memory_space<vmem>>, %arg2: memref<2x128xf32, #tpu.memory_space<vmem>>, %arg3: memref<2x8xf32, #tpu.memory_space<vmem>>, %arg4: memref<16x128xbf16, #tpu.memory_space<vmem>>, %arg5: memref<32x128xbf16, #tpu.memory_space<vmem>>, %arg6: memref<128x8xbf16, #tpu.memory_space<vmem>>, %arg7: memref<80x32xbf16, #tpu.memory_space<vmem>>, %arg8: memref<32x32xbf16, #tpu.memory_space<vmem>>, %arg9: memref<96x128xbf16, #tpu.memory_space<vmem>>, %arg10: memref<1x128xf32, #tpu.memory_space<vmem>>, %arg11: memref<96x128xbf16, #tpu.memory_space<vmem>>, %arg12: memref<1x128xf32, #tpu.memory_space<vmem>>, %arg13: memref<64x128xbf16, #tpu.memory_space<vmem>>, %arg14: memref<1x128xf32, #tpu.memory_space<vmem>>, %arg15: memref<10x2x128xf32, #tpu.memory_space<vmem>>) attributes {dimension_semantics = [], scalar_prefetch = 0 : i64, scratch_operands = 0 : i64, tpu.core_type = #tpu.core_type<tc>} {
    %c0 = arith.constant 0 : index
    %c0_0 = arith.constant 0 : index
    %c0_1 = arith.constant 0 : index
    %0 = vector.load %arg1[%c0, %c0_0, %c0_1] : memref<2x8x32xf32, #tpu.memory_space<vmem>>, vector<2x8x32xf32>
    %c0_2 = arith.constant 0 : index
    %c0_3 = arith.constant 0 : index
    %1 = vector.load %arg2[%c0_2, %c0_3] : memref<2x128xf32, #tpu.memory_space<vmem>>, vector<2x128xf32>
    %c0_4 = arith.constant 0 : index
    %c0_5 = arith.constant 0 : index
    %2 = vector.load %arg3[%c0_4, %c0_5] : memref<2x8xf32, #tpu.memory_space<vmem>>, vector<2x8xf32>
    %3 = tpu.iota {dimensions = array<i32: 1>} : vector<2x128xi32>
    %c64_i32 = arith.constant 64 : i32
    %4 = vector.broadcast %c64_i32 : i32 to vector<2x128xi32>
    %5 = arith.cmpi sge, %3, %4 : vector<2x128xi32>
    %c96_i32 = arith.constant 96 : i32
    %6 = vector.broadcast %c96_i32 : i32 to vector<2x128xi32>
    %7 = arith.cmpi slt, %3, %6 : vector<2x128xi32>
    %8 = arith.andi %5, %7 : vector<2x128xi1>
    %9 = tpu.iota {dimensions = array<i32: 1>} : vector<2x128xi32>
    %c64_i32_6 = arith.constant 64 : i32
    %10 = vector.broadcast %c64_i32_6 : i32 to vector<2x128xi32>
    %11 = arith.cmpi sge, %9, %10 : vector<2x128xi32>
    %c96_i32_7 = arith.constant 96 : i32
    %12 = vector.broadcast %c96_i32_7 : i32 to vector<2x128xi32>
    %13 = arith.cmpi slt, %9, %12 : vector<2x128xi32>
    %14 = arith.andi %11, %13 : vector<2x128xi1>
    %cst = arith.constant 0.000000e+00 : f32
    %15 = vector.broadcast %cst : f32 to vector<2x81xf32>
    %cst_8 = arith.constant 0.000000e+00 : f32
    %16 = vector.broadcast %cst_8 : f32 to vector<2x39xf32>
    %cst_9 = arith.constant 0.000000e+00 : f32
    %17 = vector.broadcast %cst_9 : f32 to vector<2x32xf32>
    %cst_10 = arith.constant 0.000000e+00 : f32
    %18 = vector.broadcast %cst_10 : f32 to vector<2x32xf32>
    %cst_11 = arith.constant 0.000000e+00 : f32
    %19 = vector.broadcast %cst_11 : f32 to vector<2x32xf32>
    %cst_12 = arith.constant 0.000000e+00 : f32
    %20 = vector.broadcast %cst_12 : f32 to vector<2x32xf32>
    %cst_13 = arith.constant 0.000000e+00 : f32
    %21 = vector.broadcast %cst_13 : f32 to vector<2x32xf32>
    %cst_14 = arith.constant 0.000000e+00 : f32
    %22 = vector.broadcast %cst_14 : f32 to vector<2x8xf32>
    %cst_15 = arith.constant 0.000000e+00 : f32
    %23 = vector.broadcast %cst_15 : f32 to vector<2x8xf32>
    %c0_i32 = arith.constant 0 : i32
    %24 = arith.index_cast %c0_i32 : i32 to index
    %c0_16 = arith.constant 0 : index
    %c0_17 = arith.constant 0 : index
    %25 = vector.load %arg0[%24, %c0_16, %c0_17] : memref<10x2x80xf32, #tpu.memory_space<vmem>>, vector<1x2x80xf32>
    %26 = vector.shape_cast %25 : vector<1x2x80xf32> to vector<2x80xf32>
    %c0_18 = arith.constant 0 : index
    %c0_19 = arith.constant 0 : index
    %27 = vector.load %arg7[%c0_18, %c0_19] : memref<80x32xbf16, #tpu.memory_space<vmem>>, vector<80x32xbf16>
    %28 = arith.truncf %26 : vector<2x80xf32> to vector<2x80xbf16>
    %cst_20 = arith.constant dense<0.000000e+00> : vector<2x32xf32>
    %29 = tpu.matmul %28, %27, %cst_20 {dimension_numbers = #tpu.dot_dimension_numbers<[1], [0], [0], [1], [0, 0, 1, 1], [], []>} : vector<2x80xbf16>, vector<80x32xbf16>, vector<2x32xf32> -> vector<2x32xf32>
    %cst_21 = arith.constant 0.000000e+00 : f32
    %30 = vector.broadcast %cst_21 : f32 to vector<2x32xf32>
    %31 = arith.maximumf %29, %30 : vector<2x32xf32>
    %c0_22 = arith.constant 0 : index
    %c0_23 = arith.constant 0 : index
    %32 = vector.load %arg8[%c0_22, %c0_23] : memref<32x32xbf16, #tpu.memory_space<vmem>>, vector<32x32xbf16>
    %33 = arith.truncf %31 : vector<2x32xf32> to vector<2x32xbf16>
    %cst_24 = arith.constant dense<0.000000e+00> : vector<2x32xf32>
    %34 = tpu.matmul %33, %32, %cst_24 {dimension_numbers = #tpu.dot_dimension_numbers<[1], [0], [0], [1], [0, 0, 1, 1], [], []>} : vector<2x32xbf16>, vector<32x32xbf16>, vector<2x32xf32> -> vector<2x32xf32>
    %cst_25 = arith.constant 0.000000e+00 : f32
    %35 = vector.broadcast %cst_25 : f32 to vector<2x32xf32>
    %36 = arith.maximumf %34, %35 : vector<2x32xf32>
    %37 = tpu.concatenate %36, %21, %17 in 1 : vector<2x32xf32>, vector<2x32xf32>, vector<2x32xf32> -> vector<2x96xf32>
    %c0_26 = arith.constant 0 : index
    %c0_27 = arith.constant 0 : index
    %38 = vector.load %arg9[%c0_26, %c0_27] : memref<96x128xbf16, #tpu.memory_space<vmem>>, vector<96x128xbf16>
    %c0_28 = arith.constant 0 : index
    %c0_29 = arith.constant 0 : index
    %39 = vector.load %arg10[%c0_28, %c0_29] : memref<1x128xf32, #tpu.memory_space<vmem>>, vector<1x128xf32>
    %40 = arith.truncf %37 : vector<2x96xf32> to vector<2x96xbf16>
    %cst_30 = arith.constant dense<0.000000e+00> : vector<2x128xf32>
    %41 = tpu.matmul %40, %38, %cst_30 {dimension_numbers = #tpu.dot_dimension_numbers<[1], [0], [0], [1], [0, 0, 1, 1], [], []>} : vector<2x96xbf16>, vector<96x128xbf16>, vector<2x128xf32> -> vector<2x128xf32>
    %42 = vector.broadcast %39 : vector<1x128xf32> to vector<2x128xf32>
    %43 = arith.addf %41, %42 : vector<2x128xf32>
    %44 = math.tanh %43 : vector<2x128xf32>
    %45 = arith.negf %43 : vector<2x128xf32>
    %46 = math.exp %45 : vector<2x128xf32>
    %cst_31 = arith.constant 1.000000e+00 : f32
    %47 = vector.broadcast %cst_31 : f32 to vector<2x128xf32>
    %48 = arith.addf %47, %46 : vector<2x128xf32>
    %49 = arith.divf %47, %48 : vector<2x128xf32>
    %50 = arith.select %8, %44, %49 : vector<2x128xi1>, vector<2x128xf32>
    %51 = vector.extract_strided_slice %50 {offsets = [0, 0], sizes = [2, 32], strides = [1, 1]} : vector<2x128xf32> to vector<2x32xf32>
    %52 = vector.extract_strided_slice %50 {offsets = [0, 32], sizes = [2, 32], strides = [1, 1]} : vector<2x128xf32> to vector<2x32xf32>
    %53 = vector.extract_strided_slice %50 {offsets = [0, 64], sizes = [2, 32], strides = [1, 1]} : vector<2x128xf32> to vector<2x32xf32>
    %54 = vector.extract_strided_slice %50 {offsets = [0, 96], sizes = [2, 32], strides = [1, 1]} : vector<2x128xf32> to vector<2x32xf32>
    %55 = arith.mulf %52, %18 : vector<2x32xf32>
    %56 = arith.mulf %51, %53 : vector<2x32xf32>
    %57 = arith.addf %55, %56 : vector<2x32xf32>
    %58 = math.tanh %57 : vector<2x32xf32>
    %59 = arith.mulf %54, %58 : vector<2x32xf32>
    %60 = tpu.concatenate %22, %23 in 1 : vector<2x8xf32>, vector<2x8xf32> -> vector<2x16xf32>
    %c0_32 = arith.constant 0 : index
    %c0_33 = arith.constant 0 : index
    %61 = vector.load %arg5[%c0_32, %c0_33] : memref<32x128xbf16, #tpu.memory_space<vmem>>, vector<32x128xbf16>
    %62 = arith.truncf %59 : vector<2x32xf32> to vector<2x32xbf16>
    %cst_34 = arith.constant dense<0.000000e+00> : vector<2x128xf32>
    %63 = tpu.matmul %62, %61, %cst_34 {dimension_numbers = #tpu.dot_dimension_numbers<[1], [0], [0], [1], [0, 0, 1, 1], [], []>} : vector<2x32xbf16>, vector<32x128xbf16>, vector<2x128xf32> -> vector<2x128xf32>
    %64 = arith.addf %63, %1 : vector<2x128xf32>
    %c0_35 = arith.constant 0 : index
    %c0_36 = arith.constant 0 : index
    %65 = vector.load %arg4[%c0_35, %c0_36] : memref<16x128xbf16, #tpu.memory_space<vmem>>, vector<16x128xbf16>
    %66 = arith.truncf %60 : vector<2x16xf32> to vector<2x16xbf16>
    %cst_37 = arith.constant dense<0.000000e+00> : vector<2x128xf32>
    %67 = tpu.matmul %66, %65, %cst_37 {dimension_numbers = #tpu.dot_dimension_numbers<[1], [0], [0], [1], [0, 0, 1, 1], [], []>} : vector<2x16xbf16>, vector<16x128xbf16>, vector<2x128xf32> -> vector<2x128xf32>
    %68 = arith.addf %64, %67 : vector<2x128xf32>
    %69 = math.tanh %68 : vector<2x128xf32>
    %c0_38 = arith.constant 0 : index
    %c0_39 = arith.constant 0 : index
    %70 = vector.load %arg6[%c0_38, %c0_39] : memref<128x8xbf16, #tpu.memory_space<vmem>>, vector<128x8xbf16>
    %71 = arith.truncf %69 : vector<2x128xf32> to vector<2x128xbf16>
    %cst_40 = arith.constant dense<0.000000e+00> : vector<2x8xf32>
    %72 = tpu.matmul %71, %70, %cst_40 {dimension_numbers = #tpu.dot_dimension_numbers<[1], [0], [0], [1], [0, 0, 1, 1], [], []>} : vector<2x128xbf16>, vector<128x8xbf16>, vector<2x8xf32> -> vector<2x8xf32>
    %73 = arith.addf %72, %2 : vector<2x8xf32>
    %cst_41 = arith.constant dense<0xFF800000> : vector<2xf32>
    %74 = vector.multi_reduction <maximumf>, %73, %cst_41 [1] : vector<2x8xf32> to vector<2xf32>
    %75 = vector.shape_cast %74 : vector<2xf32> to vector<2x1xf32>
    %76 = vector.broadcast %75 : vector<2x1xf32> to vector<2x8xf32>
    %77 = arith.subf %73, %76 : vector<2x8xf32>
    %78 = math.exp %77 : vector<2x8xf32>
    %cst_42 = arith.constant dense<0.000000e+00> : vector<2xf32>
    %79 = vector.multi_reduction <add>, %78, %cst_42 [1] : vector<2x8xf32> to vector<2xf32>
    %80 = vector.shape_cast %79 : vector<2xf32> to vector<2x1xf32>
    %81 = tpu.reciprocal %80 {approx = true} : vector<2x1xf32> -> vector<2x1xf32>
    %82 = vector.broadcast %81 : vector<2x1xf32> to vector<2x8xf32>
    %83 = arith.mulf %78, %82 : vector<2x8xf32>
    %84 = vector.shape_cast %83 : vector<2x8xf32> to vector<2x1x8xf32>
    "tpu.trace_start"() <{level = 10 : i32, message = "bqt,bte->bqe"}> : () -> ()
    %cst_43 = arith.constant dense<0.000000e+00> : vector<2x1x32xf32>
    %85 = tpu.matmul %84, %0, %cst_43 {dimension_numbers = #tpu.dot_dimension_numbers<[2], [1], [1], [2], [0, 0, 0, 1, 1, 2], [0], [0]>} : vector<2x1x8xf32>, vector<2x8x32xf32>, vector<2x1x32xf32> -> vector<2x1x32xf32>
    "tpu.trace_stop"() : () -> ()
    %86 = vector.shape_cast %85 : vector<2x1x32xf32> to vector<2x32xf32>
    %87 = arith.addf %23, %83 : vector<2x8xf32>
    %88 = tpu.concatenate %59, %86, %19 in 1 : vector<2x32xf32>, vector<2x32xf32>, vector<2x32xf32> -> vector<2x96xf32>
    %c0_44 = arith.constant 0 : index
    %c0_45 = arith.constant 0 : index
    %89 = vector.load %arg11[%c0_44, %c0_45] : memref<96x128xbf16, #tpu.memory_space<vmem>>, vector<96x128xbf16>
    %c0_46 = arith.constant 0 : index
    %c0_47 = arith.constant 0 : index
    %90 = vector.load %arg12[%c0_46, %c0_47] : memref<1x128xf32, #tpu.memory_space<vmem>>, vector<1x128xf32>
    %91 = arith.truncf %88 : vector<2x96xf32> to vector<2x96xbf16>
    %cst_48 = arith.constant dense<0.000000e+00> : vector<2x128xf32>
    %92 = tpu.matmul %91, %89, %cst_48 {dimension_numbers = #tpu.dot_dimension_numbers<[1], [0], [0], [1], [0, 0, 1, 1], [], []>} : vector<2x96xbf16>, vector<96x128xbf16>, vector<2x128xf32> -> vector<2x128xf32>
    %93 = vector.broadcast %90 : vector<1x128xf32> to vector<2x128xf32>
    %94 = arith.addf %92, %93 : vector<2x128xf32>
    %95 = math.tanh %94 : vector<2x128xf32>
    %96 = arith.negf %94 : vector<2x128xf32>
    %97 = math.exp %96 : vector<2x128xf32>
    %cst_49 = arith.constant 1.000000e+00 : f32
    %98 = vector.broadcast %cst_49 : f32 to vector<2x128xf32>
    %99 = arith.addf %98, %97 : vector<2x128xf32>
    %100 = arith.divf %98, %99 : vector<2x128xf32>
    %101 = arith.select %14, %95, %100 : vector<2x128xi1>, vector<2x128xf32>
    %102 = vector.extract_strided_slice %101 {offsets = [0, 0], sizes = [2, 32], strides = [1, 1]} : vector<2x128xf32> to vector<2x32xf32>
    %103 = vector.extract_strided_slice %101 {offsets = [0, 32], sizes = [2, 32], strides = [1, 1]} : vector<2x128xf32> to vector<2x32xf32>
    %104 = vector.extract_strided_slice %101 {offsets = [0, 64], sizes = [2, 32], strides = [1, 1]} : vector<2x128xf32> to vector<2x32xf32>
    %105 = vector.extract_strided_slice %101 {offsets = [0, 96], sizes = [2, 32], strides = [1, 1]} : vector<2x128xf32> to vector<2x32xf32>
    %106 = arith.mulf %103, %20 : vector<2x32xf32>
    %107 = arith.mulf %102, %104 : vector<2x32xf32>
    %108 = arith.addf %106, %107 : vector<2x32xf32>
    %109 = math.tanh %108 : vector<2x32xf32>
    %110 = arith.mulf %105, %109 : vector<2x32xf32>
    %111 = tpu.concatenate %110, %86 in 1 : vector<2x32xf32>, vector<2x32xf32> -> vector<2x64xf32>
    %c0_50 = arith.constant 0 : index
    %c0_51 = arith.constant 0 : index
    %112 = vector.load %arg13[%c0_50, %c0_51] : memref<64x128xbf16, #tpu.memory_space<vmem>>, vector<64x128xbf16>
    %113 = arith.truncf %111 : vector<2x64xf32> to vector<2x64xbf16>
    %cst_52 = arith.constant dense<0.000000e+00> : vector<2x128xf32>
    %114 = tpu.matmul %113, %112, %cst_52 {dimension_numbers = #tpu.dot_dimension_numbers<[1], [0], [0], [1], [0, 0, 1, 1], [], []>} : vector<2x64xbf16>, vector<64x128xbf16>, vector<2x128xf32> -> vector<2x128xf32>
    %c0_53 = arith.constant 0 : index
    %c0_54 = arith.constant 0 : index
    %115 = vector.load %arg14[%c0_53, %c0_54] : memref<1x128xf32, #tpu.memory_space<vmem>>, vector<1x128xf32>
    %116 = vector.broadcast %115 : vector<1x128xf32> to vector<2x128xf32>
    %117 = arith.addf %114, %116 : vector<2x128xf32>
    %118 = tpu.concatenate %15, %83, %16 in 1 : vector<2x81xf32>, vector<2x8xf32>, vector<2x39xf32> -> vector<2x128xf32>
    %119 = arith.addf %117, %118 : vector<2x128xf32>
    %120 = arith.index_cast %c0_i32 : i32 to index
    %c0_55 = arith.constant 0 : index
    %c0_56 = arith.constant 0 : index
    %121 = vector.load %arg15[%120, %c0_55, %c0_56] : memref<10x2x128xf32, #tpu.memory_space<vmem>>, vector<1x2x128xf32>
    %122 = vector.shape_cast %121 : vector<1x2x128xf32> to vector<2x128xf32>
    %123 = vector.shape_cast %119 : vector<2x128xf32> to vector<1x2x128xf32>
    tpu.vector_store %arg15[%120, %c0_55, %c0_56], %123 {strides = array<i32>} : memref<10x2x128xf32, #tpu.memory_space<vmem>>, vector<1x2x128xf32>,
    %c1_i32 = arith.constant 1 : i32
    %124 = arith.index_cast %c1_i32 : i32 to index
    %c0_57 = arith.constant 0 : index
    %c0_58 = arith.constant 0 : index
    %125 = vector.load %arg0[%124, %c0_57, %c0_58] : memref<10x2x80xf32, #tpu.memory_space<vmem>>, vector<1x2x80xf32>
    %126 = vector.shape_cast %125 : vector<1x2x80xf32> to vector<2x80xf32>
    %c0_59 = arith.constant 0 : index
    %c0_60 = arith.constant 0 : index
    %127 = vector.load %arg7[%c0_59, %c0_60] : memref<80x32xbf16, #tpu.memory_space<vmem>>, vector<80x32xbf16>
    %128 = arith.truncf %126 : vector<2x80xf32> to vector<2x80xbf16>
    %cst_61 = arith.constant dense<0.000000e+00> : vector<2x32xf32>
    %129 = tpu.matmul %128, %127, %cst_61 {dimension_numbers = #tpu.dot_dimension_numbers<[1], [0], [0], [1], [0, 0, 1, 1], [], []>} : vector<2x80xbf16>, vector<80x32xbf16>, vector<2x32xf32> -> vector<2x32xf32>
    %cst_62 = arith.constant 0.000000e+00 : f32
    %130 = vector.broadcast %cst_62 : f32 to vector<2x32xf32>
    %131 = arith.maximumf %129, %130 : vector<2x32xf32>
    %c0_63 = arith.constant 0 : index
    %c0_64 = arith.constant 0 : index
    %132 = vector.load %arg8[%c0_63, %c0_64] : memref<32x32xbf16, #tpu.memory_space<vmem>>, vector<32x32xbf16>
    %133 = arith.truncf %131 : vector<2x32xf32> to vector<2x32xbf16>
    %cst_65 = arith.constant dense<0.000000e+00> : vector<2x32xf32>
    %134 = tpu.matmul %133, %132, %cst_65 {dimension_numbers = #tpu.dot_dimension_numbers<[1], [0], [0], [1], [0, 0, 1, 1], [], []>} : vector<2x32xbf16>, vector<32x32xbf16>, vector<2x32xf32> -> vector<2x32xf32>
    %cst_66 = arith.constant 0.000000e+00 : f32
    %135 = vector.broadcast %cst_66 : f32 to vector<2x32xf32>
    %136 = arith.maximumf %134, %135 : vector<2x32xf32>
    %137 = tpu.concatenate %136, %86, %59 in 1 : vector<2x32xf32>, vector<2x32xf32>, vector<2x32xf32> -> vector<2x96xf32>
    %c0_67 = arith.constant 0 : index
    %c0_68 = arith.constant 0 : index
    %138 = vector.load %arg9[%c0_67, %c0_68] : memref<96x128xbf16, #tpu.memory_space<vmem>>, vector<96x128xbf16>
    %c0_69 = arith.constant 0 : index
    %c0_70 = arith.constant 0 : index
    %139 = vector.load %arg10[%c0_69, %c0_70] : memref<1x128xf32, #tpu.memory_space<vmem>>, vector<1x128xf32>
    %140 = arith.truncf %137 : vector<2x96xf32> to vector<2x96xbf16>
    %cst_71 = arith.constant dense<0.000000e+00> : vector<2x128xf32>
    %141 = tpu.matmul %140, %138, %cst_71 {dimension_numbers = #tpu.dot_dimension_numbers<[1], [0], [0], [1], [0, 0, 1, 1], [], []>} : vector<2x96xbf16>, vector<96x128xbf16>, vector<2x128xf32> -> vector<2x128xf32>
    %142 = vector.broadcast %139 : vector<1x128xf32> to vector<2x128xf32>
    %143 = arith.addf %141, %142 : vector<2x128xf32>
    %144 = math.tanh %143 : vector<2x128xf32>
    %145 = arith.negf %143 : vector<2x128xf32>
    %146 = math.exp %145 : vector<2x128xf32>
    %cst_72 = arith.constant 1.000000e+00 : f32
    %147 = vector.broadcast %cst_72 : f32 to vector<2x128xf32>
    %148 = arith.addf %147, %146 : vector<2x128xf32>
    %149 = arith.divf %147, %148 : vector<2x128xf32>
    %150 = arith.select %8, %144, %149 : vector<2x128xi1>, vector<2x128xf32>
    %151 = vector.extract_strided_slice %150 {offsets = [0, 0], sizes = [2, 32], strides = [1, 1]} : vector<2x128xf32> to vector<2x32xf32>
    %152 = vector.extract_strided_slice %150 {offsets = [0, 32], sizes = [2, 32], strides = [1, 1]} : vector<2x128xf32> to vector<2x32xf32>
    %153 = vector.extract_strided_slice %150 {offsets = [0, 64], sizes = [2, 32], strides = [1, 1]} : vector<2x128xf32> to vector<2x32xf32>
    %154 = vector.extract_strided_slice %150 {offsets = [0, 96], sizes = [2, 32], strides = [1, 1]} : vector<2x128xf32> to vector<2x32xf32>
    %155 = arith.mulf %152, %57 : vector<2x32xf32>
    %156 = arith.mulf %151, %153 : vector<2x32xf32>
    %157 = arith.addf %155, %156 : vector<2x32xf32>
    %158 = math.tanh %157 : vector<2x32xf32>
    %159 = arith.mulf %154, %158 : vector<2x32xf32>
    %160 = tpu.concatenate %83, %87 in 1 : vector<2x8xf32>, vector<2x8xf32> -> vector<2x16xf32>
    %c0_73 = arith.constant 0 : index
    %c0_74 = arith.constant 0 : index
    %161 = vector.load %arg5[%c0_73, %c0_74] : memref<32x128xbf16, #tpu.memory_space<vmem>>, vector<32x128xbf16>
    %162 = arith.truncf %159 : vector<2x32xf32> to vector<2x32xbf16>
    %cst_75 = arith.constant dense<0.000000e+00> : vector<2x128xf32>
    %163 = tpu.matmul %162, %161, %cst_75 {dimension_numbers = #tpu.dot_dimension_numbers<[1], [0], [0], [1], [0, 0, 1, 1], [], []>} : vector<2x32xbf16>, vector<32x128xbf16>, vector<2x128xf32> -> vector<2x128xf32>
    %164 = arith.addf %163, %1 : vector<2x128xf32>
    %c0_76 = arith.constant 0 : index
    %c0_77 = arith.constant 0 : index
    %165 = vector.load %arg4[%c0_76, %c0_77] : memref<16x128xbf16, #tpu.memory_space<vmem>>, vector<16x128xbf16>
    %166 = arith.truncf %160 : vector<2x16xf32> to vector<2x16xbf16>
    %cst_78 = arith.constant dense<0.000000e+00> : vector<2x128xf32>
    %167 = tpu.matmul %166, %165, %cst_78 {dimension_numbers = #tpu.dot_dimension_numbers<[1], [0], [0], [1], [0, 0, 1, 1], [], []>} : vector<2x16xbf16>, vector<16x128xbf16>, vector<2x128xf32> -> vector<2x128xf32>
    %168 = arith.addf %164, %167 : vector<2x128xf32>
    %169 = math.tanh %168 : vector<2x128xf32>
    %c0_79 = arith.constant 0 : index
    %c0_80 = arith.constant 0 : index
    %170 = vector.load %arg6[%c0_79, %c0_80] : memref<128x8xbf16, #tpu.memory_space<vmem>>, vector<128x8xbf16>
    %171 = arith.truncf %169 : vector<2x128xf32> to vector<2x128xbf16>
    %cst_81 = arith.constant dense<0.000000e+00> : vector<2x8xf32>
    %172 = tpu.matmul %171, %170, %cst_81 {dimension_numbers = #tpu.dot_dimension_numbers<[1], [0], [0], [1], [0, 0, 1, 1], [], []>} : vector<2x128xbf16>, vector<128x8xbf16>, vector<2x8xf32> -> vector<2x8xf32>
    %173 = arith.addf %172, %2 : vector<2x8xf32>
    %cst_82 = arith.constant dense<0xFF800000> : vector<2xf32>
    %174 = vector.multi_reduction <maximumf>, %173, %cst_82 [1] : vector<2x8xf32> to vector<2xf32>
    %175 = vector.shape_cast %174 : vector<2xf32> to vector<2x1xf32>
    %176 = vector.broadcast %175 : vector<2x1xf32> to vector<2x8xf32>
    %177 = arith.subf %173, %176 : vector<2x8xf32>
    %178 = math.exp %177 : vector<2x8xf32>
    %cst_83 = arith.constant dense<0.000000e+00> : vector<2xf32>
    %179 = vector.multi_reduction <add>, %178, %cst_83 [1] : vector<2x8xf32> to vector<2xf32>
    %180 = vector.shape_cast %179 : vector<2xf32> to vector<2x1xf32>
    %181 = tpu.reciprocal %180 {approx = true} : vector<2x1xf32> -> vector<2x1xf32>
    %182 = vector.broadcast %181 : vector<2x1xf32> to vector<2x8xf32>
    %183 = arith.mulf %178, %182 : vector<2x8xf32>
    %184 = vector.shape_cast %183 : vector<2x8xf32> to vector<2x1x8xf32>
    "tpu.trace_start"() <{level = 10 : i32, message = "bqt,bte->bqe"}> : () -> ()
    %cst_84 = arith.constant dense<0.000000e+00> : vector<2x1x32xf32>
    %185 = tpu.matmul %184, %0, %cst_84 {dimension_numbers = #tpu.dot_dimension_numbers<[2], [1], [1], [2], [0, 0, 0, 1, 1, 2], [0], [0]>} : vector<2x1x8xf32>, vector<2x8x32xf32>, vector<2x1x32xf32> -> vector<2x1x32xf32>
    "tpu.trace_stop"() : () -> ()
    %186 = vector.shape_cast %185 : vector<2x1x32xf32> to vector<2x32xf32>
    %187 = arith.addf %87, %183 : vector<2x8xf32>
    %188 = tpu.concatenate %159, %186, %110 in 1 : vector<2x32xf32>, vector<2x32xf32>, vector<2x32xf32> -> vector<2x96xf32>
    %c0_85 = arith.constant 0 : index
    %c0_86 = arith.constant 0 : index
    %189 = vector.load %arg11[%c0_85, %c0_86] : memref<96x128xbf16, #tpu.memory_space<vmem>>, vector<96x128xbf16>
    %c0_87 = arith.constant 0 : index
    %c0_88 = arith.constant 0 : index
    %190 = vector.load %arg12[%c0_87, %c0_88] : memref<1x128xf32, #tpu.memory_space<vmem>>, vector<1x128xf32>
    %191 = arith.truncf %188 : vector<2x96xf32> to vector<2x96xbf16>
    %cst_89 = arith.constant dense<0.000000e+00> : vector<2x128xf32>
    %192 = tpu.matmul %191, %189, %cst_89 {dimension_numbers = #tpu.dot_dimension_numbers<[1], [0], [0], [1], [0, 0, 1, 1], [], []>} : vector<2x96xbf16>, vector<96x128xbf16>, vector<2x128xf32> -> vector<2x128xf32>
    %193 = vector.broadcast %190 : vector<1x128xf32> to vector<2x128xf32>
    %194 = arith.addf %192, %193 : vector<2x128xf32>
    %195 = math.tanh %194 : vector<2x128xf32>
    %196 = arith.negf %194 : vector<2x128xf32>
    %197 = math.exp %196 : vector<2x128xf32>
    %cst_90 = arith.constant 1.000000e+00 : f32
    %198 = vector.broadcast %cst_90 : f32 to vector<2x128xf32>
    %199 = arith.addf %198, %197 : vector<2x128xf32>
    %200 = arith.divf %198, %199 : vector<2x128xf32>
    %201 = arith.select %14, %195, %200 : vector<2x128xi1>, vector<2x128xf32>
    %202 = vector.extract_strided_slice %201 {offsets = [0, 0], sizes = [2, 32], strides = [1, 1]} : vector<2x128xf32> to vector<2x32xf32>
    %203 = vector.extract_strided_slice %201 {offsets = [0, 32], sizes = [2, 32], strides = [1, 1]} : vector<2x128xf32> to vector<2x32xf32>
    %204 = vector.extract_strided_slice %201 {offsets = [0, 64], sizes = [2, 32], strides = [1, 1]} : vector<2x128xf32> to vector<2x32xf32>
    %205 = vector.extract_strided_slice %201 {offsets = [0, 96], sizes = [2, 32], strides = [1, 1]} : vector<2x128xf32> to vector<2x32xf32>
    %206 = arith.mulf %203, %108 : vector<2x32xf32>
    %207 = arith.mulf %202, %204 : vector<2x32xf32>
    %208 = arith.addf %206, %207 : vector<2x32xf32>
    %209 = math.tanh %208 : vector<2x32xf32>
    %210 = arith.mulf %205, %209 : vector<2x32xf32>
    %211 = tpu.concatenate %210, %186 in 1 : vector<2x32xf32>, vector<2x32xf32> -> vector<2x64xf32>
    %c0_91 = arith.constant 0 : index
    %c0_92 = arith.constant 0 : index
    %212 = vector.load %arg13[%c0_91, %c0_92] : memref<64x128xbf16, #tpu.memory_space<vmem>>, vector<64x128xbf16>
    %213 = arith.truncf %211 : vector<2x64xf32> to vector<2x64xbf16>
    %cst_93 = arith.constant dense<0.000000e+00> : vector<2x128xf32>
    %214 = tpu.matmul %213, %212, %cst_93 {dimension_numbers = #tpu.dot_dimension_numbers<[1], [0], [0], [1], [0, 0, 1, 1], [], []>} : vector<2x64xbf16>, vector<64x128xbf16>, vector<2x128xf32> -> vector<2x128xf32>
    %c0_94 = arith.constant 0 : index
    %c0_95 = arith.constant 0 : index
    %215 = vector.load %arg14[%c0_94, %c0_95] : memref<1x128xf32, #tpu.memory_space<vmem>>, vector<1x128xf32>
    %216 = vector.broadcast %215 : vector<1x128xf32> to vector<2x128xf32>
    %217 = arith.addf %214, %216 : vector<2x128xf32>
    %218 = tpu.concatenate %15, %183, %16 in 1 : vector<2x81xf32>, vector<2x8xf32>, vector<2x39xf32> -> vector<2x128xf32>
    %219 = arith.addf %217, %218 : vector<2x128xf32>
    %220 = arith.index_cast %c1_i32 : i32 to index
    %c0_96 = arith.constant 0 : index
    %c0_97 = arith.constant 0 : index
    %221 = vector.load %arg15[%220, %c0_96, %c0_97] : memref<10x2x128xf32, #tpu.memory_space<vmem>>, vector<1x2x128xf32>
    %222 = vector.shape_cast %221 : vector<1x2x128xf32> to vector<2x128xf32>
    %223 = vector.shape_cast %219 : vector<2x128xf32> to vector<1x2x128xf32>
    tpu.vector_store %arg15[%220, %c0_96, %c0_97], %223 {strides = array<i32>} : memref<10x2x128xf32, #tpu.memory_space<vmem>>, vector<1x2x128xf32>,
    %c2_i32 = arith.constant 2 : i32
    %224 = arith.index_cast %c2_i32 : i32 to index
    %c0_98 = arith.constant 0 : index
    %c0_99 = arith.constant 0 : index
    %225 = vector.load %arg0[%224, %c0_98, %c0_99] : memref<10x2x80xf32, #tpu.memory_space<vmem>>, vector<1x2x80xf32>
    %226 = vector.shape_cast %225 : vector<1x2x80xf32> to vector<2x80xf32>
    %c0_100 = arith.constant 0 : index
    %c0_101 = arith.constant 0 : index
    %227 = vector.load %arg7[%c0_100, %c0_101] : memref<80x32xbf16, #tpu.memory_space<vmem>>, vector<80x32xbf16>
    %228 = arith.truncf %226 : vector<2x80xf32> to vector<2x80xbf16>
    %cst_102 = arith.constant dense<0.000000e+00> : vector<2x32xf32>
    %229 = tpu.matmul %228, %227, %cst_102 {dimension_numbers = #tpu.dot_dimension_numbers<[1], [0], [0], [1], [0, 0, 1, 1], [], []>} : vector<2x80xbf16>, vector<80x32xbf16>, vector<2x32xf32> -> vector<2x32xf32>
    %cst_103 = arith.constant 0.000000e+00 : f32
    %230 = vector.broadcast %cst_103 : f32 to vector<2x32xf32>
    %231 = arith.maximumf %229, %230 : vector<2x32xf32>
    %c0_104 = arith.constant 0 : index
    %c0_105 = arith.constant 0 : index
    %232 = vector.load %arg8[%c0_104, %c0_105] : memref<32x32xbf16, #tpu.memory_space<vmem>>, vector<32x32xbf16>
    %233 = arith.truncf %231 : vector<2x32xf32> to vector<2x32xbf16>
    %cst_106 = arith.constant dense<0.000000e+00> : vector<2x32xf32>
    %234 = tpu.matmul %233, %232, %cst_106 {dimension_numbers = #tpu.dot_dimension_numbers<[1], [0], [0], [1], [0, 0, 1, 1], [], []>} : vector<2x32xbf16>, vector<32x32xbf16>, vector<2x32xf32> -> vector<2x32xf32>
    %cst_107 = arith.constant 0.000000e+00 : f32
    %235 = vector.broadcast %cst_107 : f32 to vector<2x32xf32>
    %236 = arith.maximumf %234, %235 : vector<2x32xf32>
    %237 = tpu.concatenate %236, %186, %159 in 1 : vector<2x32xf32>, vector<2x32xf32>, vector<2x32xf32> -> vector<2x96xf32>
    %c0_108 = arith.constant 0 : index
    %c0_109 = arith.constant 0 : index
    %238 = vector.load %arg9[%c0_108, %c0_109] : memref<96x128xbf16, #tpu.memory_space<vmem>>, vector<96x128xbf16>
    %c0_110 = arith.constant 0 : index
    %c0_111 = arith.constant 0 : index
    %239 = vector.load %arg10[%c0_110, %c0_111] : memref<1x128xf32, #tpu.memory_space<vmem>>, vector<1x128xf32>
    %240 = arith.truncf %237 : vector<2x96xf32> to vector<2x96xbf16>
    %cst_112 = arith.constant dense<0.000000e+00> : vector<2x128xf32>
    %241 = tpu.matmul %240, %238, %cst_112 {dimension_numbers = #tpu.dot_dimension_numbers<[1], [0], [0], [1], [0, 0, 1, 1], [], []>} : vector<2x96xbf16>, vector<96x128xbf16>, vector<2x128xf32> -> vector<2x128xf32>
    %242 = vector.broadcast %239 : vector<1x128xf32> to vector<2x128xf32>
    %243 = arith.addf %241, %242 : vector<2x128xf32>
    %244 = math.tanh %243 : vector<2x128xf32>
    %245 = arith.negf %243 : vector<2x128xf32>
    %246 = math.exp %245 : vector<2x128xf32>
    %cst_113 = arith.constant 1.000000e+00 : f32
    %247 = vector.broadcast %cst_113 : f32 to vector<2x128xf32>
    %248 = arith.addf %247, %246 : vector<2x128xf32>
    %249 = arith.divf %247, %248 : vector<2x128xf32>
    %250 = arith.select %8, %244, %249 : vector<2x128xi1>, vector<2x128xf32>
    %251 = vector.extract_strided_slice %250 {offsets = [0, 0], sizes = [2, 32], strides = [1, 1]} : vector<2x128xf32> to vector<2x32xf32>
    %252 = vector.extract_strided_slice %250 {offsets = [0, 32], sizes = [2, 32], strides = [1, 1]} : vector<2x128xf32> to vector<2x32xf32>
    %253 = vector.extract_strided_slice %250 {offsets = [0, 64], sizes = [2, 32], strides = [1, 1]} : vector<2x128xf32> to vector<2x32xf32>
    %254 = vector.extract_strided_slice %250 {offsets = [0, 96], sizes = [2, 32], strides = [1, 1]} : vector<2x128xf32> to vector<2x32xf32>
    %255 = arith.mulf %252, %157 : vector<2x32xf32>
    %256 = arith.mulf %251, %253 : vector<2x32xf32>
    %257 = arith.addf %255, %256 : vector<2x32xf32>
    %258 = math.tanh %257 : vector<2x32xf32>
    %259 = arith.mulf %254, %258 : vector<2x32xf32>
    %260 = tpu.concatenate %183, %187 in 1 : vector<2x8xf32>, vector<2x8xf32> -> vector<2x16xf32>
    %c0_114 = arith.constant 0 : index
    %c0_115 = arith.constant 0 : index
    %261 = vector.load %arg5[%c0_114, %c0_115] : memref<32x128xbf16, #tpu.memory_space<vmem>>, vector<32x128xbf16>
    %262 = arith.truncf %259 : vector<2x32xf32> to vector<2x32xbf16>
    %cst_116 = arith.constant dense<0.000000e+00> : vector<2x128xf32>
    %263 = tpu.matmul %262, %261, %cst_116 {dimension_numbers = #tpu.dot_dimension_numbers<[1], [0], [0], [1], [0, 0, 1, 1], [], []>} : vector<2x32xbf16>, vector<32x128xbf16>, vector<2x128xf32> -> vector<2x128xf32>
    %264 = arith.addf %263, %1 : vector<2x128xf32>
    %c0_117 = arith.constant 0 : index
    %c0_118 = arith.constant 0 : index
    %265 = vector.load %arg4[%c0_117, %c0_118] : memref<16x128xbf16, #tpu.memory_space<vmem>>, vector<16x128xbf16>
    %266 = arith.truncf %260 : vector<2x16xf32> to vector<2x16xbf16>
    %cst_119 = arith.constant dense<0.000000e+00> : vector<2x128xf32>
    %267 = tpu.matmul %266, %265, %cst_119 {dimension_numbers = #tpu.dot_dimension_numbers<[1], [0], [0], [1], [0, 0, 1, 1], [], []>} : vector<2x16xbf16>, vector<16x128xbf16>, vector<2x128xf32> -> vector<2x128xf32>
    %268 = arith.addf %264, %267 : vector<2x128xf32>
    %269 = math.tanh %268 : vector<2x128xf32>
    %c0_120 = arith.constant 0 : index
    %c0_121 = arith.constant 0 : index
    %270 = vector.load %arg6[%c0_120, %c0_121] : memref<128x8xbf16, #tpu.memory_space<vmem>>, vector<128x8xbf16>
    %271 = arith.truncf %269 : vector<2x128xf32> to vector<2x128xbf16>
    %cst_122 = arith.constant dense<0.000000e+00> : vector<2x8xf32>
    %272 = tpu.matmul %271, %270, %cst_122 {dimension_numbers = #tpu.dot_dimension_numbers<[1], [0], [0], [1], [0, 0, 1, 1], [], []>} : vector<2x128xbf16>, vector<128x8xbf16>, vector<2x8xf32> -> vector<2x8xf32>
    %273 = arith.addf %272, %2 : vector<2x8xf32>
    %cst_123 = arith.constant dense<0xFF800000> : vector<2xf32>
    %274 = vector.multi_reduction <maximumf>, %273, %cst_123 [1] : vector<2x8xf32> to vector<2xf32>
    %275 = vector.shape_cast %274 : vector<2xf32> to vector<2x1xf32>
    %276 = vector.broadcast %275 : vector<2x1xf32> to vector<2x8xf32>
    %277 = arith.subf %273, %276 : vector<2x8xf32>
    %278 = math.exp %277 : vector<2x8xf32>
    %cst_124 = arith.constant dense<0.000000e+00> : vector<2xf32>
    %279 = vector.multi_reduction <add>, %278, %cst_124 [1] : vector<2x8xf32> to vector<2xf32>
    %280 = vector.shape_cast %279 : vector<2xf32> to vector<2x1xf32>
    %281 = tpu.reciprocal %280 {approx = true} : vector<2x1xf32> -> vector<2x1xf32>
    %282 = vector.broadcast %281 : vector<2x1xf32> to vector<2x8xf32>
    %283 = arith.mulf %278, %282 : vector<2x8xf32>
    %284 = vector.shape_cast %283 : vector<2x8xf32> to vector<2x1x8xf32>
    "tpu.trace_start"() <{level = 10 : i32, message = "bqt,bte->bqe"}> : () -> ()
    %cst_125 = arith.constant dense<0.000000e+00> : vector<2x1x32xf32>
    %285 = tpu.matmul %284, %0, %cst_125 {dimension_numbers = #tpu.dot_dimension_numbers<[2], [1], [1], [2], [0, 0, 0, 1, 1, 2], [0], [0]>} : vector<2x1x8xf32>, vector<2x8x32xf32>, vector<2x1x32xf32> -> vector<2x1x32xf32>
    "tpu.trace_stop"() : () -> ()
    %286 = vector.shape_cast %285 : vector<2x1x32xf32> to vector<2x32xf32>
    %287 = arith.addf %187, %283 : vector<2x8xf32>
    %288 = tpu.concatenate %259, %286, %210 in 1 : vector<2x32xf32>, vector<2x32xf32>, vector<2x32xf32> -> vector<2x96xf32>
    %c0_126 = arith.constant 0 : index
    %c0_127 = arith.constant 0 : index
    %289 = vector.load %arg11[%c0_126, %c0_127] : memref<96x128xbf16, #tpu.memory_space<vmem>>, vector<96x128xbf16>
    %c0_128 = arith.constant 0 : index
    %c0_129 = arith.constant 0 : index
    %290 = vector.load %arg12[%c0_128, %c0_129] : memref<1x128xf32, #tpu.memory_space<vmem>>, vector<1x128xf32>
    %291 = arith.truncf %288 : vector<2x96xf32> to vector<2x96xbf16>
    %cst_130 = arith.constant dense<0.000000e+00> : vector<2x128xf32>
    %292 = tpu.matmul %291, %289, %cst_130 {dimension_numbers = #tpu.dot_dimension_numbers<[1], [0], [0], [1], [0, 0, 1, 1], [], []>} : vector<2x96xbf16>, vector<96x128xbf16>, vector<2x128xf32> -> vector<2x128xf32>
    %293 = vector.broadcast %290 : vector<1x128xf32> to vector<2x128xf32>
    %294 = arith.addf %292, %293 : vector<2x128xf32>
    %295 = math.tanh %294 : vector<2x128xf32>
    %296 = arith.negf %294 : vector<2x128xf32>
    %297 = math.exp %296 : vector<2x128xf32>
    %cst_131 = arith.constant 1.000000e+00 : f32
    %298 = vector.broadcast %cst_131 : f32 to vector<2x128xf32>
    %299 = arith.addf %298, %297 : vector<2x128xf32>
    %300 = arith.divf %298, %299 : vector<2x128xf32>
    %301 = arith.select %14, %295, %300 : vector<2x128xi1>, vector<2x128xf32>
    %302 = vector.extract_strided_slice %301 {offsets = [0, 0], sizes = [2, 32], strides = [1, 1]} : vector<2x128xf32> to vector<2x32xf32>
    %303 = vector.extract_strided_slice %301 {offsets = [0, 32], sizes = [2, 32], strides = [1, 1]} : vector<2x128xf32> to vector<2x32xf32>
    %304 = vector.extract_strided_slice %301 {offsets = [0, 64], sizes = [2, 32], strides = [1, 1]} : vector<2x128xf32> to vector<2x32xf32>
    %305 = vector.extract_strided_slice %301 {offsets = [0, 96], sizes = [2, 32], strides = [1, 1]} : vector<2x128xf32> to vector<2x32xf32>
    %306 = arith.mulf %303, %208 : vector<2x32xf32>
    %307 = arith.mulf %302, %304 : vector<2x32xf32>
    %308 = arith.addf %306, %307 : vector<2x32xf32>
    %309 = math.tanh %308 : vector<2x32xf32>
    %310 = arith.mulf %305, %309 : vector<2x32xf32>
    %311 = tpu.concatenate %310, %286 in 1 : vector<2x32xf32>, vector<2x32xf32> -> vector<2x64xf32>
    %c0_132 = arith.constant 0 : index
    %c0_133 = arith.constant 0 : index
    %312 = vector.load %arg13[%c0_132, %c0_133] : memref<64x128xbf16, #tpu.memory_space<vmem>>, vector<64x128xbf16>
    %313 = arith.truncf %311 : vector<2x64xf32> to vector<2x64xbf16>
    %cst_134 = arith.constant dense<0.000000e+00> : vector<2x128xf32>
    %314 = tpu.matmul %313, %312, %cst_134 {dimension_numbers = #tpu.dot_dimension_numbers<[1], [0], [0], [1], [0, 0, 1, 1], [], []>} : vector<2x64xbf16>, vector<64x128xbf16>, vector<2x128xf32> -> vector<2x128xf32>
    %c0_135 = arith.constant 0 : index
    %c0_136 = arith.constant 0 : index
    %315 = vector.load %arg14[%c0_135, %c0_136] : memref<1x128xf32, #tpu.memory_space<vmem>>, vector<1x128xf32>
    %316 = vector.broadcast %315 : vector<1x128xf32> to vector<2x128xf32>
    %317 = arith.addf %314, %316 : vector<2x128xf32>
    %318 = tpu.concatenate %15, %283, %16 in 1 : vector<2x81xf32>, vector<2x8xf32>, vector<2x39xf32> -> vector<2x128xf32>
    %319 = arith.addf %317, %318 : vector<2x128xf32>
    %320 = arith.index_cast %c2_i32 : i32 to index
    %c0_137 = arith.constant 0 : index
    %c0_138 = arith.constant 0 : index
    %321 = vector.load %arg15[%320, %c0_137, %c0_138] : memref<10x2x128xf32, #tpu.memory_space<vmem>>, vector<1x2x128xf32>
    %322 = vector.shape_cast %321 : vector<1x2x128xf32> to vector<2x128xf32>
    %323 = vector.shape_cast %319 : vector<2x128xf32> to vector<1x2x128xf32>
    tpu.vector_store %arg15[%320, %c0_137, %c0_138], %323 {strides = array<i32>} : memref<10x2x128xf32, #tpu.memory_space<vmem>>, vector<1x2x128xf32>,
    %c3_i32 = arith.constant 3 : i32
    %324 = arith.index_cast %c3_i32 : i32 to index
    %c0_139 = arith.constant 0 : index
    %c0_140 = arith.constant 0 : index
    %325 = vector.load %arg0[%324, %c0_139, %c0_140] : memref<10x2x80xf32, #tpu.memory_space<vmem>>, vector<1x2x80xf32>
    %326 = vector.shape_cast %325 : vector<1x2x80xf32> to vector<2x80xf32>
    %c0_141 = arith.constant 0 : index
    %c0_142 = arith.constant 0 : index
    %327 = vector.load %arg7[%c0_141, %c0_142] : memref<80x32xbf16, #tpu.memory_space<vmem>>, vector<80x32xbf16>
    %328 = arith.truncf %326 : vector<2x80xf32> to vector<2x80xbf16>
    %cst_143 = arith.constant dense<0.000000e+00> : vector<2x32xf32>
    %329 = tpu.matmul %328, %327, %cst_143 {dimension_numbers = #tpu.dot_dimension_numbers<[1], [0], [0], [1], [0, 0, 1, 1], [], []>} : vector<2x80xbf16>, vector<80x32xbf16>, vector<2x32xf32> -> vector<2x32xf32>
    %cst_144 = arith.constant 0.000000e+00 : f32
    %330 = vector.broadcast %cst_144 : f32 to vector<2x32xf32>
    %331 = arith.maximumf %329, %330 : vector<2x32xf32>
    %c0_145 = arith.constant 0 : index
    %c0_146 = arith.constant 0 : index
    %332 = vector.load %arg8[%c0_145, %c0_146] : memref<32x32xbf16, #tpu.memory_space<vmem>>, vector<32x32xbf16>
    %333 = arith.truncf %331 : vector<2x32xf32> to vector<2x32xbf16>
    %cst_147 = arith.constant dense<0.000000e+00> : vector<2x32xf32>
    %334 = tpu.matmul %333, %332, %cst_147 {dimension_numbers = #tpu.dot_dimension_numbers<[1], [0], [0], [1], [0, 0, 1, 1], [], []>} : vector<2x32xbf16>, vector<32x32xbf16>, vector<2x32xf32> -> vector<2x32xf32>
    %cst_148 = arith.constant 0.000000e+00 : f32
    %335 = vector.broadcast %cst_148 : f32 to vector<2x32xf32>
    %336 = arith.maximumf %334, %335 : vector<2x32xf32>
    %337 = tpu.concatenate %336, %286, %259 in 1 : vector<2x32xf32>, vector<2x32xf32>, vector<2x32xf32> -> vector<2x96xf32>
    %c0_149 = arith.constant 0 : index
    %c0_150 = arith.constant 0 : index
    %338 = vector.load %arg9[%c0_149, %c0_150] : memref<96x128xbf16, #tpu.memory_space<vmem>>, vector<96x128xbf16>
    %c0_151 = arith.constant 0 : index
    %c0_152 = arith.constant 0 : index
    %339 = vector.load %arg10[%c0_151, %c0_152] : memref<1x128xf32, #tpu.memory_space<vmem>>, vector<1x128xf32>
    %340 = arith.truncf %337 : vector<2x96xf32> to vector<2x96xbf16>
    %cst_153 = arith.constant dense<0.000000e+00> : vector<2x128xf32>
    %341 = tpu.matmul %340, %338, %cst_153 {dimension_numbers = #tpu.dot_dimension_numbers<[1], [0], [0], [1], [0, 0, 1, 1], [], []>} : vector<2x96xbf16>, vector<96x128xbf16>, vector<2x128xf32> -> vector<2x128xf32>
    %342 = vector.broadcast %339 : vector<1x128xf32> to vector<2x128xf32>
    %343 = arith.addf %341, %342 : vector<2x128xf32>
    %344 = math.tanh %343 : vector<2x128xf32>
    %345 = arith.negf %343 : vector<2x128xf32>
    %346 = math.exp %345 : vector<2x128xf32>
    %cst_154 = arith.constant 1.000000e+00 : f32
    %347 = vector.broadcast %cst_154 : f32 to vector<2x128xf32>
    %348 = arith.addf %347, %346 : vector<2x128xf32>
    %349 = arith.divf %347, %348 : vector<2x128xf32>
    %350 = arith.select %8, %344, %349 : vector<2x128xi1>, vector<2x128xf32>
    %351 = vector.extract_strided_slice %350 {offsets = [0, 0], sizes = [2, 32], strides = [1, 1]} : vector<2x128xf32> to vector<2x32xf32>
    %352 = vector.extract_strided_slice %350 {offsets = [0, 32], sizes = [2, 32], strides = [1, 1]} : vector<2x128xf32> to vector<2x32xf32>
    %353 = vector.extract_strided_slice %350 {offsets = [0, 64], sizes = [2, 32], strides = [1, 1]} : vector<2x128xf32> to vector<2x32xf32>
    %354 = vector.extract_strided_slice %350 {offsets = [0, 96], sizes = [2, 32], strides = [1, 1]} : vector<2x128xf32> to vector<2x32xf32>
    %355 = arith.mulf %352, %257 : vector<2x32xf32>
    %356 = arith.mulf %351, %353 : vector<2x32xf32>
    %357 = arith.addf %355, %356 : vector<2x32xf32>
    %358 = math.tanh %357 : vector<2x32xf32>
    %359 = arith.mulf %354, %358 : vector<2x32xf32>
    %360 = tpu.concatenate %283, %287 in 1 : vector<2x8xf32>, vector<2x8xf32> -> vector<2x16xf32>
    %c0_155 = arith.constant 0 : index
    %c0_156 = arith.constant 0 : index
    %361 = vector.load %arg5[%c0_155, %c0_156] : memref<32x128xbf16, #tpu.memory_space<vmem>>, vector<32x128xbf16>
    %362 = arith.truncf %359 : vector<2x32xf32> to vector<2x32xbf16>
    %cst_157 = arith.constant dense<0.000000e+00> : vector<2x128xf32>
    %363 = tpu.matmul %362, %361, %cst_157 {dimension_numbers = #tpu.dot_dimension_numbers<[1], [0], [0], [1], [0, 0, 1, 1], [], []>} : vector<2x32xbf16>, vector<32x128xbf16>, vector<2x128xf32> -> vector<2x128xf32>
    %364 = arith.addf %363, %1 : vector<2x128xf32>
    %c0_158 = arith.constant 0 : index
    %c0_159 = arith.constant 0 : index
    %365 = vector.load %arg4[%c0_158, %c0_159] : memref<16x128xbf16, #tpu.memory_space<vmem>>, vector<16x128xbf16>
    %366 = arith.truncf %360 : vector<2x16xf32> to vector<2x16xbf16>
    %cst_160 = arith.constant dense<0.000000e+00> : vector<2x128xf32>
    %367 = tpu.matmul %366, %365, %cst_160 {dimension_numbers = #tpu.dot_dimension_numbers<[1], [0], [0], [1], [0, 0, 1, 1], [], []>} : vector<2x16xbf16>, vector<16x128xbf16>, vector<2x128xf32> -> vector<2x128xf32>
    %368 = arith.addf %364, %367 : vector<2x128xf32>
    %369 = math.tanh %368 : vector<2x128xf32>
    %c0_161 = arith.constant 0 : index
    %c0_162 = arith.constant 0 : index
    %370 = vector.load %arg6[%c0_161, %c0_162] : memref<128x8xbf16, #tpu.memory_space<vmem>>, vector<128x8xbf16>
    %371 = arith.truncf %369 : vector<2x128xf32> to vector<2x128xbf16>
    %cst_163 = arith.constant dense<0.000000e+00> : vector<2x8xf32>
    %372 = tpu.matmul %371, %370, %cst_163 {dimension_numbers = #tpu.dot_dimension_numbers<[1], [0], [0], [1], [0, 0, 1, 1], [], []>} : vector<2x128xbf16>, vector<128x8xbf16>, vector<2x8xf32> -> vector<2x8xf32>
    %373 = arith.addf %372, %2 : vector<2x8xf32>
    %cst_164 = arith.constant dense<0xFF800000> : vector<2xf32>
    %374 = vector.multi_reduction <maximumf>, %373, %cst_164 [1] : vector<2x8xf32> to vector<2xf32>
    %375 = vector.shape_cast %374 : vector<2xf32> to vector<2x1xf32>
    %376 = vector.broadcast %375 : vector<2x1xf32> to vector<2x8xf32>
    %377 = arith.subf %373, %376 : vector<2x8xf32>
    %378 = math.exp %377 : vector<2x8xf32>
    %cst_165 = arith.constant dense<0.000000e+00> : vector<2xf32>
    %379 = vector.multi_reduction <add>, %378, %cst_165 [1] : vector<2x8xf32> to vector<2xf32>
    %380 = vector.shape_cast %379 : vector<2xf32> to vector<2x1xf32>
    %381 = tpu.reciprocal %380 {approx = true} : vector<2x1xf32> -> vector<2x1xf32>
    %382 = vector.broadcast %381 : vector<2x1xf32> to vector<2x8xf32>
    %383 = arith.mulf %378, %382 : vector<2x8xf32>
    %384 = vector.shape_cast %383 : vector<2x8xf32> to vector<2x1x8xf32>
    "tpu.trace_start"() <{level = 10 : i32, message = "bqt,bte->bqe"}> : () -> ()
    %cst_166 = arith.constant dense<0.000000e+00> : vector<2x1x32xf32>
    %385 = tpu.matmul %384, %0, %cst_166 {dimension_numbers = #tpu.dot_dimension_numbers<[2], [1], [1], [2], [0, 0, 0, 1, 1, 2], [0], [0]>} : vector<2x1x8xf32>, vector<2x8x32xf32>, vector<2x1x32xf32> -> vector<2x1x32xf32>
    "tpu.trace_stop"() : () -> ()
    %386 = vector.shape_cast %385 : vector<2x1x32xf32> to vector<2x32xf32>
    %387 = arith.addf %287, %383 : vector<2x8xf32>
    %388 = tpu.concatenate %359, %386, %310 in 1 : vector<2x32xf32>, vector<2x32xf32>, vector<2x32xf32> -> vector<2x96xf32>
    %c0_167 = arith.constant 0 : index
    %c0_168 = arith.constant 0 : index
    %389 = vector.load %arg11[%c0_167, %c0_168] : memref<96x128xbf16, #tpu.memory_space<vmem>>, vector<96x128xbf16>
    %c0_169 = arith.constant 0 : index
    %c0_170 = arith.constant 0 : index
    %390 = vector.load %arg12[%c0_169, %c0_170] : memref<1x128xf32, #tpu.memory_space<vmem>>, vector<1x128xf32>
    %391 = arith.truncf %388 : vector<2x96xf32> to vector<2x96xbf16>
    %cst_171 = arith.constant dense<0.000000e+00> : vector<2x128xf32>
    %392 = tpu.matmul %391, %389, %cst_171 {dimension_numbers = #tpu.dot_dimension_numbers<[1], [0], [0], [1], [0, 0, 1, 1], [], []>} : vector<2x96xbf16>, vector<96x128xbf16>, vector<2x128xf32> -> vector<2x128xf32>
    %393 = vector.broadcast %390 : vector<1x128xf32> to vector<2x128xf32>
    %394 = arith.addf %392, %393 : vector<2x128xf32>
    %395 = math.tanh %394 : vector<2x128xf32>
    %396 = arith.negf %394 : vector<2x128xf32>
    %397 = math.exp %396 : vector<2x128xf32>
    %cst_172 = arith.constant 1.000000e+00 : f32
    %398 = vector.broadcast %cst_172 : f32 to vector<2x128xf32>
    %399 = arith.addf %398, %397 : vector<2x128xf32>
    %400 = arith.divf %398, %399 : vector<2x128xf32>
    %401 = arith.select %14, %395, %400 : vector<2x128xi1>, vector<2x128xf32>
    %402 = vector.extract_strided_slice %401 {offsets = [0, 0], sizes = [2, 32], strides = [1, 1]} : vector<2x128xf32> to vector<2x32xf32>
    %403 = vector.extract_strided_slice %401 {offsets = [0, 32], sizes = [2, 32], strides = [1, 1]} : vector<2x128xf32> to vector<2x32xf32>
    %404 = vector.extract_strided_slice %401 {offsets = [0, 64], sizes = [2, 32], strides = [1, 1]} : vector<2x128xf32> to vector<2x32xf32>
    %405 = vector.extract_strided_slice %401 {offsets = [0, 96], sizes = [2, 32], strides = [1, 1]} : vector<2x128xf32> to vector<2x32xf32>
    %406 = arith.mulf %403, %308 : vector<2x32xf32>
    %407 = arith.mulf %402, %404 : vector<2x32xf32>
    %408 = arith.addf %406, %407 : vector<2x32xf32>
    %409 = math.tanh %408 : vector<2x32xf32>
    %410 = arith.mulf %405, %409 : vector<2x32xf32>
    %411 = tpu.concatenate %410, %386 in 1 : vector<2x32xf32>, vector<2x32xf32> -> vector<2x64xf32>
    %c0_173 = arith.constant 0 : index
    %c0_174 = arith.constant 0 : index
    %412 = vector.load %arg13[%c0_173, %c0_174] : memref<64x128xbf16, #tpu.memory_space<vmem>>, vector<64x128xbf16>
    %413 = arith.truncf %411 : vector<2x64xf32> to vector<2x64xbf16>
    %cst_175 = arith.constant dense<0.000000e+00> : vector<2x128xf32>
    %414 = tpu.matmul %413, %412, %cst_175 {dimension_numbers = #tpu.dot_dimension_numbers<[1], [0], [0], [1], [0, 0, 1, 1], [], []>} : vector<2x64xbf16>, vector<64x128xbf16>, vector<2x128xf32> -> vector<2x128xf32>
    %c0_176 = arith.constant 0 : index
    %c0_177 = arith.constant 0 : index
    %415 = vector.load %arg14[%c0_176, %c0_177] : memref<1x128xf32, #tpu.memory_space<vmem>>, vector<1x128xf32>
    %416 = vector.broadcast %415 : vector<1x128xf32> to vector<2x128xf32>
    %417 = arith.addf %414, %416 : vector<2x128xf32>
    %418 = tpu.concatenate %15, %383, %16 in 1 : vector<2x81xf32>, vector<2x8xf32>, vector<2x39xf32> -> vector<2x128xf32>
    %419 = arith.addf %417, %418 : vector<2x128xf32>
    %420 = arith.index_cast %c3_i32 : i32 to index
    %c0_178 = arith.constant 0 : index
    %c0_179 = arith.constant 0 : index
    %421 = vector.load %arg15[%420, %c0_178, %c0_179] : memref<10x2x128xf32, #tpu.memory_space<vmem>>, vector<1x2x128xf32>
    %422 = vector.shape_cast %421 : vector<1x2x128xf32> to vector<2x128xf32>
    %423 = vector.shape_cast %419 : vector<2x128xf32> to vector<1x2x128xf32>
    tpu.vector_store %arg15[%420, %c0_178, %c0_179], %423 {strides = array<i32>} : memref<10x2x128xf32, #tpu.memory_space<vmem>>, vector<1x2x128xf32>,
    %c4_i32 = arith.constant 4 : i32
    %424 = arith.index_cast %c4_i32 : i32 to index
    %c0_180 = arith.constant 0 : index
    %c0_181 = arith.constant 0 : index
    %425 = vector.load %arg0[%424, %c0_180, %c0_181] : memref<10x2x80xf32, #tpu.memory_space<vmem>>, vector<1x2x80xf32>
    %426 = vector.shape_cast %425 : vector<1x2x80xf32> to vector<2x80xf32>
    %c0_182 = arith.constant 0 : index
    %c0_183 = arith.constant 0 : index
    %427 = vector.load %arg7[%c0_182, %c0_183] : memref<80x32xbf16, #tpu.memory_space<vmem>>, vector<80x32xbf16>
    %428 = arith.truncf %426 : vector<2x80xf32> to vector<2x80xbf16>
    %cst_184 = arith.constant dense<0.000000e+00> : vector<2x32xf32>
    %429 = tpu.matmul %428, %427, %cst_184 {dimension_numbers = #tpu.dot_dimension_numbers<[1], [0], [0], [1], [0, 0, 1, 1], [], []>} : vector<2x80xbf16>, vector<80x32xbf16>, vector<2x32xf32> -> vector<2x32xf32>
    %cst_185 = arith.constant 0.000000e+00 : f32
    %430 = vector.broadcast %cst_185 : f32 to vector<2x32xf32>
    %431 = arith.maximumf %429, %430 : vector<2x32xf32>
    %c0_186 = arith.constant 0 : index
    %c0_187 = arith.constant 0 : index
    %432 = vector.load %arg8[%c0_186, %c0_187] : memref<32x32xbf16, #tpu.memory_space<vmem>>, vector<32x32xbf16>
    %433 = arith.truncf %431 : vector<2x32xf32> to vector<2x32xbf16>
    %cst_188 = arith.constant dense<0.000000e+00> : vector<2x32xf32>
    %434 = tpu.matmul %433, %432, %cst_188 {dimension_numbers = #tpu.dot_dimension_numbers<[1], [0], [0], [1], [0, 0, 1, 1], [], []>} : vector<2x32xbf16>, vector<32x32xbf16>, vector<2x32xf32> -> vector<2x32xf32>
    %cst_189 = arith.constant 0.000000e+00 : f32
    %435 = vector.broadcast %cst_189 : f32 to vector<2x32xf32>
    %436 = arith.maximumf %434, %435 : vector<2x32xf32>
    %437 = tpu.concatenate %436, %386, %359 in 1 : vector<2x32xf32>, vector<2x32xf32>, vector<2x32xf32> -> vector<2x96xf32>
    %c0_190 = arith.constant 0 : index
    %c0_191 = arith.constant 0 : index
    %438 = vector.load %arg9[%c0_190, %c0_191] : memref<96x128xbf16, #tpu.memory_space<vmem>>, vector<96x128xbf16>
    %c0_192 = arith.constant 0 : index
    %c0_193 = arith.constant 0 : index
    %439 = vector.load %arg10[%c0_192, %c0_193] : memref<1x128xf32, #tpu.memory_space<vmem>>, vector<1x128xf32>
    %440 = arith.truncf %437 : vector<2x96xf32> to vector<2x96xbf16>
    %cst_194 = arith.constant dense<0.000000e+00> : vector<2x128xf32>
    %441 = tpu.matmul %440, %438, %cst_194 {dimension_numbers = #tpu.dot_dimension_numbers<[1], [0], [0], [1], [0, 0, 1, 1], [], []>} : vector<2x96xbf16>, vector<96x128xbf16>, vector<2x128xf32> -> vector<2x128xf32>
    %442 = vector.broadcast %439 : vector<1x128xf32> to vector<2x128xf32>
    %443 = arith.addf %441, %442 : vector<2x128xf32>
    %444 = math.tanh %443 : vector<2x128xf32>
    %445 = arith.negf %443 : vector<2x128xf32>
    %446 = math.exp %445 : vector<2x128xf32>
    %cst_195 = arith.constant 1.000000e+00 : f32
    %447 = vector.broadcast %cst_195 : f32 to vector<2x128xf32>
    %448 = arith.addf %447, %446 : vector<2x128xf32>
    %449 = arith.divf %447, %448 : vector<2x128xf32>
    %450 = arith.select %8, %444, %449 : vector<2x128xi1>, vector<2x128xf32>
    %451 = vector.extract_strided_slice %450 {offsets = [0, 0], sizes = [2, 32], strides = [1, 1]} : vector<2x128xf32> to vector<2x32xf32>
    %452 = vector.extract_strided_slice %450 {offsets = [0, 32], sizes = [2, 32], strides = [1, 1]} : vector<2x128xf32> to vector<2x32xf32>
    %453 = vector.extract_strided_slice %450 {offsets = [0, 64], sizes = [2, 32], strides = [1, 1]} : vector<2x128xf32> to vector<2x32xf32>
    %454 = vector.extract_strided_slice %450 {offsets = [0, 96], sizes = [2, 32], strides = [1, 1]} : vector<2x128xf32> to vector<2x32xf32>
    %455 = arith.mulf %452, %357 : vector<2x32xf32>
    %456 = arith.mulf %451, %453 : vector<2x32xf32>
    %457 = arith.addf %455, %456 : vector<2x32xf32>
    %458 = math.tanh %457 : vector<2x32xf32>
    %459 = arith.mulf %454, %458 : vector<2x32xf32>
    %460 = tpu.concatenate %383, %387 in 1 : vector<2x8xf32>, vector<2x8xf32> -> vector<2x16xf32>
    %c0_196 = arith.constant 0 : index
    %c0_197 = arith.constant 0 : index
    %461 = vector.load %arg5[%c0_196, %c0_197] : memref<32x128xbf16, #tpu.memory_space<vmem>>, vector<32x128xbf16>
    %462 = arith.truncf %459 : vector<2x32xf32> to vector<2x32xbf16>
    %cst_198 = arith.constant dense<0.000000e+00> : vector<2x128xf32>
    %463 = tpu.matmul %462, %461, %cst_198 {dimension_numbers = #tpu.dot_dimension_numbers<[1], [0], [0], [1], [0, 0, 1, 1], [], []>} : vector<2x32xbf16>, vector<32x128xbf16>, vector<2x128xf32> -> vector<2x128xf32>
    %464 = arith.addf %463, %1 : vector<2x128xf32>
    %c0_199 = arith.constant 0 : index
    %c0_200 = arith.constant 0 : index
    %465 = vector.load %arg4[%c0_199, %c0_200] : memref<16x128xbf16, #tpu.memory_space<vmem>>, vector<16x128xbf16>
    %466 = arith.truncf %460 : vector<2x16xf32> to vector<2x16xbf16>
    %cst_201 = arith.constant dense<0.000000e+00> : vector<2x128xf32>
    %467 = tpu.matmul %466, %465, %cst_201 {dimension_numbers = #tpu.dot_dimension_numbers<[1], [0], [0], [1], [0, 0, 1, 1], [], []>} : vector<2x16xbf16>, vector<16x128xbf16>, vector<2x128xf32> -> vector<2x128xf32>
    %468 = arith.addf %464, %467 : vector<2x128xf32>
    %469 = math.tanh %468 : vector<2x128xf32>
    %c0_202 = arith.constant 0 : index
    %c0_203 = arith.constant 0 : index
    %470 = vector.load %arg6[%c0_202, %c0_203] : memref<128x8xbf16, #tpu.memory_space<vmem>>, vector<128x8xbf16>
    %471 = arith.truncf %469 : vector<2x128xf32> to vector<2x128xbf16>
    %cst_204 = arith.constant dense<0.000000e+00> : vector<2x8xf32>
    %472 = tpu.matmul %471, %470, %cst_204 {dimension_numbers = #tpu.dot_dimension_numbers<[1], [0], [0], [1], [0, 0, 1, 1], [], []>} : vector<2x128xbf16>, vector<128x8xbf16>, vector<2x8xf32> -> vector<2x8xf32>
    %473 = arith.addf %472, %2 : vector<2x8xf32>
    %cst_205 = arith.constant dense<0xFF800000> : vector<2xf32>
    %474 = vector.multi_reduction <maximumf>, %473, %cst_205 [1] : vector<2x8xf32> to vector<2xf32>
    %475 = vector.shape_cast %474 : vector<2xf32> to vector<2x1xf32>
    %476 = vector.broadcast %475 : vector<2x1xf32> to vector<2x8xf32>
    %477 = arith.subf %473, %476 : vector<2x8xf32>
    %478 = math.exp %477 : vector<2x8xf32>
    %cst_206 = arith.constant dense<0.000000e+00> : vector<2xf32>
    %479 = vector.multi_reduction <add>, %478, %cst_206 [1] : vector<2x8xf32> to vector<2xf32>
    %480 = vector.shape_cast %479 : vector<2xf32> to vector<2x1xf32>
    %481 = tpu.reciprocal %480 {approx = true} : vector<2x1xf32> -> vector<2x1xf32>
    %482 = vector.broadcast %481 : vector<2x1xf32> to vector<2x8xf32>
    %483 = arith.mulf %478, %482 : vector<2x8xf32>
    %484 = vector.shape_cast %483 : vector<2x8xf32> to vector<2x1x8xf32>
    "tpu.trace_start"() <{level = 10 : i32, message = "bqt,bte->bqe"}> : () -> ()
    %cst_207 = arith.constant dense<0.000000e+00> : vector<2x1x32xf32>
    %485 = tpu.matmul %484, %0, %cst_207 {dimension_numbers = #tpu.dot_dimension_numbers<[2], [1], [1], [2], [0, 0, 0, 1, 1, 2], [0], [0]>} : vector<2x1x8xf32>, vector<2x8x32xf32>, vector<2x1x32xf32> -> vector<2x1x32xf32>
    "tpu.trace_stop"() : () -> ()
    %486 = vector.shape_cast %485 : vector<2x1x32xf32> to vector<2x32xf32>
    %487 = arith.addf %387, %483 : vector<2x8xf32>
    %488 = tpu.concatenate %459, %486, %410 in 1 : vector<2x32xf32>, vector<2x32xf32>, vector<2x32xf32> -> vector<2x96xf32>
    %c0_208 = arith.constant 0 : index
    %c0_209 = arith.constant 0 : index
    %489 = vector.load %arg11[%c0_208, %c0_209] : memref<96x128xbf16, #tpu.memory_space<vmem>>, vector<96x128xbf16>
    %c0_210 = arith.constant 0 : index
    %c0_211 = arith.constant 0 : index
    %490 = vector.load %arg12[%c0_210, %c0_211] : memref<1x128xf32, #tpu.memory_space<vmem>>, vector<1x128xf32>
    %491 = arith.truncf %488 : vector<2x96xf32> to vector<2x96xbf16>
    %cst_212 = arith.constant dense<0.000000e+00> : vector<2x128xf32>
    %492 = tpu.matmul %491, %489, %cst_212 {dimension_numbers = #tpu.dot_dimension_numbers<[1], [0], [0], [1], [0, 0, 1, 1], [], []>} : vector<2x96xbf16>, vector<96x128xbf16>, vector<2x128xf32> -> vector<2x128xf32>
    %493 = vector.broadcast %490 : vector<1x128xf32> to vector<2x128xf32>
    %494 = arith.addf %492, %493 : vector<2x128xf32>
    %495 = math.tanh %494 : vector<2x128xf32>
    %496 = arith.negf %494 : vector<2x128xf32>
    %497 = math.exp %496 : vector<2x128xf32>
    %cst_213 = arith.constant 1.000000e+00 : f32
    %498 = vector.broadcast %cst_213 : f32 to vector<2x128xf32>
    %499 = arith.addf %498, %497 : vector<2x128xf32>
    %500 = arith.divf %498, %499 : vector<2x128xf32>
    %501 = arith.select %14, %495, %500 : vector<2x128xi1>, vector<2x128xf32>
    %502 = vector.extract_strided_slice %501 {offsets = [0, 0], sizes = [2, 32], strides = [1, 1]} : vector<2x128xf32> to vector<2x32xf32>
    %503 = vector.extract_strided_slice %501 {offsets = [0, 32], sizes = [2, 32], strides = [1, 1]} : vector<2x128xf32> to vector<2x32xf32>
    %504 = vector.extract_strided_slice %501 {offsets = [0, 64], sizes = [2, 32], strides = [1, 1]} : vector<2x128xf32> to vector<2x32xf32>
    %505 = vector.extract_strided_slice %501 {offsets = [0, 96], sizes = [2, 32], strides = [1, 1]} : vector<2x128xf32> to vector<2x32xf32>
    %506 = arith.mulf %503, %408 : vector<2x32xf32>
    %507 = arith.mulf %502, %504 : vector<2x32xf32>
    %508 = arith.addf %506, %507 : vector<2x32xf32>
    %509 = math.tanh %508 : vector<2x32xf32>
    %510 = arith.mulf %505, %509 : vector<2x32xf32>
    %511 = tpu.concatenate %510, %486 in 1 : vector<2x32xf32>, vector<2x32xf32> -> vector<2x64xf32>
    %c0_214 = arith.constant 0 : index
    %c0_215 = arith.constant 0 : index
    %512 = vector.load %arg13[%c0_214, %c0_215] : memref<64x128xbf16, #tpu.memory_space<vmem>>, vector<64x128xbf16>
    %513 = arith.truncf %511 : vector<2x64xf32> to vector<2x64xbf16>
    %cst_216 = arith.constant dense<0.000000e+00> : vector<2x128xf32>
    %514 = tpu.matmul %513, %512, %cst_216 {dimension_numbers = #tpu.dot_dimension_numbers<[1], [0], [0], [1], [0, 0, 1, 1], [], []>} : vector<2x64xbf16>, vector<64x128xbf16>, vector<2x128xf32> -> vector<2x128xf32>
    %c0_217 = arith.constant 0 : index
    %c0_218 = arith.constant 0 : index
    %515 = vector.load %arg14[%c0_217, %c0_218] : memref<1x128xf32, #tpu.memory_space<vmem>>, vector<1x128xf32>
    %516 = vector.broadcast %515 : vector<1x128xf32> to vector<2x128xf32>
    %517 = arith.addf %514, %516 : vector<2x128xf32>
    %518 = tpu.concatenate %15, %483, %16 in 1 : vector<2x81xf32>, vector<2x8xf32>, vector<2x39xf32> -> vector<2x128xf32>
    %519 = arith.addf %517, %518 : vector<2x128xf32>
    %520 = arith.index_cast %c4_i32 : i32 to index
    %c0_219 = arith.constant 0 : index
    %c0_220 = arith.constant 0 : index
    %521 = vector.load %arg15[%520, %c0_219, %c0_220] : memref<10x2x128xf32, #tpu.memory_space<vmem>>, vector<1x2x128xf32>
    %522 = vector.shape_cast %521 : vector<1x2x128xf32> to vector<2x128xf32>
    %523 = vector.shape_cast %519 : vector<2x128xf32> to vector<1x2x128xf32>
    tpu.vector_store %arg15[%520, %c0_219, %c0_220], %523 {strides = array<i32>} : memref<10x2x128xf32, #tpu.memory_space<vmem>>, vector<1x2x128xf32>,
    %c5_i32 = arith.constant 5 : i32
    %524 = arith.index_cast %c5_i32 : i32 to index
    %c0_221 = arith.constant 0 : index
    %c0_222 = arith.constant 0 : index
    %525 = vector.load %arg0[%524, %c0_221, %c0_222] : memref<10x2x80xf32, #tpu.memory_space<vmem>>, vector<1x2x80xf32>
    %526 = vector.shape_cast %525 : vector<1x2x80xf32> to vector<2x80xf32>
    %c0_223 = arith.constant 0 : index
    %c0_224 = arith.constant 0 : index
    %527 = vector.load %arg7[%c0_223, %c0_224] : memref<80x32xbf16, #tpu.memory_space<vmem>>, vector<80x32xbf16>
    %528 = arith.truncf %526 : vector<2x80xf32> to vector<2x80xbf16>
    %cst_225 = arith.constant dense<0.000000e+00> : vector<2x32xf32>
    %529 = tpu.matmul %528, %527, %cst_225 {dimension_numbers = #tpu.dot_dimension_numbers<[1], [0], [0], [1], [0, 0, 1, 1], [], []>} : vector<2x80xbf16>, vector<80x32xbf16>, vector<2x32xf32> -> vector<2x32xf32>
    %cst_226 = arith.constant 0.000000e+00 : f32
    %530 = vector.broadcast %cst_226 : f32 to vector<2x32xf32>
    %531 = arith.maximumf %529, %530 : vector<2x32xf32>
    %c0_227 = arith.constant 0 : index
    %c0_228 = arith.constant 0 : index
    %532 = vector.load %arg8[%c0_227, %c0_228] : memref<32x32xbf16, #tpu.memory_space<vmem>>, vector<32x32xbf16>
    %533 = arith.truncf %531 : vector<2x32xf32> to vector<2x32xbf16>
    %cst_229 = arith.constant dense<0.000000e+00> : vector<2x32xf32>
    %534 = tpu.matmul %533, %532, %cst_229 {dimension_numbers = #tpu.dot_dimension_numbers<[1], [0], [0], [1], [0, 0, 1, 1], [], []>} : vector<2x32xbf16>, vector<32x32xbf16>, vector<2x32xf32> -> vector<2x32xf32>
    %cst_230 = arith.constant 0.000000e+00 : f32
    %535 = vector.broadcast %cst_230 : f32 to vector<2x32xf32>
    %536 = arith.maximumf %534, %535 : vector<2x32xf32>
    %537 = tpu.concatenate %536, %486, %459 in 1 : vector<2x32xf32>, vector<2x32xf32>, vector<2x32xf32> -> vector<2x96xf32>
    %c0_231 = arith.constant 0 : index
    %c0_232 = arith.constant 0 : index
    %538 = vector.load %arg9[%c0_231, %c0_232] : memref<96x128xbf16, #tpu.memory_space<vmem>>, vector<96x128xbf16>
    %c0_233 = arith.constant 0 : index
    %c0_234 = arith.constant 0 : index
    %539 = vector.load %arg10[%c0_233, %c0_234] : memref<1x128xf32, #tpu.memory_space<vmem>>, vector<1x128xf32>
    %540 = arith.truncf %537 : vector<2x96xf32> to vector<2x96xbf16>
    %cst_235 = arith.constant dense<0.000000e+00> : vector<2x128xf32>
    %541 = tpu.matmul %540, %538, %cst_235 {dimension_numbers = #tpu.dot_dimension_numbers<[1], [0], [0], [1], [0, 0, 1, 1], [], []>} : vector<2x96xbf16>, vector<96x128xbf16>, vector<2x128xf32> -> vector<2x128xf32>
    %542 = vector.broadcast %539 : vector<1x128xf32> to vector<2x128xf32>
    %543 = arith.addf %541, %542 : vector<2x128xf32>
    %544 = math.tanh %543 : vector<2x128xf32>
    %545 = arith.negf %543 : vector<2x128xf32>
    %546 = math.exp %545 : vector<2x128xf32>
    %cst_236 = arith.constant 1.000000e+00 : f32
    %547 = vector.broadcast %cst_236 : f32 to vector<2x128xf32>
    %548 = arith.addf %547, %546 : vector<2x128xf32>
    %549 = arith.divf %547, %548 : vector<2x128xf32>
    %550 = arith.select %8, %544, %549 : vector<2x128xi1>, vector<2x128xf32>
    %551 = vector.extract_strided_slice %550 {offsets = [0, 0], sizes = [2, 32], strides = [1, 1]} : vector<2x128xf32> to vector<2x32xf32>
    %552 = vector.extract_strided_slice %550 {offsets = [0, 32], sizes = [2, 32], strides = [1, 1]} : vector<2x128xf32> to vector<2x32xf32>
    %553 = vector.extract_strided_slice %550 {offsets = [0, 64], sizes = [2, 32], strides = [1, 1]} : vector<2x128xf32> to vector<2x32xf32>
    %554 = vector.extract_strided_slice %550 {offsets = [0, 96], sizes = [2, 32], strides = [1, 1]} : vector<2x128xf32> to vector<2x32xf32>
    %555 = arith.mulf %552, %457 : vector<2x32xf32>
    %556 = arith.mulf %551, %553 : vector<2x32xf32>
    %557 = arith.addf %555, %556 : vector<2x32xf32>
    %558 = math.tanh %557 : vector<2x32xf32>
    %559 = arith.mulf %554, %558 : vector<2x32xf32>
    %560 = tpu.concatenate %483, %487 in 1 : vector<2x8xf32>, vector<2x8xf32> -> vector<2x16xf32>
    %c0_237 = arith.constant 0 : index
    %c0_238 = arith.constant 0 : index
    %561 = vector.load %arg5[%c0_237, %c0_238] : memref<32x128xbf16, #tpu.memory_space<vmem>>, vector<32x128xbf16>
    %562 = arith.truncf %559 : vector<2x32xf32> to vector<2x32xbf16>
    %cst_239 = arith.constant dense<0.000000e+00> : vector<2x128xf32>
    %563 = tpu.matmul %562, %561, %cst_239 {dimension_numbers = #tpu.dot_dimension_numbers<[1], [0], [0], [1], [0, 0, 1, 1], [], []>} : vector<2x32xbf16>, vector<32x128xbf16>, vector<2x128xf32> -> vector<2x128xf32>
    %564 = arith.addf %563, %1 : vector<2x128xf32>
    %c0_240 = arith.constant 0 : index
    %c0_241 = arith.constant 0 : index
    %565 = vector.load %arg4[%c0_240, %c0_241] : memref<16x128xbf16, #tpu.memory_space<vmem>>, vector<16x128xbf16>
    %566 = arith.truncf %560 : vector<2x16xf32> to vector<2x16xbf16>
    %cst_242 = arith.constant dense<0.000000e+00> : vector<2x128xf32>
    %567 = tpu.matmul %566, %565, %cst_242 {dimension_numbers = #tpu.dot_dimension_numbers<[1], [0], [0], [1], [0, 0, 1, 1], [], []>} : vector<2x16xbf16>, vector<16x128xbf16>, vector<2x128xf32> -> vector<2x128xf32>
    %568 = arith.addf %564, %567 : vector<2x128xf32>
    %569 = math.tanh %568 : vector<2x128xf32>
    %c0_243 = arith.constant 0 : index
    %c0_244 = arith.constant 0 : index
    %570 = vector.load %arg6[%c0_243, %c0_244] : memref<128x8xbf16, #tpu.memory_space<vmem>>, vector<128x8xbf16>
    %571 = arith.truncf %569 : vector<2x128xf32> to vector<2x128xbf16>
    %cst_245 = arith.constant dense<0.000000e+00> : vector<2x8xf32>
    %572 = tpu.matmul %571, %570, %cst_245 {dimension_numbers = #tpu.dot_dimension_numbers<[1], [0], [0], [1], [0, 0, 1, 1], [], []>} : vector<2x128xbf16>, vector<128x8xbf16>, vector<2x8xf32> -> vector<2x8xf32>
    %573 = arith.addf %572, %2 : vector<2x8xf32>
    %cst_246 = arith.constant dense<0xFF800000> : vector<2xf32>
    %574 = vector.multi_reduction <maximumf>, %573, %cst_246 [1] : vector<2x8xf32> to vector<2xf32>
    %575 = vector.shape_cast %574 : vector<2xf32> to vector<2x1xf32>
    %576 = vector.broadcast %575 : vector<2x1xf32> to vector<2x8xf32>
    %577 = arith.subf %573, %576 : vector<2x8xf32>
    %578 = math.exp %577 : vector<2x8xf32>
    %cst_247 = arith.constant dense<0.000000e+00> : vector<2xf32>
    %579 = vector.multi_reduction <add>, %578, %cst_247 [1] : vector<2x8xf32> to vector<2xf32>
    %580 = vector.shape_cast %579 : vector<2xf32> to vector<2x1xf32>
    %581 = tpu.reciprocal %580 {approx = true} : vector<2x1xf32> -> vector<2x1xf32>
    %582 = vector.broadcast %581 : vector<2x1xf32> to vector<2x8xf32>
    %583 = arith.mulf %578, %582 : vector<2x8xf32>
    %584 = vector.shape_cast %583 : vector<2x8xf32> to vector<2x1x8xf32>
    "tpu.trace_start"() <{level = 10 : i32, message = "bqt,bte->bqe"}> : () -> ()
    %cst_248 = arith.constant dense<0.000000e+00> : vector<2x1x32xf32>
    %585 = tpu.matmul %584, %0, %cst_248 {dimension_numbers = #tpu.dot_dimension_numbers<[2], [1], [1], [2], [0, 0, 0, 1, 1, 2], [0], [0]>} : vector<2x1x8xf32>, vector<2x8x32xf32>, vector<2x1x32xf32> -> vector<2x1x32xf32>
    "tpu.trace_stop"() : () -> ()
    %586 = vector.shape_cast %585 : vector<2x1x32xf32> to vector<2x32xf32>
    %587 = arith.addf %487, %583 : vector<2x8xf32>
    %588 = tpu.concatenate %559, %586, %510 in 1 : vector<2x32xf32>, vector<2x32xf32>, vector<2x32xf32> -> vector<2x96xf32>
    %c0_249 = arith.constant 0 : index
    %c0_250 = arith.constant 0 : index
    %589 = vector.load %arg11[%c0_249, %c0_250] : memref<96x128xbf16, #tpu.memory_space<vmem>>, vector<96x128xbf16>
    %c0_251 = arith.constant 0 : index
    %c0_252 = arith.constant 0 : index
    %590 = vector.load %arg12[%c0_251, %c0_252] : memref<1x128xf32, #tpu.memory_space<vmem>>, vector<1x128xf32>
    %591 = arith.truncf %588 : vector<2x96xf32> to vector<2x96xbf16>
    %cst_253 = arith.constant dense<0.000000e+00> : vector<2x128xf32>
    %592 = tpu.matmul %591, %589, %cst_253 {dimension_numbers = #tpu.dot_dimension_numbers<[1], [0], [0], [1], [0, 0, 1, 1], [], []>} : vector<2x96xbf16>, vector<96x128xbf16>, vector<2x128xf32> -> vector<2x128xf32>
    %593 = vector.broadcast %590 : vector<1x128xf32> to vector<2x128xf32>
    %594 = arith.addf %592, %593 : vector<2x128xf32>
    %595 = math.tanh %594 : vector<2x128xf32>
    %596 = arith.negf %594 : vector<2x128xf32>
    %597 = math.exp %596 : vector<2x128xf32>
    %cst_254 = arith.constant 1.000000e+00 : f32
    %598 = vector.broadcast %cst_254 : f32 to vector<2x128xf32>
    %599 = arith.addf %598, %597 : vector<2x128xf32>
    %600 = arith.divf %598, %599 : vector<2x128xf32>
    %601 = arith.select %14, %595, %600 : vector<2x128xi1>, vector<2x128xf32>
    %602 = vector.extract_strided_slice %601 {offsets = [0, 0], sizes = [2, 32], strides = [1, 1]} : vector<2x128xf32> to vector<2x32xf32>
    %603 = vector.extract_strided_slice %601 {offsets = [0, 32], sizes = [2, 32], strides = [1, 1]} : vector<2x128xf32> to vector<2x32xf32>
    %604 = vector.extract_strided_slice %601 {offsets = [0, 64], sizes = [2, 32], strides = [1, 1]} : vector<2x128xf32> to vector<2x32xf32>
    %605 = vector.extract_strided_slice %601 {offsets = [0, 96], sizes = [2, 32], strides = [1, 1]} : vector<2x128xf32> to vector<2x32xf32>
    %606 = arith.mulf %603, %508 : vector<2x32xf32>
    %607 = arith.mulf %602, %604 : vector<2x32xf32>
    %608 = arith.addf %606, %607 : vector<2x32xf32>
    %609 = math.tanh %608 : vector<2x32xf32>
    %610 = arith.mulf %605, %609 : vector<2x32xf32>
    %611 = tpu.concatenate %610, %586 in 1 : vector<2x32xf32>, vector<2x32xf32> -> vector<2x64xf32>
    %c0_255 = arith.constant 0 : index
    %c0_256 = arith.constant 0 : index
    %612 = vector.load %arg13[%c0_255, %c0_256] : memref<64x128xbf16, #tpu.memory_space<vmem>>, vector<64x128xbf16>
    %613 = arith.truncf %611 : vector<2x64xf32> to vector<2x64xbf16>
    %cst_257 = arith.constant dense<0.000000e+00> : vector<2x128xf32>
    %614 = tpu.matmul %613, %612, %cst_257 {dimension_numbers = #tpu.dot_dimension_numbers<[1], [0], [0], [1], [0, 0, 1, 1], [], []>} : vector<2x64xbf16>, vector<64x128xbf16>, vector<2x128xf32> -> vector<2x128xf32>
    %c0_258 = arith.constant 0 : index
    %c0_259 = arith.constant 0 : index
    %615 = vector.load %arg14[%c0_258, %c0_259] : memref<1x128xf32, #tpu.memory_space<vmem>>, vector<1x128xf32>
    %616 = vector.broadcast %615 : vector<1x128xf32> to vector<2x128xf32>
    %617 = arith.addf %614, %616 : vector<2x128xf32>
    %618 = tpu.concatenate %15, %583, %16 in 1 : vector<2x81xf32>, vector<2x8xf32>, vector<2x39xf32> -> vector<2x128xf32>
    %619 = arith.addf %617, %618 : vector<2x128xf32>
    %620 = arith.index_cast %c5_i32 : i32 to index
    %c0_260 = arith.constant 0 : index
    %c0_261 = arith.constant 0 : index
    %621 = vector.load %arg15[%620, %c0_260, %c0_261] : memref<10x2x128xf32, #tpu.memory_space<vmem>>, vector<1x2x128xf32>
    %622 = vector.shape_cast %621 : vector<1x2x128xf32> to vector<2x128xf32>
    %623 = vector.shape_cast %619 : vector<2x128xf32> to vector<1x2x128xf32>
    tpu.vector_store %arg15[%620, %c0_260, %c0_261], %623 {strides = array<i32>} : memref<10x2x128xf32, #tpu.memory_space<vmem>>, vector<1x2x128xf32>,
    %c6_i32 = arith.constant 6 : i32
    %624 = arith.index_cast %c6_i32 : i32 to index
    %c0_262 = arith.constant 0 : index
    %c0_263 = arith.constant 0 : index
    %625 = vector.load %arg0[%624, %c0_262, %c0_263] : memref<10x2x80xf32, #tpu.memory_space<vmem>>, vector<1x2x80xf32>
    %626 = vector.shape_cast %625 : vector<1x2x80xf32> to vector<2x80xf32>
    %c0_264 = arith.constant 0 : index
    %c0_265 = arith.constant 0 : index
    %627 = vector.load %arg7[%c0_264, %c0_265] : memref<80x32xbf16, #tpu.memory_space<vmem>>, vector<80x32xbf16>
    %628 = arith.truncf %626 : vector<2x80xf32> to vector<2x80xbf16>
    %cst_266 = arith.constant dense<0.000000e+00> : vector<2x32xf32>
    %629 = tpu.matmul %628, %627, %cst_266 {dimension_numbers = #tpu.dot_dimension_numbers<[1], [0], [0], [1], [0, 0, 1, 1], [], []>} : vector<2x80xbf16>, vector<80x32xbf16>, vector<2x32xf32> -> vector<2x32xf32>
    %cst_267 = arith.constant 0.000000e+00 : f32
    %630 = vector.broadcast %cst_267 : f32 to vector<2x32xf32>
    %631 = arith.maximumf %629, %630 : vector<2x32xf32>
    %c0_268 = arith.constant 0 : index
    %c0_269 = arith.constant 0 : index
    %632 = vector.load %arg8[%c0_268, %c0_269] : memref<32x32xbf16, #tpu.memory_space<vmem>>, vector<32x32xbf16>
    %633 = arith.truncf %631 : vector<2x32xf32> to vector<2x32xbf16>
    %cst_270 = arith.constant dense<0.000000e+00> : vector<2x32xf32>
    %634 = tpu.matmul %633, %632, %cst_270 {dimension_numbers = #tpu.dot_dimension_numbers<[1], [0], [0], [1], [0, 0, 1, 1], [], []>} : vector<2x32xbf16>, vector<32x32xbf16>, vector<2x32xf32> -> vector<2x32xf32>
    %cst_271 = arith.constant 0.000000e+00 : f32
    %635 = vector.broadcast %cst_271 : f32 to vector<2x32xf32>
    %636 = arith.maximumf %634, %635 : vector<2x32xf32>
    %637 = tpu.concatenate %636, %586, %559 in 1 : vector<2x32xf32>, vector<2x32xf32>, vector<2x32xf32> -> vector<2x96xf32>
    %c0_272 = arith.constant 0 : index
    %c0_273 = arith.constant 0 : index
    %638 = vector.load %arg9[%c0_272, %c0_273] : memref<96x128xbf16, #tpu.memory_space<vmem>>, vector<96x128xbf16>
    %c0_274 = arith.constant 0 : index
    %c0_275 = arith.constant 0 : index
    %639 = vector.load %arg10[%c0_274, %c0_275] : memref<1x128xf32, #tpu.memory_space<vmem>>, vector<1x128xf32>
    %640 = arith.truncf %637 : vector<2x96xf32> to vector<2x96xbf16>
    %cst_276 = arith.constant dense<0.000000e+00> : vector<2x128xf32>
    %641 = tpu.matmul %640, %638, %cst_276 {dimension_numbers = #tpu.dot_dimension_numbers<[1], [0], [0], [1], [0, 0, 1, 1], [], []>} : vector<2x96xbf16>, vector<96x128xbf16>, vector<2x128xf32> -> vector<2x128xf32>
    %642 = vector.broadcast %639 : vector<1x128xf32> to vector<2x128xf32>
    %643 = arith.addf %641, %642 : vector<2x128xf32>
    %644 = math.tanh %643 : vector<2x128xf32>
    %645 = arith.negf %643 : vector<2x128xf32>
    %646 = math.exp %645 : vector<2x128xf32>
    %cst_277 = arith.constant 1.000000e+00 : f32
    %647 = vector.broadcast %cst_277 : f32 to vector<2x128xf32>
    %648 = arith.addf %647, %646 : vector<2x128xf32>
    %649 = arith.divf %647, %648 : vector<2x128xf32>
    %650 = arith.select %8, %644, %649 : vector<2x128xi1>, vector<2x128xf32>
    %651 = vector.extract_strided_slice %650 {offsets = [0, 0], sizes = [2, 32], strides = [1, 1]} : vector<2x128xf32> to vector<2x32xf32>
    %652 = vector.extract_strided_slice %650 {offsets = [0, 32], sizes = [2, 32], strides = [1, 1]} : vector<2x128xf32> to vector<2x32xf32>
    %653 = vector.extract_strided_slice %650 {offsets = [0, 64], sizes = [2, 32], strides = [1, 1]} : vector<2x128xf32> to vector<2x32xf32>
    %654 = vector.extract_strided_slice %650 {offsets = [0, 96], sizes = [2, 32], strides = [1, 1]} : vector<2x128xf32> to vector<2x32xf32>
    %655 = arith.mulf %652, %557 : vector<2x32xf32>
    %656 = arith.mulf %651, %653 : vector<2x32xf32>
    %657 = arith.addf %655, %656 : vector<2x32xf32>
    %658 = math.tanh %657 : vector<2x32xf32>
    %659 = arith.mulf %654, %658 : vector<2x32xf32>
    %660 = tpu.concatenate %583, %587 in 1 : vector<2x8xf32>, vector<2x8xf32> -> vector<2x16xf32>
    %c0_278 = arith.constant 0 : index
    %c0_279 = arith.constant 0 : index
    %661 = vector.load %arg5[%c0_278, %c0_279] : memref<32x128xbf16, #tpu.memory_space<vmem>>, vector<32x128xbf16>
    %662 = arith.truncf %659 : vector<2x32xf32> to vector<2x32xbf16>
    %cst_280 = arith.constant dense<0.000000e+00> : vector<2x128xf32>
    %663 = tpu.matmul %662, %661, %cst_280 {dimension_numbers = #tpu.dot_dimension_numbers<[1], [0], [0], [1], [0, 0, 1, 1], [], []>} : vector<2x32xbf16>, vector<32x128xbf16>, vector<2x128xf32> -> vector<2x128xf32>
    %664 = arith.addf %663, %1 : vector<2x128xf32>
    %c0_281 = arith.constant 0 : index
    %c0_282 = arith.constant 0 : index
    %665 = vector.load %arg4[%c0_281, %c0_282] : memref<16x128xbf16, #tpu.memory_space<vmem>>, vector<16x128xbf16>
    %666 = arith.truncf %660 : vector<2x16xf32> to vector<2x16xbf16>
    %cst_283 = arith.constant dense<0.000000e+00> : vector<2x128xf32>
    %667 = tpu.matmul %666, %665, %cst_283 {dimension_numbers = #tpu.dot_dimension_numbers<[1], [0], [0], [1], [0, 0, 1, 1], [], []>} : vector<2x16xbf16>, vector<16x128xbf16>, vector<2x128xf32> -> vector<2x128xf32>
    %668 = arith.addf %664, %667 : vector<2x128xf32>
    %669 = math.tanh %668 : vector<2x128xf32>
    %c0_284 = arith.constant 0 : index
    %c0_285 = arith.constant 0 : index
    %670 = vector.load %arg6[%c0_284, %c0_285] : memref<128x8xbf16, #tpu.memory_space<vmem>>, vector<128x8xbf16>
    %671 = arith.truncf %669 : vector<2x128xf32> to vector<2x128xbf16>
    %cst_286 = arith.constant dense<0.000000e+00> : vector<2x8xf32>
    %672 = tpu.matmul %671, %670, %cst_286 {dimension_numbers = #tpu.dot_dimension_numbers<[1], [0], [0], [1], [0, 0, 1, 1], [], []>} : vector<2x128xbf16>, vector<128x8xbf16>, vector<2x8xf32> -> vector<2x8xf32>
    %673 = arith.addf %672, %2 : vector<2x8xf32>
    %cst_287 = arith.constant dense<0xFF800000> : vector<2xf32>
    %674 = vector.multi_reduction <maximumf>, %673, %cst_287 [1] : vector<2x8xf32> to vector<2xf32>
    %675 = vector.shape_cast %674 : vector<2xf32> to vector<2x1xf32>
    %676 = vector.broadcast %675 : vector<2x1xf32> to vector<2x8xf32>
    %677 = arith.subf %673, %676 : vector<2x8xf32>
    %678 = math.exp %677 : vector<2x8xf32>
    %cst_288 = arith.constant dense<0.000000e+00> : vector<2xf32>
    %679 = vector.multi_reduction <add>, %678, %cst_288 [1] : vector<2x8xf32> to vector<2xf32>
    %680 = vector.shape_cast %679 : vector<2xf32> to vector<2x1xf32>
    %681 = tpu.reciprocal %680 {approx = true} : vector<2x1xf32> -> vector<2x1xf32>
    %682 = vector.broadcast %681 : vector<2x1xf32> to vector<2x8xf32>
    %683 = arith.mulf %678, %682 : vector<2x8xf32>
    %684 = vector.shape_cast %683 : vector<2x8xf32> to vector<2x1x8xf32>
    "tpu.trace_start"() <{level = 10 : i32, message = "bqt,bte->bqe"}> : () -> ()
    %cst_289 = arith.constant dense<0.000000e+00> : vector<2x1x32xf32>
    %685 = tpu.matmul %684, %0, %cst_289 {dimension_numbers = #tpu.dot_dimension_numbers<[2], [1], [1], [2], [0, 0, 0, 1, 1, 2], [0], [0]>} : vector<2x1x8xf32>, vector<2x8x32xf32>, vector<2x1x32xf32> -> vector<2x1x32xf32>
    "tpu.trace_stop"() : () -> ()
    %686 = vector.shape_cast %685 : vector<2x1x32xf32> to vector<2x32xf32>
    %687 = arith.addf %587, %683 : vector<2x8xf32>
    %688 = tpu.concatenate %659, %686, %610 in 1 : vector<2x32xf32>, vector<2x32xf32>, vector<2x32xf32> -> vector<2x96xf32>
    %c0_290 = arith.constant 0 : index
    %c0_291 = arith.constant 0 : index
    %689 = vector.load %arg11[%c0_290, %c0_291] : memref<96x128xbf16, #tpu.memory_space<vmem>>, vector<96x128xbf16>
    %c0_292 = arith.constant 0 : index
    %c0_293 = arith.constant 0 : index
    %690 = vector.load %arg12[%c0_292, %c0_293] : memref<1x128xf32, #tpu.memory_space<vmem>>, vector<1x128xf32>
    %691 = arith.truncf %688 : vector<2x96xf32> to vector<2x96xbf16>
    %cst_294 = arith.constant dense<0.000000e+00> : vector<2x128xf32>
    %692 = tpu.matmul %691, %689, %cst_294 {dimension_numbers = #tpu.dot_dimension_numbers<[1], [0], [0], [1], [0, 0, 1, 1], [], []>} : vector<2x96xbf16>, vector<96x128xbf16>, vector<2x128xf32> -> vector<2x128xf32>
    %693 = vector.broadcast %690 : vector<1x128xf32> to vector<2x128xf32>
    %694 = arith.addf %692, %693 : vector<2x128xf32>
    %695 = math.tanh %694 : vector<2x128xf32>
    %696 = arith.negf %694 : vector<2x128xf32>
    %697 = math.exp %696 : vector<2x128xf32>
    %cst_295 = arith.constant 1.000000e+00 : f32
    %698 = vector.broadcast %cst_295 : f32 to vector<2x128xf32>
    %699 = arith.addf %698, %697 : vector<2x128xf32>
    %700 = arith.divf %698, %699 : vector<2x128xf32>
    %701 = arith.select %14, %695, %700 : vector<2x128xi1>, vector<2x128xf32>
    %702 = vector.extract_strided_slice %701 {offsets = [0, 0], sizes = [2, 32], strides = [1, 1]} : vector<2x128xf32> to vector<2x32xf32>
    %703 = vector.extract_strided_slice %701 {offsets = [0, 32], sizes = [2, 32], strides = [1, 1]} : vector<2x128xf32> to vector<2x32xf32>
    %704 = vector.extract_strided_slice %701 {offsets = [0, 64], sizes = [2, 32], strides = [1, 1]} : vector<2x128xf32> to vector<2x32xf32>
    %705 = vector.extract_strided_slice %701 {offsets = [0, 96], sizes = [2, 32], strides = [1, 1]} : vector<2x128xf32> to vector<2x32xf32>
    %706 = arith.mulf %703, %608 : vector<2x32xf32>
    %707 = arith.mulf %702, %704 : vector<2x32xf32>
    %708 = arith.addf %706, %707 : vector<2x32xf32>
    %709 = math.tanh %708 : vector<2x32xf32>
    %710 = arith.mulf %705, %709 : vector<2x32xf32>
    %711 = tpu.concatenate %710, %686 in 1 : vector<2x32xf32>, vector<2x32xf32> -> vector<2x64xf32>
    %c0_296 = arith.constant 0 : index
    %c0_297 = arith.constant 0 : index
    %712 = vector.load %arg13[%c0_296, %c0_297] : memref<64x128xbf16, #tpu.memory_space<vmem>>, vector<64x128xbf16>
    %713 = arith.truncf %711 : vector<2x64xf32> to vector<2x64xbf16>
    %cst_298 = arith.constant dense<0.000000e+00> : vector<2x128xf32>
    %714 = tpu.matmul %713, %712, %cst_298 {dimension_numbers = #tpu.dot_dimension_numbers<[1], [0], [0], [1], [0, 0, 1, 1], [], []>} : vector<2x64xbf16>, vector<64x128xbf16>, vector<2x128xf32> -> vector<2x128xf32>
    %c0_299 = arith.constant 0 : index
    %c0_300 = arith.constant 0 : index
    %715 = vector.load %arg14[%c0_299, %c0_300] : memref<1x128xf32, #tpu.memory_space<vmem>>, vector<1x128xf32>
    %716 = vector.broadcast %715 : vector<1x128xf32> to vector<2x128xf32>
    %717 = arith.addf %714, %716 : vector<2x128xf32>
    %718 = tpu.concatenate %15, %683, %16 in 1 : vector<2x81xf32>, vector<2x8xf32>, vector<2x39xf32> -> vector<2x128xf32>
    %719 = arith.addf %717, %718 : vector<2x128xf32>
    %720 = arith.index_cast %c6_i32 : i32 to index
    %c0_301 = arith.constant 0 : index
    %c0_302 = arith.constant 0 : index
    %721 = vector.load %arg15[%720, %c0_301, %c0_302] : memref<10x2x128xf32, #tpu.memory_space<vmem>>, vector<1x2x128xf32>
    %722 = vector.shape_cast %721 : vector<1x2x128xf32> to vector<2x128xf32>
    %723 = vector.shape_cast %719 : vector<2x128xf32> to vector<1x2x128xf32>
    tpu.vector_store %arg15[%720, %c0_301, %c0_302], %723 {strides = array<i32>} : memref<10x2x128xf32, #tpu.memory_space<vmem>>, vector<1x2x128xf32>,
    %c7_i32 = arith.constant 7 : i32
    %724 = arith.index_cast %c7_i32 : i32 to index
    %c0_303 = arith.constant 0 : index
    %c0_304 = arith.constant 0 : index
    %725 = vector.load %arg0[%724, %c0_303, %c0_304] : memref<10x2x80xf32, #tpu.memory_space<vmem>>, vector<1x2x80xf32>
    %726 = vector.shape_cast %725 : vector<1x2x80xf32> to vector<2x80xf32>
    %c0_305 = arith.constant 0 : index
    %c0_306 = arith.constant 0 : index
    %727 = vector.load %arg7[%c0_305, %c0_306] : memref<80x32xbf16, #tpu.memory_space<vmem>>, vector<80x32xbf16>
    %728 = arith.truncf %726 : vector<2x80xf32> to vector<2x80xbf16>
    %cst_307 = arith.constant dense<0.000000e+00> : vector<2x32xf32>
    %729 = tpu.matmul %728, %727, %cst_307 {dimension_numbers = #tpu.dot_dimension_numbers<[1], [0], [0], [1], [0, 0, 1, 1], [], []>} : vector<2x80xbf16>, vector<80x32xbf16>, vector<2x32xf32> -> vector<2x32xf32>
    %cst_308 = arith.constant 0.000000e+00 : f32
    %730 = vector.broadcast %cst_308 : f32 to vector<2x32xf32>
    %731 = arith.maximumf %729, %730 : vector<2x32xf32>
    %c0_309 = arith.constant 0 : index
    %c0_310 = arith.constant 0 : index
    %732 = vector.load %arg8[%c0_309, %c0_310] : memref<32x32xbf16, #tpu.memory_space<vmem>>, vector<32x32xbf16>
    %733 = arith.truncf %731 : vector<2x32xf32> to vector<2x32xbf16>
    %cst_311 = arith.constant dense<0.000000e+00> : vector<2x32xf32>
    %734 = tpu.matmul %733, %732, %cst_311 {dimension_numbers = #tpu.dot_dimension_numbers<[1], [0], [0], [1], [0, 0, 1, 1], [], []>} : vector<2x32xbf16>, vector<32x32xbf16>, vector<2x32xf32> -> vector<2x32xf32>
    %cst_312 = arith.constant 0.000000e+00 : f32
    %735 = vector.broadcast %cst_312 : f32 to vector<2x32xf32>
    %736 = arith.maximumf %734, %735 : vector<2x32xf32>
    %737 = tpu.concatenate %736, %686, %659 in 1 : vector<2x32xf32>, vector<2x32xf32>, vector<2x32xf32> -> vector<2x96xf32>
    %c0_313 = arith.constant 0 : index
    %c0_314 = arith.constant 0 : index
    %738 = vector.load %arg9[%c0_313, %c0_314] : memref<96x128xbf16, #tpu.memory_space<vmem>>, vector<96x128xbf16>
    %c0_315 = arith.constant 0 : index
    %c0_316 = arith.constant 0 : index
    %739 = vector.load %arg10[%c0_315, %c0_316] : memref<1x128xf32, #tpu.memory_space<vmem>>, vector<1x128xf32>
    %740 = arith.truncf %737 : vector<2x96xf32> to vector<2x96xbf16>
    %cst_317 = arith.constant dense<0.000000e+00> : vector<2x128xf32>
    %741 = tpu.matmul %740, %738, %cst_317 {dimension_numbers = #tpu.dot_dimension_numbers<[1], [0], [0], [1], [0, 0, 1, 1], [], []>} : vector<2x96xbf16>, vector<96x128xbf16>, vector<2x128xf32> -> vector<2x128xf32>
    %742 = vector.broadcast %739 : vector<1x128xf32> to vector<2x128xf32>
    %743 = arith.addf %741, %742 : vector<2x128xf32>
    %744 = math.tanh %743 : vector<2x128xf32>
    %745 = arith.negf %743 : vector<2x128xf32>
    %746 = math.exp %745 : vector<2x128xf32>
    %cst_318 = arith.constant 1.000000e+00 : f32
    %747 = vector.broadcast %cst_318 : f32 to vector<2x128xf32>
    %748 = arith.addf %747, %746 : vector<2x128xf32>
    %749 = arith.divf %747, %748 : vector<2x128xf32>
    %750 = arith.select %8, %744, %749 : vector<2x128xi1>, vector<2x128xf32>
    %751 = vector.extract_strided_slice %750 {offsets = [0, 0], sizes = [2, 32], strides = [1, 1]} : vector<2x128xf32> to vector<2x32xf32>
    %752 = vector.extract_strided_slice %750 {offsets = [0, 32], sizes = [2, 32], strides = [1, 1]} : vector<2x128xf32> to vector<2x32xf32>
    %753 = vector.extract_strided_slice %750 {offsets = [0, 64], sizes = [2, 32], strides = [1, 1]} : vector<2x128xf32> to vector<2x32xf32>
    %754 = vector.extract_strided_slice %750 {offsets = [0, 96], sizes = [2, 32], strides = [1, 1]} : vector<2x128xf32> to vector<2x32xf32>
    %755 = arith.mulf %752, %657 : vector<2x32xf32>
    %756 = arith.mulf %751, %753 : vector<2x32xf32>
    %757 = arith.addf %755, %756 : vector<2x32xf32>
    %758 = math.tanh %757 : vector<2x32xf32>
    %759 = arith.mulf %754, %758 : vector<2x32xf32>
    %760 = tpu.concatenate %683, %687 in 1 : vector<2x8xf32>, vector<2x8xf32> -> vector<2x16xf32>
    %c0_319 = arith.constant 0 : index
    %c0_320 = arith.constant 0 : index
    %761 = vector.load %arg5[%c0_319, %c0_320] : memref<32x128xbf16, #tpu.memory_space<vmem>>, vector<32x128xbf16>
    %762 = arith.truncf %759 : vector<2x32xf32> to vector<2x32xbf16>
    %cst_321 = arith.constant dense<0.000000e+00> : vector<2x128xf32>
    %763 = tpu.matmul %762, %761, %cst_321 {dimension_numbers = #tpu.dot_dimension_numbers<[1], [0], [0], [1], [0, 0, 1, 1], [], []>} : vector<2x32xbf16>, vector<32x128xbf16>, vector<2x128xf32> -> vector<2x128xf32>
    %764 = arith.addf %763, %1 : vector<2x128xf32>
    %c0_322 = arith.constant 0 : index
    %c0_323 = arith.constant 0 : index
    %765 = vector.load %arg4[%c0_322, %c0_323] : memref<16x128xbf16, #tpu.memory_space<vmem>>, vector<16x128xbf16>
    %766 = arith.truncf %760 : vector<2x16xf32> to vector<2x16xbf16>
    %cst_324 = arith.constant dense<0.000000e+00> : vector<2x128xf32>
    %767 = tpu.matmul %766, %765, %cst_324 {dimension_numbers = #tpu.dot_dimension_numbers<[1], [0], [0], [1], [0, 0, 1, 1], [], []>} : vector<2x16xbf16>, vector<16x128xbf16>, vector<2x128xf32> -> vector<2x128xf32>
    %768 = arith.addf %764, %767 : vector<2x128xf32>
    %769 = math.tanh %768 : vector<2x128xf32>
    %c0_325 = arith.constant 0 : index
    %c0_326 = arith.constant 0 : index
    %770 = vector.load %arg6[%c0_325, %c0_326] : memref<128x8xbf16, #tpu.memory_space<vmem>>, vector<128x8xbf16>
    %771 = arith.truncf %769 : vector<2x128xf32> to vector<2x128xbf16>
    %cst_327 = arith.constant dense<0.000000e+00> : vector<2x8xf32>
    %772 = tpu.matmul %771, %770, %cst_327 {dimension_numbers = #tpu.dot_dimension_numbers<[1], [0], [0], [1], [0, 0, 1, 1], [], []>} : vector<2x128xbf16>, vector<128x8xbf16>, vector<2x8xf32> -> vector<2x8xf32>
    %773 = arith.addf %772, %2 : vector<2x8xf32>
    %cst_328 = arith.constant dense<0xFF800000> : vector<2xf32>
    %774 = vector.multi_reduction <maximumf>, %773, %cst_328 [1] : vector<2x8xf32> to vector<2xf32>
    %775 = vector.shape_cast %774 : vector<2xf32> to vector<2x1xf32>
    %776 = vector.broadcast %775 : vector<2x1xf32> to vector<2x8xf32>
    %777 = arith.subf %773, %776 : vector<2x8xf32>
    %778 = math.exp %777 : vector<2x8xf32>
    %cst_329 = arith.constant dense<0.000000e+00> : vector<2xf32>
    %779 = vector.multi_reduction <add>, %778, %cst_329 [1] : vector<2x8xf32> to vector<2xf32>
    %780 = vector.shape_cast %779 : vector<2xf32> to vector<2x1xf32>
    %781 = tpu.reciprocal %780 {approx = true} : vector<2x1xf32> -> vector<2x1xf32>
    %782 = vector.broadcast %781 : vector<2x1xf32> to vector<2x8xf32>
    %783 = arith.mulf %778, %782 : vector<2x8xf32>
    %784 = vector.shape_cast %783 : vector<2x8xf32> to vector<2x1x8xf32>
    "tpu.trace_start"() <{level = 10 : i32, message = "bqt,bte->bqe"}> : () -> ()
    %cst_330 = arith.constant dense<0.000000e+00> : vector<2x1x32xf32>
    %785 = tpu.matmul %784, %0, %cst_330 {dimension_numbers = #tpu.dot_dimension_numbers<[2], [1], [1], [2], [0, 0, 0, 1, 1, 2], [0], [0]>} : vector<2x1x8xf32>, vector<2x8x32xf32>, vector<2x1x32xf32> -> vector<2x1x32xf32>
    "tpu.trace_stop"() : () -> ()
    %786 = vector.shape_cast %785 : vector<2x1x32xf32> to vector<2x32xf32>
    %787 = arith.addf %687, %783 : vector<2x8xf32>
    %788 = tpu.concatenate %759, %786, %710 in 1 : vector<2x32xf32>, vector<2x32xf32>, vector<2x32xf32> -> vector<2x96xf32>
    %c0_331 = arith.constant 0 : index
    %c0_332 = arith.constant 0 : index
    %789 = vector.load %arg11[%c0_331, %c0_332] : memref<96x128xbf16, #tpu.memory_space<vmem>>, vector<96x128xbf16>
    %c0_333 = arith.constant 0 : index
    %c0_334 = arith.constant 0 : index
    %790 = vector.load %arg12[%c0_333, %c0_334] : memref<1x128xf32, #tpu.memory_space<vmem>>, vector<1x128xf32>
    %791 = arith.truncf %788 : vector<2x96xf32> to vector<2x96xbf16>
    %cst_335 = arith.constant dense<0.000000e+00> : vector<2x128xf32>
    %792 = tpu.matmul %791, %789, %cst_335 {dimension_numbers = #tpu.dot_dimension_numbers<[1], [0], [0], [1], [0, 0, 1, 1], [], []>} : vector<2x96xbf16>, vector<96x128xbf16>, vector<2x128xf32> -> vector<2x128xf32>
    %793 = vector.broadcast %790 : vector<1x128xf32> to vector<2x128xf32>
    %794 = arith.addf %792, %793 : vector<2x128xf32>
    %795 = math.tanh %794 : vector<2x128xf32>
    %796 = arith.negf %794 : vector<2x128xf32>
    %797 = math.exp %796 : vector<2x128xf32>
    %cst_336 = arith.constant 1.000000e+00 : f32
    %798 = vector.broadcast %cst_336 : f32 to vector<2x128xf32>
    %799 = arith.addf %798, %797 : vector<2x128xf32>
    %800 = arith.divf %798, %799 : vector<2x128xf32>
    %801 = arith.select %14, %795, %800 : vector<2x128xi1>, vector<2x128xf32>
    %802 = vector.extract_strided_slice %801 {offsets = [0, 0], sizes = [2, 32], strides = [1, 1]} : vector<2x128xf32> to vector<2x32xf32>
    %803 = vector.extract_strided_slice %801 {offsets = [0, 32], sizes = [2, 32], strides = [1, 1]} : vector<2x128xf32> to vector<2x32xf32>
    %804 = vector.extract_strided_slice %801 {offsets = [0, 64], sizes = [2, 32], strides = [1, 1]} : vector<2x128xf32> to vector<2x32xf32>
    %805 = vector.extract_strided_slice %801 {offsets = [0, 96], sizes = [2, 32], strides = [1, 1]} : vector<2x128xf32> to vector<2x32xf32>
    %806 = arith.mulf %803, %708 : vector<2x32xf32>
    %807 = arith.mulf %802, %804 : vector<2x32xf32>
    %808 = arith.addf %806, %807 : vector<2x32xf32>
    %809 = math.tanh %808 : vector<2x32xf32>
    %810 = arith.mulf %805, %809 : vector<2x32xf32>
    %811 = tpu.concatenate %810, %786 in 1 : vector<2x32xf32>, vector<2x32xf32> -> vector<2x64xf32>
    %c0_337 = arith.constant 0 : index
    %c0_338 = arith.constant 0 : index
    %812 = vector.load %arg13[%c0_337, %c0_338] : memref<64x128xbf16, #tpu.memory_space<vmem>>, vector<64x128xbf16>
    %813 = arith.truncf %811 : vector<2x64xf32> to vector<2x64xbf16>
    %cst_339 = arith.constant dense<0.000000e+00> : vector<2x128xf32>
    %814 = tpu.matmul %813, %812, %cst_339 {dimension_numbers = #tpu.dot_dimension_numbers<[1], [0], [0], [1], [0, 0, 1, 1], [], []>} : vector<2x64xbf16>, vector<64x128xbf16>, vector<2x128xf32> -> vector<2x128xf32>
    %c0_340 = arith.constant 0 : index
    %c0_341 = arith.constant 0 : index
    %815 = vector.load %arg14[%c0_340, %c0_341] : memref<1x128xf32, #tpu.memory_space<vmem>>, vector<1x128xf32>
    %816 = vector.broadcast %815 : vector<1x128xf32> to vector<2x128xf32>
    %817 = arith.addf %814, %816 : vector<2x128xf32>
    %818 = tpu.concatenate %15, %783, %16 in 1 : vector<2x81xf32>, vector<2x8xf32>, vector<2x39xf32> -> vector<2x128xf32>
    %819 = arith.addf %817, %818 : vector<2x128xf32>
    %820 = arith.index_cast %c7_i32 : i32 to index
    %c0_342 = arith.constant 0 : index
    %c0_343 = arith.constant 0 : index
    %821 = vector.load %arg15[%820, %c0_342, %c0_343] : memref<10x2x128xf32, #tpu.memory_space<vmem>>, vector<1x2x128xf32>
    %822 = vector.shape_cast %821 : vector<1x2x128xf32> to vector<2x128xf32>
    %823 = vector.shape_cast %819 : vector<2x128xf32> to vector<1x2x128xf32>
    tpu.vector_store %arg15[%820, %c0_342, %c0_343], %823 {strides = array<i32>} : memref<10x2x128xf32, #tpu.memory_space<vmem>>, vector<1x2x128xf32>,
    %c8_i32 = arith.constant 8 : i32
    %824 = arith.index_cast %c8_i32 : i32 to index
    %c0_344 = arith.constant 0 : index
    %c0_345 = arith.constant 0 : index
    %825 = vector.load %arg0[%824, %c0_344, %c0_345] : memref<10x2x80xf32, #tpu.memory_space<vmem>>, vector<1x2x80xf32>
    %826 = vector.shape_cast %825 : vector<1x2x80xf32> to vector<2x80xf32>
    %c0_346 = arith.constant 0 : index
    %c0_347 = arith.constant 0 : index
    %827 = vector.load %arg7[%c0_346, %c0_347] : memref<80x32xbf16, #tpu.memory_space<vmem>>, vector<80x32xbf16>
    %828 = arith.truncf %826 : vector<2x80xf32> to vector<2x80xbf16>
    %cst_348 = arith.constant dense<0.000000e+00> : vector<2x32xf32>
    %829 = tpu.matmul %828, %827, %cst_348 {dimension_numbers = #tpu.dot_dimension_numbers<[1], [0], [0], [1], [0, 0, 1, 1], [], []>} : vector<2x80xbf16>, vector<80x32xbf16>, vector<2x32xf32> -> vector<2x32xf32>
    %cst_349 = arith.constant 0.000000e+00 : f32
    %830 = vector.broadcast %cst_349 : f32 to vector<2x32xf32>
    %831 = arith.maximumf %829, %830 : vector<2x32xf32>
    %c0_350 = arith.constant 0 : index
    %c0_351 = arith.constant 0 : index
    %832 = vector.load %arg8[%c0_350, %c0_351] : memref<32x32xbf16, #tpu.memory_space<vmem>>, vector<32x32xbf16>
    %833 = arith.truncf %831 : vector<2x32xf32> to vector<2x32xbf16>
    %cst_352 = arith.constant dense<0.000000e+00> : vector<2x32xf32>
    %834 = tpu.matmul %833, %832, %cst_352 {dimension_numbers = #tpu.dot_dimension_numbers<[1], [0], [0], [1], [0, 0, 1, 1], [], []>} : vector<2x32xbf16>, vector<32x32xbf16>, vector<2x32xf32> -> vector<2x32xf32>
    %cst_353 = arith.constant 0.000000e+00 : f32
    %835 = vector.broadcast %cst_353 : f32 to vector<2x32xf32>
    %836 = arith.maximumf %834, %835 : vector<2x32xf32>
    %837 = tpu.concatenate %836, %786, %759 in 1 : vector<2x32xf32>, vector<2x32xf32>, vector<2x32xf32> -> vector<2x96xf32>
    %c0_354 = arith.constant 0 : index
    %c0_355 = arith.constant 0 : index
    %838 = vector.load %arg9[%c0_354, %c0_355] : memref<96x128xbf16, #tpu.memory_space<vmem>>, vector<96x128xbf16>
    %c0_356 = arith.constant 0 : index
    %c0_357 = arith.constant 0 : index
    %839 = vector.load %arg10[%c0_356, %c0_357] : memref<1x128xf32, #tpu.memory_space<vmem>>, vector<1x128xf32>
    %840 = arith.truncf %837 : vector<2x96xf32> to vector<2x96xbf16>
    %cst_358 = arith.constant dense<0.000000e+00> : vector<2x128xf32>
    %841 = tpu.matmul %840, %838, %cst_358 {dimension_numbers = #tpu.dot_dimension_numbers<[1], [0], [0], [1], [0, 0, 1, 1], [], []>} : vector<2x96xbf16>, vector<96x128xbf16>, vector<2x128xf32> -> vector<2x128xf32>
    %842 = vector.broadcast %839 : vector<1x128xf32> to vector<2x128xf32>
    %843 = arith.addf %841, %842 : vector<2x128xf32>
    %844 = math.tanh %843 : vector<2x128xf32>
    %845 = arith.negf %843 : vector<2x128xf32>
    %846 = math.exp %845 : vector<2x128xf32>
    %cst_359 = arith.constant 1.000000e+00 : f32
    %847 = vector.broadcast %cst_359 : f32 to vector<2x128xf32>
    %848 = arith.addf %847, %846 : vector<2x128xf32>
    %849 = arith.divf %847, %848 : vector<2x128xf32>
    %850 = arith.select %8, %844, %849 : vector<2x128xi1>, vector<2x128xf32>
    %851 = vector.extract_strided_slice %850 {offsets = [0, 0], sizes = [2, 32], strides = [1, 1]} : vector<2x128xf32> to vector<2x32xf32>
    %852 = vector.extract_strided_slice %850 {offsets = [0, 32], sizes = [2, 32], strides = [1, 1]} : vector<2x128xf32> to vector<2x32xf32>
    %853 = vector.extract_strided_slice %850 {offsets = [0, 64], sizes = [2, 32], strides = [1, 1]} : vector<2x128xf32> to vector<2x32xf32>
    %854 = vector.extract_strided_slice %850 {offsets = [0, 96], sizes = [2, 32], strides = [1, 1]} : vector<2x128xf32> to vector<2x32xf32>
    %855 = arith.mulf %852, %757 : vector<2x32xf32>
    %856 = arith.mulf %851, %853 : vector<2x32xf32>
    %857 = arith.addf %855, %856 : vector<2x32xf32>
    %858 = math.tanh %857 : vector<2x32xf32>
    %859 = arith.mulf %854, %858 : vector<2x32xf32>
    %860 = tpu.concatenate %783, %787 in 1 : vector<2x8xf32>, vector<2x8xf32> -> vector<2x16xf32>
    %c0_360 = arith.constant 0 : index
    %c0_361 = arith.constant 0 : index
    %861 = vector.load %arg5[%c0_360, %c0_361] : memref<32x128xbf16, #tpu.memory_space<vmem>>, vector<32x128xbf16>
    %862 = arith.truncf %859 : vector<2x32xf32> to vector<2x32xbf16>
    %cst_362 = arith.constant dense<0.000000e+00> : vector<2x128xf32>
    %863 = tpu.matmul %862, %861, %cst_362 {dimension_numbers = #tpu.dot_dimension_numbers<[1], [0], [0], [1], [0, 0, 1, 1], [], []>} : vector<2x32xbf16>, vector<32x128xbf16>, vector<2x128xf32> -> vector<2x128xf32>
    %864 = arith.addf %863, %1 : vector<2x128xf32>
    %c0_363 = arith.constant 0 : index
    %c0_364 = arith.constant 0 : index
    %865 = vector.load %arg4[%c0_363, %c0_364] : memref<16x128xbf16, #tpu.memory_space<vmem>>, vector<16x128xbf16>
    %866 = arith.truncf %860 : vector<2x16xf32> to vector<2x16xbf16>
    %cst_365 = arith.constant dense<0.000000e+00> : vector<2x128xf32>
    %867 = tpu.matmul %866, %865, %cst_365 {dimension_numbers = #tpu.dot_dimension_numbers<[1], [0], [0], [1], [0, 0, 1, 1], [], []>} : vector<2x16xbf16>, vector<16x128xbf16>, vector<2x128xf32> -> vector<2x128xf32>
    %868 = arith.addf %864, %867 : vector<2x128xf32>
    %869 = math.tanh %868 : vector<2x128xf32>
    %c0_366 = arith.constant 0 : index
    %c0_367 = arith.constant 0 : index
    %870 = vector.load %arg6[%c0_366, %c0_367] : memref<128x8xbf16, #tpu.memory_space<vmem>>, vector<128x8xbf16>
    %871 = arith.truncf %869 : vector<2x128xf32> to vector<2x128xbf16>
    %cst_368 = arith.constant dense<0.000000e+00> : vector<2x8xf32>
    %872 = tpu.matmul %871, %870, %cst_368 {dimension_numbers = #tpu.dot_dimension_numbers<[1], [0], [0], [1], [0, 0, 1, 1], [], []>} : vector<2x128xbf16>, vector<128x8xbf16>, vector<2x8xf32> -> vector<2x8xf32>
    %873 = arith.addf %872, %2 : vector<2x8xf32>
    %cst_369 = arith.constant dense<0xFF800000> : vector<2xf32>
    %874 = vector.multi_reduction <maximumf>, %873, %cst_369 [1] : vector<2x8xf32> to vector<2xf32>
    %875 = vector.shape_cast %874 : vector<2xf32> to vector<2x1xf32>
    %876 = vector.broadcast %875 : vector<2x1xf32> to vector<2x8xf32>
    %877 = arith.subf %873, %876 : vector<2x8xf32>
    %878 = math.exp %877 : vector<2x8xf32>
    %cst_370 = arith.constant dense<0.000000e+00> : vector<2xf32>
    %879 = vector.multi_reduction <add>, %878, %cst_370 [1] : vector<2x8xf32> to vector<2xf32>
    %880 = vector.shape_cast %879 : vector<2xf32> to vector<2x1xf32>
    %881 = tpu.reciprocal %880 {approx = true} : vector<2x1xf32> -> vector<2x1xf32>
    %882 = vector.broadcast %881 : vector<2x1xf32> to vector<2x8xf32>
    %883 = arith.mulf %878, %882 : vector<2x8xf32>
    %884 = vector.shape_cast %883 : vector<2x8xf32> to vector<2x1x8xf32>
    "tpu.trace_start"() <{level = 10 : i32, message = "bqt,bte->bqe"}> : () -> ()
    %cst_371 = arith.constant dense<0.000000e+00> : vector<2x1x32xf32>
    %885 = tpu.matmul %884, %0, %cst_371 {dimension_numbers = #tpu.dot_dimension_numbers<[2], [1], [1], [2], [0, 0, 0, 1, 1, 2], [0], [0]>} : vector<2x1x8xf32>, vector<2x8x32xf32>, vector<2x1x32xf32> -> vector<2x1x32xf32>
    "tpu.trace_stop"() : () -> ()
    %886 = vector.shape_cast %885 : vector<2x1x32xf32> to vector<2x32xf32>
    %887 = arith.addf %787, %883 : vector<2x8xf32>
    %888 = tpu.concatenate %859, %886, %810 in 1 : vector<2x32xf32>, vector<2x32xf32>, vector<2x32xf32> -> vector<2x96xf32>
    %c0_372 = arith.constant 0 : index
    %c0_373 = arith.constant 0 : index
    %889 = vector.load %arg11[%c0_372, %c0_373] : memref<96x128xbf16, #tpu.memory_space<vmem>>, vector<96x128xbf16>
    %c0_374 = arith.constant 0 : index
    %c0_375 = arith.constant 0 : index
    %890 = vector.load %arg12[%c0_374, %c0_375] : memref<1x128xf32, #tpu.memory_space<vmem>>, vector<1x128xf32>
    %891 = arith.truncf %888 : vector<2x96xf32> to vector<2x96xbf16>
    %cst_376 = arith.constant dense<0.000000e+00> : vector<2x128xf32>
    %892 = tpu.matmul %891, %889, %cst_376 {dimension_numbers = #tpu.dot_dimension_numbers<[1], [0], [0], [1], [0, 0, 1, 1], [], []>} : vector<2x96xbf16>, vector<96x128xbf16>, vector<2x128xf32> -> vector<2x128xf32>
    %893 = vector.broadcast %890 : vector<1x128xf32> to vector<2x128xf32>
    %894 = arith.addf %892, %893 : vector<2x128xf32>
    %895 = math.tanh %894 : vector<2x128xf32>
    %896 = arith.negf %894 : vector<2x128xf32>
    %897 = math.exp %896 : vector<2x128xf32>
    %cst_377 = arith.constant 1.000000e+00 : f32
    %898 = vector.broadcast %cst_377 : f32 to vector<2x128xf32>
    %899 = arith.addf %898, %897 : vector<2x128xf32>
    %900 = arith.divf %898, %899 : vector<2x128xf32>
    %901 = arith.select %14, %895, %900 : vector<2x128xi1>, vector<2x128xf32>
    %902 = vector.extract_strided_slice %901 {offsets = [0, 0], sizes = [2, 32], strides = [1, 1]} : vector<2x128xf32> to vector<2x32xf32>
    %903 = vector.extract_strided_slice %901 {offsets = [0, 32], sizes = [2, 32], strides = [1, 1]} : vector<2x128xf32> to vector<2x32xf32>
    %904 = vector.extract_strided_slice %901 {offsets = [0, 64], sizes = [2, 32], strides = [1, 1]} : vector<2x128xf32> to vector<2x32xf32>
    %905 = vector.extract_strided_slice %901 {offsets = [0, 96], sizes = [2, 32], strides = [1, 1]} : vector<2x128xf32> to vector<2x32xf32>
    %906 = arith.mulf %903, %808 : vector<2x32xf32>
    %907 = arith.mulf %902, %904 : vector<2x32xf32>
    %908 = arith.addf %906, %907 : vector<2x32xf32>
    %909 = math.tanh %908 : vector<2x32xf32>
    %910 = arith.mulf %905, %909 : vector<2x32xf32>
    %911 = tpu.concatenate %910, %886 in 1 : vector<2x32xf32>, vector<2x32xf32> -> vector<2x64xf32>
    %c0_378 = arith.constant 0 : index
    %c0_379 = arith.constant 0 : index
    %912 = vector.load %arg13[%c0_378, %c0_379] : memref<64x128xbf16, #tpu.memory_space<vmem>>, vector<64x128xbf16>
    %913 = arith.truncf %911 : vector<2x64xf32> to vector<2x64xbf16>
    %cst_380 = arith.constant dense<0.000000e+00> : vector<2x128xf32>
    %914 = tpu.matmul %913, %912, %cst_380 {dimension_numbers = #tpu.dot_dimension_numbers<[1], [0], [0], [1], [0, 0, 1, 1], [], []>} : vector<2x64xbf16>, vector<64x128xbf16>, vector<2x128xf32> -> vector<2x128xf32>
    %c0_381 = arith.constant 0 : index
    %c0_382 = arith.constant 0 : index
    %915 = vector.load %arg14[%c0_381, %c0_382] : memref<1x128xf32, #tpu.memory_space<vmem>>, vector<1x128xf32>
    %916 = vector.broadcast %915 : vector<1x128xf32> to vector<2x128xf32>
    %917 = arith.addf %914, %916 : vector<2x128xf32>
    %918 = tpu.concatenate %15, %883, %16 in 1 : vector<2x81xf32>, vector<2x8xf32>, vector<2x39xf32> -> vector<2x128xf32>
    %919 = arith.addf %917, %918 : vector<2x128xf32>
    %920 = arith.index_cast %c8_i32 : i32 to index
    %c0_383 = arith.constant 0 : index
    %c0_384 = arith.constant 0 : index
    %921 = vector.load %arg15[%920, %c0_383, %c0_384] : memref<10x2x128xf32, #tpu.memory_space<vmem>>, vector<1x2x128xf32>
    %922 = vector.shape_cast %921 : vector<1x2x128xf32> to vector<2x128xf32>
    %923 = vector.shape_cast %919 : vector<2x128xf32> to vector<1x2x128xf32>
    tpu.vector_store %arg15[%920, %c0_383, %c0_384], %923 {strides = array<i32>} : memref<10x2x128xf32, #tpu.memory_space<vmem>>, vector<1x2x128xf32>,
    %c9_i32 = arith.constant 9 : i32
    %924 = arith.index_cast %c9_i32 : i32 to index
    %c0_385 = arith.constant 0 : index
    %c0_386 = arith.constant 0 : index
    %925 = vector.load %arg0[%924, %c0_385, %c0_386] : memref<10x2x80xf32, #tpu.memory_space<vmem>>, vector<1x2x80xf32>
    %926 = vector.shape_cast %925 : vector<1x2x80xf32> to vector<2x80xf32>
    %c0_387 = arith.constant 0 : index
    %c0_388 = arith.constant 0 : index
    %927 = vector.load %arg7[%c0_387, %c0_388] : memref<80x32xbf16, #tpu.memory_space<vmem>>, vector<80x32xbf16>
    %928 = arith.truncf %926 : vector<2x80xf32> to vector<2x80xbf16>
    %cst_389 = arith.constant dense<0.000000e+00> : vector<2x32xf32>
    %929 = tpu.matmul %928, %927, %cst_389 {dimension_numbers = #tpu.dot_dimension_numbers<[1], [0], [0], [1], [0, 0, 1, 1], [], []>} : vector<2x80xbf16>, vector<80x32xbf16>, vector<2x32xf32> -> vector<2x32xf32>
    %cst_390 = arith.constant 0.000000e+00 : f32
    %930 = vector.broadcast %cst_390 : f32 to vector<2x32xf32>
    %931 = arith.maximumf %929, %930 : vector<2x32xf32>
    %c0_391 = arith.constant 0 : index
    %c0_392 = arith.constant 0 : index
    %932 = vector.load %arg8[%c0_391, %c0_392] : memref<32x32xbf16, #tpu.memory_space<vmem>>, vector<32x32xbf16>
    %933 = arith.truncf %931 : vector<2x32xf32> to vector<2x32xbf16>
    %cst_393 = arith.constant dense<0.000000e+00> : vector<2x32xf32>
    %934 = tpu.matmul %933, %932, %cst_393 {dimension_numbers = #tpu.dot_dimension_numbers<[1], [0], [0], [1], [0, 0, 1, 1], [], []>} : vector<2x32xbf16>, vector<32x32xbf16>, vector<2x32xf32> -> vector<2x32xf32>
    %cst_394 = arith.constant 0.000000e+00 : f32
    %935 = vector.broadcast %cst_394 : f32 to vector<2x32xf32>
    %936 = arith.maximumf %934, %935 : vector<2x32xf32>
    %937 = tpu.concatenate %936, %886, %859 in 1 : vector<2x32xf32>, vector<2x32xf32>, vector<2x32xf32> -> vector<2x96xf32>
    %c0_395 = arith.constant 0 : index
    %c0_396 = arith.constant 0 : index
    %938 = vector.load %arg9[%c0_395, %c0_396] : memref<96x128xbf16, #tpu.memory_space<vmem>>, vector<96x128xbf16>
    %c0_397 = arith.constant 0 : index
    %c0_398 = arith.constant 0 : index
    %939 = vector.load %arg10[%c0_397, %c0_398] : memref<1x128xf32, #tpu.memory_space<vmem>>, vector<1x128xf32>
    %940 = arith.truncf %937 : vector<2x96xf32> to vector<2x96xbf16>
    %cst_399 = arith.constant dense<0.000000e+00> : vector<2x128xf32>
    %941 = tpu.matmul %940, %938, %cst_399 {dimension_numbers = #tpu.dot_dimension_numbers<[1], [0], [0], [1], [0, 0, 1, 1], [], []>} : vector<2x96xbf16>, vector<96x128xbf16>, vector<2x128xf32> -> vector<2x128xf32>
    %942 = vector.broadcast %939 : vector<1x128xf32> to vector<2x128xf32>
    %943 = arith.addf %941, %942 : vector<2x128xf32>
    %944 = math.tanh %943 : vector<2x128xf32>
    %945 = arith.negf %943 : vector<2x128xf32>
    %946 = math.exp %945 : vector<2x128xf32>
    %cst_400 = arith.constant 1.000000e+00 : f32
    %947 = vector.broadcast %cst_400 : f32 to vector<2x128xf32>
    %948 = arith.addf %947, %946 : vector<2x128xf32>
    %949 = arith.divf %947, %948 : vector<2x128xf32>
    %950 = arith.select %8, %944, %949 : vector<2x128xi1>, vector<2x128xf32>
    %951 = vector.extract_strided_slice %950 {offsets = [0, 0], sizes = [2, 32], strides = [1, 1]} : vector<2x128xf32> to vector<2x32xf32>
    %952 = vector.extract_strided_slice %950 {offsets = [0, 32], sizes = [2, 32], strides = [1, 1]} : vector<2x128xf32> to vector<2x32xf32>
    %953 = vector.extract_strided_slice %950 {offsets = [0, 64], sizes = [2, 32], strides = [1, 1]} : vector<2x128xf32> to vector<2x32xf32>
    %954 = vector.extract_strided_slice %950 {offsets = [0, 96], sizes = [2, 32], strides = [1, 1]} : vector<2x128xf32> to vector<2x32xf32>
    %955 = arith.mulf %952, %857 : vector<2x32xf32>
    %956 = arith.mulf %951, %953 : vector<2x32xf32>
    %957 = arith.addf %955, %956 : vector<2x32xf32>
    %958 = math.tanh %957 : vector<2x32xf32>
    %959 = arith.mulf %954, %958 : vector<2x32xf32>
    %960 = tpu.concatenate %883, %887 in 1 : vector<2x8xf32>, vector<2x8xf32> -> vector<2x16xf32>
    %c0_401 = arith.constant 0 : index
    %c0_402 = arith.constant 0 : index
    %961 = vector.load %arg5[%c0_401, %c0_402] : memref<32x128xbf16, #tpu.memory_space<vmem>>, vector<32x128xbf16>
    %962 = arith.truncf %959 : vector<2x32xf32> to vector<2x32xbf16>
    %cst_403 = arith.constant dense<0.000000e+00> : vector<2x128xf32>
    %963 = tpu.matmul %962, %961, %cst_403 {dimension_numbers = #tpu.dot_dimension_numbers<[1], [0], [0], [1], [0, 0, 1, 1], [], []>} : vector<2x32xbf16>, vector<32x128xbf16>, vector<2x128xf32> -> vector<2x128xf32>
    %964 = arith.addf %963, %1 : vector<2x128xf32>
    %c0_404 = arith.constant 0 : index
    %c0_405 = arith.constant 0 : index
    %965 = vector.load %arg4[%c0_404, %c0_405] : memref<16x128xbf16, #tpu.memory_space<vmem>>, vector<16x128xbf16>
    %966 = arith.truncf %960 : vector<2x16xf32> to vector<2x16xbf16>
    %cst_406 = arith.constant dense<0.000000e+00> : vector<2x128xf32>
    %967 = tpu.matmul %966, %965, %cst_406 {dimension_numbers = #tpu.dot_dimension_numbers<[1], [0], [0], [1], [0, 0, 1, 1], [], []>} : vector<2x16xbf16>, vector<16x128xbf16>, vector<2x128xf32> -> vector<2x128xf32>
    %968 = arith.addf %964, %967 : vector<2x128xf32>
    %969 = math.tanh %968 : vector<2x128xf32>
    %c0_407 = arith.constant 0 : index
    %c0_408 = arith.constant 0 : index
    %970 = vector.load %arg6[%c0_407, %c0_408] : memref<128x8xbf16, #tpu.memory_space<vmem>>, vector<128x8xbf16>
    %971 = arith.truncf %969 : vector<2x128xf32> to vector<2x128xbf16>
    %cst_409 = arith.constant dense<0.000000e+00> : vector<2x8xf32>
    %972 = tpu.matmul %971, %970, %cst_409 {dimension_numbers = #tpu.dot_dimension_numbers<[1], [0], [0], [1], [0, 0, 1, 1], [], []>} : vector<2x128xbf16>, vector<128x8xbf16>, vector<2x8xf32> -> vector<2x8xf32>
    %973 = arith.addf %972, %2 : vector<2x8xf32>
    %cst_410 = arith.constant dense<0xFF800000> : vector<2xf32>
    %974 = vector.multi_reduction <maximumf>, %973, %cst_410 [1] : vector<2x8xf32> to vector<2xf32>
    %975 = vector.shape_cast %974 : vector<2xf32> to vector<2x1xf32>
    %976 = vector.broadcast %975 : vector<2x1xf32> to vector<2x8xf32>
    %977 = arith.subf %973, %976 : vector<2x8xf32>
    %978 = math.exp %977 : vector<2x8xf32>
    %cst_411 = arith.constant dense<0.000000e+00> : vector<2xf32>
    %979 = vector.multi_reduction <add>, %978, %cst_411 [1] : vector<2x8xf32> to vector<2xf32>
    %980 = vector.shape_cast %979 : vector<2xf32> to vector<2x1xf32>
    %981 = tpu.reciprocal %980 {approx = true} : vector<2x1xf32> -> vector<2x1xf32>
    %982 = vector.broadcast %981 : vector<2x1xf32> to vector<2x8xf32>
    %983 = arith.mulf %978, %982 : vector<2x8xf32>
    %984 = vector.shape_cast %983 : vector<2x8xf32> to vector<2x1x8xf32>
    "tpu.trace_start"() <{level = 10 : i32, message = "bqt,bte->bqe"}> : () -> ()
    %cst_412 = arith.constant dense<0.000000e+00> : vector<2x1x32xf32>
    %985 = tpu.matmul %984, %0, %cst_412 {dimension_numbers = #tpu.dot_dimension_numbers<[2], [1], [1], [2], [0, 0, 0, 1, 1, 2], [0], [0]>} : vector<2x1x8xf32>, vector<2x8x32xf32>, vector<2x1x32xf32> -> vector<2x1x32xf32>
    "tpu.trace_stop"() : () -> ()
    %986 = vector.shape_cast %985 : vector<2x1x32xf32> to vector<2x32xf32>
    %987 = arith.addf %887, %983 : vector<2x8xf32>
    %988 = tpu.concatenate %959, %986, %910 in 1 : vector<2x32xf32>, vector<2x32xf32>, vector<2x32xf32> -> vector<2x96xf32>
    %c0_413 = arith.constant 0 : index
    %c0_414 = arith.constant 0 : index
    %989 = vector.load %arg11[%c0_413, %c0_414] : memref<96x128xbf16, #tpu.memory_space<vmem>>, vector<96x128xbf16>
    %c0_415 = arith.constant 0 : index
    %c0_416 = arith.constant 0 : index
    %990 = vector.load %arg12[%c0_415, %c0_416] : memref<1x128xf32, #tpu.memory_space<vmem>>, vector<1x128xf32>
    %991 = arith.truncf %988 : vector<2x96xf32> to vector<2x96xbf16>
    %cst_417 = arith.constant dense<0.000000e+00> : vector<2x128xf32>
    %992 = tpu.matmul %991, %989, %cst_417 {dimension_numbers = #tpu.dot_dimension_numbers<[1], [0], [0], [1], [0, 0, 1, 1], [], []>} : vector<2x96xbf16>, vector<96x128xbf16>, vector<2x128xf32> -> vector<2x128xf32>
    %993 = vector.broadcast %990 : vector<1x128xf32> to vector<2x128xf32>
    %994 = arith.addf %992, %993 : vector<2x128xf32>
    %995 = math.tanh %994 : vector<2x128xf32>
    %996 = arith.negf %994 : vector<2x128xf32>
    %997 = math.exp %996 : vector<2x128xf32>
    %cst_418 = arith.constant 1.000000e+00 : f32
    %998 = vector.broadcast %cst_418 : f32 to vector<2x128xf32>
    %999 = arith.addf %998, %997 : vector<2x128xf32>
    %1000 = arith.divf %998, %999 : vector<2x128xf32>
    %1001 = arith.select %14, %995, %1000 : vector<2x128xi1>, vector<2x128xf32>
    %1002 = vector.extract_strided_slice %1001 {offsets = [0, 0], sizes = [2, 32], strides = [1, 1]} : vector<2x128xf32> to vector<2x32xf32>
    %1003 = vector.extract_strided_slice %1001 {offsets = [0, 32], sizes = [2, 32], strides = [1, 1]} : vector<2x128xf32> to vector<2x32xf32>
    %1004 = vector.extract_strided_slice %1001 {offsets = [0, 64], sizes = [2, 32], strides = [1, 1]} : vector<2x128xf32> to vector<2x32xf32>
    %1005 = vector.extract_strided_slice %1001 {offsets = [0, 96], sizes = [2, 32], strides = [1, 1]} : vector<2x128xf32> to vector<2x32xf32>
    %1006 = arith.mulf %1003, %908 : vector<2x32xf32>
    %1007 = arith.mulf %1002, %1004 : vector<2x32xf32>
    %1008 = arith.addf %1006, %1007 : vector<2x32xf32>
    %1009 = math.tanh %1008 : vector<2x32xf32>
    %1010 = arith.mulf %1005, %1009 : vector<2x32xf32>
    %1011 = tpu.concatenate %1010, %986 in 1 : vector<2x32xf32>, vector<2x32xf32> -> vector<2x64xf32>
    %c0_419 = arith.constant 0 : index
    %c0_420 = arith.constant 0 : index
    %1012 = vector.load %arg13[%c0_419, %c0_420] : memref<64x128xbf16, #tpu.memory_space<vmem>>, vector<64x128xbf16>
    %1013 = arith.truncf %1011 : vector<2x64xf32> to vector<2x64xbf16>
    %cst_421 = arith.constant dense<0.000000e+00> : vector<2x128xf32>
    %1014 = tpu.matmul %1013, %1012, %cst_421 {dimension_numbers = #tpu.dot_dimension_numbers<[1], [0], [0], [1], [0, 0, 1, 1], [], []>} : vector<2x64xbf16>, vector<64x128xbf16>, vector<2x128xf32> -> vector<2x128xf32>
    %c0_422 = arith.constant 0 : index
    %c0_423 = arith.constant 0 : index
    %1015 = vector.load %arg14[%c0_422, %c0_423] : memref<1x128xf32, #tpu.memory_space<vmem>>, vector<1x128xf32>
    %1016 = vector.broadcast %1015 : vector<1x128xf32> to vector<2x128xf32>
    %1017 = arith.addf %1014, %1016 : vector<2x128xf32>
    %1018 = tpu.concatenate %15, %983, %16 in 1 : vector<2x81xf32>, vector<2x8xf32>, vector<2x39xf32> -> vector<2x128xf32>
    %1019 = arith.addf %1017, %1018 : vector<2x128xf32>
    %1020 = arith.index_cast %c9_i32 : i32 to index
    %c0_424 = arith.constant 0 : index
    %c0_425 = arith.constant 0 : index
    %1021 = vector.load %arg15[%1020, %c0_424, %c0_425] : memref<10x2x128xf32, #tpu.memory_space<vmem>>, vector<1x2x128xf32>
    %1022 = vector.shape_cast %1021 : vector<1x2x128xf32> to vector<2x128xf32>
    %1023 = vector.shape_cast %1019 : vector<2x128xf32> to vector<1x2x128xf32>
    tpu.vector_store %arg15[%1020, %c0_424, %c0_425], %1023 {strides = array<i32>} : memref<10x2x128xf32, #tpu.memory_space<vmem>>, vector<1x2x128xf32>,
    %c10_i32 = arith.constant 10 : i32
    return
  }
}

</mosaic_0001>

<bundles_post_ra>
// kernel: tile.9
= control target key start
LH: loop header
LB: loop body
LE: loop exit
PB: predicated region body
PF: predicated region fallthrough
CT: control target
= control target key end

     0   :  { %vm260_vm0 = vcmask 1047556   ;;  %vm262_vm1 = vcmask 130048   ;;  %s554_s22 = smov 80   ;;  %s555_s23 = smov 96   ;;  %vm281_vm2 = vcmask 1048448   ;;  %vm323_vm3 = vcmask 786048   ;;  %s615_s0 = inlined_call_operand.vmem [shape: bf16[16,8,16], index: 0, kind: input, shape index: {}]   ;;  %s616_s1 = inlined_call_operand.vmem [shape: bf16[16,128], index: 1, kind: output, shape index: {}]  }
   0x1   :  { %v504_v0 = vld [vmem:[%s615_s0 + $0x38] sm:$0xff]   ;;  %v505_v1 = vld [vmem:[%s615_s0 + $0x30] sm:$0xff]   ;;  %v506_v2 = vld [vmem:[%s615_s0 + $0x28] sm:$0xff]   ;;  %s556_s24 = smov 64   ;;  %s557_s25 = smov 48   ;;  %vm302_vm4 = vcmask 917248  }
   0x2   :  { %v469_v3 = vunpack.c.l.bf16 %v504_v0  ;;  %v470_v4 = vunpack.c.h.bf16 %v504_v0  ;;  %v473_v5 = vunpack.c.l.bf16 %v505_v1  ;;  %v474_v6 = vunpack.c.h.bf16 %v505_v1  ;;  %v507_v7 = vld [vmem:[%s615_s0 + $0x20] sm:$0xff]   ;;  %v508_v8 = vld [vmem:[%s615_s0 + $0x18] sm:$0xff]   ;;  %v509_v9 = vld [vmem:[%s615_s0 + $0x10] sm:$0xff]   ;;  %s558_s26 = smov 32   ;;  %s559_s27 = smov 16  }
   0x3   :  { %v477_v10 = vunpack.c.l.bf16 %v506_v2  ;;  %v478_v11 = vunpack.c.h.bf16 %v506_v2  ;;  %v481_v12 = vunpack.c.l.bf16 %v507_v7  ;;  %v482_v13 = vunpack.c.h.bf16 %v507_v7  ;;  %v510_v14 = vld [vmem:[%s615_s0 + $0x8] sm:$0xff]   ;;  %v496_v15 = vld [vmem:[%s615_s0] sm:$0xff]   ;;  %s553_s0 = smov 112  }
   0x4   :  { %21 = vst [vmem:[#allocation1 + $0x78] sm:$0xff] %v470_v4  ;;  %37 = vst [vmem:[#allocation1 + $0x70] sm:$0xff] %v469_v3  ;;  %v485_v16 = vunpack.c.l.bf16 %v508_v8  ;;  %v486_v17 = vunpack.c.h.bf16 %v508_v8  ;;  %v489_v18 = vunpack.c.l.bf16 %v509_v9  ;;  %v490_v19 = vunpack.c.h.bf16 %v509_v9 }
   0x5   :  { %53 = vst [vmem:[#allocation1 + $0x68] sm:$0xff] %v474_v6  ;;  %69 = vst [vmem:[#allocation1 + $0x60] sm:$0xff] %v473_v5  ;;  %v493_v20 = vunpack.c.l.bf16 %v510_v14  ;;  %v494_v21 = vunpack.c.h.bf16 %v510_v14  ;;  %v497_v22 = vunpack.c.l.bf16 %v496_v15  ;;  %v498_v23 = vunpack.c.h.bf16 %v496_v15 }
   0x6   :  { %85 = vst [vmem:[#allocation1 + $0x58] sm:$0xff] %v478_v11  ;;  %101 = vst [vmem:[#allocation1 + $0x50] sm:$0xff] %v477_v10  ;;  %vm344_vm5 = vcmask 654848   ;;  %vm365_vm6 = vcmask 523648   ;;  %vm386_vm7 = vcmask 392448   ;;  %vm407_vm8 = vcmask 261248  }
   0x7   :  { %117 = vst [vmem:[#allocation1 + $0x48] sm:$0xff] %v482_v13  ;;  %133 = vst [vmem:[#allocation1 + $0x40] sm:$0xff] %v481_v12 }
   0x8   :  { %149 = vst [vmem:[#allocation1 + $0x38] sm:$0xff] %v486_v17  ;;  %165 = vst [vmem:[#allocation1 + $0x30] sm:$0xff] %v485_v16 }
   0x9   :  { %181 = vst [vmem:[#allocation1 + $0x28] sm:$0xff] %v490_v19  ;;  %197 = vst [vmem:[#allocation1 + $0x20] sm:$0xff] %v489_v18 }
   0xa   :  { %213 = vst [vmem:[#allocation1 + $0x18] sm:$0xff] %v494_v21  ;;  %229 = vst [vmem:[#allocation1 + $0x10] sm:$0xff] %v493_v20 }
   0xb   :  { %244 = vst [vmem:[#allocation1 + $0x8] sm:$0xff] %v498_v23  ;;  %257 = vst [vmem:[#allocation1] sm:$0xff] %v497_v22 }
   0xc   :  { %v286_v24 = vld [vmem:[#allocation1 + $0x47] ss:$8 sm:$0xf0]   ;;  %v328_v25 = vld [vmem:[#allocation1 + $0x45] ss:$8 sm:$0xf0]  }
   0xd   :  { %v307_v42 = vld [vmem:[#allocation1 + $0x46] ss:$8 sm:$0xf0]   ;;  %v349_v49 = vld [vmem:[#allocation1 + $0x44] ss:$8 sm:$0xf0]  }
   0xe   :  { %v284_v26 = vld [vmem:[#allocation1 + $0x47] ss:$8 sm:$0xf]   ;;  %v326_v27 = vld [vmem:[#allocation1 + $0x45] ss:$8 sm:$0xf]  }
   0xf   :  { %v288_v29 = vsel %vm260_vm0, %v286_v24, %v284_v26  ;;  %v330_v31 = vsel %vm260_vm0, %v328_v25, %v326_v27  ;;  %v305_v41 = vld [vmem:[#allocation1 + $0x46] ss:$8 sm:$0xf]   ;;  %v347_v48 = vld [vmem:[#allocation1 + $0x44] ss:$8 sm:$0xf]  }
  0x10   :  { %v276_v28 = vld [vmem:[#allocation1 + $0x7] ss:$8 sm:$0xf0]   ;;  %v318_v30 = vld [vmem:[#allocation1 + $0x5] ss:$8 sm:$0xf0]   ;;  %v309_v43 = vsel %vm260_vm0, %v307_v42, %v305_v41  ;;  %v351_v50 = vsel %vm260_vm0, %v349_v49, %v347_v48 }
  0x11   :  { %v297_v37 = vld [vmem:[#allocation1 + $0x6] ss:$8 sm:$0xf0]   ;;  %v339_v45 = vld [vmem:[#allocation1 + $0x4] ss:$8 sm:$0xf0]  }
  0x12   :  { %v274_v32 = vld [vmem:[#allocation1 + $0x7] ss:$8 sm:$0xf]   ;;  %v316_v33 = vld [vmem:[#allocation1 + $0x5] ss:$8 sm:$0xf]  }
  0x13   :  { %v278_v34 = vsel %vm260_vm0, %v276_v28, %v274_v32  ;;  %v320_v35 = vsel %vm260_vm0, %v318_v30, %v316_v33  ;;  %v295_v36 = vld [vmem:[#allocation1 + $0x6] ss:$8 sm:$0xf]   ;;  %v337_v44 = vld [vmem:[#allocation1 + $0x4] ss:$8 sm:$0xf]  }
  0x14   :  { %v518_v38 = vpack.i.bf16 %v288_v29, %v278_v34  ;;  %v528_v39 = vpack.i.bf16 %v330_v31, %v320_v35  ;;  %v299_v40 = vsel %vm260_vm0, %v297_v37, %v295_v36  ;;  %v341_v47 = vsel %vm260_vm0, %v339_v45, %v337_v44  ;;  %v358_v51 = vld [vmem:[#allocation1 + $0x3] ss:$8 sm:$0xf]   ;;  %v379_v58 = vld [vmem:[#allocation1 + $0x2] ss:$8 sm:$0xf]  }
  0x15   :  { %v523_v46 = vpack.i.bf16 %v309_v43, %v299_v40  ;;  %v360_v52 = vld [vmem:[#allocation1 + $0x3] ss:$8 sm:$0xf0]   ;;  %v533_v53 = vpack.i.bf16 %v351_v50, %v341_v47  ;;  %v381_v59 = vld [vmem:[#allocation1 + $0x2] ss:$8 sm:$0xf0]  }
  0x16   :  { %519 = vrot.lane.b32.xlu0 %v518_v38, %s553_s0  ;;  %529 = vrot.lane.b32.xlu1 %v528_v39, %s554_s22  ;;  %v362_v54 = vsel %vm260_vm0, %v360_v52, %v358_v51  ;;  %v368_v55 = vld [vmem:[#allocation1 + $0x43] ss:$8 sm:$0xf]   ;;  %v383_v61 = vsel %vm260_vm0, %v381_v59, %v379_v58  ;;  %v389_v62 = vld [vmem:[#allocation1 + $0x42] ss:$8 sm:$0xf]  }
  0x17   :  { %v370_v56 = vld [vmem:[#allocation1 + $0x43] ss:$8 sm:$0xf0]   ;;  %v391_v63 = vld [vmem:[#allocation1 + $0x42] ss:$8 sm:$0xf0]  }
  0x18   :  { %v372_v57 = vsel %vm260_vm0, %v370_v56, %v368_v55  ;;  %v393_v0 = vsel %vm260_vm0, %v391_v63, %v389_v62  ;;  %v400_v1 = vld [vmem:[#allocation1 + $0x1] ss:$8 sm:$0xf]   ;;  %v258_v8 = vld [vmem:[#allocation1] ss:$8 sm:$0xf]  }
  0x19   :  { %v538_v60 = vpack.i.bf16 %v372_v57, %v362_v54  ;;  %v402_v2 = vld [vmem:[#allocation1 + $0x1] ss:$8 sm:$0xf0]   ;;  %v543_v3 = vpack.i.bf16 %v393_v0, %v383_v61  ;;  %v259_v9 = vld [vmem:[#allocation1] ss:$8 sm:$0xf0]  }
  0x1a   :  { %524 = vrot.lane.b32.xlu0 %v523_v46, %s555_s23  ;;  %534 = vrot.lane.b32.xlu1 %v533_v53, %s556_s24  ;;  %v404_v4 = vsel %vm260_vm0, %v402_v2, %v400_v1  ;;  %v410_v5 = vld [vmem:[#allocation1 + $0x41] ss:$8 sm:$0xf]   ;;  %v261_v11 = vsel %vm260_vm0, %v259_v9, %v258_v8  ;;  %v265_v12 = vld [vmem:[#allocation1 + $0x40] ss:$8 sm:$0xf]  }
  0x1b   :  { %v412_v6 = vld [vmem:[#allocation1 + $0x41] ss:$8 sm:$0xf0]   ;;  %v267_v13 = vld [vmem:[#allocation1 + $0x40] ss:$8 sm:$0xf0]  }
  0x1c   :  { %v414_v7 = vsel %vm260_vm0, %v412_v6, %v410_v5  ;;  %263 = vst.msk [vmem:[#allocation0] sm:$0xff] %vm262_vm1, %v261_v11   ;;  %v269_v14 = vsel %vm260_vm0, %v267_v13, %v265_v12 }
  0x1d   :  { %v548_v10 = vpack.i.bf16 %v414_v7, %v404_v4  ;;  %272 = vst.msk [vmem:[#allocation0 + $0x8] sm:$0xff] %vm262_vm1, %v269_v14  }
  0x1e   :  { %539 = vrot.lane.b32.xlu0 %v538_v60, %s557_s25  ;;  %544 = vrot.lane.b32.xlu1 %v543_v3, %s558_s26 }
  0x22   :  { %549 = vrot.lane.b32.xlu0 %v548_v10, %s559_s27 }
  0x88   :  { %v520_v15 = vpop.permute.xlu0 %519  ;;  %v530_v16 = vpop.permute.xlu1 %529 }
  0x89   :  { %v522_v17 = vunpack.i.h.bf16 %v520_v15  ;;  %v521_v18 = vunpack.i.l.bf16 %v520_v15  ;;  %v532_v25 = vunpack.i.h.bf16 %v530_v16  ;;  %v531_v26 = vunpack.i.l.bf16 %v530_v16 }
  0x8b   :  { %282 = vst.msk [vmem:[#allocation0] sm:$0xff] %vm281_vm2, %v521_v18   ;;  %293 = vst.msk [vmem:[#allocation0 + $0x8] sm:$0xff] %vm281_vm2, %v522_v17  }
  0x8c   :  { %v525_v19 = vpop.permute.xlu0 %524  ;;  %v535_v20 = vpop.permute.xlu1 %534 }
  0x8d   :  { %v527_v21 = vunpack.i.h.bf16 %v525_v19  ;;  %v526_v22 = vunpack.i.l.bf16 %v525_v19  ;;  %v537_v23 = vunpack.i.h.bf16 %v535_v20  ;;  %v536_v24 = vunpack.i.l.bf16 %v535_v20 }
  0x8f   :  { %303 = vst.msk [vmem:[#allocation0] sm:$0xff] %vm302_vm4, %v526_v22   ;;  %314 = vst.msk [vmem:[#allocation0 + $0x8] sm:$0xff] %vm302_vm4, %v527_v21  }
  0x90   :  { %324 = vst.msk [vmem:[#allocation0] sm:$0xff] %vm323_vm3, %v531_v26   ;;  %335 = vst.msk [vmem:[#allocation0 + $0x8] sm:$0xff] %vm323_vm3, %v532_v25   ;;  %v540_v27 = vpop.permute.xlu0 %539  ;;  %v545_v28 = vpop.permute.xlu1 %544 }
  0x91   :  { %345 = vst.msk [vmem:[#allocation0] sm:$0xff] %vm344_vm5, %v536_v24   ;;  %356 = vst.msk [vmem:[#allocation0 + $0x8] sm:$0xff] %vm344_vm5, %v537_v23   ;;  %v542_v29 = vunpack.i.h.bf16 %v540_v27  ;;  %v541_v30 = vunpack.i.l.bf16 %v540_v27  ;;  %v547_v31 = vunpack.i.h.bf16 %v545_v28  ;;  %v546_v32 = vunpack.i.l.bf16 %v545_v28 }
  0x93   :  { %366 = vst.msk [vmem:[#allocation0] sm:$0xff] %vm365_vm6, %v541_v30   ;;  %377 = vst.msk [vmem:[#allocation0 + $0x8] sm:$0xff] %vm365_vm6, %v542_v29  }
  0x94   :  { %387 = vst.msk [vmem:[#allocation0] sm:$0xff] %vm386_vm7, %v546_v32   ;;  %398 = vst.msk [vmem:[#allocation0 + $0x8] sm:$0xff] %vm386_vm7, %v547_v31   ;;  %v550_v33 = vpop.permute.xlu0 %549 }
  0x95   :  { %v552_v34 = vunpack.i.h.bf16 %v550_v33  ;;  %v551_v35 = vunpack.i.l.bf16 %v550_v33 }
  0x97   :  { %408 = vst.msk [vmem:[#allocation0] sm:$0xff] %vm407_vm8, %v551_v35   ;;  %419 = vst.msk [vmem:[#allocation0 + $0x8] sm:$0xff] %vm407_vm8, %v552_v34  }
  0x9e   :  { %v425_v36 = vld [vmem:[#allocation0] sm:$0xff]  ;;  %v431_v37 = vld [vmem:[#allocation0 + $0x8] sm:$0xff] }
  0x9f   :  { %v502_v38 = vpack.c.bf16 %v431_v37, %v425_v36 }
  0xa1   :  { %503 = vst [vmem:[%s616_s1] sm:$0xff] %v502_v38  }

// kernel: tacotron2_forward.3
= control target key start
LH: loop header
LB: loop body
LE: loop exit
PB: predicated region body
PF: predicated region fallthrough
CT: control target
= control target key end

     0   :  { %v1591_v0 = vmov 0   ;;  %v1592_v3 = vmov 0.0   ;;  %v26_v9 = vlaneseq  ;;  %vm45_vm0 = vcmask 326656   ;;  %s1873_s0 = inlined_call_operand.vmem [shape: s32[16,1], index: 0, kind: input, shape index: {}]   ;;  %s1874_s1 = inlined_call_operand.vmem [shape: f32[40,32], index: 1, kind: input, shape index: {}]   ;;  %s1875_s2 = inlined_call_operand.vmem [shape: bf16[3,5,32,32], index: 2, kind: input, shape index: {}]   ;;  %s1876_s3 = inlined_call_operand.vmem [shape: f32[3,1,32], index: 3, kind: input, shape index: {}]   ;;  %s1877_s4 = inlined_call_operand.vmem [shape: f32[3,1,32], index: 4, kind: input, shape index: {}]   ;;  %s1878_s5 = inlined_call_operand.vmem [shape: f32[3,1,32], index: 5, kind: input, shape index: {}]   ;;  %s1879_s6 = inlined_call_operand.vmem [shape: f32[16,32], index: 6, kind: output, shape index: {}]  }
   0x1   :  { %1560 = vset.pattern.permute.xlu0 %v1591_v0  ;;  %v24_v1 = vld [vmem:[%s1873_s0] sm:$0xff]  ;;  %1437 = vmatprep.subr.bf16.mxu1 %v1592_v3  ;;  %v43_v4 = vld [vmem:[%s1874_s1 + $0x18] sm:$0xff]  ;;  %v25_v5 = vld [vmem:[%s1873_s0 + $0x8] sm:$0xff]  ;;  %vm1593_vm3 = vmmov 0   ;;  %vm161_vm4 = vcmask 261120   ;;  %vm137_vm5 = vcmask 1043456  }
   0x2   :  { %v44_v2 = vld [vmem:[%s1874_s1 + $0x20] sm:$0xff]  ;;  %29 = vperm.xlu0 %1560, %v24_v1   ;;  %v42_v6 = vld [vmem:[%s1874_s1 + $0x10] sm:$0xff]  ;;  %v41_v7 = vld [vmem:[%s1874_s1 + $0x8] sm:$0xff]  ;;  %v27_v10 = vand.u32 127, %v26_v9  ;;  %1441 = vmatprep.mubr.msk.bf16.mxu1 %vm1593_vm3, %v1592_v3  ;;  %vm208_vm6 = vcmask 1041408   ;;  %vm343_vm7 = vcmask 1045504  }
   0x3   :  { %1424 = vmatprep.subr.mxu0 %v44_v2  ;;  %v40_v8 = vld [vmem:[%s1874_s1] sm:$0xff]  ;;  %v1561_v14 = vld [vmem:[%s1875_s2 + $0x28] sm:$0xff]   ;;  %v1566_v27 = vld [vmem:[%s1875_s2 + $0x18] sm:$0xff]  }
   0x4   :  { %1425 = vmatpush3.msra.mxu0 %v44_v2  ;;  %v1562_v16 = vld [vmem:[%s1875_s2 + $0x8] sm:$0xff]   ;;  %v1563_v17 = vld [vmem:[%s1875_s2 + $0x20] sm:$0xff]   ;;  %v1568_v32 = vld [vmem:[%s1875_s2 + $0x10] sm:$0xff]  }
   0x5   :  { %1426 = vmatprep.subr.mxu0 %v43_v4  ;;  %1438 = vmatpush3.bf16.msra.mxu1 %v1562_v16  ;;  %v1564_v18 = vld [vmem:[%s1875_s2] sm:$0xff]   ;;  %v1565_v23 = vld [vmem:[%s1875_s2 + $0x48] sm:$0xff]   ;;  %v1569_v37 = vld [vmem:[%s1875_s2 + $0x38] sm:$0xff]  }
   0x6   :  { %1427 = vmatpush3.msra.mxu0 %v43_v4  ;;  %32 = vperm.xlu0 %1560, %v25_v5   ;;  %v1567_v30 = vld [vmem:[%s1875_s2 + $0x40] sm:$0xff]   ;;  %v1570_v41 = vld [vmem:[%s1875_s2 + $0x30] sm:$0xff]   ;;  %v1571_v45 = vld [vmem:[%s1875_s2 + $0x58] sm:$0xff]  }
   0x7   :  { %1428 = vmatprep.subr.mxu0 %v42_v6  ;;  %1439 = vmatprep.subr.bf16.mxu1 %v1592_v3  ;;  %v1572_v46 = vld [vmem:[%s1875_s2 + $0x68] sm:$0xff]   ;;  %v1573_v47 = vld [vmem:[%s1875_s2 + $0x50] sm:$0xff]   ;;  %v1574_v48 = vld [vmem:[%s1875_s2 + $0x60] sm:$0xff]  }
   0x8   :  { %1429 = vmatpush3.msra.mxu0 %v42_v6  ;;  %v1256_v56 = vld [vmem:[%s1876_s3] ss:$0 sm:$0xff] }
   0x9   :  { %1430 = vmatprep.subr.mxu0 %v41_v7  ;;  %1440 = vmatpush3.bf16.msra.mxu1 %v1564_v18 }
   0xa   :  { %1431 = vmatpush3.msra.mxu0 %v41_v7  ;;  %1445 = vmatprep.subr.bf16.mxu1 %v1592_v3 }
   0xb   :  { %1432 = vmatprep.subr.mxu0 %v40_v8 }
   0xc   :  { %1433 = vmatpush3.msra.mxu0 %v40_v8 }
   0xd   :  { %1453 = vmatprep.subr.bf16.mxu0 %v1592_v3 }
  0x7d   :  { %v30_v11 = vpop.permute.xlu0 %29 }
  0x7e   :  { %vm34_vm1 = vcmp.eq.s32.totalorder %v30_v11, %v27_v10 }
  0x7f   :  { %v1252_v12 = vsel %vm34_vm1, 1.0, %v1592_v3 }
  0x80   :  { %1434 = vmatprep.mubr.msk.f32.mxu0 %vm45_vm0, %v1252_v12 }
  0x81   :  { %v33_v13 = vpop.permute.xlu0 %32 }
  0x82   :  { %vm35_vm2 = vcmp.eq.s32.totalorder %v33_v13, %v27_v10  ;;  %v1288_v10 = vld [vmem:[%s1877_s4] ss:$0 sm:$0xff] }
  0x83   :  { %v1253_v15 = vsel %vm35_vm2, 1.0, %v1592_v3 }
  0x84   :  { %1435 = vmatmul.mubr.msk.f32.vlgmr.msra.gmra.mxu0 %vm45_vm0, %v1253_v15 }
  0x85   :  { %1454 = vmatpush3.bf16.msra.mxu0 %v1561_v14  ;;  %1457 = vmatprep.mubr.msk.bf16.mxu0 %vm1593_vm3, %v1592_v3  ;;  %v1289_v14 = vld [vmem:[%s1878_s5] ss:$0 sm:$0xff] }
  0x86   :  { %1455 = vmatprep.subr.bf16.mxu0 %v1592_v3 }
  0x89   :  { %1456 = vmatpush3.bf16.msra.mxu0 %v1563_v17 }
  0x8a   :  { %1469 = vmatprep.subr.bf16.mxu0 %v1592_v3 }
 0x144   :  { %v1436_v19 = vpop.f32.mrf.mxu0 }
 0x145   :  { %v139_v21 = vrot.slane %v1436_v19, 4  ;;  %v210_v31 = vrot.slane %v1436_v19, 6  ;;  %v345_v40 = vrot.slane %v1436_v19, 2 }
 0x146   :  { %v118_v20 = vpop.f32.mrf.mxu0 }
 0x147   :  { %v138_v22 = vrot.slane %v118_v20, 4  ;;  %v284_v24 = vpack.c.bf16 %v1436_v19, %v118_v20  ;;  %v209_v29 = vrot.slane %v118_v20, 6  ;;  %v415_v33 = vsel %vm137_vm5, %v139_v21, 0.0 }
 0x148   :  { %v344_v39 = vrot.slane %v118_v20, 2  ;;  %v349_v43 = vsel %vm343_vm7, %v345_v40, 0.0 }
 0x149   :  { %v143_v25 = vsel %vm137_vm5, 0.0, %v138_v22  ;;  %v140_v26 = vsel %vm137_vm5, %v138_v22, %v139_v21  ;;  %1458 = vmatmul.mubr.msk.bf16.vlgmr.msra.gmra.mxu0 %vm161_vm4, %v284_v24  ;;  %v211_v34 = vsel %vm208_vm6, %v209_v29, %v210_v31  ;;  %v214_v35 = vsel %vm208_vm6, 0.0, %v209_v29 }
 0x14a   :  { %v148_v28 = vpack.c.bf16 %v140_v26, %v143_v25  ;;  %1470 = vmatpush3.bf16.msra.mxu0 %v1565_v23  ;;  %1473 = vmatprep.mubr.msk.bf16.mxu0 %vm1593_vm3, %v1592_v3  ;;  %v421_v36 = vpack.c.bf16 %v415_v33, %v140_v26  ;;  %v220_v38 = vpack.c.bf16 %v211_v34, %v214_v35  ;;  %v1575_v33 = vld [vmem:[%s1875_s2 + $0x78] sm:$0xff]   ;;  %v1576_v34 = vld [vmem:[%s1875_s2 + $0x88] sm:$0xff]  }
 0x14b   :  { %1471 = vmatprep.subr.bf16.mxu0 %v1592_v3  ;;  %v346_v42 = vsel %vm343_vm7, %v344_v39, %v345_v40  ;;  %v1577_v39 = vld [vmem:[%s1875_s2 + $0x70] sm:$0xff]   ;;  %v1578_v40 = vld [vmem:[%s1875_s2 + $0x80] sm:$0xff]  }
 0x14c   :  { %1442 = vmatmul.mubr.msk.bf16.vlgmr.msra.gmra.mxu1 %vm161_vm4, %v148_v28  ;;  %v355_v44 = vpack.c.bf16 %v349_v43, %v346_v42  ;;  %v1579_v43 = vld [vmem:[%s1875_s2 + $0x98] sm:$0xff]  }
 0x14d   :  { %1446 = vmatpush3.bf16.msra.mxu1 %v1566_v27  ;;  %1449 = vmatprep.mubr.msk.bf16.mxu1 %vm1593_vm3, %v1592_v3 }
 0x14e   :  { %1447 = vmatprep.subr.bf16.mxu1 %v1592_v3  ;;  %1472 = vmatpush3.bf16.msra.mxu0 %v1567_v30 }
 0x14f   :  { %1485 = vmatprep.subr.bf16.mxu0 %v1592_v3 }
 0x151   :  { %1448 = vmatpush3.bf16.msra.mxu1 %v1568_v32  ;;  %1474 = vmatmul.mubr.msk.bf16.vlgmr.msra.gmra.mxu0 %vm161_vm4, %v421_v36 }
 0x152   :  { %1461 = vmatprep.subr.bf16.mxu1 %v1592_v3  ;;  %1489 = vmatprep.mubr.msk.bf16.mxu0 %vm1593_vm3, %v1592_v3 }
 0x153   :  { %1486 = vmatpush3.bf16.msra.mxu0 %v1572_v46  ;;  %v1580_v46 = vld [vmem:[%s1875_s2 + $0x90] sm:$0xff]  }
 0x154   :  { %1450 = vmatmul.mubr.msk.bf16.vlgmr.msra.gmra.mxu1 %vm161_vm4, %v220_v38  ;;  %1487 = vmatprep.subr.bf16.mxu0 %v1592_v3 }
 0x155   :  { %1462 = vmatpush3.bf16.msra.mxu1 %v1569_v37  ;;  %1465 = vmatprep.mubr.msk.bf16.mxu1 %vm1593_vm3, %v1592_v3 }
 0x156   :  { %1463 = vmatprep.subr.bf16.mxu1 %v1592_v3 }
 0x157   :  { %1488 = vmatpush3.bf16.msra.mxu0 %v1574_v48 }
 0x158   :  { %1501 = vmatprep.subr.bf16.mxu0 %v1592_v3 }
 0x159   :  { %1464 = vmatpush3.bf16.msra.mxu1 %v1570_v41 }
 0x15a   :  { %1477 = vmatprep.subr.bf16.mxu1 %v1592_v3 }
 0x15c   :  { %1466 = vmatmul.mubr.msk.bf16.vlgmr.msra.gmra.mxu1 %vm161_vm4, %v355_v44 }
 0x15d   :  { %1481 = vmatprep.mubr.msk.bf16.mxu1 %vm1593_vm3, %v1592_v3  ;;  %1478 = vmatpush3.bf16.msra.mxu1 %v1571_v45 }
 0x15e   :  { %1479 = vmatprep.subr.bf16.mxu1 %v1592_v3 }
 0x161   :  { %1480 = vmatpush3.bf16.msra.mxu1 %v1573_v47 }
 0x162   :  { %1493 = vmatprep.subr.bf16.mxu1 %v1592_v3 }
 0x209   :  { %v334_v49 = vpop.f32.mrf.mxu0 }
 0x20b   :  { %v1459_v50 = vpop.f32.mrf.mxu0 }
 0x20c   :  { %v199_v51 = vpop.f32.mrf.mxu1  ;;  %v1582_v50 = vld [vmem:[%s1875_s2 + $0xb8] sm:$0xff]  }
 0x20d   :  { %v337_v52 = vpop.f32.mrf.mxu0  ;;  %v206_v61 = vadd.f32 %v1256_v56, %v199_v51  ;;  %v1583_v51 = vld [vmem:[%s1875_s2 + $0xa0] sm:$0xff]  }
 0x20e   :  { %v1443_v53 = vpop.f32.mrf.mxu1 }
 0x20f   :  { %v1460_v54 = vpop.f32.mrf.mxu0 }
 0x210   :  { %v202_v55 = vpop.f32.mrf.mxu1 }
 0x211   :  { %v471_v57 = vpop.f32.mrf.mxu0  ;;  %v207_v4 = vadd.f32 %v1256_v56, %v202_v55  ;;  %v1291_v55 = vld [vmem:[%s1876_s3 + $0x1] ss:$0 sm:$0xff] }
 0x212   :  { %v1444_v58 = vpop.f32.mrf.mxu1 }
 0x213   :  { %v1475_v59 = vpop.f32.mrf.mxu0 }
 0x214   :  { %v270_v60 = vpop.f32.mrf.mxu1 }
 0x215   :  { %v474_v62 = vpop.f32.mrf.mxu0  ;;  %v277_v0 = vadd.f32 %v270_v60, %v206_v61 }
 0x216   :  { %v1451_v63 = vpop.f32.mrf.mxu1 }
 0x217   :  { %v1476_v1 = vpop.f32.mrf.mxu0  ;;  %v341_v7 = vadd.f32 %v334_v49, %v277_v0  ;;  %v1581_v49 = vld [vmem:[%s1875_s2 + $0xa8] sm:$0xff]  }
 0x218   :  { %v273_v2 = vpop.f32.mrf.mxu1 }
 0x219   :  { %v278_v6 = vadd.f32 %v273_v2, %v207_v4 }
 0x21a   :  { %v1452_v5 = vpop.f32.mrf.mxu1 }
 0x21b   :  { %v342_v13 = vadd.f32 %v337_v52, %v278_v6  ;;  %v1584_v52 = vld [vmem:[%s1875_s2 + $0xb0] sm:$0xff]  }
 0x21c   :  { %v405_v8 = vpop.f32.mrf.mxu1 }
 0x21d   :  { %v412_v9 = vadd.f32 %v405_v8, %v341_v7 }
 0x21e   :  { %v1467_v11 = vpop.f32.mrf.mxu1 }
 0x21f   :  { %v478_v12 = vadd.f32 %v471_v57, %v412_v9 }
 0x220   :  { %v408_v15 = vpop.f32.mrf.mxu1 }
 0x221   :  { %v487_v16 = vmul.f32 %v1288_v10, %v478_v12  ;;  %v413_v17 = vadd.f32 %v408_v15, %v342_v13  ;;  %v1328_v15 = vld [vmem:[%s1877_s4 + $0x1] ss:$0 sm:$0xff] }
 0x222   :  { %v1468_v18 = vpop.f32.mrf.mxu1 }
 0x223   :  { %v496_v19 = vadd.f32 %v1289_v14, %v487_v16  ;;  %v479_v20 = vadd.f32 %v474_v62, %v413_v17  ;;  %v1330_v17 = vld [vmem:[%s1878_s5 + $0x1] ss:$0 sm:$0xff] }
 0x225   :  { %v498_v21 = vmax.f32 %v496_v19, 0.0  ;;  %v488_v22 = vmul.f32 %v1288_v10, %v479_v20 }
 0x227   :  { %v497_v23 = vadd.f32 %v1289_v14, %v488_v22  ;;  %v511_v25 = vrot.slane %v498_v21, 4  ;;  %v581_v26 = vrot.slane %v498_v21, 6  ;;  %v715_v38 = vrot.slane %v498_v21, 2 }
 0x229   :  { %v499_v24 = vmax.f32 %v497_v23, 0.0  ;;  %v516_v30 = vsel %vm137_vm5, 0.0, %v511_v25  ;;  %v586_v32 = vsel %vm208_vm6, 0.0, %v581_v26 }
 0x22b   :  { %v512_v27 = vrot.slane %v499_v24, 4  ;;  %v582_v28 = vrot.slane %v499_v24, 6  ;;  %v716_v37 = vrot.slane %v499_v24, 2  ;;  %v656_v44 = vpack.c.bf16 %v499_v24, %v498_v21 }
 0x22d   :  { %v513_v29 = vsel %vm137_vm5, %v511_v25, %v512_v27  ;;  %v583_v31 = vsel %vm208_vm6, %v581_v26, %v582_v28  ;;  %v717_v41 = vsel %vm343_vm7, %v715_v38, %v716_v37  ;;  %v720_v42 = vsel %vm343_vm7, %v716_v37, 0.0  ;;  %v1585_v37 = vld [vmem:[%s1875_s2 + $0xc8] sm:$0xff]   ;;  %v1586_v38 = vld [vmem:[%s1875_s2 + $0xd8] sm:$0xff]  }
 0x22e   :  { %v522_v35 = vpack.c.bf16 %v513_v29, %v516_v30  ;;  %v592_v36 = vpack.c.bf16 %v583_v31, %v586_v32  ;;  %v726_v45 = vpack.c.bf16 %v720_v42, %v717_v41  ;;  %v786_v47 = vsel %vm137_vm5, %v512_v27, 0.0 }
 0x22f   :  { %v792_v48 = vpack.c.bf16 %v786_v47, %v513_v29  ;;  %v1589_v47 = vld [vmem:[%s1875_s2 + $0xe8] sm:$0xff]  }
 0x230   :  { %1482 = vmatmul.mubr.msk.bf16.vlgmr.msra.gmra.mxu1 %vm161_vm4, %v522_v35  ;;  %1490 = vmatmul.mubr.msk.bf16.vlgmr.msra.gmra.mxu0 %vm161_vm4, %v592_v36 }
 0x231   :  { %1494 = vmatpush3.bf16.msra.mxu1 %v1575_v33  ;;  %1502 = vmatpush3.bf16.msra.mxu0 %v1576_v34 }
 0x232   :  { %1495 = vmatprep.subr.bf16.mxu1 %v1592_v3  ;;  %1503 = vmatprep.subr.bf16.mxu0 %v1592_v3 }
 0x233   :  { %1497 = vmatprep.mubr.msk.bf16.mxu1 %vm1593_vm3, %v1592_v3  ;;  %1505 = vmatprep.mubr.msk.bf16.mxu0 %vm1593_vm3, %v1592_v3 }
 0x235   :  { %1496 = vmatpush3.bf16.msra.mxu1 %v1577_v39  ;;  %1504 = vmatpush3.bf16.msra.mxu0 %v1578_v40 }
 0x236   :  { %1509 = vmatprep.subr.bf16.mxu1 %v1592_v3  ;;  %1517 = vmatprep.subr.bf16.mxu0 %v1592_v3 }
 0x238   :  { %1498 = vmatmul.mubr.msk.bf16.vlgmr.msra.gmra.mxu1 %vm161_vm4, %v656_v44  ;;  %1506 = vmatmul.mubr.msk.bf16.vlgmr.msra.gmra.mxu0 %vm161_vm4, %v726_v45  ;;  %v1588_v44 = vld [vmem:[%s1875_s2 + $0xd0] sm:$0xff]  }
 0x239   :  { %1510 = vmatpush3.bf16.msra.mxu1 %v1579_v43  ;;  %1513 = vmatprep.mubr.msk.bf16.mxu1 %vm1593_vm3, %v1592_v3  ;;  %v1587_v43 = vld [vmem:[%s1875_s2 + $0xc0] sm:$0xff]  }
 0x23a   :  { %1511 = vmatprep.subr.bf16.mxu1 %v1592_v3  ;;  %1521 = vmatprep.mubr.msk.bf16.mxu0 %vm1593_vm3, %v1592_v3 }
 0x23b   :  { %1518 = vmatpush3.bf16.msra.mxu0 %v1581_v49 }
 0x23c   :  { %1519 = vmatprep.subr.bf16.mxu0 %v1592_v3 }
 0x23d   :  { %1512 = vmatpush3.bf16.msra.mxu1 %v1580_v46 }
 0x23e   :  { %1525 = vmatprep.subr.bf16.mxu1 %v1592_v3 }
 0x23f   :  { %1520 = vmatpush3.bf16.msra.mxu0 %v1583_v51 }
 0x240   :  { %1514 = vmatmul.mubr.msk.bf16.vlgmr.msra.gmra.mxu1 %vm161_vm4, %v792_v48  ;;  %1533 = vmatprep.subr.bf16.mxu0 %v1592_v3 }
 0x241   :  { %1529 = vmatprep.mubr.msk.bf16.mxu1 %vm1593_vm3, %v1592_v3  ;;  %1526 = vmatpush3.bf16.msra.mxu1 %v1582_v50  ;;  %v1590_v50 = vld [vmem:[%s1875_s2 + $0xe0] sm:$0xff]  }
 0x242   :  { %1527 = vmatprep.subr.bf16.mxu1 %v1592_v3 }
 0x245   :  { %1528 = vmatpush3.bf16.msra.mxu1 %v1584_v52 }
 0x246   :  { %1541 = vmatprep.subr.bf16.mxu1 %v1592_v3 }
 0x2f0   :  { %v572_v53 = vpop.f32.mrf.mxu1  ;;  %v642_v54 = vpop.f32.mrf.mxu0 }
 0x2f1   :  { %v579_v60 = vadd.f32 %v1291_v55, %v572_v53 }
 0x2f2   :  { %v1483_v56 = vpop.f32.mrf.mxu1  ;;  %v1491_v57 = vpop.f32.mrf.mxu0 }
 0x2f3   :  { %v649_v1 = vadd.f32 %v642_v54, %v579_v60 }
 0x2f4   :  { %v575_v58 = vpop.f32.mrf.mxu1  ;;  %v645_v59 = vpop.f32.mrf.mxu0 }
 0x2f5   :  { %v580_v2 = vadd.f32 %v1291_v55, %v575_v58  ;;  %v1332_v55 = vld [vmem:[%s1876_s3 + $0x2] ss:$0 sm:$0xff] }
 0x2f6   :  { %v1484_v61 = vpop.f32.mrf.mxu1  ;;  %v1492_v62 = vpop.f32.mrf.mxu0 }
 0x2f7   :  { %v650_v9 = vadd.f32 %v645_v59, %v580_v2 }
 0x2f8   :  { %v706_v63 = vpop.f32.mrf.mxu1  ;;  %v776_v0 = vpop.f32.mrf.mxu0 }
 0x2f9   :  { %v713_v6 = vadd.f32 %v706_v63, %v649_v1 }
 0x2fa   :  { %v1499_v4 = vpop.f32.mrf.mxu1  ;;  %v1507_v5 = vpop.f32.mrf.mxu0 }
 0x2fb   :  { %v783_v12 = vadd.f32 %v776_v0, %v713_v6 }
 0x2fc   :  { %v709_v7 = vpop.f32.mrf.mxu1  ;;  %v779_v8 = vpop.f32.mrf.mxu0 }
 0x2fd   :  { %v714_v13 = vadd.f32 %v709_v7, %v650_v9 }
 0x2fe   :  { %v1500_v10 = vpop.f32.mrf.mxu1  ;;  %v1508_v11 = vpop.f32.mrf.mxu0 }
 0x2ff   :  { %v784_v19 = vadd.f32 %v779_v8, %v714_v13 }
 0x300   :  { %v842_v14 = vpop.f32.mrf.mxu1 }
 0x301   :  { %v849_v16 = vadd.f32 %v842_v14, %v783_v12  ;;  %v1369_v14 = vld [vmem:[%s1877_s4 + $0x2] ss:$0 sm:$0xff] }
 0x302   :  { %v1515_v18 = vpop.f32.mrf.mxu1 }
 0x303   :  { %v859_v20 = vmul.f32 %v1328_v15, %v849_v16  ;;  %v1371_v16 = vld [vmem:[%s1878_s5 + $0x2] ss:$0 sm:$0xff] }
 0x304   :  { %v845_v21 = vpop.f32.mrf.mxu1 }
 0x305   :  { %v869_v22 = vadd.f32 %v1330_v17, %v859_v20  ;;  %v850_v23 = vadd.f32 %v845_v21, %v784_v19 }
 0x306   :  { %v1516_v24 = vpop.f32.mrf.mxu1 }
 0x307   :  { %v871_v25 = vmax.f32 %v869_v22, 0.0  ;;  %v860_v26 = vmul.f32 %v1328_v15, %v850_v23 }
 0x309   :  { %v870_v27 = vadd.f32 %v1330_v17, %v860_v26  ;;  %v884_v28 = vrot.slane %v871_v25, 4  ;;  %v954_v29 = vrot.slane %v871_v25, 6  ;;  %v1088_v42 = vrot.slane %v871_v25, 2 }
 0x30b   :  { %v872_v30 = vmax.f32 %v870_v27, 0.0  ;;  %v889_v34 = vsel %vm137_vm5, 0.0, %v884_v28  ;;  %v959_v36 = vsel %vm208_vm6, 0.0, %v954_v29 }
 0x30d   :  { %v885_v31 = vrot.slane %v872_v30, 4  ;;  %v955_v32 = vrot.slane %v872_v30, 6  ;;  %v1089_v41 = vrot.slane %v872_v30, 2  ;;  %v1029_v48 = vpack.c.bf16 %v872_v30, %v871_v25 }
 0x30f   :  { %v886_v33 = vsel %vm137_vm5, %v884_v28, %v885_v31  ;;  %v956_v35 = vsel %vm208_vm6, %v954_v29, %v955_v32  ;;  %v1090_v45 = vsel %vm343_vm7, %v1088_v42, %v1089_v41  ;;  %v1093_v46 = vsel %vm343_vm7, %v1089_v41, 0.0 }
 0x310   :  { %v895_v39 = vpack.c.bf16 %v886_v33, %v889_v34  ;;  %v965_v40 = vpack.c.bf16 %v956_v35, %v959_v36  ;;  %v1099_v49 = vpack.c.bf16 %v1093_v46, %v1090_v45  ;;  %v1159_v51 = vsel %vm137_vm5, %v885_v31, 0.0 }
 0x311   :  { %v1165_v52 = vpack.c.bf16 %v1159_v51, %v886_v33 }
 0x312   :  { %1522 = vmatmul.mubr.msk.bf16.vlgmr.msra.gmra.mxu0 %vm161_vm4, %v895_v39  ;;  %1530 = vmatmul.mubr.msk.bf16.vlgmr.msra.gmra.mxu1 %vm161_vm4, %v965_v40 }
 0x313   :  { %1534 = vmatpush3.bf16.msra.mxu0 %v1585_v37  ;;  %1542 = vmatpush3.bf16.msra.mxu1 %v1586_v38 }
 0x314   :  { %1535 = vmatprep.subr.bf16.mxu0 %v1592_v3  ;;  %1543 = vmatprep.subr.bf16.mxu1 %v1592_v3 }
 0x315   :  { %1537 = vmatprep.mubr.msk.bf16.mxu0 %vm1593_vm3, %v1592_v3  ;;  %1545 = vmatprep.mubr.msk.bf16.mxu1 %vm1593_vm3, %v1592_v3 }
 0x317   :  { %1536 = vmatpush3.bf16.msra.mxu0 %v1587_v43  ;;  %1544 = vmatpush3.bf16.msra.mxu1 %v1588_v44 }
 0x318   :  { %1549 = vmatprep.subr.bf16.mxu0 %v1592_v3 }
 0x31a   :  { %1538 = vmatmul.mubr.msk.bf16.vlgmr.msra.gmra.mxu0 %vm161_vm4, %v1029_v48  ;;  %1546 = vmatmul.mubr.msk.bf16.vlgmr.msra.gmra.mxu1 %vm161_vm4, %v1099_v49 }
 0x31b   :  { %1550 = vmatpush3.bf16.msra.mxu0 %v1589_v47  ;;  %1553 = vmatprep.mubr.msk.bf16.mxu0 %vm1593_vm3, %v1592_v3 }
 0x31c   :  { %1551 = vmatprep.subr.bf16.mxu0 %v1592_v3 }
 0x31f   :  { %1552 = vmatpush3.bf16.msra.mxu0 %v1590_v50 }
 0x322   :  { %1554 = vmatmul.mubr.msk.bf16.vlgmr.msra.gmra.mxu0 %vm161_vm4, %v1165_v52 }
 0x3d2   :  { %v945_v53 = vpop.f32.mrf.mxu0  ;;  %v1015_v54 = vpop.f32.mrf.mxu1 }
 0x3d3   :  { %v952_v60 = vadd.f32 %v1332_v55, %v945_v53 }
 0x3d4   :  { %v1523_v56 = vpop.f32.mrf.mxu0  ;;  %v1531_v57 = vpop.f32.mrf.mxu1 }
 0x3d5   :  { %v1022_v0 = vadd.f32 %v1015_v54, %v952_v60 }
 0x3d6   :  { %v948_v58 = vpop.f32.mrf.mxu0  ;;  %v1018_v59 = vpop.f32.mrf.mxu1 }
 0x3d7   :  { %v953_v1 = vadd.f32 %v1332_v55, %v948_v58 }
 0x3d8   :  { %v1524_v61 = vpop.f32.mrf.mxu0  ;;  %v1532_v62 = vpop.f32.mrf.mxu1 }
 0x3d9   :  { %v1023_v8 = vadd.f32 %v1018_v59, %v953_v1 }
 0x3da   :  { %v1079_v3 = vpop.f32.mrf.mxu0  ;;  %v1149_v63 = vpop.f32.mrf.mxu1 }
 0x3db   :  { %v1086_v5 = vadd.f32 %v1079_v3, %v1022_v0 }
 0x3dc   :  { %v1539_v2 = vpop.f32.mrf.mxu0  ;;  %v1547_v4 = vpop.f32.mrf.mxu1 }
 0x3dd   :  { %v1156_v11 = vadd.f32 %v1149_v63, %v1086_v5 }
 0x3de   :  { %v1082_v6 = vpop.f32.mrf.mxu0  ;;  %v1152_v7 = vpop.f32.mrf.mxu1 }
 0x3df   :  { %v1087_v12 = vadd.f32 %v1082_v6, %v1023_v8 }
 0x3e0   :  { %v1540_v9 = vpop.f32.mrf.mxu0  ;;  %v1548_v10 = vpop.f32.mrf.mxu1 }
 0x3e1   :  { %v1157_v18 = vadd.f32 %v1152_v7, %v1087_v12 }
 0x3e2   :  { %v1215_v13 = vpop.f32.mrf.mxu0 }
 0x3e3   :  { %v1222_v15 = vadd.f32 %v1215_v13, %v1156_v11 }
 0x3e4   :  { %v1555_v17 = vpop.f32.mrf.mxu0 }
 0x3e5   :  { %v1232_v19 = vmul.f32 %v1369_v14, %v1222_v15 }
 0x3e6   :  { %v1218_v20 = vpop.f32.mrf.mxu0 }
 0x3e7   :  { %v1242_v21 = vadd.f32 %v1371_v16, %v1232_v19  ;;  %v1223_v22 = vadd.f32 %v1218_v20, %v1157_v18 }
 0x3e8   :  { %v1556_v23 = vpop.f32.mrf.mxu0 }
 0x3e9   :  { %v1244_v24 = vmax.f32 %v1242_v21, 0.0  ;;  %v1233_v25 = vmul.f32 %v1369_v14, %v1223_v22 }
 0x3eb   :  { %1246 = vst.msk [vmem:[%s1879_s6] sm:$0xff] %vm161_vm4, %v1244_v24  ;;  %v1243_v26 = vadd.f32 %v1371_v16, %v1233_v25 }
 0x3ed   :  { %v1245_v27 = vmax.f32 %v1243_v26, 0.0 }
 0x3ef   :  { %1247 = vst.msk [vmem:[%s1879_s6 + $0x8] sm:$0xff] %vm161_vm4, %v1245_v27 }

// kernel: tacotron2_forward.4
= control target key start
LH: loop header
LB: loop body
LE: loop exit
PB: predicated region body
PF: predicated region fallthrough
CT: control target
= control target key end

     0   :  { %v2391_v0 = vmov 0.0   ;;  %vm2392_vm0 = vmmov 0   ;;  %vm27_vm1 = vcmask 261120   ;;  %vm61_vm2 = vcmask 392192   ;;  %s2393_s13 = smov 96   ;;  %s2394_s14 = smov 16   ;;  %s3064_s3 = inlined_call_operand.vmem [shape: bf16[48,64], index: 3, kind: input, shape index: {}]   ;;  %s3065_s1 = inlined_call_operand.vmem [shape: bf16[48,64], index: 1, kind: input, shape index: {}]   ;;  %s3066_s0 = inlined_call_operand.vmem [shape: f32[8,2,32], index: 0, kind: input, shape index: {}]   ;;  %s3067_s4 = inlined_call_operand.vmem [shape: f32[1,64], index: 4, kind: input, shape index: {}]   ;;  %s3068_s2 = inlined_call_operand.vmem [shape: f32[1,64], index: 2, kind: input, shape index: {}]   ;;  %s3069_s5 = inlined_call_operand.vmem [shape: f32[8,2,32], index: 5, kind: output, shape index: {}]  }
   0x1   :  { %2058 = vmatprep.subr.bf16.mxu1 %v2391_v0  ;;  %v2215_v1 = vld [vmem:[%s3064_s3 + $0x10] sm:$0xff]   ;;  %2048 = vmatprep.subr.bf16.mxu0 %v2391_v0  ;;  %v2217_v3 = vld [vmem:[%s3064_s3 + $0x8] sm:$0xff]   ;;  %v2219_v6 = vld [vmem:[%s3064_s3] sm:$0xff]   ;;  %v21_v31 = vlaneseq  ;;  %s2395_s21 = smov 32   ;;  %s2396_s28 = smov 112   ;;  %vm237_vm6 = vcmask 123904  }
   0x2   :  { %v2216_v2 = vld [vmem:[%s3065_s1 + $0x10] sm:$0xff]   ;;  %2064 = vmatprep.mubr.msk.bf16.mxu1 %vm2392_vm0, %v2391_v0  ;;  %2054 = vmatprep.mubr.msk.bf16.mxu0 %vm2392_vm0, %v2391_v0  ;;  %v2218_v4 = vld [vmem:[%s3065_s1 + $0x8] sm:$0xff]   ;;  %v26_v8 = vld [vmem:[%s3066_s0] sm:$0x3]  ;;  %vm1852_vm7 = vcmask 130048   ;;  %vm1861_vm8 = vcmask 254976  }
   0x3   :  { %2059 = vmatpush3.bf16.msra.mxu1 %v2215_v1  ;;  %2049 = vmatpush3.bf16.msra.mxu0 %v2216_v2  ;;  %v1880_v5 = vld [vmem:[%s3066_s0 + $0xe] sm:$0x3]  ;;  %v2220_v9 = vld [vmem:[%s3065_s1] sm:$0xff]   ;;  %v28_v10 = vsel %vm27_vm1, %v26_v8, 0.0  ;;  %v22_v32 = vand.u32 127, %v21_v31  ;;  %v2221_v50 = vld [vmem:[%s3064_s3 + $0x10] sm:$0xff]  }
   0x4   :  { %2060 = vmatprep.subr.bf16.mxu1 %v2391_v0  ;;  %2050 = vmatprep.subr.bf16.mxu0 %v2391_v0  ;;  %v132_v7 = vsel %vm27_vm1, %v1880_v5, 0.0  ;;  %v36_v12 = vpack.c.bf16 %v28_v10, %v28_v10  ;;  %v2475_v13 = vld [vmem:[%s3067_s4] ss:$0 sm:$0xff]  ;;  %v2222_v51 = vld [vmem:[%s3065_s1 + $0x10] sm:$0xff]   ;;  %v2223_v52 = vld [vmem:[%s3064_s3 + $0x8] sm:$0xff]  }
   0x5   :  { %v140_v11 = vpack.c.bf16 %v132_v7, %v132_v7  ;;  %v2480_v14 = vld [vmem:[%s3068_s2] ss:$0 sm:$0xff]  ;;  %vm23_vm3 = vcmp.ge.s32.totalorder %v22_v32, 32  ;;  %vm24_vm4 = vcmp.lt.s32.totalorder %v22_v32, 48  ;;  %v2224_v55 = vld [vmem:[%s3065_s1 + $0x8] sm:$0xff]  }
   0x6   :  { %vm2484_vm5 = vmand %vm23_vm3, %vm24_vm4  ;;  %v2225_v56 = vld [vmem:[%s3064_s3] sm:$0xff]   ;;  %v1894_v62 = vld [vmem:[%s3066_s0 + $0xc] sm:$0x3] }
   0x7   :  { %2061 = vmatpush3.bf16.msra.mxu1 %v2217_v3  ;;  %2051 = vmatpush3.bf16.msra.mxu0 %v2218_v4  ;;  %v2226_v57 = vld [vmem:[%s3065_s1] sm:$0xff]  }
   0x8   :  { %2062 = vmatprep.subr.bf16.mxu1 %v2391_v0  ;;  %2052 = vmatprep.subr.bf16.mxu0 %v2391_v0  ;;  %v1887_v3 = vld [vmem:[%s3066_s0 + $0x2] sm:$0x3] }
   0xb   :  { %2063 = vmatpush3.bf16.msra.mxu1 %v2219_v6  ;;  %2053 = vmatpush3.bf16.msra.mxu0 %v2220_v9 }
   0xc   :  { %2078 = vmatprep.subr.bf16.mxu1 %v2391_v0  ;;  %2068 = vmatprep.subr.bf16.mxu0 %v2391_v0 }
   0xe   :  { %2065 = vmatmul.mubr.msk.bf16.vlgmr.msra.gmra.mxu1 %vm61_vm2, %v140_v11  ;;  %2055 = vmatmul.mubr.msk.bf16.vlgmr.msra.gmra.mxu0 %vm61_vm2, %v36_v12 }
   0xf   :  { %2084 = vmatprep.mubr.msk.bf16.mxu1 %vm2392_vm0, %v2391_v0  ;;  %2074 = vmatprep.mubr.msk.bf16.mxu0 %vm2392_vm0, %v2391_v0 }
  0x10   :  { %2079 = vmatpush3.bf16.msra.mxu1 %v2221_v50  ;;  %2069 = vmatpush3.bf16.msra.mxu0 %v2222_v51 }
  0x11   :  { %2080 = vmatprep.subr.bf16.mxu1 %v2391_v0  ;;  %2070 = vmatprep.subr.bf16.mxu0 %v2391_v0 }
  0x14   :  { %2081 = vmatpush3.bf16.msra.mxu1 %v2223_v52  ;;  %2071 = vmatpush3.bf16.msra.mxu0 %v2224_v55 }
  0x15   :  { %2082 = vmatprep.subr.bf16.mxu1 %v2391_v0  ;;  %2072 = vmatprep.subr.bf16.mxu0 %v2391_v0 }
  0x18   :  { %2083 = vmatpush3.bf16.msra.mxu1 %v2225_v56  ;;  %2073 = vmatpush3.bf16.msra.mxu0 %v2226_v57 }
  0x19   :  { %2098 = vmatprep.subr.bf16.mxu1 %v2391_v0  ;;  %2088 = vmatprep.subr.bf16.mxu0 %v2391_v0 }
  0xce   :  { %v202_v15 = vpop.f32.mrf.mxu1  ;;  %v99_v17 = vpop.f32.mrf.mxu0 }
  0xcf   :  { %v203_v16 = vadd.f32 %v2475_v13, %v202_v15  ;;  %v100_v19 = vadd.f32 %v2480_v14, %v99_v17 }
  0xd0   :  { %v2066_v18 = vpop.f32.mrf.mxu1  ;;  %v2056_v21 = vpop.f32.mrf.mxu0 }
  0xd1   :  { %v1886_v20 = vmul.f32 -1.442695, %v203_v16  ;;  %v1879_v22 = vmul.f32 -1.442695, %v100_v19 }
  0xd2   :  { %v205_v23 = vpop.f32.mrf.mxu1  ;;  %v102_v24 = vpop.f32.mrf.mxu0 }
  0xd3   :  { %2263 = vpow2.f32 %v1886_v20 }
  0xd4   :  { %2265 = vpow2.f32 %v1879_v22  ;;  %v2067_v25 = vpop.f32.mrf.mxu1  ;;  %v2057_v26 = vpop.f32.mrf.mxu0 }
  0xd5   :  { %2267 = vtanh.f32 %v203_v16 }
  0xd6   :  { %2269 = vtanh.f32 %v100_v19 }
  0xe0   :  { %v2264_v27 = vpop.eup %2263 }
  0xe1   :  { %v2266_v28 = vpop.eup %2265  ;;  %v212_v29 = vadd.f32 1.0, %v2264_v27 }
  0xe2   :  { %v109_v30 = vadd.f32 1.0, %v2266_v28  ;;  %v2268_v33 = vpop.eup %2267 }
  0xe3   :  { %2271 = vrcp.f32 %v212_v29  ;;  %v2270_v35 = vpop.eup %2269 }
  0xe4   :  { %2273 = vrcp.f32 %v109_v30 }
  0xf0   :  { %v2272_v36 = vpop.eup %2271 }
  0xf1   :  { %v2274_v37 = vpop.eup %2273  ;;  %v215_v38 = vsel %vm2484_vm5, %v2268_v33, %v2272_v36 }
  0xf2   :  { %218 = vrot.lane.b32.xlu0 %v215_v38, %s2393_s13  ;;  %v112_v39 = vsel %vm2484_vm5, %v2270_v35, %v2274_v37  ;;  %v216_v44 = vmul.f32 0.0, %v215_v38 }
  0xf3   :  { %v113_v47 = vmul.f32 0.0, %v112_v39 }
  0xf6   :  { %115 = vrot.lane.b32.xlu0 %v112_v39, %s2393_s13 }
 0x164   :  { %v219_v40 = vpop.permute.xlu0 %218 }
 0x165   :  { %v221_v41 = vmul.f32 %v219_v40, %v215_v38 }
 0x167   :  { %223 = vrot.lane.b32.xlu1 %v221_v41, %s2394_s14 }
 0x168   :  { %v116_v42 = vpop.permute.xlu0 %115 }
 0x169   :  { %v118_v43 = vmul.f32 %v116_v42, %v112_v39  ;;  %v2227_v42 = vld [vmem:[%s3064_s3 + $0x10] sm:$0xff]  }
 0x16b   :  { %120 = vrot.lane.b32.xlu1 %v118_v43, %s2394_s14  ;;  %v2228_v43 = vld [vmem:[%s3065_s1 + $0x10] sm:$0xff]  }
 0x1d9   :  { %v224_v45 = vpop.permute.xlu1 %223 }
 0x1da   :  { %v2496_v46 = vadd.f32 %v224_v45, %v216_v44  ;;  %v2229_v44 = vld [vmem:[%s3064_s3 + $0x8] sm:$0xff]  }
 0x1dc   :  { %2275 = vtanh.f32 %v2496_v46 }
 0x1dd   :  { %v121_v48 = vpop.permute.xlu1 %120 }
 0x1de   :  { %v2499_v49 = vadd.f32 %v121_v48, %v113_v47  ;;  %v2230_v47 = vld [vmem:[%s3065_s1 + $0x8] sm:$0xff]   ;;  %v2231_v48 = vld [vmem:[%s3064_s3] sm:$0xff]  }
 0x1e0   :  { %2277 = vtanh.f32 %v2499_v49 }
 0x1e9   :  { %v2276_v53 = vpop.eup %2275 }
 0x1ea   :  { %229 = vrot.lane.b32.xlu0 %v2276_v53, %s2395_s21 }
 0x1ed   :  { %v2278_v54 = vpop.eup %2277 }
 0x1ee   :  { %126 = vrot.lane.b32.xlu1 %v2278_v54, %s2395_s21  ;;  %v1908_v54 = vld [vmem:[%s3066_s0 + $0xa] sm:$0x3] }
 0x25c   :  { %v230_v58 = vpop.permute.xlu0 %229 }
 0x25d   :  { %v2528_v59 = vmul.f32 %v230_v58, %v215_v38  ;;  %v1901_v58 = vld [vmem:[%s3066_s0 + $0x4] sm:$0x3] }
 0x25f   :  { %353 = vrot.lane.b32.xlu0 %v2528_v59, %s2396_s28 }
 0x260   :  { %v127_v60 = vpop.permute.xlu1 %126 }
 0x261   :  { %v2532_v61 = vmul.f32 %v127_v60, %v112_v39 }
 0x263   :  { %247 = vrot.lane.b32.xlu1 %v2532_v61, %s2396_s28 }
 0x2d1   :  { %v354_v63 = vpop.permute.xlu0 %353 }
 0x2d2   :  { %v356_v1 = vsel %vm27_vm1, %v1894_v62, %v354_v63 }
 0x2d3   :  { %v364_v2 = vpack.c.bf16 %v356_v1, %v356_v1 }
 0x2d5   :  { %2085 = vmatmul.mubr.msk.bf16.vlgmr.msra.gmra.mxu1 %vm61_vm2, %v364_v2  ;;  %v248_v4 = vpop.permute.xlu1 %247 }
 0x2d6   :  { %v250_v5 = vsel %vm27_vm1, %v1887_v3, %v248_v4  ;;  %2104 = vmatprep.mubr.msk.bf16.mxu1 %vm2392_vm0, %v2391_v0  ;;  %2099 = vmatpush3.bf16.msra.mxu1 %v2227_v42  ;;  %v2237_v42 = vld [vmem:[%s3064_s3] sm:$0xff]  }
 0x2d7   :  { %v258_v6 = vpack.c.bf16 %v250_v5, %v250_v5  ;;  %2100 = vmatprep.subr.bf16.mxu1 %v2391_v0 }
 0x2d9   :  { %2075 = vmatmul.mubr.msk.bf16.vlgmr.msra.gmra.mxu0 %vm61_vm2, %v258_v6 }
 0x2da   :  { %2094 = vmatprep.mubr.msk.bf16.mxu0 %vm2392_vm0, %v2391_v0  ;;  %2089 = vmatpush3.bf16.msra.mxu0 %v2228_v43  ;;  %v2238_v43 = vld [vmem:[%s3065_s1] sm:$0xff]  }
 0x2db   :  { %2090 = vmatprep.subr.bf16.mxu0 %v2391_v0  ;;  %2101 = vmatpush3.bf16.msra.mxu1 %v2229_v44 }
 0x2dc   :  { %2102 = vmatprep.subr.bf16.mxu1 %v2391_v0 }
 0x2de   :  { %2091 = vmatpush3.bf16.msra.mxu0 %v2230_v47 }
 0x2df   :  { %2103 = vmatpush3.bf16.msra.mxu1 %v2231_v48  ;;  %2092 = vmatprep.subr.bf16.mxu0 %v2391_v0  ;;  %v1922_v48 = vld [vmem:[%s3066_s0 + $0x8] sm:$0x3] }
 0x2e0   :  { %2118 = vmatprep.subr.bf16.mxu1 %v2391_v0 }
 0x395   :  { %v426_v7 = vpop.f32.mrf.mxu1 }
 0x396   :  { %v427_v8 = vadd.f32 %v2475_v13, %v426_v7 }
 0x397   :  { %v2086_v9 = vpop.f32.mrf.mxu1 }
 0x398   :  { %v1900_v10 = vmul.f32 -1.442695, %v427_v8 }
 0x399   :  { %v320_v11 = vpop.f32.mrf.mxu0  ;;  %v429_v12 = vpop.f32.mrf.mxu1 }
 0x39a   :  { %2279 = vpow2.f32 %v1900_v10  ;;  %v321_v15 = vadd.f32 %v2480_v14, %v320_v11 }
 0x39b   :  { %v2076_v16 = vpop.f32.mrf.mxu0  ;;  %v2087_v17 = vpop.f32.mrf.mxu1 }
 0x39c   :  { %v1893_v18 = vmul.f32 -1.442695, %v321_v15 }
 0x39d   :  { %v323_v19 = vpop.f32.mrf.mxu0 }
 0x39e   :  { %2281 = vpow2.f32 %v1893_v18 }
 0x39f   :  { %v2077_v20 = vpop.f32.mrf.mxu0  ;;  %2283 = vtanh.f32 %v427_v8 }
 0x3a7   :  { %v2280_v21 = vpop.eup %2279 }
 0x3a8   :  { %v436_v22 = vadd.f32 1.0, %v2280_v21 }
 0x3aa   :  { %2285 = vrcp.f32 %v436_v22 }
 0x3ab   :  { %v2282_v23 = vpop.eup %2281  ;;  %2287 = vtanh.f32 %v321_v15 }
 0x3ac   :  { %v330_v24 = vadd.f32 1.0, %v2282_v23  ;;  %v2284_v25 = vpop.eup %2283 }
 0x3ae   :  { %2289 = vrcp.f32 %v330_v24 }
 0x3b7   :  { %v2286_v26 = vpop.eup %2285 }
 0x3b8   :  { %v439_v27 = vsel %vm2484_vm5, %v2284_v25, %v2286_v26  ;;  %v2288_v28 = vpop.eup %2287 }
 0x3b9   :  { %442 = vrot.lane.b32.xlu0 %v439_v27, %s2393_s13  ;;  %v440_v36 = vmul.f32 %v439_v27, %v2496_v46 }
 0x3bb   :  { %v2290_v29 = vpop.eup %2289 }
 0x3bc   :  { %v333_v30 = vsel %vm2484_vm5, %v2288_v28, %v2290_v29 }
 0x3bd   :  { %336 = vrot.lane.b32.xlu1 %v333_v30, %s2393_s13  ;;  %v334_v39 = vmul.f32 %v333_v30, %v2499_v49  ;;  %v2232_v49 = vld [vmem:[%s3065_s1] sm:$0xff]  }
 0x3be   :  { %2093 = vmatpush3.bf16.msra.mxu0 %v2232_v49 }
 0x3bf   :  { %2108 = vmatprep.subr.bf16.mxu0 %v2391_v0 }
 0x42b   :  { %v443_v31 = vpop.permute.xlu0 %442 }
 0x42c   :  { %v445_v32 = vmul.f32 %v443_v31, %v439_v27 }
 0x42e   :  { %447 = vrot.lane.b32.xlu0 %v445_v32, %s2394_s14 }
 0x42f   :  { %v337_v33 = vpop.permute.xlu1 %336 }
 0x430   :  { %v339_v35 = vmul.f32 %v337_v33, %v333_v30 }
 0x432   :  { %341 = vrot.lane.b32.xlu1 %v339_v35, %s2394_s14 }
 0x4a0   :  { %v448_v37 = vpop.permute.xlu0 %447 }
 0x4a1   :  { %v2561_v38 = vadd.f32 %v448_v37, %v440_v36  ;;  %v2233_v36 = vld [vmem:[%s3064_s3 + $0x10] sm:$0xff]  }
 0x4a2   :  { %v2234_v37 = vld [vmem:[%s3065_s1 + $0x10] sm:$0xff]  }
 0x4a3   :  { %2291 = vtanh.f32 %v2561_v38 }
 0x4a4   :  { %v342_v40 = vpop.permute.xlu1 %341 }
 0x4a5   :  { %v2565_v41 = vadd.f32 %v342_v40, %v334_v39 }
 0x4a7   :  { %2293 = vtanh.f32 %v2565_v41 }
 0x4b0   :  { %v2292_v45 = vpop.eup %2291 }
 0x4b1   :  { %453 = vrot.lane.b32.xlu0 %v2292_v45, %s2395_s21 }
 0x4b4   :  { %v2294_v46 = vpop.eup %2293 }
 0x4b5   :  { %347 = vrot.lane.b32.xlu1 %v2294_v46, %s2395_s21 }
 0x523   :  { %v454_v50 = vpop.permute.xlu0 %453 }
 0x524   :  { %v2594_v51 = vmul.f32 %v454_v50, %v439_v27 }
 0x526   :  { %577 = vrot.lane.b32.xlu0 %v2594_v51, %s2396_s28 }
 0x527   :  { %v348_v52 = vpop.permute.xlu1 %347 }
 0x528   :  { %v2598_v53 = vmul.f32 %v348_v52, %v333_v30 }
 0x52a   :  { %471 = vrot.lane.b32.xlu1 %v2598_v53, %s2396_s28 }
 0x598   :  { %v578_v55 = vpop.permute.xlu0 %577 }
 0x599   :  { %v580_v56 = vsel %vm27_vm1, %v1908_v54, %v578_v55  ;;  %v1915_v54 = vld [vmem:[%s3066_s0 + $0x6] sm:$0x3] }
 0x59a   :  { %v588_v57 = vpack.c.bf16 %v580_v56, %v580_v56 }
 0x59c   :  { %2105 = vmatmul.mubr.msk.bf16.vlgmr.msra.gmra.mxu1 %vm61_vm2, %v588_v57  ;;  %v472_v60 = vpop.permute.xlu1 %471 }
 0x59d   :  { %v474_v62 = vsel %vm27_vm1, %v1901_v58, %v472_v60  ;;  %2124 = vmatprep.mubr.msk.bf16.mxu1 %vm2392_vm0, %v2391_v0  ;;  %2119 = vmatpush3.bf16.msra.mxu1 %v2233_v36 }
 0x59e   :  { %v482_v63 = vpack.c.bf16 %v474_v62, %v474_v62  ;;  %2120 = vmatprep.subr.bf16.mxu1 %v2391_v0 }
 0x5a0   :  { %2095 = vmatmul.mubr.msk.bf16.vlgmr.msra.gmra.mxu0 %vm61_vm2, %v482_v63 }
 0x5a1   :  { %2114 = vmatprep.mubr.msk.bf16.mxu0 %vm2392_vm0, %v2391_v0  ;;  %2109 = vmatpush3.bf16.msra.mxu0 %v2234_v37  ;;  %v2242_v37 = vld [vmem:[%s3065_s1 + $0x8] sm:$0xff]  }
 0x5a2   :  { %2110 = vmatprep.subr.bf16.mxu0 %v2391_v0 }
 0x65c   :  { %v650_v1 = vpop.f32.mrf.mxu1 }
 0x65d   :  { %v651_v2 = vadd.f32 %v2475_v13, %v650_v1 }
 0x65e   :  { %v2106_v3 = vpop.f32.mrf.mxu1 }
 0x65f   :  { %v1914_v4 = vmul.f32 -1.442695, %v651_v2 }
 0x660   :  { %v544_v5 = vpop.f32.mrf.mxu0  ;;  %v653_v6 = vpop.f32.mrf.mxu1 }
 0x661   :  { %2295 = vpow2.f32 %v1914_v4  ;;  %v545_v7 = vadd.f32 %v2480_v14, %v544_v5 }
 0x662   :  { %v2096_v8 = vpop.f32.mrf.mxu0  ;;  %v2107_v9 = vpop.f32.mrf.mxu1 }
 0x663   :  { %v1907_v10 = vmul.f32 -1.442695, %v545_v7 }
 0x664   :  { %v547_v11 = vpop.f32.mrf.mxu0 }
 0x665   :  { %2297 = vpow2.f32 %v1907_v10 }
 0x666   :  { %v2097_v12 = vpop.f32.mrf.mxu0  ;;  %2299 = vtanh.f32 %v651_v2 }
 0x66e   :  { %v2296_v15 = vpop.eup %2295 }
 0x66f   :  { %v660_v16 = vadd.f32 1.0, %v2296_v15 }
 0x671   :  { %2301 = vrcp.f32 %v660_v16 }
 0x672   :  { %v2298_v17 = vpop.eup %2297  ;;  %2303 = vtanh.f32 %v545_v7 }
 0x673   :  { %v554_v18 = vadd.f32 1.0, %v2298_v17  ;;  %v2300_v19 = vpop.eup %2299 }
 0x675   :  { %2305 = vrcp.f32 %v554_v18 }
 0x67e   :  { %v2302_v20 = vpop.eup %2301 }
 0x67f   :  { %v663_v21 = vsel %vm2484_vm5, %v2300_v19, %v2302_v20  ;;  %v2304_v22 = vpop.eup %2303 }
 0x680   :  { %666 = vrot.lane.b32.xlu0 %v663_v21, %s2393_s13  ;;  %v664_v29 = vmul.f32 %v663_v21, %v2561_v38  ;;  %v2235_v38 = vld [vmem:[%s3064_s3 + $0x8] sm:$0xff]  }
 0x681   :  { %2121 = vmatpush3.bf16.msra.mxu1 %v2235_v38  ;;  %v2243_v38 = vld [vmem:[%s3064_s3] sm:$0xff]  }
 0x682   :  { %v2306_v23 = vpop.eup %2305  ;;  %2122 = vmatprep.subr.bf16.mxu1 %v2391_v0 }
 0x683   :  { %v557_v24 = vsel %vm2484_vm5, %v2304_v22, %v2306_v23 }
 0x684   :  { %560 = vrot.lane.b32.xlu1 %v557_v24, %s2393_s13  ;;  %v558_v32 = vmul.f32 %v557_v24, %v2565_v41  ;;  %v2236_v41 = vld [vmem:[%s3065_s1 + $0x8] sm:$0xff]  }
 0x685   :  { %2111 = vmatpush3.bf16.msra.mxu0 %v2236_v41  ;;  %2123 = vmatpush3.bf16.msra.mxu1 %v2237_v42 }
 0x686   :  { %2112 = vmatprep.subr.bf16.mxu0 %v2391_v0  ;;  %2138 = vmatprep.subr.bf16.mxu1 %v2391_v0 }
 0x689   :  { %2113 = vmatpush3.bf16.msra.mxu0 %v2238_v43 }
 0x68a   :  { %2128 = vmatprep.subr.bf16.mxu0 %v2391_v0 }
 0x6f2   :  { %v667_v25 = vpop.permute.xlu0 %666 }
 0x6f3   :  { %v669_v26 = vmul.f32 %v667_v25, %v663_v21 }
 0x6f5   :  { %671 = vrot.lane.b32.xlu0 %v669_v26, %s2394_s14 }
 0x6f6   :  { %v561_v27 = vpop.permute.xlu1 %560 }
 0x6f7   :  { %v563_v28 = vmul.f32 %v561_v27, %v557_v24 }
 0x6f9   :  { %565 = vrot.lane.b32.xlu1 %v563_v28, %s2394_s14 }
 0x767   :  { %v672_v30 = vpop.permute.xlu0 %671 }
 0x768   :  { %v2627_v31 = vadd.f32 %v672_v30, %v664_v29 }
 0x76a   :  { %2307 = vtanh.f32 %v2627_v31 }
 0x76b   :  { %v566_v33 = vpop.permute.xlu1 %565 }
 0x76c   :  { %v2631_v35 = vadd.f32 %v566_v33, %v558_v32  ;;  %v2239_v32 = vld [vmem:[%s3064_s3 + $0x10] sm:$0xff]   ;;  %v2241_v33 = vld [vmem:[%s3064_s3 + $0x8] sm:$0xff]  }
 0x76e   :  { %2309 = vtanh.f32 %v2631_v35 }
 0x777   :  { %v2308_v39 = vpop.eup %2307 }
 0x778   :  { %677 = vrot.lane.b32.xlu0 %v2308_v39, %s2395_s21  ;;  %v2244_v39 = vld [vmem:[%s3065_s1] sm:$0xff]  }
 0x77b   :  { %v2310_v40 = vpop.eup %2309 }
 0x77c   :  { %571 = vrot.lane.b32.xlu1 %v2310_v40, %s2395_s21 }
 0x7ea   :  { %v678_v44 = vpop.permute.xlu0 %677 }
 0x7eb   :  { %v2660_v45 = vmul.f32 %v678_v44, %v663_v21  ;;  %v1936_v44 = vld [vmem:[%s3066_s0 + $0x6] sm:$0x3] }
 0x7ed   :  { %801 = vrot.lane.b32.xlu0 %v2660_v45, %s2396_s28 }
 0x7ee   :  { %v572_v46 = vpop.permute.xlu1 %571 }
 0x7ef   :  { %v2664_v47 = vmul.f32 %v572_v46, %v557_v24 }
 0x7f1   :  { %695 = vrot.lane.b32.xlu1 %v2664_v47, %s2396_s28 }
 0x85f   :  { %v802_v49 = vpop.permute.xlu0 %801 }
 0x860   :  { %v804_v50 = vsel %vm27_vm1, %v1922_v48, %v802_v49 }
 0x861   :  { %v812_v52 = vpack.c.bf16 %v804_v50, %v804_v50  ;;  %v1929_v50 = vld [vmem:[%s3066_s0 + $0x8] sm:$0x3] }
 0x863   :  { %2125 = vmatmul.mubr.msk.bf16.vlgmr.msra.gmra.mxu1 %vm61_vm2, %v812_v52  ;;  %v696_v55 = vpop.permute.xlu1 %695 }
 0x864   :  { %v698_v56 = vsel %vm27_vm1, %v1915_v54, %v696_v55  ;;  %2144 = vmatprep.mubr.msk.bf16.mxu1 %vm2392_vm0, %v2391_v0  ;;  %2139 = vmatpush3.bf16.msra.mxu1 %v2239_v32  ;;  %v2245_v32 = vld [vmem:[%s3064_s3 + $0x10] sm:$0xff]  }
 0x865   :  { %v706_v57 = vpack.c.bf16 %v698_v56, %v698_v56  ;;  %2140 = vmatprep.subr.bf16.mxu1 %v2391_v0 }
 0x867   :  { %2115 = vmatmul.mubr.msk.bf16.vlgmr.msra.gmra.mxu0 %vm61_vm2, %v706_v57 }
 0x868   :  { %2134 = vmatprep.mubr.msk.bf16.mxu0 %vm2392_vm0, %v2391_v0  ;;  %2141 = vmatpush3.bf16.msra.mxu1 %v2241_v33 }
 0x869   :  { %2142 = vmatprep.subr.bf16.mxu1 %v2391_v0 }
 0x86c   :  { %2143 = vmatpush3.bf16.msra.mxu1 %v2243_v38 }
 0x86d   :  { %2158 = vmatprep.subr.bf16.mxu1 %v2391_v0 }
 0x923   :  { %v874_v58 = vpop.f32.mrf.mxu1 }
 0x924   :  { %v875_v60 = vadd.f32 %v2475_v13, %v874_v58 }
 0x925   :  { %v2126_v62 = vpop.f32.mrf.mxu1 }
 0x926   :  { %v1928_v63 = vmul.f32 -1.442695, %v875_v60 }
 0x927   :  { %v768_v1 = vpop.f32.mrf.mxu0  ;;  %v877_v2 = vpop.f32.mrf.mxu1 }
 0x928   :  { %2311 = vpow2.f32 %v1928_v63  ;;  %v769_v3 = vadd.f32 %v2480_v14, %v768_v1 }
 0x929   :  { %v2116_v4 = vpop.f32.mrf.mxu0  ;;  %v2127_v5 = vpop.f32.mrf.mxu1 }
 0x92a   :  { %v1921_v6 = vmul.f32 -1.442695, %v769_v3 }
 0x92b   :  { %v771_v7 = vpop.f32.mrf.mxu0 }
 0x92c   :  { %2313 = vpow2.f32 %v1921_v6 }
 0x92d   :  { %v2117_v8 = vpop.f32.mrf.mxu0  ;;  %2315 = vtanh.f32 %v875_v60 }
 0x935   :  { %v2312_v9 = vpop.eup %2311 }
 0x936   :  { %v884_v10 = vadd.f32 1.0, %v2312_v9 }
 0x938   :  { %2317 = vrcp.f32 %v884_v10 }
 0x939   :  { %v2314_v11 = vpop.eup %2313  ;;  %2319 = vtanh.f32 %v769_v3 }
 0x93a   :  { %v778_v12 = vadd.f32 1.0, %v2314_v11  ;;  %v2316_v15 = vpop.eup %2315 }
 0x93c   :  { %2321 = vrcp.f32 %v778_v12 }
 0x945   :  { %v2318_v16 = vpop.eup %2317 }
 0x946   :  { %v887_v17 = vsel %vm2484_vm5, %v2316_v15, %v2318_v16  ;;  %v2320_v18 = vpop.eup %2319 }
 0x947   :  { %890 = vrot.lane.b32.xlu0 %v887_v17, %s2393_s13  ;;  %v888_v25 = vmul.f32 %v887_v17, %v2627_v31  ;;  %v2240_v31 = vld [vmem:[%s3065_s1 + $0x10] sm:$0xff]  }
 0x948   :  { %2129 = vmatpush3.bf16.msra.mxu0 %v2240_v31  ;;  %v2247_v31 = vld [vmem:[%s3064_s3 + $0x8] sm:$0xff]  }
 0x949   :  { %v2322_v19 = vpop.eup %2321  ;;  %2130 = vmatprep.subr.bf16.mxu0 %v2391_v0 }
 0x94a   :  { %v781_v20 = vsel %vm2484_vm5, %v2320_v18, %v2322_v19 }
 0x94b   :  { %784 = vrot.lane.b32.xlu1 %v781_v20, %s2393_s13  ;;  %v782_v28 = vmul.f32 %v781_v20, %v2631_v35 }
 0x94c   :  { %2131 = vmatpush3.bf16.msra.mxu0 %v2242_v37  ;;  %v2250_v37 = vld [vmem:[%s3065_s1] sm:$0xff]  }
 0x94d   :  { %2132 = vmatprep.subr.bf16.mxu0 %v2391_v0 }
 0x950   :  { %2133 = vmatpush3.bf16.msra.mxu0 %v2244_v39 }
 0x951   :  { %2148 = vmatprep.subr.bf16.mxu0 %v2391_v0 }
 0x9b9   :  { %v891_v21 = vpop.permute.xlu0 %890 }
 0x9ba   :  { %v893_v22 = vmul.f32 %v891_v21, %v887_v17 }
 0x9bc   :  { %895 = vrot.lane.b32.xlu0 %v893_v22, %s2394_s14 }
 0x9bd   :  { %v785_v23 = vpop.permute.xlu1 %784 }
 0x9be   :  { %v787_v24 = vmul.f32 %v785_v23, %v781_v20 }
 0x9c0   :  { %789 = vrot.lane.b32.xlu1 %v787_v24, %s2394_s14 }
 0xa2e   :  { %v896_v26 = vpop.permute.xlu0 %895 }
 0xa2f   :  { %v2693_v27 = vadd.f32 %v896_v26, %v888_v25 }
 0xa31   :  { %2323 = vtanh.f32 %v2693_v27 }
 0xa32   :  { %v790_v29 = vpop.permute.xlu1 %789 }
 0xa33   :  { %v2697_v30 = vadd.f32 %v790_v29, %v782_v28 }
 0xa35   :  { %2325 = vtanh.f32 %v2697_v30 }
 0xa3e   :  { %v2324_v35 = vpop.eup %2323 }
 0xa3f   :  { %901 = vrot.lane.b32.xlu0 %v2324_v35, %s2395_s21  ;;  %v2248_v35 = vld [vmem:[%s3065_s1 + $0x8] sm:$0xff]  }
 0xa42   :  { %v2326_v36 = vpop.eup %2325 }
 0xa43   :  { %795 = vrot.lane.b32.xlu1 %v2326_v36, %s2395_s21  ;;  %v2249_v36 = vld [vmem:[%s3064_s3] sm:$0xff]  }
 0xab1   :  { %v902_v40 = vpop.permute.xlu0 %901 }
 0xab2   :  { %v2726_v41 = vmul.f32 %v902_v40, %v887_v17 }
 0xab4   :  { %1023 = vrot.lane.b32.xlu0 %v2726_v41, %s2396_s28 }
 0xab5   :  { %v796_v42 = vpop.permute.xlu1 %795 }
 0xab6   :  { %v2730_v43 = vmul.f32 %v796_v42, %v781_v20 }
 0xab8   :  { %918 = vrot.lane.b32.xlu1 %v2730_v43, %s2396_s28 }
 0xb26   :  { %v1024_v46 = vpop.permute.xlu0 %1023 }
 0xb27   :  { %v1026_v48 = vsel %vm27_vm1, %v1936_v44, %v1024_v46  ;;  %v1950_v44 = vld [vmem:[%s3066_s0 + $0x4] sm:$0x3] }
 0xb28   :  { %v1034_v49 = vpack.c.bf16 %v1026_v48, %v1026_v48 }
 0xb2a   :  { %2145 = vmatmul.mubr.msk.bf16.vlgmr.msra.gmra.mxu1 %vm61_vm2, %v1034_v49  ;;  %v919_v52 = vpop.permute.xlu1 %918 }
 0xb2b   :  { %v921_v54 = vsel %vm27_vm1, %v1929_v50, %v919_v52  ;;  %2164 = vmatprep.mubr.msk.bf16.mxu1 %vm2392_vm0, %v2391_v0  ;;  %2159 = vmatpush3.bf16.msra.mxu1 %v2245_v32  ;;  %v1943_v50 = vld [vmem:[%s3066_s0 + $0xa] sm:$0x3]  ;;  %v2251_v32 = vld [vmem:[%s3064_s3 + $0x10] sm:$0xff]  }
 0xb2c   :  { %v929_v55 = vpack.c.bf16 %v921_v54, %v921_v54  ;;  %2160 = vmatprep.subr.bf16.mxu1 %v2391_v0 }
 0xb2e   :  { %2135 = vmatmul.mubr.msk.bf16.vlgmr.msra.gmra.mxu0 %vm61_vm2, %v929_v55 }
 0xb2f   :  { %2154 = vmatprep.mubr.msk.bf16.mxu0 %vm2392_vm0, %v2391_v0  ;;  %2161 = vmatpush3.bf16.msra.mxu1 %v2247_v31 }
 0xb30   :  { %2162 = vmatprep.subr.bf16.mxu1 %v2391_v0 }
 0xb33   :  { %2163 = vmatpush3.bf16.msra.mxu1 %v2249_v36 }
 0xb34   :  { %2178 = vmatprep.subr.bf16.mxu1 %v2391_v0 }
 0xbea   :  { %v1096_v56 = vpop.f32.mrf.mxu1 }
 0xbeb   :  { %v1097_v57 = vadd.f32 %v2475_v13, %v1096_v56 }
 0xbec   :  { %v2146_v58 = vpop.f32.mrf.mxu1 }
 0xbed   :  { %v1942_v60 = vmul.f32 -1.442695, %v1097_v57 }
 0xbee   :  { %v991_v62 = vpop.f32.mrf.mxu0  ;;  %v1099_v63 = vpop.f32.mrf.mxu1 }
 0xbef   :  { %2327 = vpow2.f32 %v1942_v60  ;;  %v992_v1 = vadd.f32 %v2480_v14, %v991_v62 }
 0xbf0   :  { %v2136_v2 = vpop.f32.mrf.mxu0  ;;  %v2147_v3 = vpop.f32.mrf.mxu1 }
 0xbf1   :  { %v1935_v4 = vmul.f32 -1.442695, %v992_v1 }
 0xbf2   :  { %v994_v5 = vpop.f32.mrf.mxu0 }
 0xbf3   :  { %2329 = vpow2.f32 %v1935_v4 }
 0xbf4   :  { %v2137_v6 = vpop.f32.mrf.mxu0  ;;  %2331 = vtanh.f32 %v1097_v57 }
 0xbfc   :  { %v2328_v7 = vpop.eup %2327 }
 0xbfd   :  { %v1106_v8 = vadd.f32 1.0, %v2328_v7 }
 0xbff   :  { %2333 = vrcp.f32 %v1106_v8 }
 0xc00   :  { %v2330_v9 = vpop.eup %2329  ;;  %2335 = vtanh.f32 %v992_v1 }
 0xc01   :  { %v1001_v10 = vadd.f32 1.0, %v2330_v9  ;;  %v2332_v11 = vpop.eup %2331 }
 0xc03   :  { %2337 = vrcp.f32 %v1001_v10 }
 0xc0c   :  { %v2334_v12 = vpop.eup %2333 }
 0xc0d   :  { %v1109_v15 = vsel %vm2484_vm5, %v2332_v11, %v2334_v12  ;;  %v2336_v16 = vpop.eup %2335 }
 0xc0e   :  { %1112 = vrot.lane.b32.xlu0 %v1109_v15, %s2393_s13  ;;  %v1110_v23 = vmul.f32 %v1109_v15, %v2693_v27  ;;  %v2246_v27 = vld [vmem:[%s3065_s1 + $0x10] sm:$0xff]  }
 0xc0f   :  { %2149 = vmatpush3.bf16.msra.mxu0 %v2246_v27  ;;  %v2253_v27 = vld [vmem:[%s3064_s3 + $0x8] sm:$0xff]  }
 0xc10   :  { %v2338_v17 = vpop.eup %2337  ;;  %2150 = vmatprep.subr.bf16.mxu0 %v2391_v0 }
 0xc11   :  { %v1004_v18 = vsel %vm2484_vm5, %v2336_v16, %v2338_v17 }
 0xc12   :  { %1007 = vrot.lane.b32.xlu1 %v1004_v18, %s2393_s13  ;;  %v1005_v26 = vmul.f32 %v1004_v18, %v2697_v30 }
 0xc13   :  { %2151 = vmatpush3.bf16.msra.mxu0 %v2248_v35  ;;  %v2256_v35 = vld [vmem:[%s3065_s1] sm:$0xff]  }
 0xc14   :  { %2152 = vmatprep.subr.bf16.mxu0 %v2391_v0 }
 0xc17   :  { %2153 = vmatpush3.bf16.msra.mxu0 %v2250_v37 }
 0xc18   :  { %2168 = vmatprep.subr.bf16.mxu0 %v2391_v0 }
 0xc80   :  { %v1113_v19 = vpop.permute.xlu0 %1112 }
 0xc81   :  { %v1115_v20 = vmul.f32 %v1113_v19, %v1109_v15 }
 0xc83   :  { %1117 = vrot.lane.b32.xlu0 %v1115_v20, %s2394_s14 }
 0xc84   :  { %v1008_v21 = vpop.permute.xlu1 %1007 }
 0xc85   :  { %v1010_v22 = vmul.f32 %v1008_v21, %v1004_v18 }
 0xc87   :  { %1012 = vrot.lane.b32.xlu1 %v1010_v22, %s2394_s14 }
 0xcf5   :  { %v1118_v24 = vpop.permute.xlu0 %1117 }
 0xcf6   :  { %v2759_v25 = vadd.f32 %v1118_v24, %v1110_v23 }
 0xcf8   :  { %2339 = vtanh.f32 %v2759_v25 }
 0xcf9   :  { %v1013_v28 = vpop.permute.xlu1 %1012 }
 0xcfa   :  { %v2763_v29 = vadd.f32 %v1013_v28, %v1005_v26 }
 0xcfc   :  { %2341 = vtanh.f32 %v2763_v29 }
 0xd05   :  { %v2340_v30 = vpop.eup %2339 }
 0xd06   :  { %1123 = vrot.lane.b32.xlu0 %v2340_v30, %s2395_s21  ;;  %v2254_v30 = vld [vmem:[%s3065_s1 + $0x8] sm:$0xff]  }
 0xd09   :  { %v2342_v33 = vpop.eup %2341 }
 0xd0a   :  { %1018 = vrot.lane.b32.xlu1 %v2342_v33, %s2395_s21  ;;  %v2255_v33 = vld [vmem:[%s3064_s3] sm:$0xff]  }
 0xd78   :  { %v1124_v38 = vpop.permute.xlu0 %1123 }
 0xd79   :  { %v2792_v39 = vmul.f32 %v1124_v38, %v1109_v15 }
 0xd7b   :  { %1245 = vrot.lane.b32.xlu0 %v2792_v39, %s2396_s28 }
 0xd7c   :  { %v1019_v40 = vpop.permute.xlu1 %1018 }
 0xd7d   :  { %v2796_v42 = vmul.f32 %v1019_v40, %v1004_v18 }
 0xd7f   :  { %1140 = vrot.lane.b32.xlu1 %v2796_v42, %s2396_s28 }
 0xded   :  { %v1246_v46 = vpop.permute.xlu0 %1245 }
 0xdee   :  { %v1248_v48 = vsel %vm27_vm1, %v1950_v44, %v1246_v46  ;;  %v1964_v44 = vld [vmem:[%s3066_s0 + $0x2] sm:$0x3] }
 0xdef   :  { %v1256_v49 = vpack.c.bf16 %v1248_v48, %v1248_v48 }
 0xdf1   :  { %2165 = vmatmul.mubr.msk.bf16.vlgmr.msra.gmra.mxu1 %vm61_vm2, %v1256_v49  ;;  %v1141_v52 = vpop.permute.xlu1 %1140 }
 0xdf2   :  { %v1143_v54 = vsel %vm27_vm1, %v1943_v50, %v1141_v52  ;;  %2184 = vmatprep.mubr.msk.bf16.mxu1 %vm2392_vm0, %v2391_v0  ;;  %2179 = vmatpush3.bf16.msra.mxu1 %v2251_v32  ;;  %v1957_v50 = vld [vmem:[%s3066_s0 + $0xc] sm:$0x3] }
 0xdf3   :  { %v1151_v55 = vpack.c.bf16 %v1143_v54, %v1143_v54  ;;  %2180 = vmatprep.subr.bf16.mxu1 %v2391_v0 }
 0xdf5   :  { %2155 = vmatmul.mubr.msk.bf16.vlgmr.msra.gmra.mxu0 %vm61_vm2, %v1151_v55 }
 0xdf6   :  { %2174 = vmatprep.mubr.msk.bf16.mxu0 %vm2392_vm0, %v2391_v0  ;;  %2181 = vmatpush3.bf16.msra.mxu1 %v2253_v27 }
 0xdf7   :  { %2182 = vmatprep.subr.bf16.mxu1 %v2391_v0 }
 0xdfa   :  { %2183 = vmatpush3.bf16.msra.mxu1 %v2255_v33 }
 0xdfb   :  { %2198 = vmatprep.subr.bf16.mxu1 %v2391_v0 }
 0xeb1   :  { %v1318_v56 = vpop.f32.mrf.mxu1 }
 0xeb2   :  { %v1319_v57 = vadd.f32 %v2475_v13, %v1318_v56  ;;  %v2883_v56 = vld [vmem:[%s3067_s4] ss:$0 sm:$0xff] }
 0xeb3   :  { %v2166_v58 = vpop.f32.mrf.mxu1 }
 0xeb4   :  { %v1956_v60 = vmul.f32 -1.442695, %v1319_v57 }
 0xeb5   :  { %v1213_v62 = vpop.f32.mrf.mxu0  ;;  %v1321_v63 = vpop.f32.mrf.mxu1 }
 0xeb6   :  { %2343 = vpow2.f32 %v1956_v60  ;;  %v1214_v1 = vadd.f32 %v2480_v14, %v1213_v62  ;;  %v2889_v62 = vld [vmem:[%s3068_s2] ss:$0 sm:$0xff] }
 0xeb7   :  { %v2156_v2 = vpop.f32.mrf.mxu0  ;;  %v2167_v3 = vpop.f32.mrf.mxu1 }
 0xeb8   :  { %v1949_v4 = vmul.f32 -1.442695, %v1214_v1 }
 0xeb9   :  { %v1216_v5 = vpop.f32.mrf.mxu0 }
 0xeba   :  { %2345 = vpow2.f32 %v1949_v4 }
 0xebb   :  { %v2157_v6 = vpop.f32.mrf.mxu0  ;;  %2347 = vtanh.f32 %v1319_v57 }
 0xec3   :  { %v2344_v7 = vpop.eup %2343 }
 0xec4   :  { %v1328_v8 = vadd.f32 1.0, %v2344_v7 }
 0xec6   :  { %2349 = vrcp.f32 %v1328_v8 }
 0xec7   :  { %v2346_v9 = vpop.eup %2345  ;;  %2351 = vtanh.f32 %v1214_v1 }
 0xec8   :  { %v1223_v10 = vadd.f32 1.0, %v2346_v9  ;;  %v2348_v13 = vpop.eup %2347 }
 0xeca   :  { %2353 = vrcp.f32 %v1223_v10 }
 0xed3   :  { %v2350_v11 = vpop.eup %2349 }
 0xed4   :  { %v1331_v12 = vsel %vm2484_vm5, %v2348_v13, %v2350_v11  ;;  %v2352_v14 = vpop.eup %2351 }
 0xed5   :  { %1334 = vrot.lane.b32.xlu0 %v1331_v12, %s2393_s13  ;;  %v1332_v21 = vmul.f32 %v1331_v12, %v2759_v25  ;;  %v2252_v25 = vld [vmem:[%s3065_s1 + $0x10] sm:$0xff]  }
 0xed6   :  { %2169 = vmatpush3.bf16.msra.mxu0 %v2252_v25 }
 0xed7   :  { %v2354_v15 = vpop.eup %2353  ;;  %2170 = vmatprep.subr.bf16.mxu0 %v2391_v0 }
 0xed8   :  { %v1226_v16 = vsel %vm2484_vm5, %v2352_v14, %v2354_v15 }
 0xed9   :  { %1229 = vrot.lane.b32.xlu1 %v1226_v16, %s2393_s13  ;;  %v1227_v24 = vmul.f32 %v1226_v16, %v2763_v29 }
 0xeda   :  { %2171 = vmatpush3.bf16.msra.mxu0 %v2254_v30  ;;  %v2259_v30 = vld [vmem:[%s3064_s3 + $0x8] sm:$0xff]  }
 0xedb   :  { %2172 = vmatprep.subr.bf16.mxu0 %v2391_v0 }
 0xede   :  { %2173 = vmatpush3.bf16.msra.mxu0 %v2256_v35  ;;  %v2260_v35 = vld [vmem:[%s3065_s1 + $0x8] sm:$0xff]  }
 0xedf   :  { %2188 = vmatprep.subr.bf16.mxu0 %v2391_v0 }
 0xf47   :  { %v1335_v17 = vpop.permute.xlu0 %1334 }
 0xf48   :  { %v1337_v18 = vmul.f32 %v1335_v17, %v1331_v12 }
 0xf4a   :  { %1339 = vrot.lane.b32.xlu0 %v1337_v18, %s2394_s14 }
 0xf4b   :  { %v1230_v19 = vpop.permute.xlu1 %1229 }
 0xf4c   :  { %v1232_v20 = vmul.f32 %v1230_v19, %v1226_v16 }
 0xf4e   :  { %1234 = vrot.lane.b32.xlu1 %v1232_v20, %s2394_s14 }
 0xfbc   :  { %v1340_v22 = vpop.permute.xlu0 %1339 }
 0xfbd   :  { %v2825_v23 = vadd.f32 %v1340_v22, %v1332_v21 }
 0xfbf   :  { %2355 = vtanh.f32 %v2825_v23 }
 0xfc0   :  { %v1235_v26 = vpop.permute.xlu1 %1234 }
 0xfc1   :  { %v2829_v28 = vadd.f32 %v1235_v26, %v1227_v24 }
 0xfc3   :  { %2357 = vtanh.f32 %v2829_v28 }
 0xfcc   :  { %v2356_v29 = vpop.eup %2355 }
 0xfcd   :  { %1345 = vrot.lane.b32.xlu0 %v2356_v29, %s2395_s21 }
 0xfd0   :  { %v2358_v31 = vpop.eup %2357 }
 0xfd1   :  { %1240 = vrot.lane.b32.xlu1 %v2358_v31, %s2395_s21  ;;  %v2257_v31 = vld [vmem:[%s3064_s3 + $0x10] sm:$0xff]  }
0x103f   :  { %v1346_v36 = vpop.permute.xlu0 %1345 }
0x1040   :  { %v2858_v37 = vmul.f32 %v1346_v36, %v1331_v12  ;;  %v2261_v36 = vld [vmem:[%s3064_s3] sm:$0xff]  }
0x1042   :  { %1467 = vrot.lane.b32.xlu0 %v2858_v37, %s2396_s28 }
0x1043   :  { %v1241_v38 = vpop.permute.xlu1 %1240 }
0x1044   :  { %v2862_v40 = vmul.f32 %v1241_v38, %v1226_v16  ;;  %v2262_v38 = vld [vmem:[%s3065_s1] sm:$0xff]  }
0x1046   :  { %1362 = vrot.lane.b32.xlu1 %v2862_v40, %s2396_s28 }
0x10b4   :  { %v1468_v46 = vpop.permute.xlu0 %1467 }
0x10b5   :  { %v1470_v48 = vsel %vm27_vm1, %v1964_v44, %v1468_v46 }
0x10b6   :  { %v1478_v49 = vpack.c.bf16 %v1470_v48, %v1470_v48 }
0x10b8   :  { %2185 = vmatmul.mubr.msk.bf16.vlgmr.msra.gmra.mxu1 %vm61_vm2, %v1478_v49  ;;  %v1363_v52 = vpop.permute.xlu1 %1362 }
0x10b9   :  { %v1365_v54 = vsel %vm27_vm1, %v1957_v50, %v1363_v52  ;;  %2204 = vmatprep.mubr.msk.bf16.mxu1 %vm2392_vm0, %v2391_v0  ;;  %2199 = vmatpush3.bf16.msra.mxu1 %v2257_v31 }
0x10ba   :  { %v1373_v55 = vpack.c.bf16 %v1365_v54, %v1365_v54  ;;  %2200 = vmatprep.subr.bf16.mxu1 %v2391_v0 }
0x10bc   :  { %2175 = vmatmul.mubr.msk.bf16.vlgmr.msra.gmra.mxu0 %vm61_vm2, %v1373_v55  ;;  %v1971_v55 = vld [vmem:[%s3066_s0 + $0xe] sm:$0x3] }
0x10bd   :  { %2194 = vmatprep.mubr.msk.bf16.mxu0 %vm2392_vm0, %v2391_v0  ;;  %2201 = vmatpush3.bf16.msra.mxu1 %v2259_v30 }
0x10be   :  { %2202 = vmatprep.subr.bf16.mxu1 %v2391_v0 }
0x10c1   :  { %2203 = vmatpush3.bf16.msra.mxu1 %v2261_v36 }
0x1178   :  { %v1540_v57 = vpop.f32.mrf.mxu1 }
0x1179   :  { %v1541_v58 = vadd.f32 %v2883_v56, %v1540_v57 }
0x117a   :  { %v2186_v60 = vpop.f32.mrf.mxu1 }
0x117b   :  { %v1970_v63 = vmul.f32 -1.442695, %v1541_v58 }
0x117c   :  { %v1435_v1 = vpop.f32.mrf.mxu0  ;;  %v1543_v2 = vpop.f32.mrf.mxu1 }
0x117d   :  { %2359 = vpow2.f32 %v1970_v63  ;;  %v1436_v3 = vadd.f32 %v2889_v62, %v1435_v1 }
0x117e   :  { %v2176_v4 = vpop.f32.mrf.mxu0  ;;  %v2187_v5 = vpop.f32.mrf.mxu1 }
0x117f   :  { %v1963_v6 = vmul.f32 -1.442695, %v1436_v3 }
0x1180   :  { %v1438_v7 = vpop.f32.mrf.mxu0 }
0x1181   :  { %2361 = vpow2.f32 %v1963_v6 }
0x1182   :  { %v2177_v8 = vpop.f32.mrf.mxu0  ;;  %2363 = vtanh.f32 %v1541_v58 }
0x118a   :  { %v2360_v9 = vpop.eup %2359 }
0x118b   :  { %v1550_v10 = vadd.f32 1.0, %v2360_v9 }
0x118d   :  { %2365 = vrcp.f32 %v1550_v10 }
0x118e   :  { %v2362_v13 = vpop.eup %2361  ;;  %2367 = vtanh.f32 %v1436_v3 }
0x118f   :  { %v1445_v11 = vadd.f32 1.0, %v2362_v13  ;;  %v2364_v12 = vpop.eup %2363 }
0x1191   :  { %2369 = vrcp.f32 %v1445_v11 }
0x119a   :  { %v2366_v14 = vpop.eup %2365 }
0x119b   :  { %v1553_v15 = vsel %vm2484_vm5, %v2364_v12, %v2366_v14  ;;  %v2368_v16 = vpop.eup %2367 }
0x119c   :  { %1556 = vrot.lane.b32.xlu0 %v1553_v15, %s2393_s13  ;;  %v1554_v24 = vmul.f32 %v1553_v15, %v2825_v23  ;;  %v2258_v23 = vld [vmem:[%s3065_s1 + $0x10] sm:$0xff]  }
0x119d   :  { %2189 = vmatpush3.bf16.msra.mxu0 %v2258_v23 }
0x119e   :  { %v2370_v17 = vpop.eup %2369  ;;  %2190 = vmatprep.subr.bf16.mxu0 %v2391_v0 }
0x119f   :  { %v1448_v18 = vsel %vm2484_vm5, %v2368_v16, %v2370_v17 }
0x11a0   :  { %1451 = vrot.lane.b32.xlu1 %v1448_v18, %s2393_s13  ;;  %v1449_v25 = vmul.f32 %v1448_v18, %v2829_v28 }
0x11a1   :  { %2191 = vmatpush3.bf16.msra.mxu0 %v2260_v35 }
0x11a2   :  { %2192 = vmatprep.subr.bf16.mxu0 %v2391_v0  ;;  %v1688_v0 = vld [vmem:[%s3066_s0] sm:$0x3]  ;;  %s2397_s0 = smov 80  }
0x11a5   :  { %2193 = vmatpush3.bf16.msra.mxu0 %v2262_v38 }
0x120e   :  { %v1557_v19 = vpop.permute.xlu0 %1556 }
0x120f   :  { %v1559_v20 = vmul.f32 %v1557_v19, %v1553_v15 }
0x1211   :  { %1561 = vrot.lane.b32.xlu0 %v1559_v20, %s2394_s14 }
0x1212   :  { %v1452_v21 = vpop.permute.xlu1 %1451 }
0x1213   :  { %v1454_v22 = vmul.f32 %v1452_v21, %v1448_v18 }
0x1215   :  { %1456 = vrot.lane.b32.xlu1 %v1454_v22, %s2394_s14 }
0x1283   :  { %v1562_v26 = vpop.permute.xlu0 %1561 }
0x1284   :  { %v2901_v32 = vadd.f32 %v1562_v26, %v1554_v24 }
0x1286   :  { %2371 = vtanh.f32 %v2901_v32 }
0x1287   :  { %v1457_v27 = vpop.permute.xlu1 %1456 }
0x1288   :  { %v2905_v29 = vadd.f32 %v1457_v27, %v1449_v25 }
0x128a   :  { %2373 = vtanh.f32 %v2905_v29 }
0x1293   :  { %v2372_v28 = vpop.eup %2371 }
0x1294   :  { %1567 = vrot.lane.b32.xlu0 %v2372_v28, %s2395_s21 }
0x1297   :  { %v2374_v33 = vpop.eup %2373 }
0x1298   :  { %1462 = vrot.lane.b32.xlu1 %v2374_v33, %s2395_s21 }
0x1306   :  { %v1568_v44 = vpop.permute.xlu0 %1567 }
0x1307   :  { %v2932_v46 = vmul.f32 %v1568_v44, %v1553_v15 }
0x1309   :  { %1689 = vrot.lane.b32.xlu0 %v2932_v46, %s2396_s28 }
0x130a   :  { %v1463_v48 = vpop.permute.xlu1 %1462 }
0x130b   :  { %v2936_v49 = vmul.f32 %v1463_v48, %v1448_v18 }
0x130d   :  { %1584 = vrot.lane.b32.xlu1 %v2936_v49, %s2396_s28 }
0x137b   :  { %v1690_v50 = vpop.permute.xlu0 %1689 }
0x137c   :  { %v1692_v52 = vsel %vm27_vm1, %v1688_v0, %v1690_v50 }
0x137d   :  { %v1700_v54 = vpack.c.bf16 %v1692_v52, %v1692_v52 }
0x137f   :  { %2205 = vmatmul.mubr.msk.bf16.vlgmr.msra.gmra.mxu1 %vm61_vm2, %v1700_v54  ;;  %v1585_v57 = vpop.permute.xlu1 %1584 }
0x1380   :  { %v1587_v58 = vsel %vm27_vm1, %v1971_v55, %v1585_v57 }
0x1381   :  { %v1595_v60 = vpack.c.bf16 %v1587_v58, %v1587_v58 }
0x1383   :  { %2195 = vmatmul.mubr.msk.bf16.vlgmr.msra.gmra.mxu0 %vm61_vm2, %v1595_v60 }
0x143f   :  { %v1762_v63 = vpop.f32.mrf.mxu1 }
0x1440   :  { %v1763_v1 = vadd.f32 %v2883_v56, %v1762_v63 }
0x1441   :  { %v2206_v2 = vpop.f32.mrf.mxu1 }
0x1442   :  { %v1983_v3 = vmul.f32 -1.442695, %v1763_v1 }
0x1443   :  { %v1657_v4 = vpop.f32.mrf.mxu0  ;;  %v1765_v5 = vpop.f32.mrf.mxu1 }
0x1444   :  { %2375 = vpow2.f32 %v1983_v3  ;;  %v1658_v6 = vadd.f32 %v2889_v62, %v1657_v4 }
0x1445   :  { %v2196_v7 = vpop.f32.mrf.mxu0  ;;  %v2207_v8 = vpop.f32.mrf.mxu1 }
0x1446   :  { %v1977_v9 = vmul.f32 -1.442695, %v1658_v6 }
0x1447   :  { %v1660_v10 = vpop.f32.mrf.mxu0 }
0x1448   :  { %2377 = vpow2.f32 %v1977_v9 }
0x1449   :  { %v2197_v13 = vpop.f32.mrf.mxu0  ;;  %2379 = vtanh.f32 %v1763_v1 }
0x1451   :  { %v2376_v11 = vpop.eup %2375 }
0x1452   :  { %v1772_v12 = vadd.f32 1.0, %v2376_v11 }
0x1454   :  { %2381 = vrcp.f32 %v1772_v12 }
0x1455   :  { %v2378_v14 = vpop.eup %2377  ;;  %2383 = vtanh.f32 %v1658_v6 }
0x1456   :  { %v1667_v15 = vadd.f32 1.0, %v2378_v14  ;;  %v2380_v56 = vpop.eup %2379 }
0x1458   :  { %2385 = vrcp.f32 %v1667_v15 }
0x1461   :  { %v2382_v16 = vpop.eup %2381 }
0x1462   :  { %v1775_v17 = vsel %vm2484_vm5, %v2380_v56, %v2382_v16  ;;  %v2384_v62 = vpop.eup %2383 }
0x1463   :  { %1778 = vrot.lane.b32.xlu0 %v1775_v17, %s2393_s13  ;;  %v1776_v34 = vmul.f32 %v1775_v17, %v2901_v32 }
0x1465   :  { %v2386_v18 = vpop.eup %2385 }
0x1466   :  { %v2957_v19 = vsel %vm2484_vm5, %v2384_v62, %v2386_v18 }
0x1467   :  { %1673 = vrot.lane.b32.xlu1 %v2957_v19, %s2393_s13  ;;  %v1671_v27 = vmul.f32 %v2957_v19, %v2905_v29 }
0x14d5   :  { %v1779_v20 = vpop.permute.xlu0 %1778 }
0x14d6   :  { %v1781_v21 = vmul.f32 %v1779_v20, %v1775_v17 }
0x14d8   :  { %1783 = vrot.lane.b32.xlu0 %v1781_v21, %s2394_s14 }
0x14d9   :  { %v1674_v22 = vpop.permute.xlu1 %1673 }
0x14da   :  { %v1676_v24 = vmul.f32 %v1674_v22, %v2957_v19 }
0x14dc   :  { %1678 = vrot.lane.b32.xlu1 %v1676_v24, %s2394_s14 }
0x14e0   :  { %464 = vrot.lane.b32.xlu1 %v2594_v51, %s2397_s0 }
0x14e4   :  { %912 = vrot.lane.b32.xlu1 %v2726_v41, %s2397_s0 }
0x14e8   :  { %1356 = vrot.lane.b32.xlu1 %v2858_v37, %s2397_s0 }
0x154a   :  { %v1784_v26 = vpop.permute.xlu0 %1783 }
0x154b   :  { %v1786_v25 = vadd.f32 %v1784_v26, %v1776_v34 }
0x154d   :  { %2387 = vtanh.f32 %v1786_v25 }
0x154e   :  { %v1679_v31 = vpop.permute.xlu1 %1678 }
0x154f   :  { %v1681_v23 = vadd.f32 %v1679_v31, %v1671_v27 }
0x1551   :  { %2389 = vtanh.f32 %v1681_v23 }
0x1552   :  { %v465_v30 = vpop.permute.xlu1 %464 }
0x1553   :  { %468 = vst.msk [vmem:[#allocation3 + $0xc] sm:$0x3] %vm237_vm6, %v465_v30 }
0x1556   :  { %v913_v51 = vpop.permute.xlu1 %912 }
0x1557   :  { %916 = vst.msk [vmem:[#allocation3 + $0x8] sm:$0x3] %vm237_vm6, %v913_v51 }
0x155a   :  { %v2388_v41 = vpop.eup %2387  ;;  %v1357_v37 = vpop.permute.xlu1 %1356  ;;  %v1818_v2 = vld [vmem:[#allocation3 + $0xc] sm:$0x3] }
0x155b   :  { %1360 = vst.msk [vmem:[#allocation3 + $0x4] sm:$0x3] %vm237_vm6, %v1357_v37  ;;  %1789 = vrot.lane.b32.xlu0 %v2388_v41, %s2395_s21 }
0x155e   :  { %v2390_v32 = vpop.eup %2389 }
0x155f   :  { %240 = vrot.lane.b32.xlu0 %v2528_v59, %s2397_s0  ;;  %1684 = vrot.lane.b32.xlu1 %v2390_v32, %s2395_s21 }
0x1562   :  { %v1814_v59 = vld [vmem:[#allocation3 + $0x4] sm:$0x3] }
0x1563   :  { %688 = vrot.lane.b32.xlu0 %v2660_v45, %s2397_s0  ;;  %v1816_v45 = vld [vmem:[#allocation3 + $0x8] sm:$0x3] }
0x1567   :  { %1134 = vrot.lane.b32.xlu0 %v2792_v39, %s2397_s0 }
0x156b   :  { %1578 = vrot.lane.b32.xlu0 %v2932_v46, %s2397_s0 }
0x156f   :  { %234 = vrot.lane.b32.xlu0 %v2532_v61, %s2397_s0 }
0x1573   :  { %682 = vrot.lane.b32.xlu0 %v2664_v47, %s2397_s0 }
0x1577   :  { %1128 = vrot.lane.b32.xlu0 %v2796_v42, %s2397_s0 }
0x157b   :  { %1572 = vrot.lane.b32.xlu0 %v2936_v49, %s2397_s0 }
0x157f   :  { %1832 = vrot.lane.b32.xlu0 %v1814_v59, %s2394_s14 }
0x1583   :  { %1836 = vrot.lane.b32.xlu0 %v1816_v45, %s2394_s14 }
0x15cd   :  { %v1790_v39 = vpop.permute.xlu0 %1789 }
0x15ce   :  { %v1792_v29 = vmul.f32 %v1790_v39, %v1775_v17 }
0x15d0   :  { %1800 = vrot.lane.b32.xlu1 %v1792_v29, %s2397_s0 }
0x15d1   :  { %v241_v61 = vpop.permute.xlu0 %240  ;;  %v1685_v36 = vpop.permute.xlu1 %1684 }
0x15d2   :  { %244 = vst.msk [vmem:[#allocation3 + $0xe] sm:$0x3] %vm237_vm6, %v241_v61 }
0x15d4   :  { %458 = vrot.lane.b32.xlu1 %v2598_v53, %s2397_s0 }
0x15d5   :  { %v689_v47 = vpop.permute.xlu0 %688 }
0x15d6   :  { %692 = vst.msk [vmem:[#allocation3 + $0xa] sm:$0x3] %vm237_vm6, %v689_v47 }
0x15d8   :  { %906 = vrot.lane.b32.xlu1 %v2730_v43, %s2397_s0 }
0x15d9   :  { %v1135_v42 = vpop.permute.xlu0 %1134  ;;  %v1819_v54 = vld [vmem:[#allocation3 + $0xe] sm:$0x3] }
0x15da   :  { %1138 = vst.msk [vmem:[#allocation3 + $0x6] sm:$0x3] %vm237_vm6, %v1135_v42 }
0x15dc   :  { %1350 = vrot.lane.b32.xlu1 %v2862_v40, %s2397_s0  ;;  %v1687_v40 = vmul.f32 %v1685_v36, %v2957_v19 }
0x15dd   :  { %v1579_v28 = vpop.permute.xlu0 %1578  ;;  %v1817_v49 = vld [vmem:[#allocation3 + $0xa] sm:$0x3] }
0x15de   :  { %1582 = vst.msk [vmem:[#allocation3 + $0x2] sm:$0x3] %vm237_vm6, %v1579_v28 }
0x15e1   :  { %v235_v33 = vpop.permute.xlu0 %234  ;;  %v1815_v38 = vld [vmem:[#allocation3 + $0x6] sm:$0x3] }
0x15e2   :  { %238 = vst.msk [vmem:[#allocation2] sm:$0x3] %vm237_vm6, %v235_v33 }
0x15e5   :  { %v683_v35 = vpop.permute.xlu0 %682  ;;  %v1813_v53 = vld [vmem:[#allocation3 + $0x2] sm:$0x3] }
0x15e6   :  { %686 = vst.msk [vmem:[#allocation2 + $0x4] sm:$0x3] %vm237_vm6, %v683_v35  ;;  %1830 = vrot.lane.b32.xlu1 %v1813_v53, %s2394_s14 }
0x15e9   :  { %v1129_v43 = vpop.permute.xlu0 %1128  ;;  %v1804_v56 = vld [vmem:[#allocation2] sm:$0x3] }
0x15ea   :  { %1132 = vst.msk [vmem:[#allocation2 + $0x8] sm:$0x3] %vm237_vm6, %v1129_v43  ;;  %1834 = vrot.lane.b32.xlu1 %v1815_v38, %s2394_s14 }
0x15ed   :  { %v1573_v44 = vpop.permute.xlu0 %1572  ;;  %v1806_v46 = vld [vmem:[#allocation2 + $0x4] sm:$0x3] }
0x15ee   :  { %1576 = vst.msk [vmem:[#allocation2 + $0xc] sm:$0x3] %vm237_vm6, %v1573_v44  ;;  %1794 = vrot.lane.b32.xlu1 %v1687_v40, %s2397_s0 }
0x15f1   :  { %v1833_v48 = vpop.permute.xlu0 %1832  ;;  %v1808_v50 = vld [vmem:[#allocation2 + $0x8] sm:$0x3] }
0x15f2   :  { %v1855_v0 = vsel %vm1852_vm7, %v1806_v46, %v1833_v48  ;;  %1838 = vrot.lane.b32.xlu1 %v1817_v49, %s2394_s14 }
0x15f3   :  { %1864 = vst.msk [vmem:[%s3069_s5 + $0x4] sm:$0x3] %vm1861_vm8, %v1855_v0 }
0x15f5   :  { %v1837_v52 = vpop.permute.xlu0 %1836  ;;  %v1810_v62 = vld [vmem:[#allocation2 + $0xc] sm:$0x3] }
0x15f6   :  { %v1857_v55 = vsel %vm1852_vm7, %v1808_v50, %v1837_v52  ;;  %1842 = vrot.lane.b32.xlu1 %v1819_v54, %s2394_s14 }
0x15f7   :  { %1866 = vst.msk [vmem:[%s3069_s5 + $0x8] sm:$0x3] %vm1861_vm8, %v1857_v55 }
0x1642   :  { %v1801_v57 = vpop.permute.xlu1 %1800 }
0x1643   :  { %1803 = vst.msk [vmem:[#allocation3] sm:$0x3] %vm237_vm6, %v1801_v57 }
0x1646   :  { %v459_v58 = vpop.permute.xlu1 %458 }
0x1647   :  { %462 = vst.msk [vmem:[#allocation2 + $0x2] sm:$0x3] %vm237_vm6, %v459_v58 }
0x164a   :  { %v907_v60 = vpop.permute.xlu1 %906  ;;  %v1812_v63 = vld [vmem:[#allocation3] sm:$0x3] }
0x164b   :  { %910 = vst.msk [vmem:[#allocation2 + $0x6] sm:$0x3] %vm237_vm6, %v907_v60  ;;  %1828 = vrot.lane.b32.xlu0 %v1812_v63, %s2394_s14 }
0x164e   :  { %v1351_v1 = vpop.permute.xlu1 %1350  ;;  %v1805_v3 = vld [vmem:[#allocation2 + $0x2] sm:$0x3] }
0x164f   :  { %1354 = vst.msk [vmem:[#allocation2 + $0xa] sm:$0x3] %vm237_vm6, %v1351_v1  ;;  %1840 = vrot.lane.b32.xlu0 %v1818_v2, %s2394_s14 }
0x1652   :  { %v1807_v6 = vld [vmem:[#allocation2 + $0x6] sm:$0x3] }
0x1656   :  { %v1809_v10 = vld [vmem:[#allocation2 + $0xa] sm:$0x3] }
0x1658   :  { %v1831_v4 = vpop.permute.xlu1 %1830 }
0x1659   :  { %v1854_v5 = vsel %vm1852_vm7, %v1805_v3, %v1831_v4 }
0x165a   :  { %1863 = vst.msk [vmem:[%s3069_s5 + $0x2] sm:$0x3] %vm1861_vm8, %v1854_v5 }
0x165c   :  { %v1835_v7 = vpop.permute.xlu1 %1834 }
0x165d   :  { %v1856_v8 = vsel %vm1852_vm7, %v1807_v6, %v1835_v7 }
0x165e   :  { %1865 = vst.msk [vmem:[%s3069_s5 + $0x6] sm:$0x3] %vm1861_vm8, %v1856_v8 }
0x1660   :  { %v1795_v9 = vpop.permute.xlu1 %1794 }
0x1661   :  { %1798 = vst.msk [vmem:[#allocation2 + $0xe] sm:$0x3] %vm237_vm6, %v1795_v9 }
0x1664   :  { %v1839_v13 = vpop.permute.xlu1 %1838 }
0x1665   :  { %v1858_v11 = vsel %vm1852_vm7, %v1809_v10, %v1839_v13 }
0x1666   :  { %1867 = vst.msk [vmem:[%s3069_s5 + $0xa] sm:$0x3] %vm1861_vm8, %v1858_v11 }
0x1668   :  { %v1811_v12 = vld [vmem:[#allocation2 + $0xe] sm:$0x3]  ;;  %v1843_v14 = vpop.permute.xlu1 %1842 }
0x1669   :  { %v1860_v15 = vsel %vm1852_vm7, %v1811_v12, %v1843_v14 }
0x166a   :  { %1869 = vst.msk [vmem:[%s3069_s5 + $0xe] sm:$0x3] %vm1861_vm8, %v1860_v15 }
0x16bd   :  { %v1829_v16 = vpop.permute.xlu0 %1828 }
0x16be   :  { %v1853_v17 = vsel %vm1852_vm7, %v1804_v56, %v1829_v16 }
0x16bf   :  { %1862 = vst.msk [vmem:[%s3069_s5] sm:$0x3] %vm1861_vm8, %v1853_v17 }
0x16c1   :  { %v1841_v18 = vpop.permute.xlu0 %1840 }
0x16c2   :  { %v1859_v19 = vsel %vm1852_vm7, %v1810_v62, %v1841_v18 }
0x16c3   :  { %1868 = vst.msk [vmem:[%s3069_s5 + $0xc] sm:$0x3] %vm1861_vm8, %v1859_v19 }

// kernel: tacotron2_forward.5
= control target key start
LH: loop header
LB: loop body
LE: loop exit
PB: predicated region body
PF: predicated region fallthrough
CT: control target
= control target key end

     0   :  { %v11943_v0 = vmov 0.0   ;;  %vm11944_vm0 = vmmov 0   ;;  %vm102_vm1 = vcmask 654336   ;;  %vm164_vm2 = vcmask 261120   ;;  %s11945_s18 = smov 64   ;;  %s11946_s19 = smov 32   ;;  %s14633_s7 = inlined_call_operand.vmem [shape: bf16[80,32], index: 7, kind: input, shape index: {}]   ;;  %s14634_s8 = inlined_call_operand.vmem [shape: bf16[32,32], index: 8, kind: input, shape index: {}]   ;;  %s14635_s0 = inlined_call_operand.vmem [shape: f32[10,2,80], index: 0, kind: input, shape index: {}]   ;;  %s14636_s9 = inlined_call_operand.vmem [shape: bf16[96,128], index: 9, kind: input, shape index: {}]   ;;  %s14637_s10 = inlined_call_operand.vmem [shape: f32[1,128], index: 10, kind: input, shape index: {}]   ;;  %s14638_s5 = inlined_call_operand.vmem [shape: bf16[32,128], index: 5, kind: input, shape index: {}]   ;;  %s14639_s4 = inlined_call_operand.vmem [shape: bf16[16,128], index: 4, kind: input, shape index: {}]   ;;  %s14640_s6 = inlined_call_operand.vmem [shape: bf16[128,8], index: 6, kind: input, shape index: {}]   ;;  %s14641_s2 = inlined_call_operand.vmem [shape: f32[2,128], index: 2, kind: input, shape index: {}]   ;;  %s14642_s3 = inlined_call_operand.vmem [shape: f32[2,8], index: 3, kind: input, shape index: {}]   ;;  %s14643_s1 = inlined_call_operand.vmem [shape: f32[2,8,32], index: 1, kind: input, shape index: {}]   ;;  %s14644_s11 = inlined_call_operand.vmem [shape: bf16[96,128], index: 11, kind: input, shape index: {}]   ;;  %s14645_s12 = inlined_call_operand.vmem [shape: f32[1,128], index: 12, kind: input, shape index: {}]   ;;  %s14646_s13 = inlined_call_operand.vmem [shape: bf16[64,128], index: 13, kind: input, shape index: {}]   ;;  %s14647_s14 = inlined_call_operand.vmem [shape: f32[1,128], index: 14, kind: input, shape index: {}]   ;;  %s14648_s15 = inlined_call_operand.vmem [shape: f32[10,2,128], index: 15, kind: output, shape index: {}]  }
   0x1   :  { %10207 = vmatprep.subr.bf16.mxu0 %v11943_v0  ;;  %v11366_v1 = vld [vmem:[%s14633_s7 + $0x20] sm:$0xff]   ;;  %10217 = vmatprep.mubr.msk.bf16.mxu0 %vm11944_vm0, %v11943_v0  ;;  %v11367_v2 = vld [vmem:[%s14633_s7 + $0x18] sm:$0xff]   ;;  %v11368_v3 = vld [vmem:[%s14633_s7 + $0x10] sm:$0xff]   ;;  %vm210_vm3 = vcmask 523264   ;;  %vm268_vm4 = vcmask 785408   ;;  %v55_v39 = vlaneseq  ;;  %v11947_v59 = vmov 0.0|0.0  }
   0x2   :  { %10221 = vmatprep.subr.bf16.mxu1 %v11943_v0  ;;  %10225 = vmatprep.mubr.msk.bf16.mxu1 %vm11944_vm0, %v11943_v0  ;;  %v11371_v4 = vld [vmem:[%s14634_s8 + $0x8] sm:$0xff]   ;;  %v11370_v6 = vld [vmem:[%s14633_s7] sm:$0xff]   ;;  %v11375_v18 = vld [vmem:[%s14636_s9 + $0x18] sm:$0xff]   ;;  %vm560_vm8 = vcmask 58368   ;;  %vm595_vm9 = vcmask 64512   ;;  %vm748_vm10 = vcmask 1041409  }
   0x3   :  { %10208 = vmatpush3.bf16.msra.mxu0 %v11366_v1  ;;  %v11369_v5 = vld [vmem:[%s14633_s7 + $0x8] sm:$0xff]   ;;  %10222 = vmatpush3.bf16.msra.mxu1 %v11371_v4  ;;  %v60_v7 = vld [vmem:[%s14635_s0] sm:$0x3]  ;;  %v11376_v19 = vld [vmem:[%s14636_s9 + $0x10] sm:$0xff]   ;;  %v56_v40 = vand.u32 127, %v55_v39  ;;  %s11949_s17 = smov 96  }
   0x4   :  { %10209 = vmatprep.subr.bf16.mxu0 %v11943_v0  ;;  %10223 = vmatprep.subr.bf16.mxu1 %v11943_v0  ;;  %v71_v8 = vpack.c.bf16 %v60_v7, %v60_v7  ;;  %v11372_v9 = vld [vmem:[%s14634_s8] sm:$0xff]   ;;  %v11373_v13 = vld [vmem:[%s14636_s9 + $0x28] sm:$0xff]   ;;  %v11382_v55 = vld [vmem:[%s14640_s6 + $0x38] sm:$0xff]   ;;  %s11950_s30 = smov 8   ;;  %vm409_vm11 = vcmask 130048   ;;  %vm970_vm12 = vcmask 662528  }
   0x5   :  { %v11374_v17 = vld [vmem:[%s14636_s9 + $0x20] sm:$0xff]   ;;  %v11377_v20 = vld [vmem:[%s14636_s9 + $0x8] sm:$0xff]   ;;  %vm57_vm5 = vcmp.ge.s32.totalorder %v56_v40, 64  ;;  %vm58_vm6 = vcmp.lt.s32.totalorder %v56_v40, 96  ;;  %v11383_v60 = vld [vmem:[%s14640_s6 + $0x30] sm:$0xff]   ;;  %vm972_vm13 = vcmask 728064  }
   0x6   :  { %v11378_v21 = vld [vmem:[%s14636_s9] sm:$0xff]   ;;  %vm12108_vm7 = vmand %vm57_vm5, %vm58_vm6  ;;  %v11379_v50 = vld [vmem:[%s14638_s5 + $0x8] sm:$0xff]  }
   0x7   :  { %10210 = vmatpush3.bf16.msra.mxu0 %v11367_v2  ;;  %10224 = vmatpush3.bf16.msra.mxu1 %v11372_v9  ;;  %v9259_v30 = vld [vmem:[%s14637_s10] ss:$0 sm:$0xff]  ;;  %v11384_v61 = vld [vmem:[%s14640_s6 + $0x28] sm:$0xff]   ;;  %v11386_v63 = vld [vmem:[%s14640_s6 + $0x18] sm:$0xff]  }
   0x8   :  { %10211 = vmatprep.subr.bf16.mxu0 %v11943_v0  ;;  %10229 = vmatprep.subr.bf16.mxu1 %v11943_v0  ;;  %v11380_v51 = vld [vmem:[%s14638_s5] sm:$0xff]   ;;  %v11387_v1 = vld [vmem:[%s14640_s6 + $0x10] sm:$0xff]   ;;  %v11388_v2 = vld [vmem:[%s14640_s6 + $0x8] sm:$0xff]  }
   0x9   :  { %v11381_v57 = vld [vmem:[%s14639_s4] sm:$0xff]   ;;  %v11702_v41 = vld [vmem:[%s14646_s13 + $0x18] sm:$0xff]  }
   0xa   :  { %v11385_v62 = vld [vmem:[%s14640_s6 + $0x20] sm:$0xff]  }
   0xb   :  { %10212 = vmatpush3.bf16.msra.mxu0 %v11368_v3  ;;  %v11389_v3 = vld [vmem:[%s14640_s6] sm:$0xff]  }
   0xc   :  { %10213 = vmatprep.subr.bf16.mxu0 %v11943_v0 }
   0xf   :  { %10214 = vmatpush3.bf16.msra.mxu0 %v11369_v5 }
  0x10   :  { %10215 = vmatprep.subr.bf16.mxu0 %v11943_v0 }
  0x13   :  { %10216 = vmatpush3.bf16.msra.mxu0 %v11370_v6  ;;  %v12177_v6 = vld [vmem:[%s14641_s2] sm:$0x3] }
  0x14   :  { %10245 = vmatprep.subr.bf16.mxu0 %v11943_v0 }
  0x16   :  { %10218 = vmatmul.mubr.msk.bf16.vlgmr.msra.gmra.mxu0 %vm102_vm1, %v71_v8 }
  0x17   :  { %10249 = vmatprep.mubr.msk.bf16.mxu0 %vm11944_vm0, %v11943_v0  ;;  %10246 = vmatpush3.bf16.msra.mxu0 %v11379_v50  ;;  %v11395_v50 = vld [vmem:[%s14644_s11] sm:$0xff]  }
  0x18   :  { %10247 = vmatprep.subr.bf16.mxu0 %v11943_v0 }
  0x1b   :  { %10248 = vmatpush3.bf16.msra.mxu0 %v11380_v51 }
  0x1c   :  { %10253 = vmatprep.subr.bf16.mxu0 %v11943_v0 }
  0xd6   :  { %v140_v10 = vpop.f32.mrf.mxu0 }
  0xd7   :  { %v146_v11 = vmax.f32 %v140_v10, 0.0 }
  0xd8   :  { %v10219_v12 = vpop.f32.mrf.mxu0 }
  0xd9   :  { %v151_v14 = vpack.c.bf16 %v146_v11, %v146_v11 }
  0xda   :  { %v143_v15 = vpop.f32.mrf.mxu0 }
  0xdb   :  { %10226 = vmatmul.mubr.msk.bf16.vlgmr.msra.gmra.mxu1 %vm164_vm2, %v151_v14 }
  0xdc   :  { %v10220_v16 = vpop.f32.mrf.mxu0  ;;  %10230 = vmatpush3.bf16.msra.mxu1 %v11373_v13  ;;  %10241 = vmatprep.mubr.msk.bf16.mxu1 %vm11944_vm0, %v11943_v0 }
  0xdd   :  { %10231 = vmatprep.subr.bf16.mxu1 %v11943_v0 }
  0xe0   :  { %10232 = vmatpush3.bf16.msra.mxu1 %v11374_v17  ;;  %v12185_v17 = vld [vmem:[%s14642_s3] sm:$0x3] }
  0xe1   :  { %10233 = vmatprep.subr.bf16.mxu1 %v11943_v0 }
  0xe4   :  { %10234 = vmatpush3.bf16.msra.mxu1 %v11375_v18 }
  0xe5   :  { %10235 = vmatprep.subr.bf16.mxu1 %v11943_v0 }
  0xe8   :  { %10236 = vmatpush3.bf16.msra.mxu1 %v11376_v19 }
  0xe9   :  { %10237 = vmatprep.subr.bf16.mxu1 %v11943_v0 }
  0xec   :  { %10238 = vmatpush3.bf16.msra.mxu1 %v11377_v20 }
  0xed   :  { %10239 = vmatprep.subr.bf16.mxu1 %v11943_v0 }
  0xf0   :  { %10240 = vmatpush3.bf16.msra.mxu1 %v11378_v21 }
  0xf1   :  { %10259 = vmatprep.subr.bf16.mxu1 %v11943_v0 }
 0x19b   :  { %v202_v22 = vpop.f32.mrf.mxu1 }
 0x19c   :  { %v208_v23 = vmax.f32 %v202_v22, 0.0 }
 0x19d   :  { %v10227_v24 = vpop.f32.mrf.mxu1 }
 0x19e   :  { %v209_v25 = vsel %vm164_vm2, %v208_v23, 0.0 }
 0x19f   :  { %v211_v26 = vsel %vm210_vm3, %v209_v25, 0.0  ;;  %v205_v27 = vpop.f32.mrf.mxu1 }
 0x1a0   :  { %v225_v28 = vpack.c.bf16 %v211_v26, %v211_v26 }
 0x1a1   :  { %v10228_v29 = vpop.f32.mrf.mxu1 }
 0x1a2   :  { %10242 = vmatmul.mubr.msk.bf16.vlgmr.msra.gmra.mxu1 %vm268_vm4, %v225_v28  ;;  %v12193_v29 = vld [vmem:[%s14643_s1] sm:$0xff] }
 0x1a3   :  { %10275 = vmatprep.mubr.msk.bf16.mxu1 %vm11944_vm0, %v11943_v0  ;;  %10260 = vmatpush3.bf16.msra.mxu1 %v11382_v55 }
 0x1a4   :  { %10261 = vmatprep.subr.bf16.mxu1 %v11943_v0 }
 0x1a7   :  { %10262 = vmatpush3.bf16.msra.mxu1 %v11383_v60 }
 0x1a8   :  { %10263 = vmatprep.subr.bf16.mxu1 %v11943_v0 }
 0x1ab   :  { %10264 = vmatpush3.bf16.msra.mxu1 %v11384_v61 }
 0x1ac   :  { %10265 = vmatprep.subr.bf16.mxu1 %v11943_v0 }
 0x1af   :  { %10266 = vmatpush3.bf16.msra.mxu1 %v11385_v62 }
 0x1b0   :  { %10267 = vmatprep.subr.bf16.mxu1 %v11943_v0 }
 0x1b3   :  { %10268 = vmatpush3.bf16.msra.mxu1 %v11386_v63 }
 0x1b4   :  { %10269 = vmatprep.subr.bf16.mxu1 %v11943_v0 }
 0x1b7   :  { %10270 = vmatpush3.bf16.msra.mxu1 %v11387_v1 }
 0x1b8   :  { %10271 = vmatprep.subr.bf16.mxu1 %v11943_v0 }
 0x1bb   :  { %10272 = vmatpush3.bf16.msra.mxu1 %v11388_v2  ;;  %v12257_v2 = vld [vmem:[%s14645_s12] ss:$0 sm:$0xff] }
 0x1bc   :  { %10273 = vmatprep.subr.bf16.mxu1 %v11943_v0 }
 0x1bf   :  { %10274 = vmatpush3.bf16.msra.mxu1 %v11389_v3 }
 0x1c0   :  { %10305 = vmatprep.subr.bf16.mxu1 %v11943_v0 }
 0x262   :  { %v306_v31 = vpop.f32.mrf.mxu1 }
 0x263   :  { %v307_v32 = vadd.f32 %v9259_v30, %v306_v31  ;;  %v11948_v31 = vmov 1966171168  }
 0x264   :  { %v10243_v33 = vpop.f32.mrf.mxu1 }
 0x265   :  { %v9267_v34 = vmul.f32 -1.442695, %v307_v32 }
 0x266   :  { %v309_v35 = vpop.f32.mrf.mxu1 }
 0x267   :  { %11706 = vpow2.f32 %v9267_v34  ;;  %v577_v34 = vshrl.u32 %v55_v39, 7 }
 0x268   :  { %v10244_v36 = vpop.f32.mrf.mxu1  ;;  %11708 = vtanh.f32 %v307_v32  ;;  %v574_v32 = vunpack.c.l.s4 %v11948_v31  ;;  %v11403_v31 = vld [vmem:[%s14646_s13 + $0x8] sm:$0xff]  }
 0x26a   :  { %v575_v33 = vunpack.c.0.s8 %v574_v32 }
 0x26c   :  { %v12198_v35 = vsub.s32 %v575_v33, %v577_v34  ;;  %v11404_v33 = vld [vmem:[%s14646_s13] sm:$0xff]  }
 0x274   :  { %v11707_v37 = vpop.eup %11706 }
 0x275   :  { %v316_v38 = vadd.f32 1.0, %v11707_v37  ;;  %v11709_v42 = vpop.eup %11708 }
 0x277   :  { %11710 = vrcp.f32 %v316_v38 }
 0x284   :  { %v11711_v43 = vpop.eup %11710 }
 0x285   :  { %v319_v44 = vsel %vm12108_vm7, %v11709_v42, %v11711_v43  ;;  %v12208_v42 = vld [vmem:[%s14643_s1 + $0x8] sm:$0xff] }
 0x286   :  { %322 = vrot.lane.b32.xlu0 %v319_v44, %s11945_s18  ;;  %v320_v47 = vmul.f32 0.0, %v319_v44 }
 0x2f8   :  { %v323_v45 = vpop.permute.xlu0 %322 }
 0x2f9   :  { %v325_v46 = vmul.f32 %v323_v45, %v319_v44  ;;  %v11391_v45 = vld [vmem:[%s14644_s11 + $0x20] sm:$0xff]  }
 0x2fb   :  { %327 = vrot.lane.b32.xlu0 %v325_v46, %s11946_s19  ;;  %v11392_v46 = vld [vmem:[%s14644_s11 + $0x18] sm:$0xff]  }
 0x36d   :  { %v328_v48 = vpop.permute.xlu0 %327 }
 0x36e   :  { %v12116_v49 = vadd.f32 %v328_v48, %v320_v47  ;;  %v11393_v47 = vld [vmem:[%s14644_s11 + $0x10] sm:$0xff]   ;;  %v11394_v48 = vld [vmem:[%s14644_s11 + $0x8] sm:$0xff]  }
 0x370   :  { %11712 = vtanh.f32 %v12116_v49 }
 0x37d   :  { %v11713_v52 = vpop.eup %11712 }
 0x37e   :  { %333 = vrot.lane.b32.xlu1 %v11713_v52, %s11945_s18 }
 0x3f0   :  { %v334_v53 = vpop.permute.xlu1 %333 }
 0x3f1   :  { %v12128_v54 = vmul.f32 %v334_v53, %v319_v44  ;;  %v11390_v44 = vld [vmem:[%s14644_s11 + $0x28] sm:$0xff]  }
 0x3f3   :  { %v341_v56 = vpack.c.bf16 %v12128_v54, %v12128_v54 }
 0x3f5   :  { %343 = vrot.lane.b32.xlu1 %v341_v56, %s11946_s19 }
 0x467   :  { %v344_v58 = vpop.permute.xlu1 %343 }
 0x468   :  { %10250 = vmatmul.mubr.msk.bf16.vlgmr.msra.gmra.mxu0 %vm164_vm2, %v344_v58 }
 0x469   :  { %10254 = vmatpush3.bf16.msra.mxu0 %v11381_v57  ;;  %10255 = vmatprep.mubr.msk.bf16.mxu0 %vm11944_vm0, %v11943_v0 }
 0x46a   :  { %10279 = vmatprep.subr.mxu0 %v11943_v0 }
 0x470   :  { %10256 = vmatmul.mubr.bf16.vlgmr.msra.gmra.mxu0 %v11947_v59 }
 0x471   :  { %10281 = vmatprep.mubr.msk.f32.mxu0 %vm11944_vm0, %v11943_v0  ;;  %10280 = vmatpush3.msra.mxu0 %v12193_v29 }
 0x472   :  { %10284 = vmatprep.subr.mxu0 %v11943_v0 }
 0x528   :  { %v394_v4 = vpop.f32.mrf.mxu0 }
 0x529   :  { %v395_v9 = vadd.f32 %v394_v4, %v12177_v6 }
 0x52a   :  { %v10251_v5 = vpop.f32.mrf.mxu0 }
 0x52c   :  { %v397_v7 = vpop.f32.mrf.mxu0 }
 0x52e   :  { %v10252_v8 = vpop.f32.mrf.mxu0 }
 0x530   :  { %v447_v10 = vpop.f32.mrf.mxu0 }
 0x531   :  { %v453_v11 = vadd.f32 %v447_v10, %v395_v9 }
 0x532   :  { %v10257_v12 = vpop.f32.mrf.mxu0 }
 0x533   :  { %11714 = vtanh.f32 %v453_v11 }
 0x534   :  { %v450_v13 = vpop.f32.mrf.mxu0 }
 0x536   :  { %v10258_v14 = vpop.f32.mrf.mxu0 }
 0x540   :  { %v11715_v15 = vpop.eup %11714 }
 0x541   :  { %v471_v16 = vpack.c.bf16 %v11715_v15, %v11715_v15 }
 0x543   :  { %10276 = vmatmul.mubr.bf16.vlgmr.msra.gmra.mxu1 %v471_v16 }
 0x544   :  { %10313 = vmatprep.mubr.msk.bf16.mxu1 %vm11944_vm0, %v11943_v0 }
 0x603   :  { %v554_v18 = vpop.f32.mrf.mxu1 }
 0x604   :  { %v555_v19 = vadd.f32 %v554_v18, %v12185_v17  ;;  %v11396_v18 = vld [vmem:[%s14633_s7 + $0x20] sm:$0xff]  }
 0x605   :  { %v10277_v20 = vpop.f32.mrf.mxu1 }
 0x606   :  { %v561_v21 = vsel %vm560_vm8, %v555_v19, -inf  ;;  %v11398_v20 = vld [vmem:[%s14633_s7 + $0x10] sm:$0xff]  }
 0x607   :  { %562 = vmax.xlane.f32.xlu0 %v561_v21  ;;  %v557_v22 = vpop.f32.mrf.mxu1  ;;  %v11399_v21 = vld [vmem:[%s14633_s7 + $0x8] sm:$0xff]  }
 0x608   :  { %v11400_v22 = vld [vmem:[%s14633_s7] sm:$0xff]  }
 0x609   :  { %v10278_v23 = vpop.f32.mrf.mxu1 }
 0x60a   :  { %v9297_v23 = vld [vmem:[%s14635_s0 + $0x2] sm:$0x3] }
 0x690   :  { %v563_v24 = vpop.xlane.xlu0 %562 }
 0x691   :  { %v564_v25 = vsub.f32 %v555_v19, %v563_v24  ;;  %v11397_v19 = vld [vmem:[%s14633_s7 + $0x18] sm:$0xff]   ;;  %v988_v24 = vpack.c.bf16 %v9297_v23, %v9297_v23 }
 0x693   :  { %v565_v26 = vmul.f32 1.442695, %v564_v25 }
 0x695   :  { %11716 = vpow2.f32 %v565_v26 }
 0x6a2   :  { %v11717_v27 = vpop.eup %11716 }
 0x6a3   :  { %v567_v28 = vsel %vm560_vm8, %v11717_v27, 0.0 }
 0x6a4   :  { %568 = vadd.xlane.f32.xlu1 %v567_v28  ;;  %v11401_v28 = vld [vmem:[%s14646_s13 + $0x18] sm:$0xff]  }
 0x6a5   :  { %10306 = vmatpush3.bf16.msra.mxu1 %v11401_v28  ;;  %v11413_v28 = vld [vmem:[%s14638_s5 + $0x8] sm:$0xff]  }
 0x6a6   :  { %10307 = vmatprep.subr.bf16.mxu1 %v11943_v0 }
 0x72d   :  { %v569_v30 = vpop.xlane.xlu1 %568 }
 0x72e   :  { %11718 = vrcp.f32 %v569_v30  ;;  %v11402_v30 = vld [vmem:[%s14646_s13 + $0x10] sm:$0xff]  }
 0x72f   :  { %10308 = vmatpush3.bf16.msra.mxu1 %v11402_v30  ;;  %v11414_v30 = vld [vmem:[%s14638_s5] sm:$0xff]  }
 0x730   :  { %10309 = vmatprep.subr.bf16.mxu1 %v11943_v0 }
 0x733   :  { %10310 = vmatpush3.bf16.msra.mxu1 %v11403_v31 }
 0x734   :  { %10311 = vmatprep.subr.bf16.mxu1 %v11943_v0 }
 0x737   :  { %10312 = vmatpush3.bf16.msra.mxu1 %v11404_v33 }
 0x738   :  { %10331 = vmatprep.subr.bf16.mxu1 %v11943_v0 }
 0x73b   :  { %v11719_v36 = vpop.eup %11718 }
 0x73c   :  { %v12200_v37 = vmul.f32 %v11719_v36, %v11717_v27 }
 0x73e   :  { %v579_v38 = vrot.slane %v12200_v37, %v12198_v35 }
 0x740   :  { %v587_v40 = vrot.slane %v579_v38, %v12198_v35  ;;  %v580_v43 = vcombine.high %v579_v38, %v579_v38 }
 0x742   :  { %10282 = vmatmul.mubr.msk.f32.vlgmr.msra.gmra.mxu0 %vm595_vm9, %v587_v40  ;;  %v594_v39 = vrot.slane %v580_v43, %v12198_v35 }
 0x743   :  { %10285 = vmatpush3.msra.mxu0 %v12208_v42  ;;  %10286 = vmatprep.mubr.msk.f32.mxu0 %vm11944_vm0, %v11943_v0 }
 0x744   :  { %10289 = vmatprep.subr.bf16.mxu0 %v11943_v0 }
 0x746   :  { %10287 = vmatmul.mubr.msk.f32.vlgmr.msra.gmra.mxu0 %vm595_vm9, %v594_v39 }
 0x747   :  { %10301 = vmatprep.mubr.msk.bf16.mxu0 %vm11944_vm0, %v11943_v0  ;;  %10290 = vmatpush3.bf16.msra.mxu0 %v11390_v44 }
 0x748   :  { %10291 = vmatprep.subr.bf16.mxu0 %v11943_v0 }
 0x74b   :  { %10292 = vmatpush3.bf16.msra.mxu0 %v11391_v45 }
 0x74c   :  { %10293 = vmatprep.subr.bf16.mxu0 %v11943_v0 }
 0x74f   :  { %10294 = vmatpush3.bf16.msra.mxu0 %v11392_v46 }
 0x750   :  { %10295 = vmatprep.subr.bf16.mxu0 %v11943_v0 }
 0x753   :  { %10296 = vmatpush3.bf16.msra.mxu0 %v11393_v47 }
 0x754   :  { %10297 = vmatprep.subr.bf16.mxu0 %v11943_v0 }
 0x757   :  { %10298 = vmatpush3.bf16.msra.mxu0 %v11394_v48  ;;  %v11406_v48 = vld [vmem:[%s14634_s8] sm:$0xff]  }
 0x758   :  { %10299 = vmatprep.subr.bf16.mxu0 %v11943_v0 }
 0x75b   :  { %10300 = vmatpush3.bf16.msra.mxu0 %v11395_v50 }
 0x75c   :  { %10317 = vmatprep.subr.bf16.mxu0 %v11943_v0 }
 0x802   :  { %v664_v51 = vpop.f32.mrf.mxu0 }
 0x804   :  { %v10283_v52 = vpop.f32.mrf.mxu0 }
 0x805   :  { %v11408_v52 = vld [vmem:[%s14636_s9 + $0x20] sm:$0xff]  }
 0x806   :  { %v736_v53 = vpop.f32.mrf.mxu0 }
 0x807   :  { %v747_v55 = vrot.slane %v736_v53, 7  ;;  %v11409_v53 = vld [vmem:[%s14636_s9 + $0x18] sm:$0xff]  }
 0x808   :  { %v10288_v56 = vpop.f32.mrf.mxu0 }
 0x809   :  { %v749_v57 = vsel %vm748_vm10, %v747_v55, %v664_v51  ;;  %v11407_v51 = vld [vmem:[%s14636_s9 + $0x28] sm:$0xff]   ;;  %v11410_v55 = vld [vmem:[%s14636_s9 + $0x10] sm:$0xff]  }
 0x80a   :  { %v11316_v58 = vpack.i.bf16 %v749_v57, %v12128_v54  ;;  %v11411_v56 = vld [vmem:[%s14636_s9 + $0x8] sm:$0xff]   ;;  %v11412_v57 = vld [vmem:[%s14636_s9] sm:$0xff]  }
 0x80c   :  { %11317 = vrot.lane.b32.xlu0 %v11316_v58, %s11946_s19 }
 0x87e   :  { %v11318_v59 = vpop.permute.xlu0 %11317 }
 0x87f   :  { %v12246_v60 = vunpack.i.h.bf16 %v11318_v59  ;;  %v11319_v61 = vunpack.i.l.bf16 %v11318_v59 }
 0x881   :  { %v753_v62 = vsel %vm164_vm2, %v11319_v61, %v12246_v60 }
 0x882   :  { %v754_v63 = vsel %vm210_vm3, %v753_v62, 0.0 }
 0x883   :  { %v768_v1 = vpack.c.bf16 %v754_v63, %v754_v63 }
 0x885   :  { %10302 = vmatmul.mubr.msk.bf16.vlgmr.msra.gmra.mxu0 %vm268_vm4, %v768_v1 }
 0x886   :  { %10327 = vmatprep.mubr.msk.bf16.mxu0 %vm11944_vm0, %v11943_v0  ;;  %10318 = vmatpush3.bf16.msra.mxu0 %v11396_v18 }
 0x887   :  { %10319 = vmatprep.subr.bf16.mxu0 %v11943_v0 }
 0x88a   :  { %10320 = vmatpush3.bf16.msra.mxu0 %v11397_v19 }
 0x88b   :  { %10321 = vmatprep.subr.bf16.mxu0 %v11943_v0 }
 0x88e   :  { %10322 = vmatpush3.bf16.msra.mxu0 %v11398_v20 }
 0x88f   :  { %10323 = vmatprep.subr.bf16.mxu0 %v11943_v0 }
 0x892   :  { %10324 = vmatpush3.bf16.msra.mxu0 %v11399_v21 }
 0x893   :  { %10325 = vmatprep.subr.bf16.mxu0 %v11943_v0 }
 0x896   :  { %10326 = vmatpush3.bf16.msra.mxu0 %v11400_v22 }
 0x897   :  { %10355 = vmatprep.subr.bf16.mxu0 %v11943_v0 }
 0x899   :  { %10328 = vmatmul.mubr.msk.bf16.vlgmr.msra.gmra.mxu0 %vm102_vm1, %v988_v24 }
 0x89a   :  { %10359 = vmatprep.mubr.msk.bf16.mxu0 %vm11944_vm0, %v11943_v0  ;;  %10356 = vmatpush3.bf16.msra.mxu0 %v11413_v28 }
 0x89b   :  { %10357 = vmatprep.subr.bf16.mxu0 %v11943_v0 }
 0x89e   :  { %10358 = vmatpush3.bf16.msra.mxu0 %v11414_v30 }
 0x89f   :  { %10363 = vmatprep.subr.bf16.mxu0 %v11943_v0 }
 0x945   :  { %v848_v3 = vpop.f32.mrf.mxu0 }
 0x946   :  { %v849_v4 = vadd.f32 %v12257_v2, %v848_v3 }
 0x947   :  { %v10303_v5 = vpop.f32.mrf.mxu0 }
 0x948   :  { %v9290_v7 = vmul.f32 -1.442695, %v849_v4 }
 0x949   :  { %v851_v8 = vpop.f32.mrf.mxu0 }
 0x94a   :  { %11720 = vpow2.f32 %v9290_v7 }
 0x94b   :  { %v10304_v9 = vpop.f32.mrf.mxu0  ;;  %11722 = vtanh.f32 %v849_v4 }
 0x957   :  { %v11721_v10 = vpop.eup %11720 }
 0x958   :  { %v858_v11 = vadd.f32 1.0, %v11721_v10  ;;  %v11723_v12 = vpop.eup %11722 }
 0x959   :  { %v1056_v34 = vpop.f32.mrf.mxu0 }
 0x95a   :  { %11724 = vrcp.f32 %v858_v11  ;;  %v1062_v47 = vmax.f32 %v1056_v34, 0.0  ;;  %v11415_v34 = vld [vmem:[%s14639_s4] sm:$0xff]  }
 0x95b   :  { %v10329_v36 = vpop.f32.mrf.mxu0 }
 0x95c   :  { %v1067_v50 = vpack.c.bf16 %v1062_v47, %v1062_v47  ;;  %v11420_v47 = vld [vmem:[%s14640_s6 + $0x18] sm:$0xff]  }
 0x95d   :  { %v1059_v38 = vpop.f32.mrf.mxu0 }
 0x95f   :  { %v10330_v40 = vpop.f32.mrf.mxu0 }
 0x967   :  { %v11725_v13 = vpop.eup %11724 }
 0x968   :  { %v861_v14 = vsel %vm12108_vm7, %v11723_v12, %v11725_v13  ;;  %v11926_v12 = vld [vmem:[%s14637_s10] ss:$0 sm:$0xff] }
 0x969   :  { %864 = vrot.lane.b32.xlu1 %v861_v14, %s11945_s18  ;;  %v862_v25 = vmul.f32 0.0, %v861_v14 }
 0x9db   :  { %v865_v15 = vpop.permute.xlu1 %864 }
 0x9dc   :  { %v867_v16 = vmul.f32 %v865_v15, %v861_v14 }
 0x9de   :  { %869 = vrot.lane.b32.xlu0 %v867_v16, %s11946_s19 }
 0xa50   :  { %v870_v26 = vpop.permute.xlu0 %869 }
 0xa51   :  { %v12290_v27 = vadd.f32 %v870_v26, %v862_v25 }
 0xa53   :  { %11726 = vtanh.f32 %v12290_v27 }
 0xa60   :  { %v11727_v32 = vpop.eup %11726 }
 0xa61   :  { %875 = vrot.lane.b32.xlu1 %v11727_v32, %s11945_s18 }
 0xa65   :  { %1124 = vrot.lane.b32.xlu1 %v12128_v54, %s11949_s17  ;;  %v11405_v54 = vld [vmem:[%s14634_s8 + $0x8] sm:$0xff]  }
 0xad3   :  { %v876_v43 = vpop.permute.xlu1 %875 }
 0xad4   :  { %v12312_v39 = vmul.f32 %v876_v43, %v861_v14  ;;  %v11416_v43 = vld [vmem:[%s14640_s6 + $0x38] sm:$0xff]  }
 0xad6   :  { %880 = vrot.lane.b32.xlu0 %v12312_v39, %s11946_s19 }
 0xad7   :  { %v1125_v4 = vpop.permute.xlu1 %1124 }
 0xb48   :  { %v881_v44 = vpop.permute.xlu0 %880 }
 0xb49   :  { %v883_v45 = vsel %vm164_vm2, %v881_v44, %v12246_v60 }
 0xb4a   :  { %v892_v46 = vpack.c.bf16 %v883_v45, %v883_v45  ;;  %v11417_v45 = vld [vmem:[%s14640_s6 + $0x30] sm:$0xff]  }
 0xb4c   :  { %10314 = vmatmul.mubr.msk.bf16.vlgmr.msra.gmra.mxu1 %vm210_vm3, %v892_v46  ;;  %v11419_v46 = vld [vmem:[%s14640_s6 + $0x20] sm:$0xff]  }
 0xb4d   :  { %10332 = vmatpush3.bf16.msra.mxu1 %v11405_v54  ;;  %10335 = vmatprep.mubr.msk.bf16.mxu1 %vm11944_vm0, %v11943_v0  ;;  %v11418_v54 = vld [vmem:[%s14640_s6 + $0x28] sm:$0xff]  }
 0xb4e   :  { %10333 = vmatprep.subr.bf16.mxu1 %v11943_v0 }
 0xb51   :  { %10334 = vmatpush3.bf16.msra.mxu1 %v11406_v48  ;;  %v11421_v48 = vld [vmem:[%s14640_s6 + $0x10] sm:$0xff]  }
 0xb52   :  { %10339 = vmatprep.subr.bf16.mxu1 %v11943_v0 }
 0xb54   :  { %10336 = vmatmul.mubr.msk.bf16.vlgmr.msra.gmra.mxu1 %vm164_vm2, %v1067_v50  ;;  %v11422_v50 = vld [vmem:[%s14640_s6 + $0x8] sm:$0xff]  }
 0xb55   :  { %10340 = vmatpush3.bf16.msra.mxu1 %v11407_v51  ;;  %10351 = vmatprep.mubr.msk.bf16.mxu1 %vm11944_vm0, %v11943_v0  ;;  %v11423_v51 = vld [vmem:[%s14640_s6] sm:$0xff]  }
 0xb56   :  { %10341 = vmatprep.subr.bf16.mxu1 %v11943_v0 }
 0xb59   :  { %10342 = vmatpush3.bf16.msra.mxu1 %v11408_v52 }
 0xb5a   :  { %10343 = vmatprep.subr.bf16.mxu1 %v11943_v0 }
 0xb5d   :  { %10344 = vmatpush3.bf16.msra.mxu1 %v11409_v53 }
 0xb5e   :  { %10345 = vmatprep.subr.bf16.mxu1 %v11943_v0 }
 0xb61   :  { %10346 = vmatpush3.bf16.msra.mxu1 %v11410_v55 }
 0xb62   :  { %10347 = vmatprep.subr.bf16.mxu1 %v11943_v0 }
 0xb65   :  { %10348 = vmatpush3.bf16.msra.mxu1 %v11411_v56 }
 0xb66   :  { %10349 = vmatprep.subr.bf16.mxu1 %v11943_v0 }
 0xb69   :  { %10350 = vmatpush3.bf16.msra.mxu1 %v11412_v57 }
 0xb6a   :  { %10389 = vmatprep.subr.mxu1 %v11943_v0 }
 0xc0c   :  { %v12356_v58 = vpop.f32.mrf.mxu1 }
 0xc0e   :  { %v10315_v59 = vpop.f32.mrf.mxu1 }
 0xc10   :  { %v964_v61 = vpop.f32.mrf.mxu1 }
 0xc12   :  { %v10316_v62 = vpop.f32.mrf.mxu1 }
 0xc14   :  { %v1117_v63 = vpop.f32.mrf.mxu1 }
 0xc15   :  { %v1123_v1 = vmax.f32 %v1117_v63, 0.0 }
 0xc16   :  { %v10337_v3 = vpop.f32.mrf.mxu1 }
 0xc17   :  { %v1127_v5 = vsel %vm164_vm2, %v1123_v1, %v12246_v60 }
 0xc18   :  { %v1128_v7 = vsel %vm210_vm3, %v1127_v5, %v1125_v4  ;;  %v1120_v8 = vpop.f32.mrf.mxu1 }
 0xc19   :  { %v1142_v9 = vpack.c.bf16 %v1128_v7, %v1128_v7 }
 0xc1a   :  { %v10338_v10 = vpop.f32.mrf.mxu1 }
 0xc1b   :  { %10352 = vmatmul.mubr.msk.bf16.vlgmr.msra.gmra.mxu1 %vm268_vm4, %v1142_v9 }
 0xc1c   :  { %10390 = vmatpush3.msra.mxu1 %v12193_v29  ;;  %10391 = vmatprep.mubr.msk.f32.mxu1 %vm11944_vm0, %v11943_v0 }
 0xc1d   :  { %10394 = vmatprep.subr.mxu1 %v11943_v0 }
 0xcdb   :  { %v1222_v11 = vpop.f32.mrf.mxu1 }
 0xcdc   :  { %v1223_v60 = vadd.f32 %v11926_v12, %v1222_v11 }
 0xcdd   :  { %v10353_v13 = vpop.f32.mrf.mxu1 }
 0xcde   :  { %v9315_v14 = vmul.f32 -1.442695, %v1223_v60 }
 0xcdf   :  { %v1225_v15 = vpop.f32.mrf.mxu1 }
 0xce0   :  { %11728 = vpow2.f32 %v9315_v14 }
 0xce1   :  { %v10354_v16 = vpop.f32.mrf.mxu1  ;;  %11730 = vtanh.f32 %v1223_v60 }
 0xced   :  { %v11729_v18 = vpop.eup %11728 }
 0xcee   :  { %v1232_v19 = vadd.f32 1.0, %v11729_v18  ;;  %v11731_v29 = vpop.eup %11730 }
 0xcf0   :  { %11732 = vrcp.f32 %v1232_v19 }
 0xcfd   :  { %v11733_v20 = vpop.eup %11732 }
 0xcfe   :  { %v1235_v21 = vsel %vm12108_vm7, %v11731_v29, %v11733_v20  ;;  %v11424_v20 = vld [vmem:[%s14644_s11 + $0x28] sm:$0xff]  }
 0xcff   :  { %1238 = vrot.lane.b32.xlu0 %v1235_v21, %s11945_s18  ;;  %v1236_v24 = vmul.f32 %v1235_v21, %v12116_v49 }
 0xd71   :  { %v1239_v22 = vpop.permute.xlu0 %1238 }
 0xd72   :  { %v1241_v23 = vmul.f32 %v1239_v22, %v1235_v21  ;;  %v11427_v22 = vld [vmem:[%s14644_s11 + $0x10] sm:$0xff]  }
 0xd74   :  { %1243 = vrot.lane.b32.xlu1 %v1241_v23, %s11946_s19  ;;  %v11428_v23 = vld [vmem:[%s14644_s11 + $0x8] sm:$0xff]  }
 0xde6   :  { %v1244_v25 = vpop.permute.xlu1 %1243 }
 0xde7   :  { %v12374_v26 = vadd.f32 %v1244_v25, %v1236_v24  ;;  %v11429_v24 = vld [vmem:[%s14644_s11] sm:$0xff]  }
 0xde9   :  { %11734 = vtanh.f32 %v12374_v26 }
 0xdf6   :  { %v11735_v31 = vpop.eup %11734 }
 0xdf7   :  { %1249 = vrot.lane.b32.xlu0 %v11735_v31, %s11945_s18 }
 0xdfb   :  { %1254 = vrot.lane.b32.xlu0 %v12200_v37, %s11950_s30 }
 0xe69   :  { %v1250_v49 = vpop.permute.xlu0 %1249 }
 0xe6a   :  { %v12388_v32 = vmul.f32 %v1250_v49, %v1235_v21  ;;  %v11426_v21 = vld [vmem:[%s14644_s11 + $0x18] sm:$0xff]  }
 0xe6c   :  { %v1262_v33 = vpack.c.bf16 %v12388_v32, %v12388_v32 }
 0xe6d   :  { %v1255_v38 = vpop.permute.xlu0 %1254 }
 0xe6e   :  { %1264 = vrot.lane.b32.xlu1 %v1262_v33, %s11946_s19  ;;  %v1257_v40 = vsel %vm595_vm9, %v12200_v37, %v1255_v38 }
 0xe6f   :  { %v1323_v44 = vpack.c.bf16 %v1257_v40, %v1257_v40 }
 0xee0   :  { %v1265_v36 = vpop.permute.xlu1 %1264 }
 0xee1   :  { %10360 = vmatmul.mubr.msk.bf16.vlgmr.msra.gmra.mxu0 %vm164_vm2, %v1265_v36 }
 0xee2   :  { %10364 = vmatpush3.bf16.msra.mxu0 %v11415_v34  ;;  %10365 = vmatprep.mubr.msk.bf16.mxu0 %vm11944_vm0, %v11943_v0 }
 0xee3   :  { %10369 = vmatprep.subr.bf16.mxu0 %v11943_v0 }
 0xee9   :  { %10366 = vmatmul.mubr.msk.bf16.vlgmr.msra.gmra.mxu0 %vm409_vm11, %v1323_v44 }
 0xeea   :  { %10370 = vmatpush3.bf16.msra.mxu0 %v11416_v43  ;;  %10385 = vmatprep.mubr.msk.bf16.mxu0 %vm11944_vm0, %v11943_v0 }
 0xeeb   :  { %10371 = vmatprep.subr.bf16.mxu0 %v11943_v0 }
 0xeee   :  { %10372 = vmatpush3.bf16.msra.mxu0 %v11417_v45 }
 0xeef   :  { %10373 = vmatprep.subr.bf16.mxu0 %v11943_v0 }
 0xef2   :  { %10374 = vmatpush3.bf16.msra.mxu0 %v11418_v54 }
 0xef3   :  { %10375 = vmatprep.subr.bf16.mxu0 %v11943_v0 }
 0xef6   :  { %10376 = vmatpush3.bf16.msra.mxu0 %v11419_v46 }
 0xef7   :  { %10377 = vmatprep.subr.bf16.mxu0 %v11943_v0 }
 0xefa   :  { %10378 = vmatpush3.bf16.msra.mxu0 %v11420_v47 }
 0xefb   :  { %10379 = vmatprep.subr.bf16.mxu0 %v11943_v0 }
 0xefe   :  { %10380 = vmatpush3.bf16.msra.mxu0 %v11421_v48 }
 0xeff   :  { %10381 = vmatprep.subr.bf16.mxu0 %v11943_v0 }
 0xf02   :  { %10382 = vmatpush3.bf16.msra.mxu0 %v11422_v50 }
 0xf03   :  { %10383 = vmatprep.subr.bf16.mxu0 %v11943_v0 }
 0xf06   :  { %10384 = vmatpush3.bf16.msra.mxu0 %v11423_v51 }
 0xf07   :  { %10415 = vmatprep.subr.bf16.mxu0 %v11943_v0 }
 0xfa1   :  { %v1315_v52 = vpop.f32.mrf.mxu0 }
 0xfa2   :  { %v1316_v57 = vadd.f32 %v1315_v52, %v12177_v6 }
 0xfa3   :  { %v10361_v53 = vpop.f32.mrf.mxu0 }
 0xfa5   :  { %v1318_v55 = vpop.f32.mrf.mxu0 }
 0xfa7   :  { %v10362_v56 = vpop.f32.mrf.mxu0 }
 0xfa9   :  { %v1367_v59 = vpop.f32.mrf.mxu0 }
 0xfaa   :  { %v1373_v61 = vadd.f32 %v1367_v59, %v1316_v57 }
 0xfab   :  { %v10367_v62 = vpop.f32.mrf.mxu0 }
 0xfac   :  { %11736 = vtanh.f32 %v1373_v61 }
 0xfad   :  { %v1370_v63 = vpop.f32.mrf.mxu0 }
 0xfae   :  { %v11431_v63 = vld [vmem:[%s14633_s7 + $0x18] sm:$0xff]  }
 0xfaf   :  { %v10368_v1 = vpop.f32.mrf.mxu0 }
 0xfb0   :  { %v11432_v1 = vld [vmem:[%s14633_s7 + $0x10] sm:$0xff]  }
 0xfb9   :  { %v11737_v3 = vpop.eup %11736 }
 0xfba   :  { %v1391_v4 = vpack.c.bf16 %v11737_v3, %v11737_v3  ;;  %v11433_v3 = vld [vmem:[%s14633_s7 + $0x8] sm:$0xff]  }
 0xfbc   :  { %10386 = vmatmul.mubr.bf16.vlgmr.msra.gmra.mxu0 %v1391_v4  ;;  %v11434_v4 = vld [vmem:[%s14633_s7] sm:$0xff]  }
 0xfbd   :  { %10423 = vmatprep.mubr.msk.bf16.mxu0 %vm11944_vm0, %v11943_v0 }
0x107c   :  { %v1474_v5 = vpop.f32.mrf.mxu0 }
0x107d   :  { %v1475_v7 = vadd.f32 %v1474_v5, %v12185_v17  ;;  %v9347_v5 = vld [vmem:[%s14635_s0 + $0x4] sm:$0x3] }
0x107e   :  { %v10387_v8 = vpop.f32.mrf.mxu0 }
0x107f   :  { %v1480_v9 = vsel %vm560_vm8, %v1475_v7, -inf }
0x1080   :  { %1481 = vmax.xlane.f32.xlu1 %v1480_v9  ;;  %v1477_v6 = vpop.f32.mrf.mxu0 }
0x1082   :  { %v10388_v10 = vpop.f32.mrf.mxu0 }
0x1083   :  { %v11435_v10 = vld [vmem:[%s14646_s13 + $0x18] sm:$0xff]  }
0x1084   :  { %10416 = vmatpush3.bf16.msra.mxu0 %v11435_v10  ;;  %v11448_v10 = vld [vmem:[%s14638_s5] sm:$0xff]  }
0x1085   :  { %10417 = vmatprep.subr.bf16.mxu0 %v11943_v0 }
0x1091   :  { %1670 = vrot.lane.b32.xlu1 %v12312_v39, %s11949_s17 }
0x1109   :  { %v1482_v11 = vpop.xlane.xlu1 %1481 }
0x110a   :  { %v1483_v12 = vsub.f32 %v1475_v7, %v1482_v11  ;;  %v1907_v7 = vpack.c.bf16 %v9347_v5, %v9347_v5  ;;  %v11436_v11 = vld [vmem:[%s14646_s13 + $0x10] sm:$0xff]  }
0x110b   :  { %10418 = vmatpush3.bf16.msra.mxu0 %v11436_v11 }
0x110c   :  { %v1484_v60 = vmul.f32 1.442695, %v1483_v12  ;;  %10419 = vmatprep.subr.bf16.mxu0 %v11943_v0 }
0x110d   :  { %v1671_v43 = vpop.permute.xlu1 %1670 }
0x110e   :  { %11738 = vpow2.f32 %v1484_v60  ;;  %v11438_v60 = vld [vmem:[%s14646_s13] sm:$0xff]  }
0x111b   :  { %v11739_v13 = vpop.eup %11738 }
0x111c   :  { %v1486_v14 = vsel %vm560_vm8, %v11739_v13, 0.0 }
0x111d   :  { %1487 = vadd.xlane.f32.xlu0 %v1486_v14 }
0x11a6   :  { %v1488_v15 = vpop.xlane.xlu0 %1487 }
0x11a7   :  { %11740 = vrcp.f32 %v1488_v15 }
0x11b4   :  { %v11741_v17 = vpop.eup %11740 }
0x11b5   :  { %v12445_v16 = vmul.f32 %v11741_v17, %v11739_v13 }
0x11b7   :  { %v1498_v18 = vrot.slane %v12445_v16, %v12198_v35 }
0x11b9   :  { %v1506_v19 = vrot.slane %v1498_v18, %v12198_v35  ;;  %v1499_v29 = vcombine.high %v1498_v18, %v1498_v18 }
0x11bb   :  { %10392 = vmatmul.mubr.msk.f32.vlgmr.msra.gmra.mxu1 %vm595_vm9, %v1506_v19  ;;  %v1513_v39 = vrot.slane %v1499_v29, %v12198_v35 }
0x11bc   :  { %10395 = vmatpush3.msra.mxu1 %v12208_v42  ;;  %10396 = vmatprep.mubr.msk.f32.mxu1 %vm11944_vm0, %v11943_v0  ;;  %v11425_v42 = vld [vmem:[%s14644_s11 + $0x20] sm:$0xff]  }
0x11bd   :  { %10399 = vmatprep.subr.bf16.mxu1 %v11943_v0 }
0x11bf   :  { %10397 = vmatmul.mubr.msk.f32.vlgmr.msra.gmra.mxu1 %vm595_vm9, %v1513_v39 }
0x11c0   :  { %10411 = vmatprep.mubr.msk.bf16.mxu1 %vm11944_vm0, %v11943_v0  ;;  %10400 = vmatpush3.bf16.msra.mxu1 %v11424_v20 }
0x11c1   :  { %10401 = vmatprep.subr.bf16.mxu1 %v11943_v0 }
0x11c4   :  { %10402 = vmatpush3.bf16.msra.mxu1 %v11425_v42 }
0x11c5   :  { %10403 = vmatprep.subr.bf16.mxu1 %v11943_v0 }
0x11c8   :  { %10404 = vmatpush3.bf16.msra.mxu1 %v11426_v21  ;;  %v11440_v21 = vld [vmem:[%s14634_s8] sm:$0xff]  }
0x11c9   :  { %10405 = vmatprep.subr.bf16.mxu1 %v11943_v0 }
0x11cc   :  { %10406 = vmatpush3.bf16.msra.mxu1 %v11427_v22 }
0x11cd   :  { %10407 = vmatprep.subr.bf16.mxu1 %v11943_v0 }
0x11d0   :  { %10408 = vmatpush3.bf16.msra.mxu1 %v11428_v23  ;;  %v11441_v23 = vld [vmem:[%s14636_s9 + $0x28] sm:$0xff]  }
0x11d1   :  { %10409 = vmatprep.subr.bf16.mxu1 %v11943_v0 }
0x11d4   :  { %10410 = vmatpush3.bf16.msra.mxu1 %v11429_v24  ;;  %v11442_v24 = vld [vmem:[%s14636_s9 + $0x20] sm:$0xff]  }
0x11d5   :  { %10427 = vmatprep.subr.bf16.mxu1 %v11943_v0 }
0x127b   :  { %v1582_v25 = vpop.f32.mrf.mxu1 }
0x127d   :  { %v10393_v28 = vpop.f32.mrf.mxu1 }
0x127e   :  { %v11444_v28 = vld [vmem:[%s14636_s9 + $0x10] sm:$0xff]  }
0x127f   :  { %v1654_v30 = vpop.f32.mrf.mxu1 }
0x1280   :  { %v1665_v31 = vrot.slane %v1654_v30, 7  ;;  %v11445_v30 = vld [vmem:[%s14636_s9 + $0x8] sm:$0xff]  }
0x1281   :  { %v10398_v49 = vpop.f32.mrf.mxu1 }
0x1282   :  { %v1666_v33 = vsel %vm748_vm10, %v1665_v31, %v1582_v25  ;;  %v11443_v25 = vld [vmem:[%s14636_s9 + $0x18] sm:$0xff]   ;;  %v11446_v31 = vld [vmem:[%s14636_s9] sm:$0xff]  }
0x1283   :  { %v11321_v34 = vpack.i.bf16 %v1666_v33, %v12388_v32 }
0x1285   :  { %11322 = vrot.lane.b32.xlu0 %v11321_v34, %s11946_s19 }
0x12f7   :  { %v11323_v36 = vpop.permute.xlu0 %11322 }
0x12f8   :  { %v12486_v38 = vunpack.i.h.bf16 %v11323_v36  ;;  %v11324_v40 = vunpack.i.l.bf16 %v11323_v36 }
0x12fa   :  { %v1673_v44 = vsel %vm164_vm2, %v11324_v40, %v12486_v38 }
0x12fb   :  { %v1674_v45 = vsel %vm210_vm3, %v1673_v44, %v1671_v43 }
0x12fc   :  { %v1688_v54 = vpack.c.bf16 %v1674_v45, %v1674_v45 }
0x12fe   :  { %10412 = vmatmul.mubr.msk.bf16.vlgmr.msra.gmra.mxu1 %vm268_vm4, %v1688_v54 }
0x12ff   :  { %10437 = vmatprep.mubr.msk.bf16.mxu1 %vm11944_vm0, %v11943_v0 }
0x13be   :  { %v1768_v46 = vpop.f32.mrf.mxu1 }
0x13bf   :  { %v1769_v47 = vadd.f32 %v12257_v2, %v1768_v46  ;;  %v11430_v2 = vld [vmem:[%s14633_s7 + $0x20] sm:$0xff]  }
0x13c0   :  { %v10413_v48 = vpop.f32.mrf.mxu1  ;;  %10428 = vmatpush3.bf16.msra.mxu1 %v11430_v2 }
0x13c1   :  { %v9339_v50 = vmul.f32 -1.442695, %v1769_v47  ;;  %10429 = vmatprep.subr.bf16.mxu1 %v11943_v0 }
0x13c2   :  { %v1771_v51 = vpop.f32.mrf.mxu1 }
0x13c3   :  { %11742 = vpow2.f32 %v9339_v50  ;;  %v12601_v51 = vld [vmem:[%s14643_s1] sm:$0xff] }
0x13c4   :  { %v10414_v52 = vpop.f32.mrf.mxu1  ;;  %11744 = vtanh.f32 %v1769_v47  ;;  %10430 = vmatpush3.bf16.msra.mxu1 %v11431_v63 }
0x13c5   :  { %10431 = vmatprep.subr.bf16.mxu1 %v11943_v0 }
0x13c8   :  { %10432 = vmatpush3.bf16.msra.mxu1 %v11432_v1 }
0x13c9   :  { %10433 = vmatprep.subr.bf16.mxu1 %v11943_v0 }
0x13cc   :  { %10434 = vmatpush3.bf16.msra.mxu1 %v11433_v3 }
0x13cd   :  { %10435 = vmatprep.subr.bf16.mxu1 %v11943_v0 }
0x13d0   :  { %v11743_v53 = vpop.eup %11742  ;;  %10436 = vmatpush3.bf16.msra.mxu1 %v11434_v4 }
0x13d1   :  { %v1778_v55 = vadd.f32 1.0, %v11743_v53  ;;  %v11745_v56 = vpop.eup %11744  ;;  %10465 = vmatprep.subr.bf16.mxu1 %v11943_v0 }
0x13d3   :  { %11746 = vrcp.f32 %v1778_v55  ;;  %10438 = vmatmul.mubr.msk.bf16.vlgmr.msra.gmra.mxu1 %vm102_vm1, %v1907_v7 }
0x13d4   :  { %10469 = vmatprep.mubr.msk.bf16.mxu1 %vm11944_vm0, %v11943_v0 }
0x13e0   :  { %v11747_v57 = vpop.eup %11746 }
0x13e1   :  { %v1781_v59 = vsel %vm12108_vm7, %v11745_v56, %v11747_v57 }
0x13e2   :  { %1784 = vrot.lane.b32.xlu1 %v1781_v59, %s11945_s18  ;;  %v1782_v8 = vmul.f32 %v1781_v59, %v12290_v27  ;;  %v11437_v27 = vld [vmem:[%s14646_s13 + $0x8] sm:$0xff]  }
0x13e3   :  { %10420 = vmatpush3.bf16.msra.mxu0 %v11437_v27 }
0x13e4   :  { %10421 = vmatprep.subr.bf16.mxu0 %v11943_v0 }
0x13e7   :  { %10422 = vmatpush3.bf16.msra.mxu0 %v11438_v60 }
0x13e8   :  { %10441 = vmatprep.subr.bf16.mxu0 %v11943_v0 }
0x1454   :  { %v1785_v61 = vpop.permute.xlu1 %1784 }
0x1455   :  { %v1787_v62 = vmul.f32 %v1785_v61, %v1781_v59 }
0x1457   :  { %1789 = vrot.lane.b32.xlu0 %v1787_v62, %s11946_s19 }
0x1493   :  { %v1975_v13 = vpop.f32.mrf.mxu1 }
0x1494   :  { %v1981_v42 = vmax.f32 %v1975_v13, 0.0  ;;  %v11449_v13 = vld [vmem:[%s14639_s4] sm:$0xff]  }
0x1495   :  { %v10439_v14 = vpop.f32.mrf.mxu1 }
0x1496   :  { %v1986_v22 = vpack.c.bf16 %v1981_v42, %v1981_v42  ;;  %v11454_v42 = vld [vmem:[%s14640_s6 + $0x18] sm:$0xff]  }
0x1497   :  { %v1978_v15 = vpop.f32.mrf.mxu1 }
0x1499   :  { %v10440_v17 = vpop.f32.mrf.mxu1 }
0x14c9   :  { %v1790_v9 = vpop.permute.xlu0 %1789 }
0x14ca   :  { %v12526_v6 = vadd.f32 %v1790_v9, %v1782_v8  ;;  %v11447_v9 = vld [vmem:[%s14638_s5 + $0x8] sm:$0xff]  }
0x14cb   :  { %10466 = vmatpush3.bf16.msra.mxu1 %v11447_v9  ;;  %v11458_v9 = vld [vmem:[%s14644_s11 + $0x28] sm:$0xff]  }
0x14cc   :  { %11748 = vtanh.f32 %v12526_v6  ;;  %10467 = vmatprep.subr.bf16.mxu1 %v11943_v0 }
0x14cf   :  { %10468 = vmatpush3.bf16.msra.mxu1 %v11448_v10  ;;  %v11459_v10 = vld [vmem:[%s14644_s11 + $0x20] sm:$0xff]  }
0x14d0   :  { %10473 = vmatprep.subr.bf16.mxu1 %v11943_v0 }
0x14d9   :  { %v11749_v12 = vpop.eup %11748 }
0x14da   :  { %1795 = vrot.lane.b32.xlu1 %v11749_v12, %s11945_s18 }
0x14de   :  { %2043 = vrot.lane.b32.xlu1 %v12388_v32, %s11949_s17  ;;  %v11439_v32 = vld [vmem:[%s14634_s8 + $0x8] sm:$0xff]  }
0x154c   :  { %v1796_v18 = vpop.permute.xlu1 %1795 }
0x154d   :  { %v12548_v19 = vmul.f32 %v1796_v18, %v1781_v59  ;;  %v11450_v18 = vld [vmem:[%s14640_s6 + $0x38] sm:$0xff]  }
0x154f   :  { %1800 = vrot.lane.b32.xlu0 %v12548_v19, %s11946_s19 }
0x1550   :  { %v2044_v45 = vpop.permute.xlu1 %2043 }
0x15c1   :  { %v1801_v29 = vpop.permute.xlu0 %1800 }
0x15c2   :  { %v1803_v39 = vsel %vm164_vm2, %v1801_v29, %v12486_v38 }
0x15c3   :  { %v1812_v20 = vpack.c.bf16 %v1803_v39, %v1803_v39  ;;  %v11451_v39 = vld [vmem:[%s14640_s6 + $0x30] sm:$0xff]  }
0x15c5   :  { %10424 = vmatmul.mubr.msk.bf16.vlgmr.msra.gmra.mxu0 %vm210_vm3, %v1812_v20  ;;  %v11453_v20 = vld [vmem:[%s14640_s6 + $0x20] sm:$0xff]  }
0x15c6   :  { %10442 = vmatpush3.bf16.msra.mxu0 %v11439_v32  ;;  %10445 = vmatprep.mubr.msk.bf16.mxu0 %vm11944_vm0, %v11943_v0  ;;  %v11452_v32 = vld [vmem:[%s14640_s6 + $0x28] sm:$0xff]  }
0x15c7   :  { %10443 = vmatprep.subr.bf16.mxu0 %v11943_v0 }
0x15ca   :  { %10444 = vmatpush3.bf16.msra.mxu0 %v11440_v21  ;;  %v11455_v21 = vld [vmem:[%s14640_s6 + $0x10] sm:$0xff]  }
0x15cb   :  { %10449 = vmatprep.subr.bf16.mxu0 %v11943_v0 }
0x15cd   :  { %10446 = vmatmul.mubr.msk.bf16.vlgmr.msra.gmra.mxu0 %vm164_vm2, %v1986_v22  ;;  %v11456_v22 = vld [vmem:[%s14640_s6 + $0x8] sm:$0xff]  }
0x15ce   :  { %10450 = vmatpush3.bf16.msra.mxu0 %v11441_v23  ;;  %10461 = vmatprep.mubr.msk.bf16.mxu0 %vm11944_vm0, %v11943_v0  ;;  %v11457_v23 = vld [vmem:[%s14640_s6] sm:$0xff]  }
0x15cf   :  { %10451 = vmatprep.subr.bf16.mxu0 %v11943_v0 }
0x15d2   :  { %10452 = vmatpush3.bf16.msra.mxu0 %v11442_v24 }
0x15d3   :  { %10453 = vmatprep.subr.bf16.mxu0 %v11943_v0 }
0x15d6   :  { %10454 = vmatpush3.bf16.msra.mxu0 %v11443_v25 }
0x15d7   :  { %10455 = vmatprep.subr.bf16.mxu0 %v11943_v0 }
0x15da   :  { %10456 = vmatpush3.bf16.msra.mxu0 %v11444_v28 }
0x15db   :  { %10457 = vmatprep.subr.bf16.mxu0 %v11943_v0 }
0x15de   :  { %10458 = vmatpush3.bf16.msra.mxu0 %v11445_v30 }
0x15df   :  { %10459 = vmatprep.subr.bf16.mxu0 %v11943_v0 }
0x15e2   :  { %10460 = vmatpush3.bf16.msra.mxu0 %v11446_v31  ;;  %v12688_v31 = vld [vmem:[%s14641_s2] sm:$0x3] }
0x15e3   :  { %10499 = vmatprep.subr.mxu0 %v11943_v0 }
0x1685   :  { %v12592_v49 = vpop.f32.mrf.mxu0 }
0x1687   :  { %v10425_v33 = vpop.f32.mrf.mxu0 }
0x1689   :  { %v1884_v34 = vpop.f32.mrf.mxu0 }
0x168b   :  { %v10426_v36 = vpop.f32.mrf.mxu0 }
0x168d   :  { %v2036_v40 = vpop.f32.mrf.mxu0 }
0x168e   :  { %v2042_v43 = vmax.f32 %v2036_v40, 0.0 }
0x168f   :  { %v10447_v44 = vpop.f32.mrf.mxu0 }
0x1690   :  { %v2046_v54 = vsel %vm164_vm2, %v2042_v43, %v12486_v38  ;;  %v12610_v38 = vld [vmem:[%s14637_s10] ss:$0 sm:$0xff] }
0x1691   :  { %v2047_v46 = vsel %vm210_vm3, %v2046_v54, %v2044_v45  ;;  %v2039_v47 = vpop.f32.mrf.mxu0 }
0x1692   :  { %v2061_v48 = vpack.c.bf16 %v2047_v46, %v2047_v46  ;;  %v12696_v47 = vld [vmem:[%s14642_s3] sm:$0x3] }
0x1693   :  { %v10448_v50 = vpop.f32.mrf.mxu0 }
0x1694   :  { %10462 = vmatmul.mubr.msk.bf16.vlgmr.msra.gmra.mxu0 %vm268_vm4, %v2061_v48 }
0x1695   :  { %10500 = vmatpush3.msra.mxu0 %v12601_v51  ;;  %10501 = vmatprep.mubr.msk.f32.mxu0 %vm11944_vm0, %v11943_v0 }
0x1696   :  { %10504 = vmatprep.subr.mxu0 %v11943_v0 }
0x1754   :  { %v2141_v52 = vpop.f32.mrf.mxu0 }
0x1755   :  { %v2142_v53 = vadd.f32 %v12610_v38, %v2141_v52 }
0x1756   :  { %v10463_v55 = vpop.f32.mrf.mxu0 }
0x1757   :  { %v9365_v56 = vmul.f32 -1.442695, %v2142_v53 }
0x1758   :  { %v2144_v57 = vpop.f32.mrf.mxu0 }
0x1759   :  { %11750 = vpow2.f32 %v9365_v56 }
0x175a   :  { %v10464_v59 = vpop.f32.mrf.mxu0  ;;  %11752 = vtanh.f32 %v2142_v53 }
0x1766   :  { %v11751_v61 = vpop.eup %11750 }
0x1767   :  { %v2151_v62 = vadd.f32 1.0, %v11751_v61  ;;  %v11753_v2 = vpop.eup %11752 }
0x1769   :  { %11754 = vrcp.f32 %v2151_v62 }
0x1776   :  { %v11755_v63 = vpop.eup %11754 }
0x1777   :  { %v2154_v1 = vsel %vm12108_vm7, %v11753_v2, %v11755_v63 }
0x1778   :  { %2157 = vrot.lane.b32.xlu0 %v2154_v1, %s11945_s18  ;;  %v2155_v5 = vmul.f32 %v2154_v1, %v12374_v26  ;;  %v12632_v26 = vadd.f32 %v12445_v16, %v12200_v37 }
0x17ea   :  { %v2158_v3 = vpop.permute.xlu0 %2157 }
0x17eb   :  { %v2160_v4 = vmul.f32 %v2158_v3, %v2154_v1 }
0x17ed   :  { %2162 = vrot.lane.b32.xlu1 %v2160_v4, %s11946_s19 }
0x185f   :  { %v2163_v7 = vpop.permute.xlu1 %2162 }
0x1860   :  { %v12618_v8 = vadd.f32 %v2163_v7, %v2155_v5 }
0x1862   :  { %11756 = vtanh.f32 %v12618_v8 }
0x186f   :  { %v11757_v11 = vpop.eup %11756 }
0x1870   :  { %2168 = vrot.lane.b32.xlu0 %v11757_v11, %s11945_s18  ;;  %v11460_v11 = vld [vmem:[%s14644_s11 + $0x18] sm:$0xff]  }
0x1874   :  { %2173 = vrot.lane.b32.xlu0 %v12632_v26, %s11950_s30 }
0x18e2   :  { %v2169_v27 = vpop.permute.xlu0 %2168 }
0x18e3   :  { %v12636_v12 = vmul.f32 %v2169_v27, %v2154_v1  ;;  %v11461_v27 = vld [vmem:[%s14644_s11 + $0x10] sm:$0xff]  }
0x18e5   :  { %v2181_v60 = vpack.c.bf16 %v12636_v12, %v12636_v12 }
0x18e6   :  { %v2174_v15 = vpop.permute.xlu0 %2173 }
0x18e7   :  { %2183 = vrot.lane.b32.xlu1 %v2181_v60, %s11946_s19  ;;  %v2176_v17 = vsel %vm595_vm9, %v12445_v16, %v2174_v15  ;;  %v11462_v60 = vld [vmem:[%s14644_s11 + $0x8] sm:$0xff]  }
0x18e8   :  { %v2242_v29 = vpack.c.bf16 %v2176_v17, %v2176_v17 }
0x1959   :  { %v2184_v14 = vpop.permute.xlu1 %2183 }
0x195a   :  { %10470 = vmatmul.mubr.msk.bf16.vlgmr.msra.gmra.mxu1 %vm164_vm2, %v2184_v14 }
0x195b   :  { %10474 = vmatpush3.bf16.msra.mxu1 %v11449_v13  ;;  %10475 = vmatprep.mubr.msk.bf16.mxu1 %vm11944_vm0, %v11943_v0  ;;  %v11463_v13 = vld [vmem:[%s14644_s11] sm:$0xff]  }
0x195c   :  { %10479 = vmatprep.subr.bf16.mxu1 %v11943_v0 }
0x1962   :  { %10476 = vmatmul.mubr.msk.bf16.vlgmr.msra.gmra.mxu1 %vm409_vm11, %v2242_v29 }
0x1963   :  { %10480 = vmatpush3.bf16.msra.mxu1 %v11450_v18  ;;  %10495 = vmatprep.mubr.msk.bf16.mxu1 %vm11944_vm0, %v11943_v0 }
0x1964   :  { %10481 = vmatprep.subr.bf16.mxu1 %v11943_v0 }
0x1967   :  { %10482 = vmatpush3.bf16.msra.mxu1 %v11451_v39 }
0x1968   :  { %10483 = vmatprep.subr.bf16.mxu1 %v11943_v0 }
0x196b   :  { %10484 = vmatpush3.bf16.msra.mxu1 %v11452_v32 }
0x196c   :  { %10485 = vmatprep.subr.bf16.mxu1 %v11943_v0 }
0x196f   :  { %10486 = vmatpush3.bf16.msra.mxu1 %v11453_v20 }
0x1970   :  { %10487 = vmatprep.subr.bf16.mxu1 %v11943_v0 }
0x1973   :  { %10488 = vmatpush3.bf16.msra.mxu1 %v11454_v42 }
0x1974   :  { %10489 = vmatprep.subr.bf16.mxu1 %v11943_v0 }
0x1977   :  { %10490 = vmatpush3.bf16.msra.mxu1 %v11455_v21 }
0x1978   :  { %10491 = vmatprep.subr.bf16.mxu1 %v11943_v0 }
0x197b   :  { %10492 = vmatpush3.bf16.msra.mxu1 %v11456_v22 }
0x197c   :  { %10493 = vmatprep.subr.bf16.mxu1 %v11943_v0 }
0x197f   :  { %10494 = vmatpush3.bf16.msra.mxu1 %v11457_v23 }
0x1980   :  { %10525 = vmatprep.subr.bf16.mxu1 %v11943_v0 }
0x1a1a   :  { %v2234_v24 = vpop.f32.mrf.mxu1 }
0x1a1b   :  { %v2235_v33 = vadd.f32 %v12688_v31, %v2234_v24 }
0x1a1c   :  { %v10471_v25 = vpop.f32.mrf.mxu1 }
0x1a1e   :  { %v2237_v28 = vpop.f32.mrf.mxu1 }
0x1a1f   :  { %v12760_v28 = vld [vmem:[%s14645_s12] ss:$0 sm:$0xff] }
0x1a20   :  { %v10472_v30 = vpop.f32.mrf.mxu1 }
0x1a22   :  { %v2286_v34 = vpop.f32.mrf.mxu1 }
0x1a23   :  { %v2292_v36 = vadd.f32 %v2286_v34, %v2235_v33 }
0x1a24   :  { %v10477_v40 = vpop.f32.mrf.mxu1 }
0x1a25   :  { %11758 = vtanh.f32 %v2292_v36 }
0x1a26   :  { %v2289_v43 = vpop.f32.mrf.mxu1 }
0x1a28   :  { %v10478_v44 = vpop.f32.mrf.mxu1 }
0x1a32   :  { %v11759_v45 = vpop.eup %11758 }
0x1a33   :  { %v2310_v54 = vpack.c.bf16 %v11759_v45, %v11759_v45 }
0x1a35   :  { %10496 = vmatmul.mubr.bf16.vlgmr.msra.gmra.mxu1 %v2310_v54 }
0x1a36   :  { %10533 = vmatprep.mubr.msk.bf16.mxu1 %vm11944_vm0, %v11943_v0 }
0x1af5   :  { %v2393_v46 = vpop.f32.mrf.mxu1 }
0x1af6   :  { %v2394_v48 = vadd.f32 %v12696_v47, %v2393_v46 }
0x1af7   :  { %v10497_v50 = vpop.f32.mrf.mxu1 }
0x1af8   :  { %v2399_v52 = vsel %vm560_vm8, %v2394_v48, -inf }
0x1af9   :  { %2400 = vmax.xlane.f32.xlu1 %v2399_v52  ;;  %v2396_v53 = vpop.f32.mrf.mxu1 }
0x1afa   :  { %v11464_v53 = vld [vmem:[%s14633_s7 + $0x20] sm:$0xff]  }
0x1afb   :  { %v10498_v55 = vpop.f32.mrf.mxu1 }
0x1afc   :  { %v11465_v55 = vld [vmem:[%s14633_s7 + $0x18] sm:$0xff]  }
0x1b0a   :  { %2589 = vrot.lane.b32.xlu1 %v12548_v19, %s11949_s17  ;;  %v12712_v19 = vld [vmem:[%s14643_s1 + $0x8] sm:$0xff] }
0x1b82   :  { %v2401_v56 = vpop.xlane.xlu1 %2400 }
0x1b83   :  { %v2402_v57 = vsub.f32 %v2394_v48, %v2401_v56  ;;  %v11466_v56 = vld [vmem:[%s14633_s7 + $0x10] sm:$0xff]  }
0x1b85   :  { %v2403_v59 = vmul.f32 1.442695, %v2402_v57  ;;  %v11467_v57 = vld [vmem:[%s14633_s7 + $0x8] sm:$0xff]  }
0x1b86   :  { %v2590_v22 = vpop.permute.xlu1 %2589 }
0x1b87   :  { %11760 = vpow2.f32 %v2403_v59  ;;  %v11468_v59 = vld [vmem:[%s14633_s7] sm:$0xff]  }
0x1b94   :  { %v11761_v61 = vpop.eup %11760 }
0x1b95   :  { %v2405_v62 = vsel %vm560_vm8, %v11761_v61, 0.0 }
0x1b96   :  { %2406 = vadd.xlane.f32.xlu0 %v2405_v62 }
0x1c1f   :  { %v2407_v2 = vpop.xlane.xlu0 %2406 }
0x1c20   :  { %11762 = vrcp.f32 %v2407_v2 }
0x1c2d   :  { %v11763_v63 = vpop.eup %11762 }
0x1c2e   :  { %v12703_v1 = vmul.f32 %v11763_v63, %v11761_v61  ;;  %v9397_v61 = vld [vmem:[%s14635_s0 + $0x6] sm:$0x3] }
0x1c2f   :  { %v2826_v62 = vpack.c.bf16 %v9397_v61, %v9397_v61 }
0x1c30   :  { %v2417_v3 = vrot.slane %v12703_v1, %v12198_v35 }
0x1c32   :  { %v2425_v4 = vrot.slane %v2417_v3, %v12198_v35  ;;  %v2418_v5 = vcombine.high %v2417_v3, %v2417_v3 }
0x1c34   :  { %10502 = vmatmul.mubr.msk.f32.vlgmr.msra.gmra.mxu0 %vm595_vm9, %v2425_v4  ;;  %v2432_v7 = vrot.slane %v2418_v5, %v12198_v35  ;;  %v11469_v4 = vld [vmem:[%s14646_s13 + $0x18] sm:$0xff]   ;;  %v11470_v5 = vld [vmem:[%s14646_s13 + $0x10] sm:$0xff]  }
0x1c35   :  { %10505 = vmatpush3.msra.mxu0 %v12712_v19  ;;  %10506 = vmatprep.mubr.msk.f32.mxu0 %vm11944_vm0, %v11943_v0 }
0x1c36   :  { %10509 = vmatprep.subr.bf16.mxu0 %v11943_v0  ;;  %10526 = vmatpush3.bf16.msra.mxu1 %v11469_v4 }
0x1c37   :  { %10527 = vmatprep.subr.bf16.mxu1 %v11943_v0 }
0x1c38   :  { %10507 = vmatmul.mubr.msk.f32.vlgmr.msra.gmra.mxu0 %vm595_vm9, %v2432_v7 }
0x1c39   :  { %10521 = vmatprep.mubr.msk.bf16.mxu0 %vm11944_vm0, %v11943_v0  ;;  %10510 = vmatpush3.bf16.msra.mxu0 %v11458_v9  ;;  %v11472_v9 = vld [vmem:[%s14646_s13] sm:$0xff]  }
0x1c3a   :  { %10511 = vmatprep.subr.bf16.mxu0 %v11943_v0  ;;  %10528 = vmatpush3.bf16.msra.mxu1 %v11470_v5 }
0x1c3b   :  { %10529 = vmatprep.subr.bf16.mxu1 %v11943_v0 }
0x1c3d   :  { %10512 = vmatpush3.bf16.msra.mxu0 %v11459_v10 }
0x1c3e   :  { %10513 = vmatprep.subr.bf16.mxu0 %v11943_v0 }
0x1c41   :  { %10514 = vmatpush3.bf16.msra.mxu0 %v11460_v11 }
0x1c42   :  { %10515 = vmatprep.subr.bf16.mxu0 %v11943_v0 }
0x1c45   :  { %10516 = vmatpush3.bf16.msra.mxu0 %v11461_v27 }
0x1c46   :  { %10517 = vmatprep.subr.bf16.mxu0 %v11943_v0 }
0x1c49   :  { %10518 = vmatpush3.bf16.msra.mxu0 %v11462_v60 }
0x1c4a   :  { %10519 = vmatprep.subr.bf16.mxu0 %v11943_v0 }
0x1c4d   :  { %10520 = vmatpush3.bf16.msra.mxu0 %v11463_v13 }
0x1c4e   :  { %10537 = vmatprep.subr.bf16.mxu0 %v11943_v0 }
0x1cf4   :  { %v2501_v14 = vpop.f32.mrf.mxu0 }
0x1cf6   :  { %v10503_v15 = vpop.f32.mrf.mxu0 }
0x1cf8   :  { %v2573_v17 = vpop.f32.mrf.mxu0 }
0x1cf9   :  { %v2584_v18 = vrot.slane %v2573_v17, 7 }
0x1cfa   :  { %v10508_v29 = vpop.f32.mrf.mxu0 }
0x1cfb   :  { %v2585_v39 = vsel %vm748_vm10, %v2584_v18, %v2501_v14 }
0x1cfc   :  { %v11326_v32 = vpack.i.bf16 %v2585_v39, %v12636_v12  ;;  %v11474_v39 = vld [vmem:[%s14634_s8] sm:$0xff]  }
0x1cfe   :  { %11327 = vrot.lane.b32.xlu0 %v11326_v32, %s11946_s19 }
0x1d70   :  { %v11328_v20 = vpop.permute.xlu0 %11327 }
0x1d71   :  { %v12749_v42 = vunpack.i.h.bf16 %v11328_v20  ;;  %v11329_v21 = vunpack.i.l.bf16 %v11328_v20  ;;  %v11475_v20 = vld [vmem:[%s14636_s9 + $0x28] sm:$0xff]  }
0x1d73   :  { %v2592_v23 = vsel %vm164_vm2, %v11329_v21, %v12749_v42  ;;  %v11476_v21 = vld [vmem:[%s14636_s9 + $0x20] sm:$0xff]  }
0x1d74   :  { %v2593_v24 = vsel %vm210_vm3, %v2592_v23, %v2590_v22  ;;  %v11477_v22 = vld [vmem:[%s14636_s9 + $0x18] sm:$0xff]   ;;  %v11478_v23 = vld [vmem:[%s14636_s9 + $0x10] sm:$0xff]  }
0x1d75   :  { %v2607_v25 = vpack.c.bf16 %v2593_v24, %v2593_v24  ;;  %v11479_v24 = vld [vmem:[%s14636_s9 + $0x8] sm:$0xff]  }
0x1d77   :  { %10522 = vmatmul.mubr.msk.bf16.vlgmr.msra.gmra.mxu0 %vm268_vm4, %v2607_v25  ;;  %v11480_v25 = vld [vmem:[%s14636_s9] sm:$0xff]  }
0x1d78   :  { %10547 = vmatprep.mubr.msk.bf16.mxu0 %vm11944_vm0, %v11943_v0  ;;  %10538 = vmatpush3.bf16.msra.mxu0 %v11464_v53 }
0x1d79   :  { %10539 = vmatprep.subr.bf16.mxu0 %v11943_v0 }
0x1d7c   :  { %10540 = vmatpush3.bf16.msra.mxu0 %v11465_v55 }
0x1d7d   :  { %10541 = vmatprep.subr.bf16.mxu0 %v11943_v0 }
0x1d80   :  { %10542 = vmatpush3.bf16.msra.mxu0 %v11466_v56 }
0x1d81   :  { %10543 = vmatprep.subr.bf16.mxu0 %v11943_v0 }
0x1d84   :  { %10544 = vmatpush3.bf16.msra.mxu0 %v11467_v57 }
0x1d85   :  { %10545 = vmatprep.subr.bf16.mxu0 %v11943_v0 }
0x1d88   :  { %10546 = vmatpush3.bf16.msra.mxu0 %v11468_v59 }
0x1d89   :  { %10575 = vmatprep.subr.bf16.mxu0 %v11943_v0 }
0x1d8b   :  { %10548 = vmatmul.mubr.msk.bf16.vlgmr.msra.gmra.mxu0 %vm102_vm1, %v2826_v62 }
0x1d8c   :  { %10579 = vmatprep.mubr.msk.bf16.mxu0 %vm11944_vm0, %v11943_v0 }
0x1e37   :  { %v2687_v30 = vpop.f32.mrf.mxu0 }
0x1e38   :  { %v2688_v33 = vadd.f32 %v12760_v28, %v2687_v30 }
0x1e39   :  { %v10523_v34 = vpop.f32.mrf.mxu0 }
0x1e3a   :  { %v9389_v36 = vmul.f32 -1.442695, %v2688_v33 }
0x1e3b   :  { %v2690_v40 = vpop.f32.mrf.mxu0 }
0x1e3c   :  { %11764 = vpow2.f32 %v9389_v36 }
0x1e3d   :  { %v10524_v43 = vpop.f32.mrf.mxu0  ;;  %11766 = vtanh.f32 %v2688_v33 }
0x1e49   :  { %v11765_v44 = vpop.eup %11764 }
0x1e4a   :  { %v2697_v45 = vadd.f32 1.0, %v11765_v44  ;;  %v11767_v54 = vpop.eup %11766 }
0x1e4b   :  { %v2894_v10 = vpop.f32.mrf.mxu0 }
0x1e4c   :  { %11768 = vrcp.f32 %v2697_v45  ;;  %v2900_v29 = vmax.f32 %v2894_v10, 0.0  ;;  %v11482_v10 = vld [vmem:[%s14638_s5] sm:$0xff]  }
0x1e4d   :  { %v10549_v11 = vpop.f32.mrf.mxu0 }
0x1e4e   :  { %v2905_v32 = vpack.c.bf16 %v2900_v29, %v2900_v29 }
0x1e4f   :  { %v2897_v27 = vpop.f32.mrf.mxu0 }
0x1e51   :  { %v10550_v60 = vpop.f32.mrf.mxu0 }
0x1e59   :  { %v11769_v46 = vpop.eup %11768 }
0x1e5a   :  { %v2700_v48 = vsel %vm12108_vm7, %v11767_v54, %v11769_v46 }
0x1e5b   :  { %2703 = vrot.lane.b32.xlu1 %v2700_v48, %s11945_s18  ;;  %v2701_v2 = vmul.f32 %v2700_v48, %v12526_v6  ;;  %v11471_v6 = vld [vmem:[%s14646_s13 + $0x8] sm:$0xff]  }
0x1e5c   :  { %10530 = vmatpush3.bf16.msra.mxu1 %v11471_v6 }
0x1e5d   :  { %10531 = vmatprep.subr.bf16.mxu1 %v11943_v0 }
0x1e60   :  { %10532 = vmatpush3.bf16.msra.mxu1 %v11472_v9  ;;  %v11481_v9 = vld [vmem:[%s14638_s5 + $0x8] sm:$0xff]  }
0x1e61   :  { %10551 = vmatprep.subr.bf16.mxu1 %v11943_v0  ;;  %10576 = vmatpush3.bf16.msra.mxu0 %v11481_v9  ;;  %v11494_v9 = vld [vmem:[%s14644_s11 + $0x18] sm:$0xff]  }
0x1e62   :  { %10577 = vmatprep.subr.bf16.mxu0 %v11943_v0 }
0x1e65   :  { %10578 = vmatpush3.bf16.msra.mxu0 %v11482_v10  ;;  %v11495_v10 = vld [vmem:[%s14644_s11 + $0x10] sm:$0xff]  }
0x1e66   :  { %10583 = vmatprep.subr.bf16.mxu0 %v11943_v0 }
0x1ecd   :  { %v2704_v50 = vpop.permute.xlu1 %2703 }
0x1ece   :  { %v2706_v52 = vmul.f32 %v2704_v50, %v2700_v48 }
0x1ed0   :  { %2708 = vrot.lane.b32.xlu0 %v2706_v52, %s11946_s19 }
0x1f42   :  { %v2709_v63 = vpop.permute.xlu0 %2708 }
0x1f43   :  { %v12794_v3 = vadd.f32 %v2709_v63, %v2701_v2 }
0x1f45   :  { %11770 = vtanh.f32 %v12794_v3 }
0x1f52   :  { %v11771_v7 = vpop.eup %11770 }
0x1f53   :  { %2714 = vrot.lane.b32.xlu1 %v11771_v7, %s11945_s18 }
0x1f57   :  { %2962 = vrot.lane.b32.xlu1 %v12636_v12, %s11949_s17  ;;  %v11473_v12 = vld [vmem:[%s14634_s8 + $0x8] sm:$0xff]  }
0x1fc5   :  { %v2715_v13 = vpop.permute.xlu1 %2714 }
0x1fc6   :  { %v12816_v14 = vmul.f32 %v2715_v13, %v2700_v48 }
0x1fc8   :  { %2719 = vrot.lane.b32.xlu0 %v12816_v14, %s11946_s19 }
0x1fc9   :  { %v2963_v45 = vpop.permute.xlu1 %2962 }
0x203a   :  { %v2720_v15 = vpop.permute.xlu0 %2719 }
0x203b   :  { %v2722_v17 = vsel %vm164_vm2, %v2720_v15, %v12749_v42  ;;  %v11483_v15 = vld [vmem:[%s14639_s4] sm:$0xff]  }
0x203c   :  { %v2731_v18 = vpack.c.bf16 %v2722_v17, %v2722_v17 }
0x203e   :  { %10534 = vmatmul.mubr.msk.bf16.vlgmr.msra.gmra.mxu1 %vm210_vm3, %v2731_v18  ;;  %v11484_v18 = vld [vmem:[%s14640_s6 + $0x38] sm:$0xff]  }
0x203f   :  { %10552 = vmatpush3.bf16.msra.mxu1 %v11473_v12  ;;  %10555 = vmatprep.mubr.msk.bf16.mxu1 %vm11944_vm0, %v11943_v0 }
0x2040   :  { %10553 = vmatprep.subr.bf16.mxu1 %v11943_v0 }
0x2043   :  { %10554 = vmatpush3.bf16.msra.mxu1 %v11474_v39  ;;  %v11485_v39 = vld [vmem:[%s14640_s6 + $0x30] sm:$0xff]  }
0x2044   :  { %10559 = vmatprep.subr.bf16.mxu1 %v11943_v0 }
0x2046   :  { %10556 = vmatmul.mubr.msk.bf16.vlgmr.msra.gmra.mxu1 %vm164_vm2, %v2905_v32  ;;  %v11486_v32 = vld [vmem:[%s14640_s6 + $0x28] sm:$0xff]  }
0x2047   :  { %10560 = vmatpush3.bf16.msra.mxu1 %v11475_v20  ;;  %10571 = vmatprep.mubr.msk.bf16.mxu1 %vm11944_vm0, %v11943_v0  ;;  %v11487_v20 = vld [vmem:[%s14640_s6 + $0x20] sm:$0xff]  }
0x2048   :  { %10561 = vmatprep.subr.bf16.mxu1 %v11943_v0 }
0x204b   :  { %10562 = vmatpush3.bf16.msra.mxu1 %v11476_v21  ;;  %v11488_v21 = vld [vmem:[%s14640_s6 + $0x18] sm:$0xff]  }
0x204c   :  { %10563 = vmatprep.subr.bf16.mxu1 %v11943_v0 }
0x204f   :  { %10564 = vmatpush3.bf16.msra.mxu1 %v11477_v22  ;;  %v11489_v22 = vld [vmem:[%s14640_s6 + $0x10] sm:$0xff]  }
0x2050   :  { %10565 = vmatprep.subr.bf16.mxu1 %v11943_v0 }
0x2053   :  { %10566 = vmatpush3.bf16.msra.mxu1 %v11478_v23  ;;  %v11490_v23 = vld [vmem:[%s14640_s6 + $0x8] sm:$0xff]  }
0x2054   :  { %10567 = vmatprep.subr.bf16.mxu1 %v11943_v0 }
0x2057   :  { %10568 = vmatpush3.bf16.msra.mxu1 %v11479_v24  ;;  %v11491_v24 = vld [vmem:[%s14640_s6] sm:$0xff]  }
0x2058   :  { %10569 = vmatprep.subr.bf16.mxu1 %v11943_v0 }
0x205b   :  { %10570 = vmatpush3.bf16.msra.mxu1 %v11480_v25 }
0x205c   :  { %10609 = vmatprep.subr.mxu1 %v11943_v0 }
0x20fe   :  { %v12860_v30 = vpop.f32.mrf.mxu1 }
0x2100   :  { %v10535_v33 = vpop.f32.mrf.mxu1 }
0x2102   :  { %v2803_v34 = vpop.f32.mrf.mxu1 }
0x2104   :  { %v10536_v36 = vpop.f32.mrf.mxu1 }
0x2106   :  { %v2955_v40 = vpop.f32.mrf.mxu1 }
0x2107   :  { %v2961_v43 = vmax.f32 %v2955_v40, 0.0 }
0x2108   :  { %v10557_v44 = vpop.f32.mrf.mxu1 }
0x2109   :  { %v2965_v54 = vsel %vm164_vm2, %v2961_v43, %v12749_v42 }
0x210a   :  { %v2966_v46 = vsel %vm210_vm3, %v2965_v54, %v2963_v45  ;;  %v2958_v48 = vpop.f32.mrf.mxu1 }
0x210b   :  { %v2980_v50 = vpack.c.bf16 %v2966_v46, %v2966_v46 }
0x210c   :  { %v10558_v52 = vpop.f32.mrf.mxu1 }
0x210d   :  { %10572 = vmatmul.mubr.msk.bf16.vlgmr.msra.gmra.mxu1 %vm268_vm4, %v2980_v50 }
0x210e   :  { %10610 = vmatpush3.msra.mxu1 %v12601_v51  ;;  %10611 = vmatprep.mubr.msk.f32.mxu1 %vm11944_vm0, %v11943_v0 }
0x210f   :  { %10614 = vmatprep.subr.mxu1 %v11943_v0 }
0x21cd   :  { %v3060_v53 = vpop.f32.mrf.mxu1 }
0x21ce   :  { %v3061_v55 = vadd.f32 %v12610_v38, %v3060_v53 }
0x21cf   :  { %v10573_v56 = vpop.f32.mrf.mxu1 }
0x21d0   :  { %v9415_v57 = vmul.f32 -1.442695, %v3061_v55 }
0x21d1   :  { %v3063_v42 = vpop.f32.mrf.mxu1 }
0x21d2   :  { %11772 = vpow2.f32 %v9415_v57 }
0x21d3   :  { %v10574_v59 = vpop.f32.mrf.mxu1  ;;  %11774 = vtanh.f32 %v3061_v55 }
0x21df   :  { %v11773_v61 = vpop.eup %11772 }
0x21e0   :  { %v3070_v62 = vadd.f32 1.0, %v11773_v61  ;;  %v11775_v2 = vpop.eup %11774 }
0x21e2   :  { %11776 = vrcp.f32 %v3070_v62 }
0x21ef   :  { %v11777_v63 = vpop.eup %11776 }
0x21f0   :  { %v3073_v51 = vsel %vm12108_vm7, %v11775_v2, %v11777_v63 }
0x21f1   :  { %3076 = vrot.lane.b32.xlu0 %v3073_v51, %s11945_s18  ;;  %v3074_v38 = vmul.f32 %v3073_v51, %v12618_v8  ;;  %v12890_v8 = vadd.f32 %v12703_v1, %v12632_v26 }
0x2263   :  { %v3077_v4 = vpop.permute.xlu0 %3076 }
0x2264   :  { %v3079_v5 = vmul.f32 %v3077_v4, %v3073_v51 }
0x2266   :  { %3081 = vrot.lane.b32.xlu1 %v3079_v5, %s11946_s19 }
0x22d8   :  { %v3082_v6 = vpop.permute.xlu1 %3081 }
0x22d9   :  { %v12876_v7 = vadd.f32 %v3082_v6, %v3074_v38  ;;  %v11492_v6 = vld [vmem:[%s14644_s11 + $0x28] sm:$0xff]  }
0x22db   :  { %11778 = vtanh.f32 %v12876_v7 }
0x22e8   :  { %v11779_v11 = vpop.eup %11778 }
0x22e9   :  { %3087 = vrot.lane.b32.xlu0 %v11779_v11, %s11945_s18  ;;  %v11496_v11 = vld [vmem:[%s14644_s11 + $0x8] sm:$0xff]  }
0x22ed   :  { %3092 = vrot.lane.b32.xlu0 %v12890_v8, %s11950_s30 }
0x235b   :  { %v3088_v27 = vpop.permute.xlu0 %3087 }
0x235c   :  { %v12894_v60 = vmul.f32 %v3088_v27, %v3073_v51  ;;  %v11497_v27 = vld [vmem:[%s14644_s11] sm:$0xff]  }
0x235e   :  { %v3100_v13 = vpack.c.bf16 %v12894_v60, %v12894_v60 }
0x235f   :  { %v3093_v12 = vpop.permute.xlu0 %3092 }
0x2360   :  { %3102 = vrot.lane.b32.xlu1 %v3100_v13, %s11946_s19  ;;  %v3095_v26 = vsel %vm595_vm9, %v12703_v1, %v3093_v12 }
0x2361   :  { %v3161_v29 = vpack.c.bf16 %v3095_v26, %v3095_v26 }
0x23d2   :  { %v3103_v17 = vpop.permute.xlu1 %3102 }
0x23d3   :  { %10580 = vmatmul.mubr.msk.bf16.vlgmr.msra.gmra.mxu0 %vm164_vm2, %v3103_v17 }
0x23d4   :  { %10584 = vmatpush3.bf16.msra.mxu0 %v11483_v15  ;;  %10585 = vmatprep.mubr.msk.bf16.mxu0 %vm11944_vm0, %v11943_v0 }
0x23d5   :  { %10589 = vmatprep.subr.bf16.mxu0 %v11943_v0 }
0x23db   :  { %10586 = vmatmul.mubr.msk.bf16.vlgmr.msra.gmra.mxu0 %vm409_vm11, %v3161_v29 }
0x23dc   :  { %10590 = vmatpush3.bf16.msra.mxu0 %v11484_v18  ;;  %10605 = vmatprep.mubr.msk.bf16.mxu0 %vm11944_vm0, %v11943_v0 }
0x23dd   :  { %10591 = vmatprep.subr.bf16.mxu0 %v11943_v0 }
0x23e0   :  { %10592 = vmatpush3.bf16.msra.mxu0 %v11485_v39 }
0x23e1   :  { %10593 = vmatprep.subr.bf16.mxu0 %v11943_v0 }
0x23e4   :  { %10594 = vmatpush3.bf16.msra.mxu0 %v11486_v32 }
0x23e5   :  { %10595 = vmatprep.subr.bf16.mxu0 %v11943_v0 }
0x23e8   :  { %10596 = vmatpush3.bf16.msra.mxu0 %v11487_v20 }
0x23e9   :  { %10597 = vmatprep.subr.bf16.mxu0 %v11943_v0 }
0x23ec   :  { %10598 = vmatpush3.bf16.msra.mxu0 %v11488_v21 }
0x23ed   :  { %10599 = vmatprep.subr.bf16.mxu0 %v11943_v0 }
0x23f0   :  { %10600 = vmatpush3.bf16.msra.mxu0 %v11489_v22 }
0x23f1   :  { %10601 = vmatprep.subr.bf16.mxu0 %v11943_v0 }
0x23f4   :  { %10602 = vmatpush3.bf16.msra.mxu0 %v11490_v23 }
0x23f5   :  { %10603 = vmatprep.subr.bf16.mxu0 %v11943_v0 }
0x23f8   :  { %10604 = vmatpush3.bf16.msra.mxu0 %v11491_v24 }
0x23f9   :  { %10635 = vmatprep.subr.bf16.mxu0 %v11943_v0 }
0x2493   :  { %v3153_v25 = vpop.f32.mrf.mxu0 }
0x2494   :  { %v3154_v40 = vadd.f32 %v12688_v31, %v3153_v25 }
0x2495   :  { %v10581_v33 = vpop.f32.mrf.mxu0 }
0x2497   :  { %v3156_v34 = vpop.f32.mrf.mxu0 }
0x2499   :  { %v10582_v36 = vpop.f32.mrf.mxu0 }
0x249b   :  { %v3205_v43 = vpop.f32.mrf.mxu0 }
0x249c   :  { %v3211_v44 = vadd.f32 %v3205_v43, %v3154_v40 }
0x249d   :  { %v10587_v45 = vpop.f32.mrf.mxu0 }
0x249e   :  { %11780 = vtanh.f32 %v3211_v44 }
0x249f   :  { %v3208_v54 = vpop.f32.mrf.mxu0 }
0x24a1   :  { %v10588_v46 = vpop.f32.mrf.mxu0 }
0x24ab   :  { %v11781_v48 = vpop.eup %11780 }
0x24ac   :  { %v3229_v50 = vpack.c.bf16 %v11781_v48, %v11781_v48 }
0x24ae   :  { %10606 = vmatmul.mubr.bf16.vlgmr.msra.gmra.mxu0 %v3229_v50 }
0x24af   :  { %10643 = vmatprep.mubr.msk.bf16.mxu0 %vm11944_vm0, %v11943_v0 }
0x256e   :  { %v3312_v52 = vpop.f32.mrf.mxu0 }
0x256f   :  { %v3313_v53 = vadd.f32 %v12696_v47, %v3312_v52 }
0x2570   :  { %v10607_v55 = vpop.f32.mrf.mxu0 }
0x2571   :  { %v3318_v56 = vsel %vm560_vm8, %v3313_v53, -inf  ;;  %v11500_v55 = vld [vmem:[%s14633_s7 + $0x10] sm:$0xff]  }
0x2572   :  { %3319 = vmax.xlane.f32.xlu1 %v3318_v56  ;;  %v3315_v31 = vpop.f32.mrf.mxu0  ;;  %v11501_v56 = vld [vmem:[%s14633_s7 + $0x8] sm:$0xff]  }
0x2573   :  { %v11502_v31 = vld [vmem:[%s14633_s7] sm:$0xff]  }
0x2574   :  { %v10608_v57 = vpop.f32.mrf.mxu0 }
0x2575   :  { %v9447_v57 = vld [vmem:[%s14635_s0 + $0x8] sm:$0x3] }
0x2583   :  { %3508 = vrot.lane.b32.xlu1 %v12816_v14, %s11949_s17 }
0x25fb   :  { %v3320_v42 = vpop.xlane.xlu1 %3319 }
0x25fc   :  { %v3321_v59 = vsub.f32 %v3313_v53, %v3320_v42  ;;  %v11499_v53 = vld [vmem:[%s14633_s7 + $0x18] sm:$0xff]   ;;  %v3745_v42 = vpack.c.bf16 %v9447_v57, %v9447_v57 }
0x25fe   :  { %v3322_v61 = vmul.f32 1.442695, %v3321_v59 }
0x25ff   :  { %v3509_v21 = vpop.permute.xlu1 %3508 }
0x2600   :  { %11782 = vpow2.f32 %v3322_v61 }
0x260d   :  { %v11783_v62 = vpop.eup %11782 }
0x260e   :  { %v3324_v2 = vsel %vm560_vm8, %v11783_v62, 0.0 }
0x260f   :  { %3325 = vadd.xlane.f32.xlu0 %v3324_v2  ;;  %v11503_v2 = vld [vmem:[%s14646_s13 + $0x18] sm:$0xff]  }
0x2610   :  { %10636 = vmatpush3.bf16.msra.mxu0 %v11503_v2 }
0x2611   :  { %10637 = vmatprep.subr.bf16.mxu0 %v11943_v0 }
0x2698   :  { %v3326_v63 = vpop.xlane.xlu0 %3325 }
0x2699   :  { %11784 = vrcp.f32 %v3326_v63  ;;  %v11504_v63 = vld [vmem:[%s14646_s13 + $0x10] sm:$0xff]  }
0x269a   :  { %10638 = vmatpush3.bf16.msra.mxu0 %v11504_v63 }
0x269b   :  { %10639 = vmatprep.subr.bf16.mxu0 %v11943_v0 }
0x26a6   :  { %v11785_v47 = vpop.eup %11784 }
0x26a7   :  { %v12951_v51 = vmul.f32 %v11785_v47, %v11783_v62 }
0x26a9   :  { %v3336_v4 = vrot.slane %v12951_v51, %v12198_v35 }
0x26ab   :  { %v3344_v5 = vrot.slane %v3336_v4, %v12198_v35  ;;  %v3337_v38 = vcombine.high %v3336_v4, %v3336_v4  ;;  %v11506_v4 = vld [vmem:[%s14646_s13] sm:$0xff]  }
0x26ad   :  { %10612 = vmatmul.mubr.msk.f32.vlgmr.msra.gmra.mxu1 %vm595_vm9, %v3344_v5  ;;  %v3351_v14 = vrot.slane %v3337_v38, %v12198_v35 }
0x26ae   :  { %10615 = vmatpush3.msra.mxu1 %v12712_v19  ;;  %10616 = vmatprep.mubr.msk.f32.mxu1 %vm11944_vm0, %v11943_v0  ;;  %v11493_v19 = vld [vmem:[%s14644_s11 + $0x20] sm:$0xff]  }
0x26af   :  { %10619 = vmatprep.subr.bf16.mxu1 %v11943_v0 }
0x26b1   :  { %10617 = vmatmul.mubr.msk.f32.vlgmr.msra.gmra.mxu1 %vm595_vm9, %v3351_v14 }
0x26b2   :  { %10631 = vmatprep.mubr.msk.bf16.mxu1 %vm11944_vm0, %v11943_v0  ;;  %10620 = vmatpush3.bf16.msra.mxu1 %v11492_v6 }
0x26b3   :  { %10621 = vmatprep.subr.bf16.mxu1 %v11943_v0 }
0x26b6   :  { %10622 = vmatpush3.bf16.msra.mxu1 %v11493_v19 }
0x26b7   :  { %10623 = vmatprep.subr.bf16.mxu1 %v11943_v0 }
0x26ba   :  { %10624 = vmatpush3.bf16.msra.mxu1 %v11494_v9 }
0x26bb   :  { %10625 = vmatprep.subr.bf16.mxu1 %v11943_v0 }
0x26be   :  { %10626 = vmatpush3.bf16.msra.mxu1 %v11495_v10 }
0x26bf   :  { %10627 = vmatprep.subr.bf16.mxu1 %v11943_v0 }
0x26c2   :  { %10628 = vmatpush3.bf16.msra.mxu1 %v11496_v11 }
0x26c3   :  { %10629 = vmatprep.subr.bf16.mxu1 %v11943_v0 }
0x26c6   :  { %10630 = vmatpush3.bf16.msra.mxu1 %v11497_v27 }
0x26c7   :  { %10647 = vmatprep.subr.bf16.mxu1 %v11943_v0 }
0x276d   :  { %v3420_v13 = vpop.f32.mrf.mxu1 }
0x276f   :  { %v10613_v15 = vpop.f32.mrf.mxu1 }
0x2770   :  { %v11508_v15 = vld [vmem:[%s14634_s8] sm:$0xff]  }
0x2771   :  { %v3492_v17 = vpop.f32.mrf.mxu1 }
0x2772   :  { %v3503_v12 = vrot.slane %v3492_v17, 7 }
0x2773   :  { %v10618_v26 = vpop.f32.mrf.mxu1 }
0x2774   :  { %v3504_v18 = vsel %vm748_vm10, %v3503_v12, %v3420_v13  ;;  %v11509_v12 = vld [vmem:[%s14636_s9 + $0x28] sm:$0xff]   ;;  %v11510_v26 = vld [vmem:[%s14636_s9 + $0x20] sm:$0xff]  }
0x2775   :  { %v11331_v29 = vpack.i.bf16 %v3504_v18, %v12894_v60  ;;  %v11511_v18 = vld [vmem:[%s14636_s9 + $0x18] sm:$0xff]  }
0x2777   :  { %11332 = vrot.lane.b32.xlu0 %v11331_v29, %s11946_s19  ;;  %v11512_v29 = vld [vmem:[%s14636_s9 + $0x10] sm:$0xff]  }
0x27e9   :  { %v11333_v39 = vpop.permute.xlu0 %11332 }
0x27ea   :  { %v12992_v32 = vunpack.i.h.bf16 %v11333_v39  ;;  %v11334_v20 = vunpack.i.l.bf16 %v11333_v39  ;;  %v11513_v39 = vld [vmem:[%s14636_s9 + $0x8] sm:$0xff]  }
0x27ec   :  { %v3511_v22 = vsel %vm164_vm2, %v11334_v20, %v12992_v32  ;;  %v11514_v20 = vld [vmem:[%s14636_s9] sm:$0xff]  }
0x27ed   :  { %v3512_v23 = vsel %vm210_vm3, %v3511_v22, %v3509_v21 }
0x27ee   :  { %v3526_v24 = vpack.c.bf16 %v3512_v23, %v3512_v23 }
0x27f0   :  { %10632 = vmatmul.mubr.msk.bf16.vlgmr.msra.gmra.mxu1 %vm268_vm4, %v3526_v24 }
0x27f1   :  { %10657 = vmatprep.mubr.msk.bf16.mxu1 %vm11944_vm0, %v11943_v0 }
0x28b0   :  { %v3606_v25 = vpop.f32.mrf.mxu1 }
0x28b1   :  { %v3607_v33 = vadd.f32 %v12760_v28, %v3606_v25  ;;  %v11498_v28 = vld [vmem:[%s14633_s7 + $0x20] sm:$0xff]  }
0x28b2   :  { %v10633_v34 = vpop.f32.mrf.mxu1  ;;  %10648 = vmatpush3.bf16.msra.mxu1 %v11498_v28 }
0x28b3   :  { %v9439_v36 = vmul.f32 -1.442695, %v3607_v33  ;;  %10649 = vmatprep.subr.bf16.mxu1 %v11943_v0 }
0x28b4   :  { %v3609_v40 = vpop.f32.mrf.mxu1 }
0x28b5   :  { %11786 = vpow2.f32 %v9439_v36 }
0x28b6   :  { %v10634_v43 = vpop.f32.mrf.mxu1  ;;  %11788 = vtanh.f32 %v3607_v33  ;;  %10650 = vmatpush3.bf16.msra.mxu1 %v11499_v53 }
0x28b7   :  { %10651 = vmatprep.subr.bf16.mxu1 %v11943_v0 }
0x28ba   :  { %10652 = vmatpush3.bf16.msra.mxu1 %v11500_v55 }
0x28bb   :  { %10653 = vmatprep.subr.bf16.mxu1 %v11943_v0 }
0x28be   :  { %10654 = vmatpush3.bf16.msra.mxu1 %v11501_v56 }
0x28bf   :  { %10655 = vmatprep.subr.bf16.mxu1 %v11943_v0 }
0x28c2   :  { %v11787_v44 = vpop.eup %11786  ;;  %10656 = vmatpush3.bf16.msra.mxu1 %v11502_v31 }
0x28c3   :  { %v3616_v45 = vadd.f32 1.0, %v11787_v44  ;;  %v11789_v54 = vpop.eup %11788  ;;  %10685 = vmatprep.subr.bf16.mxu1 %v11943_v0 }
0x28c5   :  { %11790 = vrcp.f32 %v3616_v45  ;;  %10658 = vmatmul.mubr.msk.bf16.vlgmr.msra.gmra.mxu1 %vm102_vm1, %v3745_v42 }
0x28c6   :  { %10689 = vmatprep.mubr.msk.bf16.mxu1 %vm11944_vm0, %v11943_v0 }
0x28d2   :  { %v11791_v46 = vpop.eup %11790 }
0x28d3   :  { %v3619_v48 = vsel %vm12108_vm7, %v11789_v54, %v11791_v46  ;;  %v13107_v46 = vld [vmem:[%s14643_s1] sm:$0xff] }
0x28d4   :  { %3622 = vrot.lane.b32.xlu1 %v3619_v48, %s11945_s18  ;;  %v3620_v59 = vmul.f32 %v3619_v48, %v12794_v3  ;;  %v11505_v3 = vld [vmem:[%s14646_s13 + $0x8] sm:$0xff]  }
0x28d5   :  { %10640 = vmatpush3.bf16.msra.mxu0 %v11505_v3 }
0x28d6   :  { %10641 = vmatprep.subr.bf16.mxu0 %v11943_v0 }
0x28d9   :  { %10642 = vmatpush3.bf16.msra.mxu0 %v11506_v4  ;;  %v11515_v4 = vld [vmem:[%s14638_s5 + $0x8] sm:$0xff]  }
0x28da   :  { %10661 = vmatprep.subr.bf16.mxu0 %v11943_v0  ;;  %10686 = vmatpush3.bf16.msra.mxu1 %v11515_v4 }
0x28db   :  { %10687 = vmatprep.subr.bf16.mxu1 %v11943_v0 }
0x2946   :  { %v3623_v50 = vpop.permute.xlu1 %3622 }
0x2947   :  { %v3625_v52 = vmul.f32 %v3623_v50, %v3619_v48 }
0x2949   :  { %3627 = vrot.lane.b32.xlu0 %v3625_v52, %s11946_s19 }
0x2985   :  { %v3813_v5 = vpop.f32.mrf.mxu1 }
0x2986   :  { %v3819_v13 = vmax.f32 %v3813_v5, 0.0  ;;  %v11516_v5 = vld [vmem:[%s14638_s5] sm:$0xff]  }
0x2987   :  { %v10659_v38 = vpop.f32.mrf.mxu1  ;;  %10688 = vmatpush3.bf16.msra.mxu1 %v11516_v5 }
0x2988   :  { %v3824_v17 = vpack.c.bf16 %v3819_v13, %v3819_v13  ;;  %10693 = vmatprep.subr.bf16.mxu1 %v11943_v0 }
0x2989   :  { %v3816_v14 = vpop.f32.mrf.mxu1 }
0x298b   :  { %v10660_v6 = vpop.f32.mrf.mxu1 }
0x29bb   :  { %v3628_v61 = vpop.permute.xlu0 %3627 }
0x29bc   :  { %v13032_v62 = vadd.f32 %v3628_v61, %v3620_v59 }
0x29be   :  { %11792 = vtanh.f32 %v13032_v62 }
0x29cb   :  { %v11793_v47 = vpop.eup %11792 }
0x29cc   :  { %3633 = vrot.lane.b32.xlu1 %v11793_v47, %s11945_s18 }
0x29d0   :  { %3881 = vrot.lane.b32.xlu1 %v12894_v60, %s11949_s17  ;;  %v11507_v60 = vld [vmem:[%s14634_s8 + $0x8] sm:$0xff]  }
0x2a3e   :  { %v3634_v19 = vpop.permute.xlu1 %3633 }
0x2a3f   :  { %v13054_v9 = vmul.f32 %v3634_v19, %v3619_v48 }
0x2a41   :  { %3638 = vrot.lane.b32.xlu0 %v13054_v9, %s11946_s19 }
0x2a42   :  { %v3882_v36 = vpop.permute.xlu1 %3881 }
0x2ab3   :  { %v3639_v10 = vpop.permute.xlu0 %3638 }
0x2ab4   :  { %v3641_v11 = vsel %vm164_vm2, %v3639_v10, %v12992_v32  ;;  %v11517_v10 = vld [vmem:[%s14639_s4] sm:$0xff]  }
0x2ab5   :  { %v3650_v27 = vpack.c.bf16 %v3641_v11, %v3641_v11 }
0x2ab7   :  { %10644 = vmatmul.mubr.msk.bf16.vlgmr.msra.gmra.mxu0 %vm210_vm3, %v3650_v27  ;;  %v11518_v27 = vld [vmem:[%s14640_s6 + $0x38] sm:$0xff]  }
0x2ab8   :  { %10662 = vmatpush3.bf16.msra.mxu0 %v11507_v60  ;;  %10665 = vmatprep.mubr.msk.bf16.mxu0 %vm11944_vm0, %v11943_v0 }
0x2ab9   :  { %10663 = vmatprep.subr.bf16.mxu0 %v11943_v0 }
0x2abc   :  { %10664 = vmatpush3.bf16.msra.mxu0 %v11508_v15  ;;  %v11519_v15 = vld [vmem:[%s14640_s6 + $0x30] sm:$0xff]  }
0x2abd   :  { %10669 = vmatprep.subr.bf16.mxu0 %v11943_v0 }
0x2abf   :  { %10666 = vmatmul.mubr.msk.bf16.vlgmr.msra.gmra.mxu0 %vm164_vm2, %v3824_v17  ;;  %v11520_v17 = vld [vmem:[%s14640_s6 + $0x28] sm:$0xff]  }
0x2ac0   :  { %10670 = vmatpush3.bf16.msra.mxu0 %v11509_v12  ;;  %10681 = vmatprep.mubr.msk.bf16.mxu0 %vm11944_vm0, %v11943_v0  ;;  %v11521_v12 = vld [vmem:[%s14640_s6 + $0x20] sm:$0xff]  }
0x2ac1   :  { %10671 = vmatprep.subr.bf16.mxu0 %v11943_v0 }
0x2ac4   :  { %10672 = vmatpush3.bf16.msra.mxu0 %v11510_v26  ;;  %v11522_v26 = vld [vmem:[%s14640_s6 + $0x18] sm:$0xff]  }
0x2ac5   :  { %10673 = vmatprep.subr.bf16.mxu0 %v11943_v0 }
0x2ac8   :  { %10674 = vmatpush3.bf16.msra.mxu0 %v11511_v18  ;;  %v11523_v18 = vld [vmem:[%s14640_s6 + $0x10] sm:$0xff]  }
0x2ac9   :  { %10675 = vmatprep.subr.bf16.mxu0 %v11943_v0 }
0x2acc   :  { %10676 = vmatpush3.bf16.msra.mxu0 %v11512_v29  ;;  %v11524_v29 = vld [vmem:[%s14640_s6 + $0x8] sm:$0xff]  }
0x2acd   :  { %10677 = vmatprep.subr.bf16.mxu0 %v11943_v0 }
0x2ad0   :  { %10678 = vmatpush3.bf16.msra.mxu0 %v11513_v39  ;;  %v11525_v39 = vld [vmem:[%s14640_s6] sm:$0xff]  }
0x2ad1   :  { %10679 = vmatprep.subr.bf16.mxu0 %v11943_v0 }
0x2ad4   :  { %10680 = vmatpush3.bf16.msra.mxu0 %v11514_v20 }
0x2ad5   :  { %10719 = vmatprep.subr.mxu0 %v11943_v0 }
0x2b77   :  { %v13098_v21 = vpop.f32.mrf.mxu0 }
0x2b79   :  { %v10645_v22 = vpop.f32.mrf.mxu0 }
0x2b7b   :  { %v3722_v23 = vpop.f32.mrf.mxu0 }
0x2b7d   :  { %v10646_v24 = vpop.f32.mrf.mxu0 }
0x2b7f   :  { %v3874_v25 = vpop.f32.mrf.mxu0 }
0x2b80   :  { %v3880_v33 = vmax.f32 %v3874_v25, 0.0  ;;  %v13194_v25 = vld [vmem:[%s14641_s2] sm:$0x3] }
0x2b81   :  { %v10667_v34 = vpop.f32.mrf.mxu0 }
0x2b82   :  { %v3884_v40 = vsel %vm164_vm2, %v3880_v33, %v12992_v32  ;;  %v13116_v32 = vld [vmem:[%s14637_s10] ss:$0 sm:$0xff] }
0x2b83   :  { %v3885_v43 = vsel %vm210_vm3, %v3884_v40, %v3882_v36  ;;  %v3877_v44 = vpop.f32.mrf.mxu0 }
0x2b84   :  { %v3899_v45 = vpack.c.bf16 %v3885_v43, %v3885_v43 }
0x2b85   :  { %v10668_v54 = vpop.f32.mrf.mxu0 }
0x2b86   :  { %10682 = vmatmul.mubr.msk.bf16.vlgmr.msra.gmra.mxu0 %vm268_vm4, %v3899_v45 }
0x2b87   :  { %10720 = vmatpush3.msra.mxu0 %v13107_v46  ;;  %10721 = vmatprep.mubr.msk.f32.mxu0 %vm11944_vm0, %v11943_v0 }
0x2b88   :  { %10724 = vmatprep.subr.mxu0 %v11943_v0 }
0x2c46   :  { %v3979_v48 = vpop.f32.mrf.mxu0 }
0x2c47   :  { %v3980_v50 = vadd.f32 %v13116_v32, %v3979_v48 }
0x2c48   :  { %v10683_v52 = vpop.f32.mrf.mxu0 }
0x2c49   :  { %v9465_v28 = vmul.f32 -1.442695, %v3980_v50 }
0x2c4a   :  { %v3982_v53 = vpop.f32.mrf.mxu0 }
0x2c4b   :  { %11794 = vpow2.f32 %v9465_v28 }
0x2c4c   :  { %v10684_v55 = vpop.f32.mrf.mxu0  ;;  %11796 = vtanh.f32 %v3980_v50  ;;  %v13202_v50 = vld [vmem:[%s14642_s3] sm:$0x3] }
0x2c58   :  { %v11795_v56 = vpop.eup %11794 }
0x2c59   :  { %v3989_v31 = vadd.f32 1.0, %v11795_v56  ;;  %v11797_v57 = vpop.eup %11796 }
0x2c5b   :  { %11798 = vrcp.f32 %v3989_v31 }
0x2c68   :  { %v11799_v42 = vpop.eup %11798 }
0x2c69   :  { %v3992_v59 = vsel %vm12108_vm7, %v11797_v57, %v11799_v42 }
0x2c6a   :  { %3995 = vrot.lane.b32.xlu0 %v3992_v59, %s11945_s18  ;;  %v3993_v63 = vmul.f32 %v3992_v59, %v12876_v7  ;;  %v13138_v7 = vadd.f32 %v12951_v51, %v12890_v8 }
0x2cdc   :  { %v3996_v61 = vpop.permute.xlu0 %3995 }
0x2cdd   :  { %v3998_v2 = vmul.f32 %v3996_v61, %v3992_v59 }
0x2cdf   :  { %4000 = vrot.lane.b32.xlu1 %v3998_v2, %s11946_s19 }
0x2d51   :  { %v4001_v3 = vpop.permute.xlu1 %4000 }
0x2d52   :  { %v13124_v47 = vadd.f32 %v4001_v3, %v3993_v63 }
0x2d54   :  { %11800 = vtanh.f32 %v13124_v47 }
0x2d61   :  { %v11801_v38 = vpop.eup %11800 }
0x2d62   :  { %4006 = vrot.lane.b32.xlu0 %v11801_v38, %s11945_s18 }
0x2d66   :  { %4011 = vrot.lane.b32.xlu0 %v13138_v7, %s11950_s30 }
0x2dd4   :  { %v4007_v14 = vpop.permute.xlu0 %4006 }
0x2dd5   :  { %v13142_v6 = vmul.f32 %v4007_v14, %v3992_v59 }
0x2dd7   :  { %v4019_v19 = vpack.c.bf16 %v13142_v6, %v13142_v6 }
0x2dd8   :  { %v4012_v60 = vpop.permute.xlu0 %4011 }
0x2dd9   :  { %4021 = vrot.lane.b32.xlu1 %v4019_v19, %s11946_s19  ;;  %v4014_v8 = vsel %vm595_vm9, %v12951_v51, %v4012_v60  ;;  %v11526_v19 = vld [vmem:[%s14644_s11 + $0x28] sm:$0xff]   ;;  %v11529_v60 = vld [vmem:[%s14644_s11 + $0x10] sm:$0xff]  }
0x2dda   :  { %v4080_v13 = vpack.c.bf16 %v4014_v8, %v4014_v8  ;;  %v11530_v8 = vld [vmem:[%s14644_s11 + $0x8] sm:$0xff]  }
0x2e4b   :  { %v4022_v11 = vpop.permute.xlu1 %4021 }
0x2e4c   :  { %10690 = vmatmul.mubr.msk.bf16.vlgmr.msra.gmra.mxu1 %vm164_vm2, %v4022_v11  ;;  %v11528_v11 = vld [vmem:[%s14644_s11 + $0x18] sm:$0xff]  }
0x2e4d   :  { %10694 = vmatpush3.bf16.msra.mxu1 %v11517_v10  ;;  %10695 = vmatprep.mubr.msk.bf16.mxu1 %vm11944_vm0, %v11943_v0  ;;  %v11527_v10 = vld [vmem:[%s14644_s11 + $0x20] sm:$0xff]  }
0x2e4e   :  { %10699 = vmatprep.subr.bf16.mxu1 %v11943_v0 }
0x2e54   :  { %10696 = vmatmul.mubr.msk.bf16.vlgmr.msra.gmra.mxu1 %vm409_vm11, %v4080_v13 }
0x2e55   :  { %10700 = vmatpush3.bf16.msra.mxu1 %v11518_v27  ;;  %10715 = vmatprep.mubr.msk.bf16.mxu1 %vm11944_vm0, %v11943_v0  ;;  %v11531_v27 = vld [vmem:[%s14644_s11] sm:$0xff]  }
0x2e56   :  { %10701 = vmatprep.subr.bf16.mxu1 %v11943_v0 }
0x2e59   :  { %10702 = vmatpush3.bf16.msra.mxu1 %v11519_v15 }
0x2e5a   :  { %10703 = vmatprep.subr.bf16.mxu1 %v11943_v0 }
0x2e5d   :  { %10704 = vmatpush3.bf16.msra.mxu1 %v11520_v17 }
0x2e5e   :  { %10705 = vmatprep.subr.bf16.mxu1 %v11943_v0 }
0x2e61   :  { %10706 = vmatpush3.bf16.msra.mxu1 %v11521_v12 }
0x2e62   :  { %10707 = vmatprep.subr.bf16.mxu1 %v11943_v0 }
0x2e65   :  { %10708 = vmatpush3.bf16.msra.mxu1 %v11522_v26 }
0x2e66   :  { %10709 = vmatprep.subr.bf16.mxu1 %v11943_v0 }
0x2e69   :  { %10710 = vmatpush3.bf16.msra.mxu1 %v11523_v18 }
0x2e6a   :  { %10711 = vmatprep.subr.bf16.mxu1 %v11943_v0 }
0x2e6d   :  { %10712 = vmatpush3.bf16.msra.mxu1 %v11524_v29 }
0x2e6e   :  { %10713 = vmatprep.subr.bf16.mxu1 %v11943_v0 }
0x2e71   :  { %10714 = vmatpush3.bf16.msra.mxu1 %v11525_v39 }
0x2e72   :  { %10745 = vmatprep.subr.bf16.mxu1 %v11943_v0 }
0x2f0c   :  { %v4072_v20 = vpop.f32.mrf.mxu1 }
0x2f0d   :  { %v4073_v33 = vadd.f32 %v13194_v25, %v4072_v20 }
0x2f0e   :  { %v10691_v22 = vpop.f32.mrf.mxu1 }
0x2f10   :  { %v4075_v23 = vpop.f32.mrf.mxu1 }
0x2f12   :  { %v10692_v24 = vpop.f32.mrf.mxu1 }
0x2f14   :  { %v4124_v34 = vpop.f32.mrf.mxu1 }
0x2f15   :  { %v4130_v36 = vadd.f32 %v4124_v34, %v4073_v33 }
0x2f16   :  { %v10697_v40 = vpop.f32.mrf.mxu1 }
0x2f17   :  { %11802 = vtanh.f32 %v4130_v36  ;;  %v13266_v36 = vld [vmem:[%s14645_s12] ss:$0 sm:$0xff] }
0x2f18   :  { %v4127_v43 = vpop.f32.mrf.mxu1 }
0x2f1a   :  { %v10698_v44 = vpop.f32.mrf.mxu1 }
0x2f24   :  { %v11803_v45 = vpop.eup %11802 }
0x2f25   :  { %v4148_v54 = vpack.c.bf16 %v11803_v45, %v11803_v45 }
0x2f27   :  { %10716 = vmatmul.mubr.bf16.vlgmr.msra.gmra.mxu1 %v4148_v54 }
0x2f28   :  { %10753 = vmatprep.mubr.msk.bf16.mxu1 %vm11944_vm0, %v11943_v0 }
0x2fe7   :  { %v4231_v48 = vpop.f32.mrf.mxu1 }
0x2fe8   :  { %v4232_v52 = vadd.f32 %v13202_v50, %v4231_v48 }
0x2fe9   :  { %v10717_v28 = vpop.f32.mrf.mxu1 }
0x2fea   :  { %v4237_v53 = vsel %vm560_vm8, %v4232_v52, -inf }
0x2feb   :  { %4238 = vmax.xlane.f32.xlu1 %v4237_v53  ;;  %v4234_v55 = vpop.f32.mrf.mxu1 }
0x2fed   :  { %v10718_v56 = vpop.f32.mrf.mxu1 }
0x2ffc   :  { %4427 = vrot.lane.b32.xlu1 %v13054_v9, %s11949_s17  ;;  %v13218_v9 = vld [vmem:[%s14643_s1 + $0x8] sm:$0xff] }
0x3074   :  { %v4239_v31 = vpop.xlane.xlu1 %4238 }
0x3075   :  { %v4240_v57 = vsub.f32 %v4232_v52, %v4239_v31 }
0x3077   :  { %v4241_v42 = vmul.f32 1.442695, %v4240_v57 }
0x3078   :  { %v4428_v23 = vpop.permute.xlu1 %4427 }
0x3079   :  { %11804 = vpow2.f32 %v4241_v42  ;;  %v11532_v42 = vld [vmem:[%s14633_s7 + $0x20] sm:$0xff]  }
0x3086   :  { %v11805_v59 = vpop.eup %11804 }
0x3087   :  { %v4243_v61 = vsel %vm560_vm8, %v11805_v59, 0.0 }
0x3088   :  { %4244 = vadd.xlane.f32.xlu0 %v4243_v61  ;;  %v11534_v61 = vld [vmem:[%s14633_s7 + $0x10] sm:$0xff]  }
0x3111   :  { %v4245_v2 = vpop.xlane.xlu0 %4244 }
0x3112   :  { %11806 = vrcp.f32 %v4245_v2  ;;  %v11535_v2 = vld [vmem:[%s14633_s7 + $0x8] sm:$0xff]  }
0x311f   :  { %v11807_v63 = vpop.eup %11806 }
0x3120   :  { %v13209_v3 = vmul.f32 %v11807_v63, %v11805_v59  ;;  %v11533_v59 = vld [vmem:[%s14633_s7 + $0x18] sm:$0xff]   ;;  %v11536_v63 = vld [vmem:[%s14633_s7] sm:$0xff]  }
0x3122   :  { %v4255_v4 = vrot.slane %v13209_v3, %v12198_v35 }
0x3124   :  { %v4263_v5 = vrot.slane %v4255_v4, %v12198_v35  ;;  %v4256_v38 = vcombine.high %v4255_v4, %v4255_v4  ;;  %v9497_v4 = vld [vmem:[%s14635_s0 + $0xa] sm:$0x3] }
0x3126   :  { %10722 = vmatmul.mubr.msk.f32.vlgmr.msra.gmra.mxu0 %vm595_vm9, %v4263_v5  ;;  %v4270_v14 = vrot.slane %v4256_v38, %v12198_v35  ;;  %v4664_v5 = vpack.c.bf16 %v9497_v4, %v9497_v4 }
0x3127   :  { %10725 = vmatpush3.msra.mxu0 %v13218_v9  ;;  %10726 = vmatprep.mubr.msk.f32.mxu0 %vm11944_vm0, %v11943_v0 }
0x3128   :  { %10729 = vmatprep.subr.bf16.mxu0 %v11943_v0 }
0x312a   :  { %10727 = vmatmul.mubr.msk.f32.vlgmr.msra.gmra.mxu0 %vm595_vm9, %v4270_v14 }
0x312b   :  { %10741 = vmatprep.mubr.msk.bf16.mxu0 %vm11944_vm0, %v11943_v0  ;;  %10730 = vmatpush3.bf16.msra.mxu0 %v11526_v19 }
0x312c   :  { %10731 = vmatprep.subr.bf16.mxu0 %v11943_v0 }
0x312f   :  { %10732 = vmatpush3.bf16.msra.mxu0 %v11527_v10  ;;  %v11537_v10 = vld [vmem:[%s14646_s13 + $0x18] sm:$0xff]  }
0x3130   :  { %10733 = vmatprep.subr.bf16.mxu0 %v11943_v0  ;;  %10746 = vmatpush3.bf16.msra.mxu1 %v11537_v10 }
0x3131   :  { %10747 = vmatprep.subr.bf16.mxu1 %v11943_v0 }
0x3133   :  { %10734 = vmatpush3.bf16.msra.mxu0 %v11528_v11  ;;  %v11538_v11 = vld [vmem:[%s14646_s13 + $0x10] sm:$0xff]  }
0x3134   :  { %10735 = vmatprep.subr.bf16.mxu0 %v11943_v0  ;;  %10748 = vmatpush3.bf16.msra.mxu1 %v11538_v11 }
0x3135   :  { %10749 = vmatprep.subr.bf16.mxu1 %v11943_v0 }
0x3137   :  { %10736 = vmatpush3.bf16.msra.mxu0 %v11529_v60 }
0x3138   :  { %10737 = vmatprep.subr.bf16.mxu0 %v11943_v0 }
0x313b   :  { %10738 = vmatpush3.bf16.msra.mxu0 %v11530_v8  ;;  %v11540_v8 = vld [vmem:[%s14646_s13] sm:$0xff]  }
0x313c   :  { %10739 = vmatprep.subr.bf16.mxu0 %v11943_v0 }
0x313f   :  { %10740 = vmatpush3.bf16.msra.mxu0 %v11531_v27 }
0x3140   :  { %10757 = vmatprep.subr.bf16.mxu0 %v11943_v0 }
0x31e6   :  { %v4339_v13 = vpop.f32.mrf.mxu0 }
0x31e8   :  { %v10723_v15 = vpop.f32.mrf.mxu0 }
0x31ea   :  { %v4411_v17 = vpop.f32.mrf.mxu0 }
0x31eb   :  { %v4422_v12 = vrot.slane %v4411_v17, 7 }
0x31ec   :  { %v10728_v26 = vpop.f32.mrf.mxu0 }
0x31ed   :  { %v4423_v18 = vsel %vm748_vm10, %v4422_v12, %v4339_v13 }
0x31ee   :  { %v11336_v29 = vpack.i.bf16 %v4423_v18, %v13142_v6 }
0x31f0   :  { %11337 = vrot.lane.b32.xlu0 %v11336_v29, %s11946_s19 }
0x3262   :  { %v11338_v39 = vpop.permute.xlu0 %11337 }
0x3263   :  { %v13255_v20 = vunpack.i.h.bf16 %v11338_v39  ;;  %v11339_v22 = vunpack.i.l.bf16 %v11338_v39 }
0x3265   :  { %v4430_v24 = vsel %vm164_vm2, %v11339_v22, %v13255_v20 }
0x3266   :  { %v4431_v33 = vsel %vm210_vm3, %v4430_v24, %v4428_v23  ;;  %v11542_v23 = vld [vmem:[%s14634_s8] sm:$0xff]  }
0x3267   :  { %v4445_v34 = vpack.c.bf16 %v4431_v33, %v4431_v33  ;;  %v11543_v33 = vld [vmem:[%s14636_s9 + $0x28] sm:$0xff]  }
0x3269   :  { %10742 = vmatmul.mubr.msk.bf16.vlgmr.msra.gmra.mxu0 %vm268_vm4, %v4445_v34  ;;  %v11544_v34 = vld [vmem:[%s14636_s9 + $0x20] sm:$0xff]  }
0x326a   :  { %10767 = vmatprep.mubr.msk.bf16.mxu0 %vm11944_vm0, %v11943_v0  ;;  %10758 = vmatpush3.bf16.msra.mxu0 %v11532_v42 }
0x326b   :  { %10759 = vmatprep.subr.bf16.mxu0 %v11943_v0 }
0x326e   :  { %10760 = vmatpush3.bf16.msra.mxu0 %v11533_v59 }
0x326f   :  { %10761 = vmatprep.subr.bf16.mxu0 %v11943_v0 }
0x3272   :  { %10762 = vmatpush3.bf16.msra.mxu0 %v11534_v61 }
0x3273   :  { %10763 = vmatprep.subr.bf16.mxu0 %v11943_v0 }
0x3276   :  { %10764 = vmatpush3.bf16.msra.mxu0 %v11535_v2 }
0x3277   :  { %10765 = vmatprep.subr.bf16.mxu0 %v11943_v0 }
0x327a   :  { %10766 = vmatpush3.bf16.msra.mxu0 %v11536_v63 }
0x327b   :  { %10795 = vmatprep.subr.bf16.mxu0 %v11943_v0 }
0x327d   :  { %10768 = vmatmul.mubr.msk.bf16.vlgmr.msra.gmra.mxu0 %vm102_vm1, %v4664_v5 }
0x327e   :  { %10799 = vmatprep.mubr.msk.bf16.mxu0 %vm11944_vm0, %v11943_v0 }
0x3329   :  { %v4525_v40 = vpop.f32.mrf.mxu0 }
0x332a   :  { %v4526_v43 = vadd.f32 %v13266_v36, %v4525_v40  ;;  %v11545_v40 = vld [vmem:[%s14636_s9 + $0x18] sm:$0xff]  }
0x332b   :  { %v10743_v44 = vpop.f32.mrf.mxu0 }
0x332c   :  { %v9489_v45 = vmul.f32 -1.442695, %v4526_v43  ;;  %v11547_v44 = vld [vmem:[%s14636_s9 + $0x8] sm:$0xff]  }
0x332d   :  { %v4528_v54 = vpop.f32.mrf.mxu0 }
0x332e   :  { %11808 = vpow2.f32 %v9489_v45  ;;  %v11548_v45 = vld [vmem:[%s14636_s9] sm:$0xff]  }
0x332f   :  { %v10744_v48 = vpop.f32.mrf.mxu0  ;;  %11810 = vtanh.f32 %v4526_v43  ;;  %v11546_v43 = vld [vmem:[%s14636_s9 + $0x10] sm:$0xff]  }
0x333b   :  { %v11809_v52 = vpop.eup %11808 }
0x333c   :  { %v4535_v28 = vadd.f32 1.0, %v11809_v52  ;;  %v11811_v53 = vpop.eup %11810 }
0x333d   :  { %v4732_v27 = vpop.f32.mrf.mxu0 }
0x333e   :  { %11812 = vrcp.f32 %v4535_v28  ;;  %v4738_v22 = vmax.f32 %v4732_v27, 0.0 }
0x333f   :  { %v10769_v13 = vpop.f32.mrf.mxu0 }
0x3340   :  { %v4743_v24 = vpack.c.bf16 %v4738_v22, %v4738_v22  ;;  %v11551_v22 = vld [vmem:[%s14639_s4] sm:$0xff]  }
0x3341   :  { %v4735_v15 = vpop.f32.mrf.mxu0 }
0x3343   :  { %v10770_v17 = vpop.f32.mrf.mxu0 }
0x3344   :  { %v11549_v17 = vld [vmem:[%s14638_s5 + $0x8] sm:$0xff]  }
0x3345   :  { %10796 = vmatpush3.bf16.msra.mxu0 %v11549_v17 }
0x3346   :  { %10797 = vmatprep.subr.bf16.mxu0 %v11943_v0 }
0x334b   :  { %v11813_v55 = vpop.eup %11812 }
0x334c   :  { %v4538_v56 = vsel %vm12108_vm7, %v11811_v53, %v11813_v55 }
0x334d   :  { %4541 = vrot.lane.b32.xlu1 %v4538_v56, %s11945_s18  ;;  %v4539_v38 = vmul.f32 %v4538_v56, %v13032_v62  ;;  %v11539_v62 = vld [vmem:[%s14646_s13 + $0x8] sm:$0xff]  }
0x334e   :  { %10750 = vmatpush3.bf16.msra.mxu1 %v11539_v62 }
0x334f   :  { %10751 = vmatprep.subr.bf16.mxu1 %v11943_v0 }
0x3352   :  { %10752 = vmatpush3.bf16.msra.mxu1 %v11540_v8 }
0x3353   :  { %10771 = vmatprep.subr.bf16.mxu1 %v11943_v0 }
0x33bf   :  { %v4542_v31 = vpop.permute.xlu1 %4541 }
0x33c0   :  { %v4544_v57 = vmul.f32 %v4542_v31, %v4538_v56 }
0x33c2   :  { %4546 = vrot.lane.b32.xlu0 %v4544_v57, %s11946_s19 }
0x3434   :  { %v4547_v14 = vpop.permute.xlu0 %4546 }
0x3435   :  { %v13300_v19 = vadd.f32 %v4547_v14, %v4539_v38 }
0x3437   :  { %11814 = vtanh.f32 %v13300_v19 }
0x3444   :  { %v11815_v60 = vpop.eup %11814 }
0x3445   :  { %4552 = vrot.lane.b32.xlu1 %v11815_v60, %s11945_s18 }
0x3449   :  { %4800 = vrot.lane.b32.xlu1 %v13142_v6, %s11949_s17  ;;  %v11541_v6 = vld [vmem:[%s14634_s8 + $0x8] sm:$0xff]  }
0x34b7   :  { %v4553_v12 = vpop.permute.xlu1 %4552 }
0x34b8   :  { %v13322_v26 = vmul.f32 %v4553_v12, %v4538_v56  ;;  %v11550_v12 = vld [vmem:[%s14638_s5] sm:$0xff]  }
0x34b9   :  { %10798 = vmatpush3.bf16.msra.mxu0 %v11550_v12 }
0x34ba   :  { %4557 = vrot.lane.b32.xlu0 %v13322_v26, %s11946_s19  ;;  %10803 = vmatprep.subr.bf16.mxu0 %v11943_v0 }
0x34bb   :  { %v4801_v31 = vpop.permute.xlu1 %4800 }
0x352c   :  { %v4558_v18 = vpop.permute.xlu0 %4557 }
0x352d   :  { %v4560_v29 = vsel %vm164_vm2, %v4558_v18, %v13255_v20 }
0x352e   :  { %v4569_v39 = vpack.c.bf16 %v4560_v29, %v4560_v29 }
0x3530   :  { %10754 = vmatmul.mubr.msk.bf16.vlgmr.msra.gmra.mxu1 %vm210_vm3, %v4569_v39 }
0x3531   :  { %10772 = vmatpush3.bf16.msra.mxu1 %v11541_v6  ;;  %10775 = vmatprep.mubr.msk.bf16.mxu1 %vm11944_vm0, %v11943_v0 }
0x3532   :  { %10773 = vmatprep.subr.bf16.mxu1 %v11943_v0 }
0x3535   :  { %10774 = vmatpush3.bf16.msra.mxu1 %v11542_v23 }
0x3536   :  { %10779 = vmatprep.subr.bf16.mxu1 %v11943_v0 }
0x3538   :  { %10776 = vmatmul.mubr.msk.bf16.vlgmr.msra.gmra.mxu1 %vm164_vm2, %v4743_v24 }
0x3539   :  { %10780 = vmatpush3.bf16.msra.mxu1 %v11543_v33  ;;  %10791 = vmatprep.mubr.msk.bf16.mxu1 %vm11944_vm0, %v11943_v0  ;;  %v11552_v33 = vld [vmem:[%s14640_s6 + $0x38] sm:$0xff]  }
0x353a   :  { %10781 = vmatprep.subr.bf16.mxu1 %v11943_v0 }
0x353d   :  { %10782 = vmatpush3.bf16.msra.mxu1 %v11544_v34 }
0x353e   :  { %10783 = vmatprep.subr.bf16.mxu1 %v11943_v0 }
0x3541   :  { %10784 = vmatpush3.bf16.msra.mxu1 %v11545_v40  ;;  %v11553_v40 = vld [vmem:[%s14640_s6 + $0x30] sm:$0xff]  }
0x3542   :  { %10785 = vmatprep.subr.bf16.mxu1 %v11943_v0 }
0x3545   :  { %10786 = vmatpush3.bf16.msra.mxu1 %v11546_v43  ;;  %v11554_v43 = vld [vmem:[%s14640_s6 + $0x28] sm:$0xff]  }
0x3546   :  { %10787 = vmatprep.subr.bf16.mxu1 %v11943_v0 }
0x3549   :  { %10788 = vmatpush3.bf16.msra.mxu1 %v11547_v44  ;;  %v11555_v44 = vld [vmem:[%s14640_s6 + $0x20] sm:$0xff]  }
0x354a   :  { %10789 = vmatprep.subr.bf16.mxu1 %v11943_v0 }
0x354d   :  { %10790 = vmatpush3.bf16.msra.mxu1 %v11548_v45  ;;  %v11556_v45 = vld [vmem:[%s14640_s6 + $0x18] sm:$0xff]  }
0x354e   :  { %10829 = vmatprep.subr.mxu1 %v11943_v0 }
0x35f0   :  { %v13366_v54 = vpop.f32.mrf.mxu1 }
0x35f2   :  { %v10755_v48 = vpop.f32.mrf.mxu1 }
0x35f3   :  { %v11557_v48 = vld [vmem:[%s14640_s6 + $0x10] sm:$0xff]  }
0x35f4   :  { %v4641_v52 = vpop.f32.mrf.mxu1 }
0x35f5   :  { %v11558_v52 = vld [vmem:[%s14640_s6 + $0x8] sm:$0xff]  }
0x35f6   :  { %v10756_v28 = vpop.f32.mrf.mxu1 }
0x35f7   :  { %v11559_v28 = vld [vmem:[%s14640_s6] sm:$0xff]  }
0x35f8   :  { %v4793_v53 = vpop.f32.mrf.mxu1 }
0x35f9   :  { %v4799_v55 = vmax.f32 %v4793_v53, 0.0 }
0x35fa   :  { %v10777_v56 = vpop.f32.mrf.mxu1 }
0x35fb   :  { %v4803_v57 = vsel %vm164_vm2, %v4799_v55, %v13255_v20 }
0x35fc   :  { %v4804_v42 = vsel %vm210_vm3, %v4803_v57, %v4801_v31  ;;  %v4796_v59 = vpop.f32.mrf.mxu1 }
0x35fd   :  { %v4818_v61 = vpack.c.bf16 %v4804_v42, %v4804_v42 }
0x35fe   :  { %v10778_v2 = vpop.f32.mrf.mxu1 }
0x35ff   :  { %10792 = vmatmul.mubr.msk.bf16.vlgmr.msra.gmra.mxu1 %vm268_vm4, %v4818_v61 }
0x3600   :  { %10830 = vmatpush3.msra.mxu1 %v13107_v46  ;;  %10831 = vmatprep.mubr.msk.f32.mxu1 %vm11944_vm0, %v11943_v0 }
0x3601   :  { %10834 = vmatprep.subr.mxu1 %v11943_v0 }
0x36bf   :  { %v4898_v63 = vpop.f32.mrf.mxu1 }
0x36c0   :  { %v4899_v4 = vadd.f32 %v13116_v32, %v4898_v63 }
0x36c1   :  { %v10793_v5 = vpop.f32.mrf.mxu1 }
0x36c2   :  { %v9515_v38 = vmul.f32 -1.442695, %v4899_v4 }
0x36c3   :  { %v4901_v20 = vpop.f32.mrf.mxu1 }
0x36c4   :  { %11816 = vpow2.f32 %v9515_v38 }
0x36c5   :  { %v10794_v14 = vpop.f32.mrf.mxu1  ;;  %11818 = vtanh.f32 %v4899_v4 }
0x36d1   :  { %v11817_v10 = vpop.eup %11816 }
0x36d2   :  { %v4908_v11 = vadd.f32 1.0, %v11817_v10  ;;  %v11819_v62 = vpop.eup %11818 }
0x36d4   :  { %11820 = vrcp.f32 %v4908_v11 }
0x36e1   :  { %v11821_v60 = vpop.eup %11820 }
0x36e2   :  { %v4911_v46 = vsel %vm12108_vm7, %v11819_v62, %v11821_v60 }
0x36e3   :  { %4914 = vrot.lane.b32.xlu0 %v4911_v46, %s11945_s18  ;;  %v4912_v32 = vmul.f32 %v4911_v46, %v13124_v47  ;;  %v13396_v47 = vadd.f32 %v13209_v3, %v13138_v7 }
0x3755   :  { %v4915_v8 = vpop.permute.xlu0 %4914 }
0x3756   :  { %v4917_v27 = vmul.f32 %v4915_v8, %v4911_v46 }
0x3758   :  { %4919 = vrot.lane.b32.xlu1 %v4917_v27, %s11946_s19 }
0x37ca   :  { %v4920_v13 = vpop.permute.xlu1 %4919 }
0x37cb   :  { %v13382_v15 = vadd.f32 %v4920_v13, %v4912_v32 }
0x37cd   :  { %11822 = vtanh.f32 %v13382_v15 }
0x37da   :  { %v11823_v18 = vpop.eup %11822 }
0x37db   :  { %4925 = vrot.lane.b32.xlu0 %v11823_v18, %s11945_s18 }
0x37df   :  { %4930 = vrot.lane.b32.xlu0 %v13396_v47, %s11950_s30 }
0x384d   :  { %v4926_v29 = vpop.permute.xlu0 %4925 }
0x384e   :  { %v13400_v6 = vmul.f32 %v4926_v29, %v4911_v46  ;;  %v11560_v29 = vld [vmem:[%s14644_s11 + $0x28] sm:$0xff]  }
0x3850   :  { %v4938_v39 = vpack.c.bf16 %v13400_v6, %v13400_v6 }
0x3851   :  { %v4931_v24 = vpop.permute.xlu0 %4930 }
0x3852   :  { %4940 = vrot.lane.b32.xlu1 %v4938_v39, %s11946_s19  ;;  %v4933_v7 = vsel %vm595_vm9, %v13209_v3, %v4931_v24  ;;  %v11562_v39 = vld [vmem:[%s14644_s11 + $0x18] sm:$0xff]   ;;  %v11565_v24 = vld [vmem:[%s14644_s11] sm:$0xff]  }
0x3853   :  { %v4999_v34 = vpack.c.bf16 %v4933_v7, %v4933_v7 }
0x38c4   :  { %v4941_v23 = vpop.permute.xlu1 %4940 }
0x38c5   :  { %10800 = vmatmul.mubr.msk.bf16.vlgmr.msra.gmra.mxu0 %vm164_vm2, %v4941_v23  ;;  %v11564_v23 = vld [vmem:[%s14644_s11 + $0x8] sm:$0xff]  }
0x38c6   :  { %10804 = vmatpush3.bf16.msra.mxu0 %v11551_v22  ;;  %10805 = vmatprep.mubr.msk.bf16.mxu0 %vm11944_vm0, %v11943_v0  ;;  %v11563_v22 = vld [vmem:[%s14644_s11 + $0x10] sm:$0xff]  }
0x38c7   :  { %10809 = vmatprep.subr.bf16.mxu0 %v11943_v0 }
0x38cd   :  { %10806 = vmatmul.mubr.msk.bf16.vlgmr.msra.gmra.mxu0 %vm409_vm11, %v4999_v34 }
0x38ce   :  { %10810 = vmatpush3.bf16.msra.mxu0 %v11552_v33  ;;  %10825 = vmatprep.mubr.msk.bf16.mxu0 %vm11944_vm0, %v11943_v0 }
0x38cf   :  { %10811 = vmatprep.subr.bf16.mxu0 %v11943_v0 }
0x38d2   :  { %10812 = vmatpush3.bf16.msra.mxu0 %v11553_v40 }
0x38d3   :  { %10813 = vmatprep.subr.bf16.mxu0 %v11943_v0 }
0x38d6   :  { %10814 = vmatpush3.bf16.msra.mxu0 %v11554_v43 }
0x38d7   :  { %10815 = vmatprep.subr.bf16.mxu0 %v11943_v0 }
0x38da   :  { %10816 = vmatpush3.bf16.msra.mxu0 %v11555_v44 }
0x38db   :  { %10817 = vmatprep.subr.bf16.mxu0 %v11943_v0 }
0x38de   :  { %10818 = vmatpush3.bf16.msra.mxu0 %v11556_v45 }
0x38df   :  { %10819 = vmatprep.subr.bf16.mxu0 %v11943_v0 }
0x38e2   :  { %10820 = vmatpush3.bf16.msra.mxu0 %v11557_v48 }
0x38e3   :  { %10821 = vmatprep.subr.bf16.mxu0 %v11943_v0 }
0x38e6   :  { %10822 = vmatpush3.bf16.msra.mxu0 %v11558_v52 }
0x38e7   :  { %10823 = vmatprep.subr.bf16.mxu0 %v11943_v0 }
0x38ea   :  { %10824 = vmatpush3.bf16.msra.mxu0 %v11559_v28 }
0x38eb   :  { %10855 = vmatprep.subr.bf16.mxu0 %v11943_v0 }
0x3985   :  { %v4991_v53 = vpop.f32.mrf.mxu0 }
0x3986   :  { %v4992_v57 = vadd.f32 %v13194_v25, %v4991_v53 }
0x3987   :  { %v10801_v55 = vpop.f32.mrf.mxu0 }
0x3989   :  { %v4994_v56 = vpop.f32.mrf.mxu0 }
0x398b   :  { %v10802_v31 = vpop.f32.mrf.mxu0 }
0x398d   :  { %v5043_v42 = vpop.f32.mrf.mxu0 }
0x398e   :  { %v5049_v59 = vadd.f32 %v5043_v42, %v4992_v57 }
0x398f   :  { %v10807_v61 = vpop.f32.mrf.mxu0 }
0x3990   :  { %11824 = vtanh.f32 %v5049_v59 }
0x3991   :  { %v5046_v2 = vpop.f32.mrf.mxu0 }
0x3993   :  { %v10808_v63 = vpop.f32.mrf.mxu0 }
0x399d   :  { %v11825_v4 = vpop.eup %11824 }
0x399e   :  { %v5067_v5 = vpack.c.bf16 %v11825_v4, %v11825_v4 }
0x39a0   :  { %10826 = vmatmul.mubr.bf16.vlgmr.msra.gmra.mxu0 %v5067_v5 }
0x39a1   :  { %10863 = vmatprep.mubr.msk.bf16.mxu0 %vm11944_vm0, %v11943_v0 }
0x3a60   :  { %v5150_v38 = vpop.f32.mrf.mxu0 }
0x3a61   :  { %v5151_v20 = vadd.f32 %v13202_v50, %v5150_v38 }
0x3a62   :  { %v10827_v14 = vpop.f32.mrf.mxu0 }
0x3a63   :  { %v5156_v10 = vsel %vm560_vm8, %v5151_v20, -inf }
0x3a64   :  { %5157 = vmax.xlane.f32.xlu1 %v5156_v10  ;;  %v5153_v25 = vpop.f32.mrf.mxu0 }
0x3a66   :  { %v10828_v11 = vpop.f32.mrf.mxu0 }
0x3a67   :  { %v11567_v11 = vld [vmem:[%s14633_s7 + $0x18] sm:$0xff]  }
0x3a75   :  { %5346 = vrot.lane.b32.xlu1 %v13322_v26, %s11949_s17 }
0x3aed   :  { %v5158_v62 = vpop.xlane.xlu1 %5157 }
0x3aee   :  { %v5159_v60 = vsub.f32 %v5151_v20, %v5158_v62  ;;  %v11568_v62 = vld [vmem:[%s14633_s7 + $0x10] sm:$0xff]  }
0x3af0   :  { %v5160_v46 = vmul.f32 1.442695, %v5159_v60  ;;  %v11569_v60 = vld [vmem:[%s14633_s7 + $0x8] sm:$0xff]  }
0x3af1   :  { %v5347_v53 = vpop.permute.xlu1 %5346 }
0x3af2   :  { %11826 = vpow2.f32 %v5160_v46  ;;  %v11570_v46 = vld [vmem:[%s14633_s7] sm:$0xff]  }
0x3aff   :  { %v11827_v8 = vpop.eup %11826 }
0x3b00   :  { %v5162_v27 = vsel %vm560_vm8, %v11827_v8, 0.0 }
0x3b01   :  { %5163 = vadd.xlane.f32.xlu0 %v5162_v27 }
0x3b8a   :  { %v5164_v32 = vpop.xlane.xlu0 %5163 }
0x3b8b   :  { %11828 = vrcp.f32 %v5164_v32 }
0x3b98   :  { %v11829_v50 = vpop.eup %11828 }
0x3b99   :  { %v13457_v13 = vmul.f32 %v11829_v50, %v11827_v8  ;;  %v9547_v8 = vld [vmem:[%s14635_s0 + $0xc] sm:$0x3] }
0x3b9a   :  { %v5583_v27 = vpack.c.bf16 %v9547_v8, %v9547_v8 }
0x3b9b   :  { %v5174_v17 = vrot.slane %v13457_v13, %v12198_v35 }
0x3b9d   :  { %v5182_v12 = vrot.slane %v5174_v17, %v12198_v35  ;;  %v5175_v18 = vcombine.high %v5174_v17, %v5174_v17 }
0x3b9f   :  { %10832 = vmatmul.mubr.msk.f32.vlgmr.msra.gmra.mxu1 %vm595_vm9, %v5182_v12  ;;  %v5189_v26 = vrot.slane %v5175_v18, %v12198_v35  ;;  %v11571_v12 = vld [vmem:[%s14646_s13 + $0x18] sm:$0xff]   ;;  %v11572_v18 = vld [vmem:[%s14646_s13 + $0x10] sm:$0xff]  }
0x3ba0   :  { %10835 = vmatpush3.msra.mxu1 %v13218_v9  ;;  %10836 = vmatprep.mubr.msk.f32.mxu1 %vm11944_vm0, %v11943_v0  ;;  %v11561_v9 = vld [vmem:[%s14644_s11 + $0x20] sm:$0xff]  }
0x3ba1   :  { %10839 = vmatprep.subr.bf16.mxu1 %v11943_v0  ;;  %10856 = vmatpush3.bf16.msra.mxu0 %v11571_v12 }
0x3ba2   :  { %10857 = vmatprep.subr.bf16.mxu0 %v11943_v0 }
0x3ba3   :  { %10837 = vmatmul.mubr.msk.f32.vlgmr.msra.gmra.mxu1 %vm595_vm9, %v5189_v26 }
0x3ba4   :  { %10851 = vmatprep.mubr.msk.bf16.mxu1 %vm11944_vm0, %v11943_v0  ;;  %10840 = vmatpush3.bf16.msra.mxu1 %v11560_v29  ;;  %v11574_v29 = vld [vmem:[%s14646_s13] sm:$0xff]  }
0x3ba5   :  { %10841 = vmatprep.subr.bf16.mxu1 %v11943_v0  ;;  %10858 = vmatpush3.bf16.msra.mxu0 %v11572_v18 }
0x3ba6   :  { %10859 = vmatprep.subr.bf16.mxu0 %v11943_v0 }
0x3ba8   :  { %10842 = vmatpush3.bf16.msra.mxu1 %v11561_v9 }
0x3ba9   :  { %10843 = vmatprep.subr.bf16.mxu1 %v11943_v0 }
0x3bac   :  { %10844 = vmatpush3.bf16.msra.mxu1 %v11562_v39 }
0x3bad   :  { %10845 = vmatprep.subr.bf16.mxu1 %v11943_v0 }
0x3bb0   :  { %10846 = vmatpush3.bf16.msra.mxu1 %v11563_v22 }
0x3bb1   :  { %10847 = vmatprep.subr.bf16.mxu1 %v11943_v0 }
0x3bb4   :  { %10848 = vmatpush3.bf16.msra.mxu1 %v11564_v23 }
0x3bb5   :  { %10849 = vmatprep.subr.bf16.mxu1 %v11943_v0 }
0x3bb8   :  { %10850 = vmatpush3.bf16.msra.mxu1 %v11565_v24 }
0x3bb9   :  { %10867 = vmatprep.subr.bf16.mxu1 %v11943_v0 }
0x3c5f   :  { %v5258_v7 = vpop.f32.mrf.mxu1 }
0x3c61   :  { %v10833_v33 = vpop.f32.mrf.mxu1 }
0x3c63   :  { %v5330_v34 = vpop.f32.mrf.mxu1 }
0x3c64   :  { %v5341_v40 = vrot.slane %v5330_v34, 7 }
0x3c65   :  { %v10838_v43 = vpop.f32.mrf.mxu1 }
0x3c66   :  { %v5342_v44 = vsel %vm748_vm10, %v5341_v40, %v5258_v7 }
0x3c67   :  { %v11341_v45 = vpack.i.bf16 %v5342_v44, %v13400_v6  ;;  %v11576_v44 = vld [vmem:[%s14634_s8] sm:$0xff]  }
0x3c69   :  { %11342 = vrot.lane.b32.xlu0 %v11341_v45, %s11946_s19 }
0x3cdb   :  { %v11343_v48 = vpop.permute.xlu0 %11342 }
0x3cdc   :  { %v13498_v52 = vunpack.i.h.bf16 %v11343_v48  ;;  %v11344_v28 = vunpack.i.l.bf16 %v11343_v48  ;;  %v11577_v48 = vld [vmem:[%s14636_s9 + $0x28] sm:$0xff]  }
0x3cde   :  { %v5349_v55 = vsel %vm164_vm2, %v11344_v28, %v13498_v52  ;;  %v11578_v28 = vld [vmem:[%s14636_s9 + $0x20] sm:$0xff]  }
0x3cdf   :  { %v5350_v56 = vsel %vm210_vm3, %v5349_v55, %v5347_v53  ;;  %v11579_v53 = vld [vmem:[%s14636_s9 + $0x18] sm:$0xff]   ;;  %v11580_v55 = vld [vmem:[%s14636_s9 + $0x10] sm:$0xff]  }
0x3ce0   :  { %v5364_v31 = vpack.c.bf16 %v5350_v56, %v5350_v56  ;;  %v11581_v56 = vld [vmem:[%s14636_s9 + $0x8] sm:$0xff]  }
0x3ce2   :  { %10852 = vmatmul.mubr.msk.bf16.vlgmr.msra.gmra.mxu1 %vm268_vm4, %v5364_v31  ;;  %v11582_v31 = vld [vmem:[%s14636_s9] sm:$0xff]  }
0x3ce3   :  { %10877 = vmatprep.mubr.msk.bf16.mxu1 %vm11944_vm0, %v11943_v0 }
0x3da2   :  { %v5444_v57 = vpop.f32.mrf.mxu1 }
0x3da3   :  { %v5445_v42 = vadd.f32 %v13266_v36, %v5444_v57  ;;  %v11566_v36 = vld [vmem:[%s14633_s7 + $0x20] sm:$0xff]  }
0x3da4   :  { %v10853_v59 = vpop.f32.mrf.mxu1  ;;  %10868 = vmatpush3.bf16.msra.mxu1 %v11566_v36  ;;  %v13613_v36 = vld [vmem:[%s14643_s1] sm:$0xff] }
0x3da5   :  { %v9539_v61 = vmul.f32 -1.442695, %v5445_v42  ;;  %10869 = vmatprep.subr.bf16.mxu1 %v11943_v0 }
0x3da6   :  { %v5447_v2 = vpop.f32.mrf.mxu1 }
0x3da7   :  { %11830 = vpow2.f32 %v9539_v61 }
0x3da8   :  { %v10854_v63 = vpop.f32.mrf.mxu1  ;;  %11832 = vtanh.f32 %v5445_v42  ;;  %10870 = vmatpush3.bf16.msra.mxu1 %v11567_v11 }
0x3da9   :  { %10871 = vmatprep.subr.bf16.mxu1 %v11943_v0 }
0x3dac   :  { %10872 = vmatpush3.bf16.msra.mxu1 %v11568_v62 }
0x3dad   :  { %10873 = vmatprep.subr.bf16.mxu1 %v11943_v0 }
0x3db0   :  { %10874 = vmatpush3.bf16.msra.mxu1 %v11569_v60 }
0x3db1   :  { %10875 = vmatprep.subr.bf16.mxu1 %v11943_v0 }
0x3db4   :  { %v11831_v4 = vpop.eup %11830  ;;  %10876 = vmatpush3.bf16.msra.mxu1 %v11570_v46 }
0x3db5   :  { %v5454_v5 = vadd.f32 1.0, %v11831_v4  ;;  %v11833_v38 = vpop.eup %11832  ;;  %10905 = vmatprep.subr.bf16.mxu1 %v11943_v0 }
0x3db7   :  { %11834 = vrcp.f32 %v5454_v5  ;;  %10878 = vmatmul.mubr.msk.bf16.vlgmr.msra.gmra.mxu1 %vm102_vm1, %v5583_v27 }
0x3db8   :  { %10909 = vmatprep.mubr.msk.bf16.mxu1 %vm11944_vm0, %v11943_v0 }
0x3dc4   :  { %v11835_v20 = vpop.eup %11834 }
0x3dc5   :  { %v5457_v14 = vsel %vm12108_vm7, %v11833_v38, %v11835_v20 }
0x3dc6   :  { %5460 = vrot.lane.b32.xlu1 %v5457_v14, %s11945_s18  ;;  %v5458_v32 = vmul.f32 %v5457_v14, %v13300_v19  ;;  %v11573_v19 = vld [vmem:[%s14646_s13 + $0x8] sm:$0xff]  }
0x3dc7   :  { %10860 = vmatpush3.bf16.msra.mxu0 %v11573_v19 }
0x3dc8   :  { %10861 = vmatprep.subr.bf16.mxu0 %v11943_v0 }
0x3dcb   :  { %10862 = vmatpush3.bf16.msra.mxu0 %v11574_v29 }
0x3dcc   :  { %10881 = vmatprep.subr.bf16.mxu0 %v11943_v0 }
0x3e38   :  { %v5461_v10 = vpop.permute.xlu1 %5460 }
0x3e39   :  { %v5463_v25 = vmul.f32 %v5461_v10, %v5457_v14 }
0x3e3b   :  { %5465 = vrot.lane.b32.xlu0 %v5463_v25, %s11946_s19 }
0x3e77   :  { %v5651_v9 = vpop.f32.mrf.mxu1 }
0x3e78   :  { %v5657_v43 = vmax.f32 %v5651_v9, 0.0 }
0x3e79   :  { %v10879_v39 = vpop.f32.mrf.mxu1 }
0x3e7a   :  { %v5662_v45 = vpack.c.bf16 %v5657_v43, %v5657_v43  ;;  %v11585_v43 = vld [vmem:[%s14639_s4] sm:$0xff]  }
0x3e7b   :  { %v5654_v22 = vpop.f32.mrf.mxu1 }
0x3e7d   :  { %v10880_v23 = vpop.f32.mrf.mxu1 }
0x3e7e   :  { %v11583_v23 = vld [vmem:[%s14638_s5 + $0x8] sm:$0xff]  }
0x3e7f   :  { %10906 = vmatpush3.bf16.msra.mxu1 %v11583_v23 }
0x3e80   :  { %10907 = vmatprep.subr.bf16.mxu1 %v11943_v0 }
0x3ead   :  { %v5466_v50 = vpop.permute.xlu0 %5465 }
0x3eae   :  { %v13538_v17 = vadd.f32 %v5466_v50, %v5458_v32 }
0x3eb0   :  { %11836 = vtanh.f32 %v13538_v17 }
0x3ebd   :  { %v11837_v26 = vpop.eup %11836 }
0x3ebe   :  { %5471 = vrot.lane.b32.xlu1 %v11837_v26, %s11945_s18 }
0x3ec2   :  { %5719 = vrot.lane.b32.xlu1 %v13400_v6, %s11949_s17  ;;  %v11575_v6 = vld [vmem:[%s14634_s8 + $0x8] sm:$0xff]  }
0x3f30   :  { %v5472_v24 = vpop.permute.xlu1 %5471 }
0x3f31   :  { %v13560_v7 = vmul.f32 %v5472_v24, %v5457_v14  ;;  %v11584_v24 = vld [vmem:[%s14638_s5] sm:$0xff]  }
0x3f32   :  { %10908 = vmatpush3.bf16.msra.mxu1 %v11584_v24 }
0x3f33   :  { %5476 = vrot.lane.b32.xlu0 %v13560_v7, %s11946_s19  ;;  %10913 = vmatprep.subr.bf16.mxu1 %v11943_v0 }
0x3f34   :  { %v5720_v5 = vpop.permute.xlu1 %5719 }
0x3fa5   :  { %v5477_v33 = vpop.permute.xlu0 %5476 }
0x3fa6   :  { %v5479_v34 = vsel %vm164_vm2, %v5477_v33, %v13498_v52 }
0x3fa7   :  { %v5488_v40 = vpack.c.bf16 %v5479_v34, %v5479_v34 }
0x3fa9   :  { %10864 = vmatmul.mubr.msk.bf16.vlgmr.msra.gmra.mxu0 %vm210_vm3, %v5488_v40 }
0x3faa   :  { %10882 = vmatpush3.bf16.msra.mxu0 %v11575_v6  ;;  %10885 = vmatprep.mubr.msk.bf16.mxu0 %vm11944_vm0, %v11943_v0 }
0x3fab   :  { %10883 = vmatprep.subr.bf16.mxu0 %v11943_v0 }
0x3fae   :  { %10884 = vmatpush3.bf16.msra.mxu0 %v11576_v44 }
0x3faf   :  { %10889 = vmatprep.subr.bf16.mxu0 %v11943_v0 }
0x3fb1   :  { %10886 = vmatmul.mubr.msk.bf16.vlgmr.msra.gmra.mxu0 %vm164_vm2, %v5662_v45 }
0x3fb2   :  { %10890 = vmatpush3.bf16.msra.mxu0 %v11577_v48  ;;  %10901 = vmatprep.mubr.msk.bf16.mxu0 %vm11944_vm0, %v11943_v0  ;;  %v11586_v48 = vld [vmem:[%s14640_s6 + $0x38] sm:$0xff]  }
0x3fb3   :  { %10891 = vmatprep.subr.bf16.mxu0 %v11943_v0 }
0x3fb6   :  { %10892 = vmatpush3.bf16.msra.mxu0 %v11578_v28 }
0x3fb7   :  { %10893 = vmatprep.subr.bf16.mxu0 %v11943_v0 }
0x3fba   :  { %10894 = vmatpush3.bf16.msra.mxu0 %v11579_v53  ;;  %v11587_v53 = vld [vmem:[%s14640_s6 + $0x30] sm:$0xff]  }
0x3fbb   :  { %10895 = vmatprep.subr.bf16.mxu0 %v11943_v0 }
0x3fbe   :  { %10896 = vmatpush3.bf16.msra.mxu0 %v11580_v55  ;;  %v11588_v55 = vld [vmem:[%s14640_s6 + $0x28] sm:$0xff]  }
0x3fbf   :  { %10897 = vmatprep.subr.bf16.mxu0 %v11943_v0 }
0x3fc2   :  { %10898 = vmatpush3.bf16.msra.mxu0 %v11581_v56  ;;  %v11589_v56 = vld [vmem:[%s14640_s6 + $0x20] sm:$0xff]  }
0x3fc3   :  { %10899 = vmatprep.subr.bf16.mxu0 %v11943_v0 }
0x3fc6   :  { %10900 = vmatpush3.bf16.msra.mxu0 %v11582_v31  ;;  %v11590_v31 = vld [vmem:[%s14640_s6 + $0x18] sm:$0xff]  }
0x3fc7   :  { %10939 = vmatprep.subr.mxu0 %v11943_v0 }
0x4069   :  { %v13604_v57 = vpop.f32.mrf.mxu0 }
0x406b   :  { %v10865_v42 = vpop.f32.mrf.mxu0 }
0x406c   :  { %v11591_v42 = vld [vmem:[%s14640_s6 + $0x10] sm:$0xff]  }
0x406d   :  { %v5560_v59 = vpop.f32.mrf.mxu0 }
0x406e   :  { %v11592_v59 = vld [vmem:[%s14640_s6 + $0x8] sm:$0xff]  }
0x406f   :  { %v10866_v61 = vpop.f32.mrf.mxu0 }
0x4070   :  { %v11593_v61 = vld [vmem:[%s14640_s6] sm:$0xff]  }
0x4071   :  { %v5712_v2 = vpop.f32.mrf.mxu0 }
0x4072   :  { %v5718_v63 = vmax.f32 %v5712_v2, 0.0 }
0x4073   :  { %v10887_v4 = vpop.f32.mrf.mxu0 }
0x4074   :  { %v5722_v38 = vsel %vm164_vm2, %v5718_v63, %v13498_v52  ;;  %v13622_v52 = vld [vmem:[%s14637_s10] ss:$0 sm:$0xff] }
0x4075   :  { %v5723_v20 = vsel %vm210_vm3, %v5722_v38, %v5720_v5  ;;  %v5715_v14 = vpop.f32.mrf.mxu0  ;;  %v13700_v38 = vld [vmem:[%s14641_s2] sm:$0x3] }
0x4076   :  { %v5737_v10 = vpack.c.bf16 %v5723_v20, %v5723_v20 }
0x4077   :  { %v10888_v25 = vpop.f32.mrf.mxu0 }
0x4078   :  { %10902 = vmatmul.mubr.msk.bf16.vlgmr.msra.gmra.mxu0 %vm268_vm4, %v5737_v10 }
0x4079   :  { %10940 = vmatpush3.msra.mxu0 %v13613_v36  ;;  %10941 = vmatprep.mubr.msk.f32.mxu0 %vm11944_vm0, %v11943_v0 }
0x407a   :  { %10944 = vmatprep.subr.mxu0 %v11943_v0 }
0x4138   :  { %v5817_v11 = vpop.f32.mrf.mxu0 }
0x4139   :  { %v5818_v62 = vadd.f32 %v13622_v52, %v5817_v11 }
0x413a   :  { %v10903_v60 = vpop.f32.mrf.mxu0 }
0x413b   :  { %v9565_v46 = vmul.f32 -1.442695, %v5818_v62 }
0x413c   :  { %v5820_v8 = vpop.f32.mrf.mxu0 }
0x413d   :  { %11838 = vpow2.f32 %v9565_v46 }
0x413e   :  { %v10904_v27 = vpop.f32.mrf.mxu0  ;;  %11840 = vtanh.f32 %v5818_v62 }
0x413f   :  { %v13708_v27 = vld [vmem:[%s14642_s3] sm:$0x3] }
0x414a   :  { %v11839_v32 = vpop.eup %11838 }
0x414b   :  { %v5827_v50 = vadd.f32 1.0, %v11839_v32  ;;  %v11841_v12 = vpop.eup %11840 }
0x414d   :  { %11842 = vrcp.f32 %v5827_v50 }
0x415a   :  { %v11843_v18 = vpop.eup %11842 }
0x415b   :  { %v5830_v19 = vsel %vm12108_vm7, %v11841_v12, %v11843_v18 }
0x415c   :  { %5833 = vrot.lane.b32.xlu0 %v5830_v19, %s11945_s18  ;;  %v5831_v9 = vmul.f32 %v5830_v19, %v13382_v15  ;;  %v13644_v15 = vadd.f32 %v13457_v13, %v13396_v47 }
0x41ce   :  { %v5834_v26 = vpop.permute.xlu0 %5833 }
0x41cf   :  { %v5836_v29 = vmul.f32 %v5834_v26, %v5830_v19 }
0x41d1   :  { %5838 = vrot.lane.b32.xlu1 %v5836_v29, %s11946_s19 }
0x4243   :  { %v5839_v39 = vpop.permute.xlu1 %5838 }
0x4244   :  { %v13630_v22 = vadd.f32 %v5839_v39, %v5831_v9 }
0x4246   :  { %11844 = vtanh.f32 %v13630_v22 }
0x4253   :  { %v11845_v33 = vpop.eup %11844 }
0x4254   :  { %5844 = vrot.lane.b32.xlu0 %v11845_v33, %s11945_s18 }
0x4258   :  { %5849 = vrot.lane.b32.xlu0 %v13644_v15, %s11950_s30 }
0x42c6   :  { %v5845_v34 = vpop.permute.xlu0 %5844 }
0x42c7   :  { %v13648_v6 = vmul.f32 %v5845_v34, %v5830_v19 }
0x42c9   :  { %v5857_v40 = vpack.c.bf16 %v13648_v6, %v13648_v6 }
0x42ca   :  { %v5850_v45 = vpop.permute.xlu0 %5849 }
0x42cb   :  { %5859 = vrot.lane.b32.xlu1 %v5857_v40, %s11946_s19  ;;  %v5852_v47 = vsel %vm595_vm9, %v13457_v13, %v5850_v45 }
0x42cc   :  { %v5918_v28 = vpack.c.bf16 %v5852_v47, %v5852_v47  ;;  %v11594_v47 = vld [vmem:[%s14644_s11 + $0x28] sm:$0xff]  }
0x433d   :  { %v5860_v44 = vpop.permute.xlu1 %5859 }
0x433e   :  { %10910 = vmatmul.mubr.msk.bf16.vlgmr.msra.gmra.mxu1 %vm164_vm2, %v5860_v44 }
0x433f   :  { %10914 = vmatpush3.bf16.msra.mxu1 %v11585_v43  ;;  %10915 = vmatprep.mubr.msk.bf16.mxu1 %vm11944_vm0, %v11943_v0 }
0x4340   :  { %10919 = vmatprep.subr.bf16.mxu1 %v11943_v0 }
0x4346   :  { %10916 = vmatmul.mubr.msk.bf16.vlgmr.msra.gmra.mxu1 %vm409_vm11, %v5918_v28  ;;  %v11596_v28 = vld [vmem:[%s14644_s11 + $0x18] sm:$0xff]  }
0x4347   :  { %10920 = vmatpush3.bf16.msra.mxu1 %v11586_v48  ;;  %10935 = vmatprep.mubr.msk.bf16.mxu1 %vm11944_vm0, %v11943_v0  ;;  %v11595_v48 = vld [vmem:[%s14644_s11 + $0x20] sm:$0xff]  }
0x4348   :  { %10921 = vmatprep.subr.bf16.mxu1 %v11943_v0 }
0x434b   :  { %10922 = vmatpush3.bf16.msra.mxu1 %v11587_v53  ;;  %v11597_v53 = vld [vmem:[%s14644_s11 + $0x10] sm:$0xff]  }
0x434c   :  { %10923 = vmatprep.subr.bf16.mxu1 %v11943_v0 }
0x434f   :  { %10924 = vmatpush3.bf16.msra.mxu1 %v11588_v55  ;;  %v11598_v55 = vld [vmem:[%s14644_s11 + $0x8] sm:$0xff]  }
0x4350   :  { %10925 = vmatprep.subr.bf16.mxu1 %v11943_v0 }
0x4353   :  { %10926 = vmatpush3.bf16.msra.mxu1 %v11589_v56  ;;  %v11599_v56 = vld [vmem:[%s14644_s11] sm:$0xff]  }
0x4354   :  { %10927 = vmatprep.subr.bf16.mxu1 %v11943_v0 }
0x4357   :  { %10928 = vmatpush3.bf16.msra.mxu1 %v11590_v31 }
0x4358   :  { %10929 = vmatprep.subr.bf16.mxu1 %v11943_v0 }
0x435b   :  { %10930 = vmatpush3.bf16.msra.mxu1 %v11591_v42 }
0x435c   :  { %10931 = vmatprep.subr.bf16.mxu1 %v11943_v0 }
0x435f   :  { %10932 = vmatpush3.bf16.msra.mxu1 %v11592_v59 }
0x4360   :  { %10933 = vmatprep.subr.bf16.mxu1 %v11943_v0 }
0x4363   :  { %10934 = vmatpush3.bf16.msra.mxu1 %v11593_v61 }
0x4364   :  { %10965 = vmatprep.subr.bf16.mxu1 %v11943_v0 }
0x43fe   :  { %v5910_v2 = vpop.f32.mrf.mxu1 }
0x43ff   :  { %v5911_v20 = vadd.f32 %v13700_v38, %v5910_v2 }
0x4400   :  { %v10911_v63 = vpop.f32.mrf.mxu1 }
0x4402   :  { %v5913_v4 = vpop.f32.mrf.mxu1 }
0x4404   :  { %v10912_v5 = vpop.f32.mrf.mxu1 }
0x4406   :  { %v5962_v14 = vpop.f32.mrf.mxu1 }
0x4407   :  { %v5968_v10 = vadd.f32 %v5962_v14, %v5911_v20 }
0x4408   :  { %v10917_v25 = vpop.f32.mrf.mxu1 }
0x4409   :  { %11846 = vtanh.f32 %v5968_v10 }
0x440a   :  { %v5965_v11 = vpop.f32.mrf.mxu1 }
0x440c   :  { %v10918_v62 = vpop.f32.mrf.mxu1 }
0x4416   :  { %v11847_v60 = vpop.eup %11846 }
0x4417   :  { %v5986_v46 = vpack.c.bf16 %v11847_v60, %v11847_v60  ;;  %v13772_v60 = vld [vmem:[%s14645_s12] ss:$0 sm:$0xff] }
0x4419   :  { %10936 = vmatmul.mubr.bf16.vlgmr.msra.gmra.mxu1 %v5986_v46 }
0x441a   :  { %10973 = vmatprep.mubr.msk.bf16.mxu1 %vm11944_vm0, %v11943_v0 }
0x44d9   :  { %v6069_v8 = vpop.f32.mrf.mxu1 }
0x44da   :  { %v6070_v32 = vadd.f32 %v13708_v27, %v6069_v8 }
0x44db   :  { %v10937_v50 = vpop.f32.mrf.mxu1 }
0x44dc   :  { %v6075_v12 = vsel %vm560_vm8, %v6070_v32, -inf }
0x44dd   :  { %6076 = vmax.xlane.f32.xlu1 %v6075_v12  ;;  %v6072_v18 = vpop.f32.mrf.mxu1 }
0x44df   :  { %v10938_v19 = vpop.f32.mrf.mxu1 }
0x44ee   :  { %6265 = vrot.lane.b32.xlu1 %v13560_v7, %s11949_s17  ;;  %v13724_v7 = vld [vmem:[%s14643_s1 + $0x8] sm:$0xff] }
0x4566   :  { %v6077_v26 = vpop.xlane.xlu1 %6076 }
0x4567   :  { %v6078_v29 = vsub.f32 %v6070_v32, %v6077_v26 }
0x4569   :  { %v6079_v9 = vmul.f32 1.442695, %v6078_v29 }
0x456a   :  { %v6266_v10 = vpop.permute.xlu1 %6265 }
0x456b   :  { %11848 = vpow2.f32 %v6079_v9 }
0x4578   :  { %v11849_v39 = vpop.eup %11848 }
0x4579   :  { %v6081_v23 = vsel %vm560_vm8, %v11849_v39, 0.0 }
0x457a   :  { %6082 = vadd.xlane.f32.xlu0 %v6081_v23 }
0x4603   :  { %v6083_v24 = vpop.xlane.xlu0 %6082 }
0x4604   :  { %11850 = vrcp.f32 %v6083_v24 }
0x4611   :  { %v11851_v33 = vpop.eup %11850 }
0x4612   :  { %v13715_v34 = vmul.f32 %v11851_v33, %v11849_v39  ;;  %v11600_v33 = vld [vmem:[%s14633_s7 + $0x20] sm:$0xff]  }
0x4614   :  { %v6093_v40 = vrot.slane %v13715_v34, %v12198_v35 }
0x4616   :  { %v6101_v43 = vrot.slane %v6093_v40, %v12198_v35  ;;  %v6094_v44 = vcombine.high %v6093_v40, %v6093_v40  ;;  %v11601_v40 = vld [vmem:[%s14633_s7 + $0x18] sm:$0xff]  }
0x4618   :  { %10942 = vmatmul.mubr.msk.f32.vlgmr.msra.gmra.mxu0 %vm595_vm9, %v6101_v43  ;;  %v6108_v45 = vrot.slane %v6094_v44, %v12198_v35  ;;  %v11602_v43 = vld [vmem:[%s14633_s7 + $0x10] sm:$0xff]   ;;  %v11603_v44 = vld [vmem:[%s14633_s7 + $0x8] sm:$0xff]  }
0x4619   :  { %10945 = vmatpush3.msra.mxu0 %v13724_v7  ;;  %10946 = vmatprep.mubr.msk.f32.mxu0 %vm11944_vm0, %v11943_v0 }
0x461a   :  { %10949 = vmatprep.subr.bf16.mxu0 %v11943_v0 }
0x461c   :  { %10947 = vmatmul.mubr.msk.f32.vlgmr.msra.gmra.mxu0 %vm595_vm9, %v6108_v45  ;;  %v11604_v45 = vld [vmem:[%s14633_s7] sm:$0xff]  }
0x461d   :  { %10961 = vmatprep.mubr.msk.bf16.mxu0 %vm11944_vm0, %v11943_v0  ;;  %10950 = vmatpush3.bf16.msra.mxu0 %v11594_v47  ;;  %v9597_v47 = vld [vmem:[%s14635_s0 + $0xe] sm:$0x3] }
0x461e   :  { %10951 = vmatprep.subr.bf16.mxu0 %v11943_v0 }
0x4621   :  { %10952 = vmatpush3.bf16.msra.mxu0 %v11595_v48  ;;  %v6502_v48 = vpack.c.bf16 %v9597_v47, %v9597_v47 }
0x4622   :  { %10953 = vmatprep.subr.bf16.mxu0 %v11943_v0 }
0x4625   :  { %10954 = vmatpush3.bf16.msra.mxu0 %v11596_v28 }
0x4626   :  { %10955 = vmatprep.subr.bf16.mxu0 %v11943_v0 }
0x4629   :  { %10956 = vmatpush3.bf16.msra.mxu0 %v11597_v53 }
0x462a   :  { %10957 = vmatprep.subr.bf16.mxu0 %v11943_v0 }
0x462d   :  { %10958 = vmatpush3.bf16.msra.mxu0 %v11598_v55 }
0x462e   :  { %10959 = vmatprep.subr.bf16.mxu0 %v11943_v0 }
0x4631   :  { %10960 = vmatpush3.bf16.msra.mxu0 %v11599_v56  ;;  %v11605_v56 = vld [vmem:[%s14646_s13 + $0x18] sm:$0xff]  }
0x4632   :  { %10977 = vmatprep.subr.bf16.mxu0 %v11943_v0  ;;  %10966 = vmatpush3.bf16.msra.mxu1 %v11605_v56 }
0x4633   :  { %10967 = vmatprep.subr.bf16.mxu1 %v11943_v0 }
0x46d8   :  { %v6177_v31 = vpop.f32.mrf.mxu0 }
0x46da   :  { %v10943_v42 = vpop.f32.mrf.mxu0 }
0x46dc   :  { %v6249_v59 = vpop.f32.mrf.mxu0 }
0x46dd   :  { %v6260_v61 = vrot.slane %v6249_v59, 7  ;;  %v11608_v59 = vld [vmem:[%s14646_s13] sm:$0xff]  }
0x46de   :  { %v10948_v2 = vpop.f32.mrf.mxu0 }
0x46df   :  { %v6261_v63 = vsel %vm748_vm10, %v6260_v61, %v6177_v31  ;;  %v11606_v31 = vld [vmem:[%s14646_s13 + $0x10] sm:$0xff]  }
0x46e0   :  { %v11346_v4 = vpack.i.bf16 %v6261_v63, %v13648_v6  ;;  %10968 = vmatpush3.bf16.msra.mxu1 %v11606_v31 }
0x46e1   :  { %10969 = vmatprep.subr.bf16.mxu1 %v11943_v0 }
0x46e2   :  { %11347 = vrot.lane.b32.xlu0 %v11346_v4, %s11946_s19 }
0x4754   :  { %v11348_v5 = vpop.permute.xlu0 %11347 }
0x4755   :  { %v13761_v20 = vunpack.i.h.bf16 %v11348_v5  ;;  %v11349_v14 = vunpack.i.l.bf16 %v11348_v5 }
0x4757   :  { %v6268_v25 = vsel %vm164_vm2, %v11349_v14, %v13761_v20 }
0x4758   :  { %v6269_v11 = vsel %vm210_vm3, %v6268_v25, %v6266_v10 }
0x4759   :  { %v6283_v62 = vpack.c.bf16 %v6269_v11, %v6269_v11 }
0x475b   :  { %10962 = vmatmul.mubr.msk.bf16.vlgmr.msra.gmra.mxu0 %vm268_vm4, %v6283_v62 }
0x475c   :  { %10987 = vmatprep.mubr.msk.bf16.mxu0 %vm11944_vm0, %v11943_v0  ;;  %10978 = vmatpush3.bf16.msra.mxu0 %v11600_v33 }
0x475d   :  { %10979 = vmatprep.subr.bf16.mxu0 %v11943_v0 }
0x4760   :  { %10980 = vmatpush3.bf16.msra.mxu0 %v11601_v40 }
0x4761   :  { %10981 = vmatprep.subr.bf16.mxu0 %v11943_v0 }
0x4764   :  { %10982 = vmatpush3.bf16.msra.mxu0 %v11602_v43 }
0x4765   :  { %10983 = vmatprep.subr.bf16.mxu0 %v11943_v0 }
0x4768   :  { %10984 = vmatpush3.bf16.msra.mxu0 %v11603_v44 }
0x4769   :  { %10985 = vmatprep.subr.bf16.mxu0 %v11943_v0 }
0x476c   :  { %10986 = vmatpush3.bf16.msra.mxu0 %v11604_v45 }
0x476d   :  { %11015 = vmatprep.subr.bf16.mxu0 %v11943_v0 }
0x476f   :  { %10988 = vmatmul.mubr.msk.bf16.vlgmr.msra.gmra.mxu0 %vm102_vm1, %v6502_v48 }
0x4770   :  { %11019 = vmatprep.mubr.msk.bf16.mxu0 %vm11944_vm0, %v11943_v0 }
0x481b   :  { %v6363_v46 = vpop.f32.mrf.mxu0 }
0x481c   :  { %v6364_v8 = vadd.f32 %v13772_v60, %v6363_v46  ;;  %v11610_v46 = vld [vmem:[%s14634_s8] sm:$0xff]  }
0x481d   :  { %v10963_v32 = vpop.f32.mrf.mxu0 }
0x481e   :  { %v9589_v50 = vmul.f32 -1.442695, %v6364_v8  ;;  %v11611_v32 = vld [vmem:[%s14636_s9 + $0x28] sm:$0xff]  }
0x481f   :  { %v6366_v12 = vpop.f32.mrf.mxu0 }
0x4820   :  { %11852 = vpow2.f32 %v9589_v50  ;;  %v11612_v50 = vld [vmem:[%s14636_s9 + $0x20] sm:$0xff]   ;;  %v11613_v12 = vld [vmem:[%s14636_s9 + $0x18] sm:$0xff]  }
0x4821   :  { %v10964_v18 = vpop.f32.mrf.mxu0  ;;  %11854 = vtanh.f32 %v6364_v8 }
0x4822   :  { %v11614_v18 = vld [vmem:[%s14636_s9 + $0x10] sm:$0xff]  }
0x482d   :  { %v11853_v19 = vpop.eup %11852 }
0x482e   :  { %v6373_v26 = vadd.f32 1.0, %v11853_v19  ;;  %v11855_v29 = vpop.eup %11854  ;;  %v11615_v19 = vld [vmem:[%s14636_s9 + $0x8] sm:$0xff]  }
0x482f   :  { %v6570_v61 = vpop.f32.mrf.mxu0 }
0x4830   :  { %11856 = vrcp.f32 %v6373_v26  ;;  %v6576_v62 = vmax.f32 %v6570_v61, 0.0  ;;  %v11616_v26 = vld [vmem:[%s14636_s9] sm:$0xff]  }
0x4831   :  { %v10989_v2 = vpop.f32.mrf.mxu0 }
0x4832   :  { %v6581_v8 = vpack.c.bf16 %v6576_v62, %v6576_v62 }
0x4833   :  { %v6573_v63 = vpop.f32.mrf.mxu0 }
0x4835   :  { %v10990_v4 = vpop.f32.mrf.mxu0 }
0x483d   :  { %v11857_v9 = vpop.eup %11856 }
0x483e   :  { %v6376_v39 = vsel %vm12108_vm7, %v11855_v29, %v11857_v9 }
0x483f   :  { %6379 = vrot.lane.b32.xlu1 %v6376_v39, %s11945_s18  ;;  %v6377_v28 = vmul.f32 %v6376_v39, %v13538_v17  ;;  %v11607_v17 = vld [vmem:[%s14646_s13 + $0x8] sm:$0xff]  }
0x4840   :  { %10970 = vmatpush3.bf16.msra.mxu1 %v11607_v17 }
0x4841   :  { %10971 = vmatprep.subr.bf16.mxu1 %v11943_v0 }
0x4844   :  { %10972 = vmatpush3.bf16.msra.mxu1 %v11608_v59 }
0x4845   :  { %10991 = vmatprep.subr.bf16.mxu1 %v11943_v0 }
0x48b1   :  { %v6380_v23 = vpop.permute.xlu1 %6379 }
0x48b2   :  { %v6382_v24 = vmul.f32 %v6380_v23, %v6376_v39 }
0x48b4   :  { %6384 = vrot.lane.b32.xlu0 %v6382_v24, %s11946_s19 }
0x4926   :  { %v6385_v53 = vpop.permute.xlu0 %6384 }
0x4927   :  { %v13806_v55 = vadd.f32 %v6385_v53, %v6377_v28 }
0x4929   :  { %11858 = vtanh.f32 %v13806_v55 }
0x4936   :  { %v11859_v42 = vpop.eup %11858 }
0x4937   :  { %6390 = vrot.lane.b32.xlu1 %v11859_v42, %s11945_s18 }
0x493b   :  { %6638 = vrot.lane.b32.xlu1 %v13648_v6, %s11949_s17  ;;  %v11609_v6 = vld [vmem:[%s14634_s8 + $0x8] sm:$0xff]  }
0x49a9   :  { %v6391_v5 = vpop.permute.xlu1 %6390 }
0x49aa   :  { %v13828_v14 = vmul.f32 %v6391_v5, %v6376_v39 }
0x49ac   :  { %6395 = vrot.lane.b32.xlu0 %v13828_v14, %s11946_s19 }
0x49ad   :  { %v6639_v43 = vpop.permute.xlu1 %6638 }
0x4a1e   :  { %v6396_v10 = vpop.permute.xlu0 %6395 }
0x4a1f   :  { %v6398_v25 = vsel %vm164_vm2, %v6396_v10, %v13761_v20 }
0x4a20   :  { %v6407_v11 = vpack.c.bf16 %v6398_v25, %v6398_v25 }
0x4a22   :  { %10974 = vmatmul.mubr.msk.bf16.vlgmr.msra.gmra.mxu1 %vm210_vm3, %v6407_v11  ;;  %v11618_v11 = vld [vmem:[%s14638_s5] sm:$0xff]  }
0x4a23   :  { %10992 = vmatpush3.bf16.msra.mxu1 %v11609_v6  ;;  %10995 = vmatprep.mubr.msk.bf16.mxu1 %vm11944_vm0, %v11943_v0  ;;  %v11617_v6 = vld [vmem:[%s14638_s5 + $0x8] sm:$0xff]  }
0x4a24   :  { %10993 = vmatprep.subr.bf16.mxu1 %v11943_v0  ;;  %11016 = vmatpush3.bf16.msra.mxu0 %v11617_v6 }
0x4a25   :  { %11017 = vmatprep.subr.bf16.mxu0 %v11943_v0 }
0x4a27   :  { %10994 = vmatpush3.bf16.msra.mxu1 %v11610_v46 }
0x4a28   :  { %10999 = vmatprep.subr.bf16.mxu1 %v11943_v0  ;;  %11018 = vmatpush3.bf16.msra.mxu0 %v11618_v11 }
0x4a29   :  { %11023 = vmatprep.subr.bf16.mxu0 %v11943_v0 }
0x4a2a   :  { %10996 = vmatmul.mubr.msk.bf16.vlgmr.msra.gmra.mxu1 %vm164_vm2, %v6581_v8 }
0x4a2b   :  { %11000 = vmatpush3.bf16.msra.mxu1 %v11611_v32  ;;  %11011 = vmatprep.mubr.msk.bf16.mxu1 %vm11944_vm0, %v11943_v0 }
0x4a2c   :  { %11001 = vmatprep.subr.bf16.mxu1 %v11943_v0 }
0x4a2f   :  { %11002 = vmatpush3.bf16.msra.mxu1 %v11612_v50  ;;  %v11619_v50 = vld [vmem:[%s14639_s4] sm:$0xff]  }
0x4a30   :  { %11003 = vmatprep.subr.bf16.mxu1 %v11943_v0 }
0x4a33   :  { %11004 = vmatpush3.bf16.msra.mxu1 %v11613_v12 }
0x4a34   :  { %11005 = vmatprep.subr.bf16.mxu1 %v11943_v0 }
0x4a37   :  { %11006 = vmatpush3.bf16.msra.mxu1 %v11614_v18 }
0x4a38   :  { %11007 = vmatprep.subr.bf16.mxu1 %v11943_v0 }
0x4a3b   :  { %11008 = vmatpush3.bf16.msra.mxu1 %v11615_v19  ;;  %v11620_v19 = vld [vmem:[%s14640_s6 + $0x38] sm:$0xff]  }
0x4a3c   :  { %11009 = vmatprep.subr.bf16.mxu1 %v11943_v0 }
0x4a3f   :  { %11010 = vmatpush3.bf16.msra.mxu1 %v11616_v26 }
0x4a40   :  { %11049 = vmatprep.subr.mxu1 %v11943_v0 }
0x4ae2   :  { %v13872_v29 = vpop.f32.mrf.mxu1 }
0x4ae4   :  { %v10975_v9 = vpop.f32.mrf.mxu1 }
0x4ae5   :  { %v11621_v9 = vld [vmem:[%s14640_s6 + $0x30] sm:$0xff]  }
0x4ae6   :  { %v6479_v39 = vpop.f32.mrf.mxu1 }
0x4ae7   :  { %v11622_v39 = vld [vmem:[%s14640_s6 + $0x28] sm:$0xff]  }
0x4ae8   :  { %v10976_v23 = vpop.f32.mrf.mxu1 }
0x4ae9   :  { %v11623_v23 = vld [vmem:[%s14640_s6 + $0x20] sm:$0xff]  }
0x4aea   :  { %v6631_v24 = vpop.f32.mrf.mxu1 }
0x4aeb   :  { %v6637_v33 = vmax.f32 %v6631_v24, 0.0  ;;  %v11624_v24 = vld [vmem:[%s14640_s6 + $0x18] sm:$0xff]  }
0x4aec   :  { %v10997_v40 = vpop.f32.mrf.mxu1 }
0x4aed   :  { %v6641_v44 = vsel %vm164_vm2, %v6637_v33, %v13761_v20  ;;  %v11625_v33 = vld [vmem:[%s14640_s6 + $0x10] sm:$0xff]   ;;  %v11626_v40 = vld [vmem:[%s14640_s6 + $0x8] sm:$0xff]  }
0x4aee   :  { %v6642_v45 = vsel %vm210_vm3, %v6641_v44, %v6639_v43  ;;  %v6634_v47 = vpop.f32.mrf.mxu1  ;;  %v11627_v43 = vld [vmem:[%s14640_s6] sm:$0xff]  }
0x4aef   :  { %v6656_v48 = vpack.c.bf16 %v6642_v45, %v6642_v45 }
0x4af0   :  { %v10998_v28 = vpop.f32.mrf.mxu1 }
0x4af1   :  { %11012 = vmatmul.mubr.msk.bf16.vlgmr.msra.gmra.mxu1 %vm268_vm4, %v6656_v48 }
0x4af2   :  { %11050 = vmatpush3.msra.mxu1 %v13613_v36  ;;  %11051 = vmatprep.mubr.msk.f32.mxu1 %vm11944_vm0, %v11943_v0 }
0x4af3   :  { %11054 = vmatprep.subr.mxu1 %v11943_v0 }
0x4bb1   :  { %v6736_v53 = vpop.f32.mrf.mxu1 }
0x4bb2   :  { %v6737_v56 = vadd.f32 %v13622_v52, %v6736_v53 }
0x4bb3   :  { %v11013_v31 = vpop.f32.mrf.mxu1 }
0x4bb4   :  { %v9615_v17 = vmul.f32 -1.442695, %v6737_v56 }
0x4bb5   :  { %v6739_v20 = vpop.f32.mrf.mxu1 }
0x4bb6   :  { %11860 = vpow2.f32 %v9615_v17 }
0x4bb7   :  { %v11014_v42 = vpop.f32.mrf.mxu1  ;;  %11862 = vtanh.f32 %v6737_v56 }
0x4bc3   :  { %v11861_v59 = vpop.eup %11860 }
0x4bc4   :  { %v6746_v61 = vadd.f32 1.0, %v11861_v59  ;;  %v11863_v2 = vpop.eup %11862 }
0x4bc6   :  { %11864 = vrcp.f32 %v6746_v61 }
0x4bd3   :  { %v11865_v63 = vpop.eup %11864 }
0x4bd4   :  { %v6749_v36 = vsel %vm12108_vm7, %v11863_v2, %v11865_v63 }
0x4bd5   :  { %6752 = vrot.lane.b32.xlu0 %v6749_v36, %s11945_s18  ;;  %v6750_v52 = vmul.f32 %v6749_v36, %v13630_v22  ;;  %v13902_v22 = vadd.f32 %v13715_v34, %v13644_v15 }
0x4c47   :  { %v6753_v4 = vpop.permute.xlu0 %6752 }
0x4c48   :  { %v6755_v5 = vmul.f32 %v6753_v4, %v6749_v36 }
0x4c4a   :  { %6757 = vrot.lane.b32.xlu1 %v6755_v5, %s11946_s19 }
0x4cbc   :  { %v6758_v10 = vpop.permute.xlu1 %6757 }
0x4cbd   :  { %v13888_v25 = vadd.f32 %v6758_v10, %v6750_v52 }
0x4cbf   :  { %11866 = vtanh.f32 %v13888_v25 }
0x4ccc   :  { %v11867_v62 = vpop.eup %11866 }
0x4ccd   :  { %6763 = vrot.lane.b32.xlu0 %v11867_v62, %s11945_s18 }
0x4cd1   :  { %6768 = vrot.lane.b32.xlu0 %v13902_v22, %s11950_s30 }
0x4d3f   :  { %v6764_v46 = vpop.permute.xlu0 %6763 }
0x4d40   :  { %v13906_v8 = vmul.f32 %v6764_v46, %v6749_v36 }
0x4d42   :  { %v6776_v32 = vpack.c.bf16 %v13906_v8, %v13906_v8 }
0x4d43   :  { %v6769_v18 = vpop.permute.xlu0 %6768 }
0x4d44   :  { %6778 = vrot.lane.b32.xlu1 %v6776_v32, %s11946_s19  ;;  %v6771_v15 = vsel %vm595_vm9, %v13715_v34, %v6769_v18  ;;  %v11628_v18 = vld [vmem:[%s14644_s11 + $0x28] sm:$0xff]  }
0x4d45   :  { %v6837_v26 = vpack.c.bf16 %v6771_v15, %v6771_v15  ;;  %v11630_v15 = vld [vmem:[%s14644_s11 + $0x18] sm:$0xff]  }
0x4db6   :  { %v6779_v12 = vpop.permute.xlu1 %6778 }
0x4db7   :  { %11020 = vmatmul.mubr.msk.bf16.vlgmr.msra.gmra.mxu0 %vm164_vm2, %v6779_v12 }
0x4db8   :  { %11024 = vmatpush3.bf16.msra.mxu0 %v11619_v50  ;;  %11025 = vmatprep.mubr.msk.bf16.mxu0 %vm11944_vm0, %v11943_v0 }
0x4db9   :  { %11029 = vmatprep.subr.bf16.mxu0 %v11943_v0 }
0x4dbf   :  { %11026 = vmatmul.mubr.msk.bf16.vlgmr.msra.gmra.mxu0 %vm409_vm11, %v6837_v26  ;;  %v11632_v26 = vld [vmem:[%s14644_s11 + $0x8] sm:$0xff]  }
0x4dc0   :  { %11030 = vmatpush3.bf16.msra.mxu0 %v11620_v19  ;;  %11045 = vmatprep.mubr.msk.bf16.mxu0 %vm11944_vm0, %v11943_v0  ;;  %v11631_v19 = vld [vmem:[%s14644_s11 + $0x10] sm:$0xff]  }
0x4dc1   :  { %11031 = vmatprep.subr.bf16.mxu0 %v11943_v0 }
0x4dc4   :  { %11032 = vmatpush3.bf16.msra.mxu0 %v11621_v9  ;;  %v11633_v9 = vld [vmem:[%s14644_s11] sm:$0xff]  }
0x4dc5   :  { %11033 = vmatprep.subr.bf16.mxu0 %v11943_v0 }
0x4dc8   :  { %11034 = vmatpush3.bf16.msra.mxu0 %v11622_v39 }
0x4dc9   :  { %11035 = vmatprep.subr.bf16.mxu0 %v11943_v0 }
0x4dcc   :  { %11036 = vmatpush3.bf16.msra.mxu0 %v11623_v23 }
0x4dcd   :  { %11037 = vmatprep.subr.bf16.mxu0 %v11943_v0 }
0x4dd0   :  { %11038 = vmatpush3.bf16.msra.mxu0 %v11624_v24 }
0x4dd1   :  { %11039 = vmatprep.subr.bf16.mxu0 %v11943_v0 }
0x4dd4   :  { %11040 = vmatpush3.bf16.msra.mxu0 %v11625_v33 }
0x4dd5   :  { %11041 = vmatprep.subr.bf16.mxu0 %v11943_v0 }
0x4dd8   :  { %11042 = vmatpush3.bf16.msra.mxu0 %v11626_v40 }
0x4dd9   :  { %11043 = vmatprep.subr.bf16.mxu0 %v11943_v0 }
0x4ddc   :  { %11044 = vmatpush3.bf16.msra.mxu0 %v11627_v43 }
0x4ddd   :  { %11075 = vmatprep.subr.bf16.mxu0 %v11943_v0 }
0x4e77   :  { %v6829_v44 = vpop.f32.mrf.mxu0 }
0x4e78   :  { %v6830_v28 = vadd.f32 %v13700_v38, %v6829_v44 }
0x4e79   :  { %v11021_v45 = vpop.f32.mrf.mxu0 }
0x4e7b   :  { %v6832_v47 = vpop.f32.mrf.mxu0 }
0x4e7d   :  { %v11022_v48 = vpop.f32.mrf.mxu0 }
0x4e7f   :  { %v6881_v53 = vpop.f32.mrf.mxu0 }
0x4e80   :  { %v6887_v56 = vadd.f32 %v6881_v53, %v6830_v28 }
0x4e81   :  { %v11027_v31 = vpop.f32.mrf.mxu0 }
0x4e82   :  { %11868 = vtanh.f32 %v6887_v56 }
0x4e83   :  { %v6884_v17 = vpop.f32.mrf.mxu0 }
0x4e85   :  { %v11028_v20 = vpop.f32.mrf.mxu0 }
0x4e8f   :  { %v11869_v42 = vpop.eup %11868 }
0x4e90   :  { %v6905_v59 = vpack.c.bf16 %v11869_v42, %v11869_v42 }
0x4e92   :  { %11046 = vmatmul.mubr.bf16.vlgmr.msra.gmra.mxu0 %v6905_v59 }
0x4e93   :  { %11083 = vmatprep.mubr.msk.bf16.mxu0 %vm11944_vm0, %v11943_v0 }
0x4f52   :  { %v6988_v61 = vpop.f32.mrf.mxu0 }
0x4f53   :  { %v6989_v2 = vadd.f32 %v13708_v27, %v6988_v61 }
0x4f54   :  { %v11047_v63 = vpop.f32.mrf.mxu0 }
0x4f55   :  { %v6994_v36 = vsel %vm560_vm8, %v6989_v2, -inf }
0x4f56   :  { %6995 = vmax.xlane.f32.xlu1 %v6994_v36  ;;  %v6991_v38 = vpop.f32.mrf.mxu0 }
0x4f58   :  { %v11048_v4 = vpop.f32.mrf.mxu0 }
0x4f67   :  { %7184 = vrot.lane.b32.xlu1 %v13828_v14, %s11949_s17 }
0x4fdf   :  { %v6996_v5 = vpop.xlane.xlu1 %6995 }
0x4fe0   :  { %v6997_v52 = vsub.f32 %v6989_v2, %v6996_v5 }
0x4fe2   :  { %v6998_v10 = vmul.f32 1.442695, %v6997_v52 }
0x4fe3   :  { %v7185_v28 = vpop.permute.xlu1 %7184 }
0x4fe4   :  { %11870 = vpow2.f32 %v6998_v10 }
0x4ff1   :  { %v11871_v6 = vpop.eup %11870 }
0x4ff2   :  { %v7000_v11 = vsel %vm560_vm8, %v11871_v6, 0.0 }
0x4ff3   :  { %7001 = vadd.xlane.f32.xlu0 %v7000_v11  ;;  %v11636_v11 = vld [vmem:[%s14633_s7 + $0x10] sm:$0xff]  }
0x507c   :  { %v7002_v62 = vpop.xlane.xlu0 %7001 }
0x507d   :  { %11872 = vrcp.f32 %v7002_v62  ;;  %v11637_v62 = vld [vmem:[%s14633_s7 + $0x8] sm:$0xff]  }
0x508a   :  { %v11873_v27 = vpop.eup %11872 }
0x508b   :  { %v13963_v46 = vmul.f32 %v11873_v27, %v11871_v6  ;;  %v11635_v6 = vld [vmem:[%s14633_s7 + $0x18] sm:$0xff]   ;;  %v11638_v27 = vld [vmem:[%s14633_s7] sm:$0xff]  }
0x508d   :  { %v7012_v32 = vrot.slane %v13963_v46, %v12198_v35 }
0x508f   :  { %v7020_v50 = vrot.slane %v7012_v32, %v12198_v35  ;;  %v7013_v12 = vcombine.high %v7012_v32, %v7012_v32  ;;  %v9647_v32 = vld [vmem:[%s14635_s0 + $0x10] sm:$0x3] }
0x5091   :  { %11052 = vmatmul.mubr.msk.f32.vlgmr.msra.gmra.mxu1 %vm595_vm9, %v7020_v50  ;;  %v7027_v14 = vrot.slane %v7013_v12, %v12198_v35  ;;  %v7421_v50 = vpack.c.bf16 %v9647_v32, %v9647_v32 }
0x5092   :  { %11055 = vmatpush3.msra.mxu1 %v13724_v7  ;;  %11056 = vmatprep.mubr.msk.f32.mxu1 %vm11944_vm0, %v11943_v0  ;;  %v11629_v7 = vld [vmem:[%s14644_s11 + $0x20] sm:$0xff]  }
0x5093   :  { %11059 = vmatprep.subr.bf16.mxu1 %v11943_v0 }
0x5095   :  { %11057 = vmatmul.mubr.msk.f32.vlgmr.msra.gmra.mxu1 %vm595_vm9, %v7027_v14 }
0x5096   :  { %11071 = vmatprep.mubr.msk.bf16.mxu1 %vm11944_vm0, %v11943_v0  ;;  %11060 = vmatpush3.bf16.msra.mxu1 %v11628_v18 }
0x5097   :  { %11061 = vmatprep.subr.bf16.mxu1 %v11943_v0 }
0x509a   :  { %11062 = vmatpush3.bf16.msra.mxu1 %v11629_v7  ;;  %v11639_v7 = vld [vmem:[%s14646_s13 + $0x18] sm:$0xff]  }
0x509b   :  { %11063 = vmatprep.subr.bf16.mxu1 %v11943_v0  ;;  %11076 = vmatpush3.bf16.msra.mxu0 %v11639_v7 }
0x509c   :  { %11077 = vmatprep.subr.bf16.mxu0 %v11943_v0 }
0x509e   :  { %11064 = vmatpush3.bf16.msra.mxu1 %v11630_v15  ;;  %v11640_v15 = vld [vmem:[%s14646_s13 + $0x10] sm:$0xff]  }
0x509f   :  { %11065 = vmatprep.subr.bf16.mxu1 %v11943_v0  ;;  %11078 = vmatpush3.bf16.msra.mxu0 %v11640_v15 }
0x50a0   :  { %11079 = vmatprep.subr.bf16.mxu0 %v11943_v0 }
0x50a2   :  { %11066 = vmatpush3.bf16.msra.mxu1 %v11631_v19 }
0x50a3   :  { %11067 = vmatprep.subr.bf16.mxu1 %v11943_v0 }
0x50a6   :  { %11068 = vmatpush3.bf16.msra.mxu1 %v11632_v26  ;;  %v11642_v26 = vld [vmem:[%s14646_s13] sm:$0xff]  }
0x50a7   :  { %11069 = vmatprep.subr.bf16.mxu1 %v11943_v0 }
0x50aa   :  { %11070 = vmatpush3.bf16.msra.mxu1 %v11633_v9 }
0x50ab   :  { %11087 = vmatprep.subr.bf16.mxu1 %v11943_v0 }
0x5151   :  { %v7096_v39 = vpop.f32.mrf.mxu1 }
0x5153   :  { %v11053_v23 = vpop.f32.mrf.mxu1 }
0x5155   :  { %v7168_v24 = vpop.f32.mrf.mxu1 }
0x5156   :  { %v7179_v33 = vrot.slane %v7168_v24, 7 }
0x5157   :  { %v11058_v40 = vpop.f32.mrf.mxu1 }
0x5158   :  { %v7180_v43 = vsel %vm748_vm10, %v7179_v33, %v7096_v39 }
0x5159   :  { %v11351_v44 = vpack.i.bf16 %v7180_v43, %v13906_v8 }
0x515b   :  { %11352 = vrot.lane.b32.xlu0 %v11351_v44, %s11946_s19 }
0x51cd   :  { %v11353_v45 = vpop.permute.xlu0 %11352 }
0x51ce   :  { %v14004_v47 = vunpack.i.h.bf16 %v11353_v45  ;;  %v11354_v48 = vunpack.i.l.bf16 %v11353_v45 }
0x51d0   :  { %v7187_v53 = vsel %vm164_vm2, %v11354_v48, %v14004_v47 }
0x51d1   :  { %v7188_v56 = vsel %vm210_vm3, %v7187_v53, %v7185_v28  ;;  %v11644_v28 = vld [vmem:[%s14634_s8] sm:$0xff]  }
0x51d2   :  { %v7202_v31 = vpack.c.bf16 %v7188_v56, %v7188_v56  ;;  %v11645_v56 = vld [vmem:[%s14636_s9 + $0x28] sm:$0xff]  }
0x51d4   :  { %11072 = vmatmul.mubr.msk.bf16.vlgmr.msra.gmra.mxu1 %vm268_vm4, %v7202_v31  ;;  %v11646_v31 = vld [vmem:[%s14636_s9 + $0x20] sm:$0xff]  }
0x51d5   :  { %11097 = vmatprep.mubr.msk.bf16.mxu1 %vm11944_vm0, %v11943_v0 }
0x5294   :  { %v7282_v17 = vpop.f32.mrf.mxu1 }
0x5295   :  { %v7283_v20 = vadd.f32 %v13772_v60, %v7282_v17  ;;  %v11634_v60 = vld [vmem:[%s14633_s7 + $0x20] sm:$0xff]   ;;  %v11647_v17 = vld [vmem:[%s14636_s9 + $0x18] sm:$0xff]  }
0x5296   :  { %v11073_v42 = vpop.f32.mrf.mxu1  ;;  %11088 = vmatpush3.bf16.msra.mxu1 %v11634_v60 }
0x5297   :  { %v9639_v59 = vmul.f32 -1.442695, %v7283_v20  ;;  %11089 = vmatprep.subr.bf16.mxu1 %v11943_v0  ;;  %v11649_v42 = vld [vmem:[%s14636_s9 + $0x8] sm:$0xff]  }
0x5298   :  { %v7285_v61 = vpop.f32.mrf.mxu1 }
0x5299   :  { %11874 = vpow2.f32 %v9639_v59  ;;  %v11650_v59 = vld [vmem:[%s14636_s9] sm:$0xff]  }
0x529a   :  { %v11074_v2 = vpop.f32.mrf.mxu1  ;;  %11876 = vtanh.f32 %v7283_v20  ;;  %11090 = vmatpush3.bf16.msra.mxu1 %v11635_v6  ;;  %v11648_v20 = vld [vmem:[%s14636_s9 + $0x10] sm:$0xff]  }
0x529b   :  { %11091 = vmatprep.subr.bf16.mxu1 %v11943_v0 }
0x529e   :  { %11092 = vmatpush3.bf16.msra.mxu1 %v11636_v11 }
0x529f   :  { %11093 = vmatprep.subr.bf16.mxu1 %v11943_v0 }
0x52a2   :  { %11094 = vmatpush3.bf16.msra.mxu1 %v11637_v62 }
0x52a3   :  { %11095 = vmatprep.subr.bf16.mxu1 %v11943_v0 }
0x52a6   :  { %v11875_v63 = vpop.eup %11874  ;;  %11096 = vmatpush3.bf16.msra.mxu1 %v11638_v27  ;;  %v14119_v27 = vld [vmem:[%s14643_s1] sm:$0xff] }
0x52a7   :  { %v7292_v36 = vadd.f32 1.0, %v11875_v63  ;;  %v11877_v38 = vpop.eup %11876  ;;  %11125 = vmatprep.subr.bf16.mxu1 %v11943_v0 }
0x52a9   :  { %11878 = vrcp.f32 %v7292_v36  ;;  %11098 = vmatmul.mubr.msk.bf16.vlgmr.msra.gmra.mxu1 %vm102_vm1, %v7421_v50 }
0x52aa   :  { %11129 = vmatprep.mubr.msk.bf16.mxu1 %vm11944_vm0, %v11943_v0 }
0x52b6   :  { %v11879_v4 = vpop.eup %11878 }
0x52b7   :  { %v7295_v5 = vsel %vm12108_vm7, %v11877_v38, %v11879_v4 }
0x52b8   :  { %7298 = vrot.lane.b32.xlu1 %v7295_v5, %s11945_s18  ;;  %v7296_v12 = vmul.f32 %v7295_v5, %v13806_v55  ;;  %v11641_v55 = vld [vmem:[%s14646_s13 + $0x8] sm:$0xff]  }
0x52b9   :  { %11080 = vmatpush3.bf16.msra.mxu0 %v11641_v55 }
0x52ba   :  { %11081 = vmatprep.subr.bf16.mxu0 %v11943_v0 }
0x52bd   :  { %11082 = vmatpush3.bf16.msra.mxu0 %v11642_v26 }
0x52be   :  { %11101 = vmatprep.subr.bf16.mxu0 %v11943_v0 }
0x532a   :  { %v7299_v52 = vpop.permute.xlu1 %7298 }
0x532b   :  { %v7301_v10 = vmul.f32 %v7299_v52, %v7295_v5 }
0x532d   :  { %7303 = vrot.lane.b32.xlu0 %v7301_v10, %s11946_s19 }
0x5369   :  { %v7489_v9 = vpop.f32.mrf.mxu1 }
0x536a   :  { %v7495_v48 = vmax.f32 %v7489_v9, 0.0 }
0x536b   :  { %v11099_v39 = vpop.f32.mrf.mxu1 }
0x536c   :  { %v7500_v53 = vpack.c.bf16 %v7495_v48, %v7495_v48 }
0x536d   :  { %v7492_v23 = vpop.f32.mrf.mxu1 }
0x536f   :  { %v11100_v24 = vpop.f32.mrf.mxu1 }
0x539f   :  { %v7304_v14 = vpop.permute.xlu0 %7303 }
0x53a0   :  { %v14044_v18 = vadd.f32 %v7304_v14, %v7296_v12 }
0x53a2   :  { %11880 = vtanh.f32 %v14044_v18 }
0x53af   :  { %v11881_v19 = vpop.eup %11880 }
0x53b0   :  { %7309 = vrot.lane.b32.xlu1 %v11881_v19, %s11945_s18 }
0x53b4   :  { %7557 = vrot.lane.b32.xlu1 %v13906_v8, %s11949_s17  ;;  %v11643_v8 = vld [vmem:[%s14634_s8 + $0x8] sm:$0xff]  }
0x5422   :  { %v7310_v33 = vpop.permute.xlu1 %7309 }
0x5423   :  { %v14066_v40 = vmul.f32 %v7310_v33, %v7295_v5 }
0x5425   :  { %7314 = vrot.lane.b32.xlu0 %v14066_v40, %s11946_s19 }
0x5426   :  { %v7558_v52 = vpop.permute.xlu1 %7557 }
0x5497   :  { %v7315_v43 = vpop.permute.xlu0 %7314 }
0x5498   :  { %v7317_v44 = vsel %vm164_vm2, %v7315_v43, %v14004_v47 }
0x5499   :  { %v7326_v45 = vpack.c.bf16 %v7317_v44, %v7317_v44 }
0x549b   :  { %11084 = vmatmul.mubr.msk.bf16.vlgmr.msra.gmra.mxu0 %vm210_vm3, %v7326_v45  ;;  %v11652_v45 = vld [vmem:[%s14638_s5] sm:$0xff]  }
0x549c   :  { %11102 = vmatpush3.bf16.msra.mxu0 %v11643_v8  ;;  %11105 = vmatprep.mubr.msk.bf16.mxu0 %vm11944_vm0, %v11943_v0  ;;  %v11651_v8 = vld [vmem:[%s14638_s5 + $0x8] sm:$0xff]  }
0x549d   :  { %11103 = vmatprep.subr.bf16.mxu0 %v11943_v0  ;;  %11126 = vmatpush3.bf16.msra.mxu1 %v11651_v8 }
0x549e   :  { %11127 = vmatprep.subr.bf16.mxu1 %v11943_v0 }
0x54a0   :  { %11104 = vmatpush3.bf16.msra.mxu0 %v11644_v28 }
0x54a1   :  { %11109 = vmatprep.subr.bf16.mxu0 %v11943_v0  ;;  %11128 = vmatpush3.bf16.msra.mxu1 %v11652_v45 }
0x54a2   :  { %11133 = vmatprep.subr.bf16.mxu1 %v11943_v0 }
0x54a3   :  { %11106 = vmatmul.mubr.msk.bf16.vlgmr.msra.gmra.mxu0 %vm164_vm2, %v7500_v53 }
0x54a4   :  { %11110 = vmatpush3.bf16.msra.mxu0 %v11645_v56  ;;  %11121 = vmatprep.mubr.msk.bf16.mxu0 %vm11944_vm0, %v11943_v0 }
0x54a5   :  { %11111 = vmatprep.subr.bf16.mxu0 %v11943_v0 }
0x54a8   :  { %11112 = vmatpush3.bf16.msra.mxu0 %v11646_v31  ;;  %v11653_v31 = vld [vmem:[%s14639_s4] sm:$0xff]  }
0x54a9   :  { %11113 = vmatprep.subr.bf16.mxu0 %v11943_v0 }
0x54ac   :  { %11114 = vmatpush3.bf16.msra.mxu0 %v11647_v17 }
0x54ad   :  { %11115 = vmatprep.subr.bf16.mxu0 %v11943_v0 }
0x54b0   :  { %11116 = vmatpush3.bf16.msra.mxu0 %v11648_v20 }
0x54b1   :  { %11117 = vmatprep.subr.bf16.mxu0 %v11943_v0 }
0x54b4   :  { %11118 = vmatpush3.bf16.msra.mxu0 %v11649_v42  ;;  %v11654_v42 = vld [vmem:[%s14640_s6 + $0x38] sm:$0xff]  }
0x54b5   :  { %11119 = vmatprep.subr.bf16.mxu0 %v11943_v0 }
0x54b8   :  { %11120 = vmatpush3.bf16.msra.mxu0 %v11650_v59 }
0x54b9   :  { %11159 = vmatprep.subr.mxu0 %v11943_v0 }
0x555b   :  { %v14110_v61 = vpop.f32.mrf.mxu0 }
0x555d   :  { %v11085_v2 = vpop.f32.mrf.mxu0 }
0x555e   :  { %v11655_v2 = vld [vmem:[%s14640_s6 + $0x30] sm:$0xff]  }
0x555f   :  { %v7398_v63 = vpop.f32.mrf.mxu0 }
0x5560   :  { %v11656_v63 = vld [vmem:[%s14640_s6 + $0x28] sm:$0xff]  }
0x5561   :  { %v11086_v36 = vpop.f32.mrf.mxu0 }
0x5562   :  { %v11657_v36 = vld [vmem:[%s14640_s6 + $0x20] sm:$0xff]  }
0x5563   :  { %v7550_v38 = vpop.f32.mrf.mxu0 }
0x5564   :  { %v7556_v4 = vmax.f32 %v7550_v38, 0.0  ;;  %v11658_v38 = vld [vmem:[%s14640_s6 + $0x18] sm:$0xff]  }
0x5565   :  { %v11107_v5 = vpop.f32.mrf.mxu0 }
0x5566   :  { %v7560_v10 = vsel %vm164_vm2, %v7556_v4, %v14004_v47  ;;  %v14128_v47 = vld [vmem:[%s14637_s10] ss:$0 sm:$0xff]  ;;  %v11659_v4 = vld [vmem:[%s14640_s6 + $0x10] sm:$0xff]   ;;  %v11660_v5 = vld [vmem:[%s14640_s6 + $0x8] sm:$0xff]  }
0x5567   :  { %v7561_v60 = vsel %vm210_vm3, %v7560_v10, %v7558_v52  ;;  %v7553_v6 = vpop.f32.mrf.mxu0  ;;  %v11661_v52 = vld [vmem:[%s14640_s6] sm:$0xff]  }
0x5568   :  { %v7575_v11 = vpack.c.bf16 %v7561_v60, %v7561_v60 }
0x5569   :  { %v11108_v62 = vpop.f32.mrf.mxu0 }
0x556a   :  { %11122 = vmatmul.mubr.msk.bf16.vlgmr.msra.gmra.mxu0 %vm268_vm4, %v7575_v11  ;;  %v14206_v62 = vld [vmem:[%s14641_s2] sm:$0x3] }
0x556b   :  { %11160 = vmatpush3.msra.mxu0 %v14119_v27  ;;  %11161 = vmatprep.mubr.msk.f32.mxu0 %vm11944_vm0, %v11943_v0 }
0x556c   :  { %11164 = vmatprep.subr.mxu0 %v11943_v0 }
0x562a   :  { %v7655_v32 = vpop.f32.mrf.mxu0 }
0x562b   :  { %v7656_v50 = vadd.f32 %v14128_v47, %v7655_v32 }
0x562c   :  { %v11123_v12 = vpop.f32.mrf.mxu0 }
0x562d   :  { %v9665_v14 = vmul.f32 -1.442695, %v7656_v50 }
0x562e   :  { %v7658_v7 = vpop.f32.mrf.mxu0 }
0x562f   :  { %11882 = vpow2.f32 %v9665_v14 }
0x5630   :  { %v11124_v15 = vpop.f32.mrf.mxu0  ;;  %11884 = vtanh.f32 %v7656_v50 }
0x563c   :  { %v11883_v55 = vpop.eup %11882 }
0x563d   :  { %v7665_v19 = vadd.f32 1.0, %v11883_v55  ;;  %v11885_v26 = vpop.eup %11884 }
0x563f   :  { %11886 = vrcp.f32 %v7665_v19 }
0x564c   :  { %v11887_v9 = vpop.eup %11886 }
0x564d   :  { %v7668_v39 = vsel %vm12108_vm7, %v11885_v26, %v11887_v9  ;;  %v14214_v9 = vld [vmem:[%s14642_s3] sm:$0x3] }
0x564e   :  { %7671 = vrot.lane.b32.xlu0 %v7668_v39, %s11945_s18  ;;  %v7669_v33 = vmul.f32 %v7668_v39, %v13888_v25  ;;  %v14150_v25 = vadd.f32 %v13963_v46, %v13902_v22 }
0x56c0   :  { %v7672_v23 = vpop.permute.xlu0 %7671 }
0x56c1   :  { %v7674_v24 = vmul.f32 %v7672_v23, %v7668_v39 }
0x56c3   :  { %7676 = vrot.lane.b32.xlu1 %v7674_v24, %s11946_s19 }
0x5735   :  { %v7677_v43 = vpop.permute.xlu1 %7676 }
0x5736   :  { %v14136_v44 = vadd.f32 %v7677_v43, %v7669_v33 }
0x5738   :  { %11888 = vtanh.f32 %v14136_v44 }
0x5745   :  { %v11889_v48 = vpop.eup %11888 }
0x5746   :  { %7682 = vrot.lane.b32.xlu0 %v11889_v48, %s11945_s18 }
0x574a   :  { %7687 = vrot.lane.b32.xlu0 %v14150_v25, %s11950_s30 }
0x57b8   :  { %v7683_v28 = vpop.permute.xlu0 %7682 }
0x57b9   :  { %v14154_v53 = vmul.f32 %v7683_v28, %v7668_v39 }
0x57bb   :  { %v7695_v56 = vpack.c.bf16 %v14154_v53, %v14154_v53 }
0x57bc   :  { %v7688_v20 = vpop.permute.xlu0 %7687 }
0x57bd   :  { %7697 = vrot.lane.b32.xlu1 %v7695_v56, %s11946_s19  ;;  %v7690_v22 = vsel %vm595_vm9, %v13963_v46, %v7688_v20 }
0x57be   :  { %v7756_v59 = vpack.c.bf16 %v7690_v22, %v7690_v22 }
0x582f   :  { %v7698_v17 = vpop.permute.xlu1 %7697 }
0x5830   :  { %11130 = vmatmul.mubr.msk.bf16.vlgmr.msra.gmra.mxu1 %vm164_vm2, %v7698_v17 }
0x5831   :  { %11134 = vmatpush3.bf16.msra.mxu1 %v11653_v31  ;;  %11135 = vmatprep.mubr.msk.bf16.mxu1 %vm11944_vm0, %v11943_v0 }
0x5832   :  { %11139 = vmatprep.subr.bf16.mxu1 %v11943_v0 }
0x5838   :  { %11136 = vmatmul.mubr.msk.bf16.vlgmr.msra.gmra.mxu1 %vm409_vm11, %v7756_v59 }
0x5839   :  { %11140 = vmatpush3.bf16.msra.mxu1 %v11654_v42  ;;  %11155 = vmatprep.mubr.msk.bf16.mxu1 %vm11944_vm0, %v11943_v0 }
0x583a   :  { %11141 = vmatprep.subr.bf16.mxu1 %v11943_v0 }
0x583d   :  { %11142 = vmatpush3.bf16.msra.mxu1 %v11655_v2 }
0x583e   :  { %11143 = vmatprep.subr.bf16.mxu1 %v11943_v0 }
0x5841   :  { %11144 = vmatpush3.bf16.msra.mxu1 %v11656_v63  ;;  %v11662_v63 = vld [vmem:[%s14644_s11 + $0x28] sm:$0xff]  }
0x5842   :  { %11145 = vmatprep.subr.bf16.mxu1 %v11943_v0 }
0x5845   :  { %11146 = vmatpush3.bf16.msra.mxu1 %v11657_v36  ;;  %v11663_v36 = vld [vmem:[%s14644_s11 + $0x20] sm:$0xff]  }
0x5846   :  { %11147 = vmatprep.subr.bf16.mxu1 %v11943_v0 }
0x5849   :  { %11148 = vmatpush3.bf16.msra.mxu1 %v11658_v38  ;;  %v11664_v38 = vld [vmem:[%s14644_s11 + $0x18] sm:$0xff]  }
0x584a   :  { %11149 = vmatprep.subr.bf16.mxu1 %v11943_v0 }
0x584d   :  { %11150 = vmatpush3.bf16.msra.mxu1 %v11659_v4  ;;  %v11665_v4 = vld [vmem:[%s14644_s11 + $0x10] sm:$0xff]  }
0x584e   :  { %11151 = vmatprep.subr.bf16.mxu1 %v11943_v0 }
0x5851   :  { %11152 = vmatpush3.bf16.msra.mxu1 %v11660_v5  ;;  %v11666_v5 = vld [vmem:[%s14644_s11 + $0x8] sm:$0xff]  }
0x5852   :  { %11153 = vmatprep.subr.bf16.mxu1 %v11943_v0 }
0x5855   :  { %11154 = vmatpush3.bf16.msra.mxu1 %v11661_v52  ;;  %v11667_v52 = vld [vmem:[%s14644_s11] sm:$0xff]  }
0x5856   :  { %11185 = vmatprep.subr.bf16.mxu1 %v11943_v0 }
0x58f0   :  { %v7748_v10 = vpop.f32.mrf.mxu1 }
0x58f1   :  { %v7749_v32 = vadd.f32 %v14206_v62, %v7748_v10 }
0x58f2   :  { %v11131_v60 = vpop.f32.mrf.mxu1 }
0x58f4   :  { %v7751_v6 = vpop.f32.mrf.mxu1 }
0x58f6   :  { %v11132_v11 = vpop.f32.mrf.mxu1 }
0x58f8   :  { %v7800_v50 = vpop.f32.mrf.mxu1 }
0x58f9   :  { %v7806_v12 = vadd.f32 %v7800_v50, %v7749_v32 }
0x58fa   :  { %v11137_v14 = vpop.f32.mrf.mxu1 }
0x58fb   :  { %11890 = vtanh.f32 %v7806_v12 }
0x58fc   :  { %v7803_v7 = vpop.f32.mrf.mxu1 }
0x58fe   :  { %v11138_v15 = vpop.f32.mrf.mxu1 }
0x5908   :  { %v11891_v55 = vpop.eup %11890 }
0x5909   :  { %v7824_v19 = vpack.c.bf16 %v11891_v55, %v11891_v55 }
0x590b   :  { %11156 = vmatmul.mubr.bf16.vlgmr.msra.gmra.mxu1 %v7824_v19 }
0x590c   :  { %11193 = vmatprep.mubr.msk.bf16.mxu1 %vm11944_vm0, %v11943_v0 }
0x59cb   :  { %v7907_v26 = vpop.f32.mrf.mxu1 }
0x59cc   :  { %v7908_v39 = vadd.f32 %v14214_v9, %v7907_v26 }
0x59cd   :  { %v11157_v23 = vpop.f32.mrf.mxu1 }
0x59ce   :  { %v7913_v24 = vsel %vm560_vm8, %v7908_v39, -inf  ;;  %v14278_v23 = vld [vmem:[%s14645_s12] ss:$0 sm:$0xff] }
0x59cf   :  { %7914 = vmax.xlane.f32.xlu1 %v7913_v24  ;;  %v7910_v33 = vpop.f32.mrf.mxu1 }
0x59d1   :  { %v11158_v43 = vpop.f32.mrf.mxu1 }
0x59e0   :  { %8103 = vrot.lane.b32.xlu1 %v14066_v40, %s11949_s17  ;;  %v14230_v40 = vld [vmem:[%s14643_s1 + $0x8] sm:$0xff] }
0x5a58   :  { %v7915_v8 = vpop.xlane.xlu1 %7914 }
0x5a59   :  { %v7916_v45 = vsub.f32 %v7908_v39, %v7915_v8 }
0x5a5b   :  { %v7917_v48 = vmul.f32 1.442695, %v7916_v45 }
0x5a5c   :  { %v8104_v55 = vpop.permute.xlu1 %8103 }
0x5a5d   :  { %11892 = vpow2.f32 %v7917_v48 }
0x5a6a   :  { %v11893_v28 = vpop.eup %11892 }
0x5a6b   :  { %v7919_v56 = vsel %vm560_vm8, %v11893_v28, 0.0 }
0x5a6c   :  { %7920 = vadd.xlane.f32.xlu0 %v7919_v56 }
0x5af5   :  { %v7921_v31 = vpop.xlane.xlu0 %7920 }
0x5af6   :  { %11894 = vrcp.f32 %v7921_v31 }
0x5b03   :  { %v11895_v17 = vpop.eup %11894 }
0x5b04   :  { %v14221_v20 = vmul.f32 %v11895_v17, %v11893_v28 }
0x5b06   :  { %v7931_v22 = vrot.slane %v14221_v20, %v12198_v35 }
0x5b08   :  { %v7939_v42 = vrot.slane %v7931_v22, %v12198_v35  ;;  %v7932_v59 = vcombine.high %v7931_v22, %v7931_v22 }
0x5b0a   :  { %11162 = vmatmul.mubr.msk.f32.vlgmr.msra.gmra.mxu0 %vm595_vm9, %v7939_v42  ;;  %v7946_v2 = vrot.slane %v7932_v59, %v12198_v35 }
0x5b0b   :  { %11165 = vmatpush3.msra.mxu0 %v14230_v40  ;;  %11166 = vmatprep.mubr.msk.f32.mxu0 %vm11944_vm0, %v11943_v0 }
0x5b0c   :  { %11169 = vmatprep.subr.bf16.mxu0 %v11943_v0 }
0x5b0e   :  { %11167 = vmatmul.mubr.msk.f32.vlgmr.msra.gmra.mxu0 %vm595_vm9, %v7946_v2  ;;  %v11668_v2 = vld [vmem:[%s14633_s7 + $0x20] sm:$0xff]  }
0x5b0f   :  { %11181 = vmatprep.mubr.msk.bf16.mxu0 %vm11944_vm0, %v11943_v0  ;;  %11170 = vmatpush3.bf16.msra.mxu0 %v11662_v63  ;;  %v11669_v63 = vld [vmem:[%s14633_s7 + $0x18] sm:$0xff]  }
0x5b10   :  { %11171 = vmatprep.subr.bf16.mxu0 %v11943_v0 }
0x5b13   :  { %11172 = vmatpush3.bf16.msra.mxu0 %v11663_v36  ;;  %v11670_v36 = vld [vmem:[%s14633_s7 + $0x10] sm:$0xff]  }
0x5b14   :  { %11173 = vmatprep.subr.bf16.mxu0 %v11943_v0 }
0x5b17   :  { %11174 = vmatpush3.bf16.msra.mxu0 %v11664_v38  ;;  %v11671_v38 = vld [vmem:[%s14633_s7 + $0x8] sm:$0xff]  }
0x5b18   :  { %11175 = vmatprep.subr.bf16.mxu0 %v11943_v0 }
0x5b1b   :  { %11176 = vmatpush3.bf16.msra.mxu0 %v11665_v4  ;;  %v11672_v4 = vld [vmem:[%s14633_s7] sm:$0xff]  }
0x5b1c   :  { %11177 = vmatprep.subr.bf16.mxu0 %v11943_v0 }
0x5b1f   :  { %11178 = vmatpush3.bf16.msra.mxu0 %v11666_v5  ;;  %v9697_v5 = vld [vmem:[%s14635_s0 + $0x12] sm:$0x3] }
0x5b20   :  { %11179 = vmatprep.subr.bf16.mxu0 %v11943_v0 }
0x5b23   :  { %11180 = vmatpush3.bf16.msra.mxu0 %v11667_v52  ;;  %v8340_v52 = vpack.c.bf16 %v9697_v5, %v9697_v5 }
0x5b24   :  { %11197 = vmatprep.subr.bf16.mxu0 %v11943_v0 }
0x5bca   :  { %v8015_v10 = vpop.f32.mrf.mxu0 }
0x5bcc   :  { %v11163_v60 = vpop.f32.mrf.mxu0 }
0x5bce   :  { %v8087_v6 = vpop.f32.mrf.mxu0 }
0x5bcf   :  { %v8098_v11 = vrot.slane %v8087_v6, 7 }
0x5bd0   :  { %v11168_v32 = vpop.f32.mrf.mxu0 }
0x5bd1   :  { %v8099_v50 = vsel %vm748_vm10, %v8098_v11, %v8015_v10  ;;  %v11673_v11 = vld [vmem:[%s14646_s13 + $0x18] sm:$0xff]   ;;  %v11674_v32 = vld [vmem:[%s14646_s13 + $0x10] sm:$0xff]  }
0x5bd2   :  { %v11356_v12 = vpack.i.bf16 %v8099_v50, %v14154_v53  ;;  %11186 = vmatpush3.bf16.msra.mxu1 %v11673_v11 }
0x5bd3   :  { %11187 = vmatprep.subr.bf16.mxu1 %v11943_v0 }
0x5bd4   :  { %11357 = vrot.lane.b32.xlu0 %v11356_v12, %s11946_s19  ;;  %v11676_v12 = vld [vmem:[%s14646_s13] sm:$0xff]  }
0x5bd6   :  { %11188 = vmatpush3.bf16.msra.mxu1 %v11674_v32 }
0x5bd7   :  { %11189 = vmatprep.subr.bf16.mxu1 %v11943_v0 }
0x5c46   :  { %v11358_v14 = vpop.permute.xlu0 %11357 }
0x5c47   :  { %v14267_v7 = vunpack.i.h.bf16 %v11358_v14  ;;  %v11359_v15 = vunpack.i.l.bf16 %v11358_v14 }
0x5c49   :  { %v8106_v19 = vsel %vm164_vm2, %v11359_v15, %v14267_v7 }
0x5c4a   :  { %v8107_v26 = vsel %vm210_vm3, %v8106_v19, %v8104_v55 }
0x5c4b   :  { %v8121_v39 = vpack.c.bf16 %v8107_v26, %v8107_v26 }
0x5c4d   :  { %11182 = vmatmul.mubr.msk.bf16.vlgmr.msra.gmra.mxu0 %vm268_vm4, %v8121_v39 }
0x5c4e   :  { %11207 = vmatprep.mubr.msk.bf16.mxu0 %vm11944_vm0, %v11943_v0  ;;  %11198 = vmatpush3.bf16.msra.mxu0 %v11668_v2 }
0x5c4f   :  { %11199 = vmatprep.subr.bf16.mxu0 %v11943_v0 }
0x5c52   :  { %11200 = vmatpush3.bf16.msra.mxu0 %v11669_v63 }
0x5c53   :  { %11201 = vmatprep.subr.bf16.mxu0 %v11943_v0 }
0x5c56   :  { %11202 = vmatpush3.bf16.msra.mxu0 %v11670_v36 }
0x5c57   :  { %11203 = vmatprep.subr.bf16.mxu0 %v11943_v0 }
0x5c5a   :  { %11204 = vmatpush3.bf16.msra.mxu0 %v11671_v38 }
0x5c5b   :  { %11205 = vmatprep.subr.bf16.mxu0 %v11943_v0 }
0x5c5e   :  { %11206 = vmatpush3.bf16.msra.mxu0 %v11672_v4 }
0x5c5f   :  { %11235 = vmatprep.subr.bf16.mxu0 %v11943_v0 }
0x5c61   :  { %11208 = vmatmul.mubr.msk.bf16.vlgmr.msra.gmra.mxu0 %vm102_vm1, %v8340_v52 }
0x5c62   :  { %11239 = vmatprep.mubr.msk.bf16.mxu0 %vm11944_vm0, %v11943_v0 }
0x5d0d   :  { %v8201_v24 = vpop.f32.mrf.mxu0 }
0x5d0e   :  { %v8202_v33 = vadd.f32 %v14278_v23, %v8201_v24 }
0x5d0f   :  { %v11183_v43 = vpop.f32.mrf.mxu0 }
0x5d10   :  { %v9689_v8 = vmul.f32 -1.442695, %v8202_v33 }
0x5d11   :  { %v8204_v45 = vpop.f32.mrf.mxu0 }
0x5d12   :  { %11896 = vpow2.f32 %v9689_v8  ;;  %v11678_v45 = vld [vmem:[%s14634_s8] sm:$0xff]  }
0x5d13   :  { %v11184_v48 = vpop.f32.mrf.mxu0  ;;  %11898 = vtanh.f32 %v8202_v33 }
0x5d1f   :  { %v11897_v28 = vpop.eup %11896 }
0x5d20   :  { %v8211_v56 = vadd.f32 1.0, %v11897_v28  ;;  %v11899_v31 = vpop.eup %11898  ;;  %v11679_v28 = vld [vmem:[%s14636_s9 + $0x28] sm:$0xff]  }
0x5d21   :  { %v8408_v14 = vpop.f32.mrf.mxu0 }
0x5d22   :  { %11900 = vrcp.f32 %v8211_v56  ;;  %v8414_v8 = vmax.f32 %v8408_v14, 0.0  ;;  %v11680_v56 = vld [vmem:[%s14636_s9 + $0x20] sm:$0xff]  }
0x5d23   :  { %v11209_v15 = vpop.f32.mrf.mxu0 }
0x5d24   :  { %v8419_v48 = vpack.c.bf16 %v8414_v8, %v8414_v8 }
0x5d25   :  { %v8411_v55 = vpop.f32.mrf.mxu0 }
0x5d27   :  { %v11210_v19 = vpop.f32.mrf.mxu0 }
0x5d2f   :  { %v11901_v17 = vpop.eup %11900 }
0x5d30   :  { %v8214_v22 = vsel %vm12108_vm7, %v11899_v31, %v11901_v17  ;;  %v11681_v31 = vld [vmem:[%s14636_s9 + $0x18] sm:$0xff]   ;;  %v11682_v17 = vld [vmem:[%s14636_s9 + $0x10] sm:$0xff]  }
0x5d31   :  { %8217 = vrot.lane.b32.xlu1 %v8214_v22, %s11945_s18  ;;  %v8215_v10 = vmul.f32 %v8214_v22, %v14044_v18  ;;  %v11675_v18 = vld [vmem:[%s14646_s13 + $0x8] sm:$0xff]  }
0x5d32   :  { %11190 = vmatpush3.bf16.msra.mxu1 %v11675_v18 }
0x5d33   :  { %11191 = vmatprep.subr.bf16.mxu1 %v11943_v0 }
0x5d36   :  { %11192 = vmatpush3.bf16.msra.mxu1 %v11676_v12 }
0x5d37   :  { %11211 = vmatprep.subr.bf16.mxu1 %v11943_v0 }
0x5da3   :  { %v8218_v42 = vpop.permute.xlu1 %8217 }
0x5da4   :  { %v8220_v59 = vmul.f32 %v8218_v42, %v8214_v22  ;;  %v11684_v42 = vld [vmem:[%s14636_s9] sm:$0xff]  }
0x5da6   :  { %8222 = vrot.lane.b32.xlu0 %v8220_v59, %s11946_s19 }
0x5e18   :  { %v8223_v60 = vpop.permute.xlu0 %8222 }
0x5e19   :  { %v14312_v6 = vadd.f32 %v8223_v60, %v8215_v10 }
0x5e1b   :  { %11902 = vtanh.f32 %v14312_v6 }
0x5e28   :  { %v11903_v50 = vpop.eup %11902 }
0x5e29   :  { %8228 = vrot.lane.b32.xlu1 %v11903_v50, %s11945_s18 }
0x5e2d   :  { %8476 = vrot.lane.b32.xlu1 %v14154_v53, %s11949_s17  ;;  %v11677_v53 = vld [vmem:[%s14634_s8 + $0x8] sm:$0xff]  }
0x5e9b   :  { %v8229_v26 = vpop.permute.xlu1 %8228 }
0x5e9c   :  { %v14334_v39 = vmul.f32 %v8229_v26, %v8214_v22  ;;  %v11683_v22 = vld [vmem:[%s14636_s9 + $0x8] sm:$0xff]  }
0x5e9e   :  { %8233 = vrot.lane.b32.xlu0 %v14334_v39, %s11946_s19 }
0x5e9f   :  { %v8477_v52 = vpop.permute.xlu1 %8476 }
0x5f10   :  { %v8234_v24 = vpop.permute.xlu0 %8233 }
0x5f11   :  { %v8236_v33 = vsel %vm164_vm2, %v8234_v24, %v14267_v7 }
0x5f12   :  { %v8245_v43 = vpack.c.bf16 %v8236_v33, %v8236_v33 }
0x5f14   :  { %11194 = vmatmul.mubr.msk.bf16.vlgmr.msra.gmra.mxu1 %vm210_vm3, %v8245_v43 }
0x5f15   :  { %11212 = vmatpush3.bf16.msra.mxu1 %v11677_v53  ;;  %11215 = vmatprep.mubr.msk.bf16.mxu1 %vm11944_vm0, %v11943_v0 }
0x5f16   :  { %11213 = vmatprep.subr.bf16.mxu1 %v11943_v0 }
0x5f19   :  { %11214 = vmatpush3.bf16.msra.mxu1 %v11678_v45 }
0x5f1a   :  { %11219 = vmatprep.subr.bf16.mxu1 %v11943_v0 }
0x5f1c   :  { %11216 = vmatmul.mubr.msk.bf16.vlgmr.msra.gmra.mxu1 %vm164_vm2, %v8419_v48  ;;  %v11685_v48 = vld [vmem:[%s14638_s5 + $0x8] sm:$0xff]  }
0x5f1d   :  { %11220 = vmatpush3.bf16.msra.mxu1 %v11679_v28  ;;  %11231 = vmatprep.mubr.msk.bf16.mxu1 %vm11944_vm0, %v11943_v0  ;;  %v11686_v28 = vld [vmem:[%s14638_s5] sm:$0xff]  }
0x5f1e   :  { %11221 = vmatprep.subr.bf16.mxu1 %v11943_v0  ;;  %11236 = vmatpush3.bf16.msra.mxu0 %v11685_v48 }
0x5f1f   :  { %11237 = vmatprep.subr.bf16.mxu0 %v11943_v0 }
0x5f21   :  { %11222 = vmatpush3.bf16.msra.mxu1 %v11680_v56 }
0x5f22   :  { %11223 = vmatprep.subr.bf16.mxu1 %v11943_v0  ;;  %11238 = vmatpush3.bf16.msra.mxu0 %v11686_v28 }
0x5f23   :  { %11243 = vmatprep.subr.bf16.mxu0 %v11943_v0 }
0x5f25   :  { %11224 = vmatpush3.bf16.msra.mxu1 %v11681_v31 }
0x5f26   :  { %11225 = vmatprep.subr.bf16.mxu1 %v11943_v0 }
0x5f29   :  { %11226 = vmatpush3.bf16.msra.mxu1 %v11682_v17 }
0x5f2a   :  { %11227 = vmatprep.subr.bf16.mxu1 %v11943_v0 }
0x5f2d   :  { %11228 = vmatpush3.bf16.msra.mxu1 %v11683_v22 }
0x5f2e   :  { %11229 = vmatprep.subr.bf16.mxu1 %v11943_v0 }
0x5f31   :  { %11230 = vmatpush3.bf16.msra.mxu1 %v11684_v42  ;;  %v11687_v42 = vld [vmem:[%s14639_s4] sm:$0xff]  }
0x5f32   :  { %11269 = vmatprep.subr.mxu1 %v11943_v0 }
0x5fd4   :  { %v14378_v59 = vpop.f32.mrf.mxu1 }
0x5fd6   :  { %v11195_v2 = vpop.f32.mrf.mxu1 }
0x5fd8   :  { %v8317_v63 = vpop.f32.mrf.mxu1 }
0x5fda   :  { %v11196_v36 = vpop.f32.mrf.mxu1 }
0x5fdb   :  { %v11688_v36 = vld [vmem:[%s14640_s6 + $0x38] sm:$0xff]  }
0x5fdc   :  { %v8469_v38 = vpop.f32.mrf.mxu1 }
0x5fdd   :  { %v8475_v4 = vmax.f32 %v8469_v38, 0.0 }
0x5fde   :  { %v11217_v5 = vpop.f32.mrf.mxu1 }
0x5fdf   :  { %v8479_v10 = vsel %vm164_vm2, %v8475_v4, %v14267_v7  ;;  %v11689_v4 = vld [vmem:[%s14640_s6 + $0x30] sm:$0xff]   ;;  %v11690_v5 = vld [vmem:[%s14640_s6 + $0x28] sm:$0xff]  }
0x5fe0   :  { %v8480_v60 = vsel %vm210_vm3, %v8479_v10, %v8477_v52  ;;  %v8472_v11 = vpop.f32.mrf.mxu1  ;;  %v11691_v52 = vld [vmem:[%s14640_s6 + $0x20] sm:$0xff]   ;;  %v11692_v10 = vld [vmem:[%s14640_s6 + $0x18] sm:$0xff]  }
0x5fe1   :  { %v8494_v32 = vpack.c.bf16 %v8480_v60, %v8480_v60  ;;  %v11693_v60 = vld [vmem:[%s14640_s6 + $0x10] sm:$0xff]   ;;  %v11694_v11 = vld [vmem:[%s14640_s6 + $0x8] sm:$0xff]  }
0x5fe2   :  { %v11218_v18 = vpop.f32.mrf.mxu1 }
0x5fe3   :  { %11232 = vmatmul.mubr.msk.bf16.vlgmr.msra.gmra.mxu1 %vm268_vm4, %v8494_v32  ;;  %v11695_v32 = vld [vmem:[%s14640_s6] sm:$0xff]  }
0x5fe4   :  { %11270 = vmatpush3.msra.mxu1 %v14119_v27  ;;  %11271 = vmatprep.mubr.msk.f32.mxu1 %vm11944_vm0, %v11943_v0 }
0x5fe5   :  { %11274 = vmatprep.subr.mxu1 %v11943_v0 }
0x60a3   :  { %v8574_v50 = vpop.f32.mrf.mxu1 }
0x60a4   :  { %v8575_v12 = vadd.f32 %v14128_v47, %v8574_v50 }
0x60a5   :  { %v11233_v14 = vpop.f32.mrf.mxu1 }
0x60a6   :  { %v9715_v15 = vmul.f32 -1.442695, %v8575_v12 }
0x60a7   :  { %v8577_v7 = vpop.f32.mrf.mxu1 }
0x60a8   :  { %11904 = vpow2.f32 %v9715_v15 }
0x60a9   :  { %v11234_v55 = vpop.f32.mrf.mxu1  ;;  %11906 = vtanh.f32 %v8575_v12 }
0x60b5   :  { %v11905_v19 = vpop.eup %11904 }
0x60b6   :  { %v8584_v26 = vadd.f32 1.0, %v11905_v19  ;;  %v11907_v24 = vpop.eup %11906 }
0x60b8   :  { %11908 = vrcp.f32 %v8584_v26 }
0x60c5   :  { %v11909_v33 = vpop.eup %11908 }
0x60c6   :  { %v8587_v27 = vsel %vm12108_vm7, %v11907_v24, %v11909_v33 }
0x60c7   :  { %8590 = vrot.lane.b32.xlu0 %v8587_v27, %s11945_s18  ;;  %v8588_v47 = vmul.f32 %v8587_v27, %v14136_v44  ;;  %v8091_v44 = vadd.f32 %v14221_v20, %v14150_v25 }
0x6139   :  { %v8591_v53 = vpop.permute.xlu0 %8590 }
0x613a   :  { %v8593_v43 = vmul.f32 %v8591_v53, %v8587_v27 }
0x613c   :  { %8595 = vrot.lane.b32.xlu1 %v8593_v43, %s11946_s19 }
0x61ae   :  { %v8596_v8 = vpop.permute.xlu1 %8595 }
0x61af   :  { %v8598_v45 = vadd.f32 %v8596_v8, %v8588_v47 }
0x61b1   :  { %11910 = vtanh.f32 %v8598_v45 }
0x61be   :  { %v11911_v56 = vpop.eup %11910 }
0x61bf   :  { %8601 = vrot.lane.b32.xlu0 %v11911_v56, %s11945_s18 }
0x61c3   :  { %8606 = vrot.lane.b32.xlu0 %v8091_v44, %s11950_s30 }
0x6231   :  { %v8602_v31 = vpop.permute.xlu0 %8601 }
0x6232   :  { %v14406_v17 = vmul.f32 %v8602_v31, %v8587_v27 }
0x6234   :  { %v8614_v22 = vpack.c.bf16 %v14406_v17, %v14406_v17 }
0x6235   :  { %v8607_v63 = vpop.permute.xlu0 %8606 }
0x6236   :  { %8616 = vrot.lane.b32.xlu1 %v8614_v22, %s11946_s19  ;;  %v8609_v25 = vsel %vm595_vm9, %v14221_v20, %v8607_v63 }
0x6237   :  { %v8675_v38 = vpack.c.bf16 %v8609_v25, %v8609_v25 }
0x62a8   :  { %v8617_v2 = vpop.permute.xlu1 %8616 }
0x62a9   :  { %11240 = vmatmul.mubr.msk.bf16.vlgmr.msra.gmra.mxu0 %vm164_vm2, %v8617_v2 }
0x62aa   :  { %11244 = vmatpush3.bf16.msra.mxu0 %v11687_v42  ;;  %11245 = vmatprep.mubr.msk.bf16.mxu0 %vm11944_vm0, %v11943_v0 }
0x62ab   :  { %11249 = vmatprep.subr.bf16.mxu0 %v11943_v0 }
0x62b1   :  { %11246 = vmatmul.mubr.msk.bf16.vlgmr.msra.gmra.mxu0 %vm409_vm11, %v8675_v38  ;;  %v11699_v38 = vld [vmem:[%s14644_s11 + $0x10] sm:$0xff]  }
0x62b2   :  { %11250 = vmatpush3.bf16.msra.mxu0 %v11688_v36  ;;  %11265 = vmatprep.mubr.msk.bf16.mxu0 %vm11944_vm0, %v11943_v0  ;;  %v11696_v36 = vld [vmem:[%s14644_s11 + $0x28] sm:$0xff]  }
0x62b3   :  { %11251 = vmatprep.subr.bf16.mxu0 %v11943_v0 }
0x62b6   :  { %11252 = vmatpush3.bf16.msra.mxu0 %v11689_v4  ;;  %v11700_v4 = vld [vmem:[%s14644_s11 + $0x8] sm:$0xff]  }
0x62b7   :  { %11253 = vmatprep.subr.bf16.mxu0 %v11943_v0 }
0x62ba   :  { %11254 = vmatpush3.bf16.msra.mxu0 %v11690_v5  ;;  %v11701_v5 = vld [vmem:[%s14644_s11] sm:$0xff]  }
0x62bb   :  { %11255 = vmatprep.subr.bf16.mxu0 %v11943_v0 }
0x62be   :  { %11256 = vmatpush3.bf16.msra.mxu0 %v11691_v52 }
0x62bf   :  { %11257 = vmatprep.subr.bf16.mxu0 %v11943_v0 }
0x62c2   :  { %11258 = vmatpush3.bf16.msra.mxu0 %v11692_v10 }
0x62c3   :  { %11259 = vmatprep.subr.bf16.mxu0 %v11943_v0 }
0x62c6   :  { %11260 = vmatpush3.bf16.msra.mxu0 %v11693_v60 }
0x62c7   :  { %11261 = vmatprep.subr.bf16.mxu0 %v11943_v0 }
0x62ca   :  { %11262 = vmatpush3.bf16.msra.mxu0 %v11694_v11 }
0x62cb   :  { %11263 = vmatprep.subr.bf16.mxu0 %v11943_v0 }
0x62ce   :  { %11264 = vmatpush3.bf16.msra.mxu0 %v11695_v32 }
0x62cf   :  { %11295 = vmatprep.subr.bf16.mxu0 %v11943_v0 }
0x6369   :  { %v8667_v18 = vpop.f32.mrf.mxu0 }
0x636a   :  { %v8668_v15 = vadd.f32 %v14206_v62, %v8667_v18 }
0x636b   :  { %v11241_v50 = vpop.f32.mrf.mxu0 }
0x636d   :  { %v8670_v12 = vpop.f32.mrf.mxu0 }
0x636f   :  { %v11242_v14 = vpop.f32.mrf.mxu0 }
0x6371   :  { %v8719_v7 = vpop.f32.mrf.mxu0 }
0x6372   :  { %v8725_v55 = vadd.f32 %v8719_v7, %v8668_v15 }
0x6373   :  { %v11247_v19 = vpop.f32.mrf.mxu0 }
0x6374   :  { %11912 = vtanh.f32 %v8725_v55 }
0x6375   :  { %v8722_v26 = vpop.f32.mrf.mxu0 }
0x6377   :  { %v11248_v24 = vpop.f32.mrf.mxu0 }
0x6381   :  { %v11913_v33 = vpop.eup %11912 }
0x6382   :  { %v8743_v27 = vpack.c.bf16 %v11913_v33, %v11913_v33 }
0x6384   :  { %11266 = vmatmul.mubr.bf16.vlgmr.msra.gmra.mxu0 %v8743_v27 }
0x6385   :  { %11303 = vmatprep.mubr.msk.bf16.mxu0 %vm11944_vm0, %v11943_v0  ;;  %11296 = vmatpush3.bf16.msra.mxu0 %v11702_v41 }
0x6386   :  { %11297 = vmatprep.subr.bf16.mxu0 %v11943_v0 }
0x6444   :  { %v8826_v53 = vpop.f32.mrf.mxu0 }
0x6445   :  { %v8827_v43 = vadd.f32 %v14214_v9, %v8826_v53 }
0x6446   :  { %v11267_v47 = vpop.f32.mrf.mxu0 }
0x6447   :  { %v8832_v8 = vsel %vm560_vm8, %v8827_v43, -inf }
0x6448   :  { %8833 = vmax.xlane.f32.xlu1 %v8832_v8  ;;  %v8829_v62 = vpop.f32.mrf.mxu0 }
0x644a   :  { %v11268_v45 = vpop.f32.mrf.mxu0 }
0x6459   :  { %9021 = vrot.lane.b32.xlu1 %v14334_v39, %s11949_s17 }
0x64d1   :  { %v8834_v48 = vpop.xlane.xlu1 %8833 }
0x64d2   :  { %v8835_v28 = vsub.f32 %v8827_v43, %v8834_v48 }
0x64d4   :  { %v8836_v56 = vmul.f32 1.442695, %v8835_v28 }
0x64d5   :  { %v9022_v7 = vpop.permute.xlu1 %9021 }
0x64d6   :  { %11914 = vpow2.f32 %v8836_v56 }
0x64e3   :  { %v11915_v44 = vpop.eup %11914 }
0x64e4   :  { %v8838_v31 = vsel %vm560_vm8, %v11915_v44, 0.0 }
0x64e5   :  { %8839 = vadd.xlane.f32.xlu0 %v8838_v31 }
0x656e   :  { %v8840_v22 = vpop.xlane.xlu0 %8839 }
0x656f   :  { %11916 = vrcp.f32 %v8840_v22 }
0x657c   :  { %v11917_v9 = vpop.eup %11916 }
0x657d   :  { %v14463_v42 = vmul.f32 %v11917_v9, %v11915_v44  ;;  %v9291_v9 = vld [vmem:[%s14647_s14] ss:$0 sm:$0xff] }
0x657f   :  { %v8850_v2 = vrot.slane %v14463_v42, %v12198_v35 }
0x6581   :  { %v8851_v63 = vcombine.high %v8850_v2, %v8850_v2  ;;  %v8858_v25 = vrot.slane %v8850_v2, %v12198_v35 }
0x6583   :  { %11272 = vmatmul.mubr.msk.f32.vlgmr.msra.gmra.mxu1 %vm595_vm9, %v8858_v25  ;;  %v8865_v39 = vrot.slane %v8851_v63, %v12198_v35  ;;  %v11698_v35 = vld [vmem:[%s14644_s11 + $0x18] sm:$0xff]   ;;  %v9390_v63 = vld [vmem:[%s14647_s14] ss:$0 sm:$0xff] }
0x6584   :  { %11275 = vmatpush3.msra.mxu1 %v14230_v40  ;;  %11276 = vmatprep.mubr.msk.f32.mxu1 %vm11944_vm0, %v11943_v0  ;;  %v11697_v40 = vld [vmem:[%s14644_s11 + $0x20] sm:$0xff]   ;;  %s11951_s11 = smov 81  }
0x6585   :  { %11279 = vmatprep.subr.bf16.mxu1 %v11943_v0 }
0x6587   :  { %11277 = vmatmul.mubr.msk.f32.vlgmr.msra.gmra.mxu1 %vm595_vm9, %v8865_v39 }
0x6588   :  { %11291 = vmatprep.mubr.msk.bf16.mxu1 %vm11944_vm0, %v11943_v0  ;;  %11280 = vmatpush3.bf16.msra.mxu1 %v11696_v36 }
0x6589   :  { %11281 = vmatprep.subr.bf16.mxu1 %v11943_v0 }
0x658c   :  { %11282 = vmatpush3.bf16.msra.mxu1 %v11697_v40  ;;  %v2801_v40 = vadd.f32 %v9390_v63, %v12860_v30 }
0x658d   :  { %11283 = vmatprep.subr.bf16.mxu1 %v11943_v0 }
0x6590   :  { %11284 = vmatpush3.bf16.msra.mxu1 %v11698_v35  ;;  %v9490_v35 = vld [vmem:[%s14647_s14] ss:$0 sm:$0xff] }
0x6591   :  { %11285 = vmatprep.subr.bf16.mxu1 %v11943_v0 }
0x6594   :  { %11286 = vmatpush3.bf16.msra.mxu1 %v11699_v38 }
0x6595   :  { %11287 = vmatprep.subr.bf16.mxu1 %v11943_v0 }
0x6598   :  { %11288 = vmatpush3.bf16.msra.mxu1 %v11700_v4 }
0x6599   :  { %11289 = vmatprep.subr.bf16.mxu1 %v11943_v0 }
0x659c   :  { %11290 = vmatpush3.bf16.msra.mxu1 %v11701_v5  ;;  %v4639_v5 = vadd.f32 %v9490_v35, %v13366_v54 }
0x6643   :  { %v8934_v52 = vpop.f32.mrf.mxu1 }
0x6645   :  { %v11273_v10 = vpop.f32.mrf.mxu1 }
0x6647   :  { %v9006_v60 = vpop.f32.mrf.mxu1 }
0x6648   :  { %v9016_v11 = vrot.slane %v9006_v60, 7 }
0x6649   :  { %v11278_v32 = vpop.f32.mrf.mxu1 }
0x664a   :  { %v9017_v18 = vsel %vm748_vm10, %v9016_v11, %v8934_v52  ;;  %v9590_v52 = vld [vmem:[%s14647_s14] ss:$0 sm:$0xff] }
0x664b   :  { %v11361_v50 = vpack.i.bf16 %v9017_v18, %v14406_v17  ;;  %v6477_v11 = vadd.f32 %v9590_v52, %v13872_v29  ;;  %v9690_v32 = vld [vmem:[%s14647_s14] ss:$0 sm:$0xff] }
0x664d   :  { %11362 = vrot.lane.b32.xlu0 %v11361_v50, %s11946_s19 }
0x66bf   :  { %v14503_v12 = vpop.permute.xlu0 %11362 }
0x66c0   :  { %v11365_v14 = vunpack.i.h.bf16 %v14503_v12  ;;  %v11364_v15 = vunpack.i.l.bf16 %v14503_v12 }
0x66c2   :  { %v9024_v55 = vsel %vm164_vm2, %v11364_v15, %v11365_v14  ;;  %v8315_v15 = vadd.f32 %v9690_v32, %v14378_v59 }
0x66c3   :  { %v9025_v19 = vsel %vm210_vm3, %v9024_v55, %v9022_v7 }
0x66c4   :  { %v9039_v26 = vpack.c.bf16 %v9025_v19, %v9025_v19 }
0x66c6   :  { %11292 = vmatmul.mubr.msk.bf16.vlgmr.msra.gmra.mxu1 %vm268_vm4, %v9039_v26 }
0x6786   :  { %v9119_v24 = vpop.f32.mrf.mxu1 }
0x6787   :  { %v9120_v17 = vadd.f32 %v14278_v23, %v9119_v24  ;;  %v1882_v24 = vadd.f32 %v9291_v9, %v12592_v49  ;;  %v5558_v49 = vadd.f32 %v9490_v35, %v13604_v57 }
0x6788   :  { %v11293_v33 = vpop.f32.mrf.mxu1 }
0x6789   :  { %v9739_v27 = vmul.f32 -1.442695, %v9120_v17 }
0x678a   :  { %v9122_v53 = vpop.f32.mrf.mxu1 }
0x678b   :  { %11918 = vpow2.f32 %v9739_v27  ;;  %v3720_v53 = vadd.f32 %v9390_v63, %v13098_v21 }
0x678c   :  { %v11294_v43 = vpop.f32.mrf.mxu1  ;;  %11920 = vtanh.f32 %v9120_v17 }
0x6798   :  { %v11919_v47 = vpop.eup %11918 }
0x6799   :  { %v9129_v8 = vadd.f32 1.0, %v11919_v47  ;;  %v11921_v62 = vpop.eup %11920 }
0x679b   :  { %11922 = vrcp.f32 %v9129_v8 }
0x67a8   :  { %v11923_v45 = vpop.eup %11922 }
0x67a9   :  { %v9132_v48 = vsel %vm12108_vm7, %v11921_v62, %v11923_v45 }
0x67aa   :  { %9135 = vrot.lane.b32.xlu1 %v9132_v48, %s11945_s18  ;;  %v9133_v23 = vmul.f32 %v9132_v48, %v14312_v6  ;;  %v11703_v6 = vld [vmem:[%s14646_s13 + $0x10] sm:$0xff]  }
0x67ab   :  { %11298 = vmatpush3.bf16.msra.mxu0 %v11703_v6 }
0x67ac   :  { %11299 = vmatprep.subr.bf16.mxu0 %v11943_v0 }
0x681c   :  { %v9136_v28 = vpop.permute.xlu1 %9135 }
0x681d   :  { %v9138_v56 = vmul.f32 %v9136_v28, %v9132_v48 }
0x681f   :  { %9140 = vrot.lane.b32.xlu0 %v9138_v56, %s11946_s19 }
0x6891   :  { %v9141_v44 = vpop.permute.xlu0 %9140 }
0x6892   :  { %v9143_v31 = vadd.f32 %v9141_v44, %v9133_v23 }
0x6894   :  { %11924 = vtanh.f32 %v9143_v31 }
0x68a1   :  { %v11925_v22 = vpop.eup %11924 }
0x68a2   :  { %9146 = vrot.lane.b32.xlu1 %v11925_v22, %s11945_s18 }
0x68a6   :  { %967 = vrot.lane.b32.xlu1 %v12200_v37, %s11951_s11  ;;  %v11704_v37 = vld [vmem:[%s14646_s13 + $0x8] sm:$0xff]  }
0x68a7   :  { %11300 = vmatpush3.bf16.msra.mxu0 %v11704_v37 }
0x68a8   :  { %11301 = vmatprep.subr.bf16.mxu0 %v11943_v0 }
0x68aa   :  { %2806 = vrot.lane.b32.xlu1 %v12703_v1, %s11951_s11  ;;  %v11705_v1 = vld [vmem:[%s14646_s13] sm:$0xff]  }
0x68ab   :  { %11302 = vmatpush3.bf16.msra.mxu0 %v11705_v1 }
0x68ae   :  { %4644 = vrot.lane.b32.xlu1 %v13209_v3, %s11951_s11 }
0x68b2   :  { %6482 = vrot.lane.b32.xlu1 %v13715_v34, %s11951_s11 }
0x68b6   :  { %8320 = vrot.lane.b32.xlu1 %v14221_v20, %s11951_s11  ;;  %v962_v20 = vadd.f32 %v9291_v9, %v12356_v58 }
0x6914   :  { %v9147_v3 = vpop.permute.xlu1 %9146 }
0x6915   :  { %v9149_v34 = vmul.f32 %v9147_v3, %v9132_v48  ;;  %v7396_v48 = vadd.f32 %v9590_v52, %v14110_v61 }
0x6917   :  { %9151 = vrot.lane.b32.xlu0 %v9149_v34, %s11946_s19 }
0x6918   :  { %v968_v2 = vpop.permute.xlu1 %967 }
0x6919   :  { %v971_v0 = vsel %vm970_vm12, 0.0, %v968_v2 }
0x691a   :  { %v973_v25 = vsel %vm972_vm13, %v971_v0, 0.0 }
0x691b   :  { %v974_v39 = vadd.f32 %v973_v25, %v962_v20  ;;  %1887 = vrot.lane.b32.xlu0 %v12445_v16, %s11951_s11 }
0x691c   :  { %v2807_v36 = vpop.permute.xlu1 %2806 }
0x691d   :  { %975 = vst [vmem:[%s14648_s15] sm:$0x3] %v974_v39  ;;  %v2809_v58 = vsel %vm970_vm12, 0.0, %v2807_v36 }
0x691e   :  { %v2810_v38 = vsel %vm972_vm13, %v2809_v58, 0.0 }
0x691f   :  { %v2811_v4 = vadd.f32 %v2810_v38, %v2801_v40  ;;  %3725 = vrot.lane.b32.xlu0 %v12951_v51, %s11951_s11 }
0x6920   :  { %v4645_v16 = vpop.permute.xlu1 %4644 }
0x6921   :  { %9396 = vst [vmem:[%s14648_s15 + $0x4] sm:$0x3] %v2811_v4  ;;  %v4647_v30 = vsel %vm970_vm12, 0.0, %v4645_v16 }
0x6922   :  { %v4648_v10 = vsel %vm972_vm13, %v4647_v30, 0.0 }
0x6923   :  { %v4649_v60 = vadd.f32 %v4648_v10, %v4639_v5  ;;  %5563 = vrot.lane.b32.xlu0 %v13457_v13, %s11951_s11 }
0x6924   :  { %v6483_v51 = vpop.permute.xlu1 %6482 }
0x6925   :  { %9496 = vst [vmem:[%s14648_s15 + $0x8] sm:$0x3] %v4649_v60  ;;  %v6485_v54 = vsel %vm970_vm12, 0.0, %v6483_v51 }
0x6926   :  { %v6486_v18 = vsel %vm972_vm13, %v6485_v54, 0.0 }
0x6927   :  { %v6487_v50 = vadd.f32 %v6486_v18, %v6477_v11  ;;  %7401 = vrot.lane.b32.xlu0 %v13963_v46, %s11951_s11 }
0x6928   :  { %v8321_v13 = vpop.permute.xlu1 %8320 }
0x6929   :  { %9596 = vst [vmem:[%s14648_s15 + $0xc] sm:$0x3] %v6487_v50  ;;  %v8323_v29 = vsel %vm970_vm12, 0.0, %v8321_v13 }
0x692a   :  { %v8324_v7 = vsel %vm972_vm13, %v8323_v29, 0.0 }
0x692b   :  { %v8325_v55 = vadd.f32 %v8324_v7, %v8315_v15  ;;  %9238 = vrot.lane.b32.xlu0 %v14463_v42, %s11951_s11 }
0x692d   :  { %9696 = vst [vmem:[%s14648_s15 + $0x10] sm:$0x3] %v8325_v55 }
0x6989   :  { %v9152_v46 = vpop.permute.xlu0 %9151 }
0x698a   :  { %v9154_v59 = vsel %vm164_vm2, %v9152_v46, %v11365_v14 }
0x698b   :  { %v9163_v19 = vpack.c.bf16 %v9154_v59, %v9154_v59 }
0x698d   :  { %11304 = vmatmul.mubr.msk.bf16.vlgmr.msra.gmra.mxu0 %vm210_vm3, %v9163_v19  ;;  %v1888_v26 = vpop.permute.xlu0 %1887 }
0x698e   :  { %v1890_v17 = vsel %vm970_vm12, 0.0, %v1888_v26 }
0x698f   :  { %v1891_v33 = vsel %vm972_vm13, %v1890_v17, 0.0 }
0x6990   :  { %v1892_v42 = vadd.f32 %v1891_v33, %v1882_v24 }
0x6991   :  { %v3726_v27 = vpop.permute.xlu0 %3725 }
0x6992   :  { %9346 = vst [vmem:[%s14648_s15 + $0x2] sm:$0x3] %v1892_v42  ;;  %v3728_v12 = vsel %vm970_vm12, 0.0, %v3726_v27 }
0x6993   :  { %v3729_v14 = vsel %vm972_vm13, %v3728_v12, 0.0 }
0x6994   :  { %v3730_v43 = vadd.f32 %v3729_v14, %v3720_v53 }
0x6995   :  { %v5564_v47 = vpop.permute.xlu0 %5563 }
0x6996   :  { %9446 = vst [vmem:[%s14648_s15 + $0x6] sm:$0x3] %v3730_v43  ;;  %v5566_v8 = vsel %vm970_vm12, 0.0, %v5564_v47 }
0x6997   :  { %v5567_v21 = vsel %vm972_vm13, %v5566_v8, 0.0 }
0x6998   :  { %v5568_v62 = vadd.f32 %v5567_v21, %v5558_v49 }
0x6999   :  { %v7402_v45 = vpop.permute.xlu0 %7401 }
0x699a   :  { %9546 = vst [vmem:[%s14648_s15 + $0xa] sm:$0x3] %v5568_v62  ;;  %v7404_v28 = vsel %vm970_vm12, 0.0, %v7402_v45 }
0x699b   :  { %v7405_v57 = vsel %vm972_vm13, %v7404_v28, 0.0 }
0x699c   :  { %v7406_v56 = vadd.f32 %v7405_v57, %v7396_v48 }
0x699d   :  { %v9239_v23 = vpop.permute.xlu0 %9238 }
0x699e   :  { %9646 = vst [vmem:[%s14648_s15 + $0xe] sm:$0x3] %v7406_v56  ;;  %v9241_v44 = vsel %vm970_vm12, 0.0, %v9239_v23 }
0x699f   :  { %v9242_v61 = vsel %vm972_vm13, %v9241_v44, 0.0 }
0x6a4d   :  { %v9232_v31 = vpop.f32.mrf.mxu0 }
0x6a4e   :  { %v9233_v22 = vadd.f32 %v9690_v32, %v9232_v31 }
0x6a4f   :  { %v11305_v41 = vpop.f32.mrf.mxu0 }
0x6a50   :  { %v9243_v6 = vadd.f32 %v9242_v61, %v9233_v22 }
0x6a51   :  { %v9235_v37 = vpop.f32.mrf.mxu0 }
0x6a52   :  { %9746 = vst [vmem:[%s14648_s15 + $0x12] sm:$0x3] %v9243_v6 }
0x6a53   :  { %v11306_v1 = vpop.f32.mrf.mxu0 }

</bundles_post_ra>
